<compile_context>
chip_gen: v5e
topology: v5e:2x2
jax: 0.10.0
libtpu: 0.0.40
codegen_flags: <defaults>
</compile_context>

<pallas_src>
import functools

import numpy as np
import jax
import jax.numpy as jnp
from jax import lax
from jax.experimental import pallas as pl
from jax.experimental.pallas import tpu as pltpu


def _round_up(x, m):
    return ((x + m - 1) // m) * m


# ------------------------------------------------------------------ kernel ---

def hypernet_kernel(cfg, offs, boffs,
                    a_ref, e_ref, mask_a_ref, mask_e_ref, sel_ref, w_ref, b_ref,
                    wout_ref, bout_ref):
    A, E, d, H, Bt, Sb = (cfg[k] for k in ("A", "E", "d", "H", "Bt", "Sb"))
    dk = d // H
    G = Bt // Sb
    sqA, sqE = Sb * A, Sb * E
    f32, bf16 = jnp.float32, jnp.bfloat16
    inv_sqrt_dk = 1.0 / float(np.sqrt(dk))
    qk_scale = inv_sqrt_dk / H          # head-averaged scaled QK == full-d dot * this

    def W(name):                        # static slice of the resident bf16 weight slab
        r, nr, nc = offs[name]
        return w_ref[r:r + nr, :nc]

    def B(name):                        # single f32 bias row
        r, nc = boffs[name]
        return b_ref[r:r + 1, :nc]

    def mm(x, w):                       # bf16 MXU operands, f32 accumulation
        return jnp.dot(x.astype(bf16), w, preferred_element_type=f32)

    # ---- entity embeddings (biases folded via the trailing ones column) -------------
    a_emb = mm(a_ref[...], W("emb_a"))              # (Bt*A, d) f32
    e_emb = mm(e_ref[...], W("emb_e"))              # (Bt*E, d) f32

    # ---- fused Q|K|V projections (one wide matmul per entity type) ------------------
    qkv_a = mm(a_emb, W("qkv")) + B("qkv")          # (Bt*A, 3d)
    kv_e = mm(e_emb, W("kv")) + B("kv")             # (Bt*E, 2d)
    q, k_a, v_a = qkv_a[:, :d], qkv_a[:, d:2 * d], qkv_a[:, 2 * d:3 * d]
    k_e, v_e = kv_e[:, :d], kv_e[:, d:2 * d]

    # ---- per-head lane masks (iota-built in kernel, hoisted out of all loops) -------
    lane = lax.broadcasted_iota(jnp.int32, (1, d), 1)
    head_mask = [((lane >= h * dk) & (lane < (h + 1) * dk)).astype(f32)
                 for h in range(H)]

    # additive softmax masks: 0 where query/key share a batch slot, -1e30 otherwise
    mask_a01 = mask_a_ref[...]                      # (Sb*A, Sb*A) 0/1
    mask_e01 = mask_e_ref[...]                      # (Sb*A, Sb*E) 0/1
    madd_a = (mask_a01 - 1.0) * 1e30
    madd_e = (mask_e01 - 1.0) * 1e30

    # ---- cross attention, sub-blocked over groups of Sb batches ---------------------
    # Each sub-block only softmaxes over its own Sb*(A+E) keys; the piecewise softmax
    # (shared max / denominator over the agent and enemy score tiles) removes the old
    # per-head score concatenate and the probability lane slices.
    attn_parts = []
    for g in range(G):
        ra = slice(g * sqA, (g + 1) * sqA)
        re = slice(g * sqE, (g + 1) * sqE)
        q_g, ka_g, va_g = q[ra], k_a[ra], v_a[ra]
        ke_g, ve_g = k_e[re], v_e[re]
        ka_b, ke_b = ka_g.astype(bf16), ke_g.astype(bf16)
        acc = jnp.zeros((sqA, d), dtype=f32)
        for h in range(H):
            qh = (q_g * head_mask[h]).astype(bf16)
            s_a = jnp.einsum("qd,kd->qk", qh, ka_b,
                             preferred_element_type=f32) * inv_sqrt_dk + madd_a
            s_e = jnp.einsum("qd,kd->qk", qh, ke_b,
                             preferred_element_type=f32) * inv_sqrt_dk + madd_e
            m = jnp.maximum(jnp.max(s_a, axis=-1, keepdims=True),
                            jnp.max(s_e, axis=-1, keepdims=True))
            p_a = jnp.exp(s_a - m)
            p_e = jnp.exp(s_e - m)
            r = 1.0 / (jnp.sum(p_a, axis=-1, keepdims=True)
                       + jnp.sum(p_e, axis=-1, keepdims=True))
            pv = (jnp.dot(p_a.astype(bf16), (va_g * head_mask[h]).astype(bf16),
                          preferred_element_type=f32)
                  + jnp.dot(p_e.astype(bf16), (ve_g * head_mask[h]).astype(bf16),
                            preferred_element_type=f32))
            acc = acc + pv * r                      # head-h lands in head-h lanes only
        attn_parts.append(acc)
    attn = jnp.concatenate(attn_parts, axis=0)      # (Bt*A, d)

    # ---- output projection + fused weight/bias embedding MLPs -----------------------
    x = mm(attn, W("wo")) + B("wo")                             # (Bt*A, d)
    h1 = jnp.maximum(mm(x, W("mlp1")) + B("mlp1"), 0.0)         # lanes [we | be]
    h2 = jnp.maximum(mm(h1, W("mlp2")) + B("mlp2"), 0.0)        # block-diag 2nd layer
    we, be = h2[:, :d], h2[:, d:]

    # ---- weight generator: per-group block-diagonal scores, compacted to (A, Bt*A) --
    wqk = mm(we, W("gen"))                                      # (Bt*A, 2d)
    wq_g, wk_g = wqk[:, :d].astype(bf16), wqk[:, d:].astype(bf16)
    sel = sel_ref[...]                                          # (A, Sb*A) 0/1 selector
    wout_parts = []
    for g in range(G):
        ra = slice(g * sqA, (g + 1) * sqA)
        sg = jnp.einsum("qd,kd->qk", wq_g[ra], wk_g[ra],
                        preferred_element_type=f32) * mask_a01  # keep only same-batch
        # out[j, q] = sg[q, (q // A) * A + j]  (matmul-as-gather, lane-dense transpose)
        wout_parts.append(jnp.einsum("jk,qk->jq", sel, sg,
                                     preferred_element_type=f32))
    wout_ref[...] = jnp.concatenate(wout_parts, axis=1) * qk_scale

    # ---- bias generator folded to one matvec (u_bg = bg_query @ bg_wq @ bg_wk^T) ----
    u_bg = B("u_bg").astype(bf16)                               # (1, d)
    bout_ref[...] = jnp.einsum("oe,ne->on", u_bg, be.astype(bf16),
                               preferred_element_type=f32) * qk_scale


# ------------------------------------------------------------- param packing ---

def init_params(key, agent_in_dim, enemy_feat, d):
    shapes = {
        "w_ae": (agent_in_dim, d), "b_ae": (1, d),
        "w_ee": (enemy_feat, d), "b_ee": (1, d),
        "ca_wq": (d, d), "ca_bq": (1, d),
        "ca_wk": (d, d), "ca_bk": (1, d),
        "ca_wv": (d, d), "ca_bv": (1, d),
        "ca_wo": (d, d), "ca_bo": (1, d),
        "we1": (d, d), "be1": (1, d),
        "we2": (d, d), "be2": (1, d),
        "wb1": (d, d), "bb1": (1, d),
        "wb2": (d, d), "bb2": (1, d),
        "wg_wq": (d, d), "wg_wk": (d, d),
        "bg_query": (1, d), "bg_wq": (d, d), "bg_wk": (d, d),
    }
    keys = jax.random.split(key, len(shapes))
    params = {}
    for (name, shape), k in zip(shapes.items(), keys):
        fan_in = shape[0] if shape[0] > 1 else shape[1]
        bound = 1.0 / float(np.sqrt(fan_in))
        params[name] = jax.random.uniform(k, shape, jnp.float32, -bound, bound)
    return params


def pack_params(params, agent_in_dim, enemy_feat, d):
    """Pack all weights into one bf16 slab (16-row-aligned segments, 3d columns) and
    all biases into one small f32 slab.  Fused segments per the perf review."""
    assert d % 16 == 0, "hypernet_embed must be a multiple of 16 for slab alignment"
    a_in_pad = _round_up(agent_in_dim + 1, 16)      # +1 ones column (bias fold)
    e_in_pad = _round_up(enemy_feat + 1, 16)
    ncols = 3 * d

    p = {k: np.asarray(v, np.float32) for k, v in params.items()}

    def seg_emb(w, b, rows):
        m = np.zeros((rows, d), np.float32)
        m[:w.shape[0]] = w
        m[w.shape[0]] = b.reshape(-1)               # bias row hit by the ones column
        return m

    segs = {
        "emb_a": seg_emb(p["w_ae"], p["b_ae"], a_in_pad),
        "emb_e": seg_emb(p["w_ee"], p["b_ee"], e_in_pad),
        "qkv": np.concatenate([p["ca_wq"], p["ca_wk"], p["ca_wv"]], axis=1),
        "kv": np.concatenate([p["ca_wk"], p["ca_wv"]], axis=1),
        "wo": p["ca_wo"],
        "mlp1": np.concatenate([p["we1"], p["wb1"]], axis=1),
        "mlp2": np.block([[p["we2"], np.zeros((d, d), np.float32)],
                          [np.zeros((d, d), np.float32), p["wb2"]]]),
        "gen": np.concatenate([p["wg_wq"], p["wg_wk"]], axis=1),
    }
    offs, chunks, r = {}, [], 0
    for name, m in segs.items():
        nrows = _round_up(m.shape[0], 16)           # bf16 sublane tile = 16 rows
        buf = np.zeros((nrows, ncols), np.float32)
        buf[:m.shape[0], :m.shape[1]] = m
        offs[name] = (r, m.shape[0], m.shape[1])
        chunks.append(buf)
        r += nrows
    W_slab = jnp.asarray(np.concatenate(chunks, axis=0), dtype=jnp.bfloat16)

    u_bg = (p["bg_query"].reshape(1, -1) @ p["bg_wq"] @ p["bg_wk"].T).reshape(-1)
    brows = {
        "qkv": np.concatenate([p["ca_bq"].reshape(-1), p["ca_bk"].reshape(-1),
                               p["ca_bv"].reshape(-1)]),
        "kv": np.concatenate([p["ca_bk"].reshape(-1), p["ca_bv"].reshape(-1)]),
        "wo": p["ca_bo"].reshape(-1),
        "mlp1": np.concatenate([p["be1"].reshape(-1), p["bb1"].reshape(-1)]),
        "mlp2": np.concatenate([p["be2"].reshape(-1), p["bb2"].reshape(-1)]),
        "u_bg": u_bg,
    }
    Bsl = np.zeros((8, ncols), np.float32)
    boffs = {}
    for i, (name, v) in enumerate(brows.items()):
        Bsl[i, :v.shape[0]] = v
        boffs[name] = (i, int(v.shape[0]))
    return W_slab, jnp.asarray(Bsl), offs, boffs, a_in_pad, e_in_pad


def _build_constants(Sb, A, E):
    """Sub-block-local 0/1 batch masks and the (A, Sb*A) compaction selector."""
    qb = np.repeat(np.arange(Sb), A)
    kb_a = np.repeat(np.arange(Sb), A)
    kb_e = np.repeat(np.arange(Sb), E)
    mask_a01 = (qb[:, None] == kb_a[None, :]).astype(np.float32)
    mask_e01 = (qb[:, None] == kb_e[None, :]).astype(np.float32)
    sel = (np.arange(A)[:, None] == (np.arange(Sb * A) % A)[None, :]).astype(np.float32)
    return jnp.asarray(mask_a01), jnp.asarray(mask_e01), jnp.asarray(sel)


# ----------------------------------------------------------- index-glue (JAX) ---

def _prepare_entities(state, *, n_agents, n_enemies, agent_feat, enemy_feat,
                      n_actions, state_last_action, state_timestep_number):
    bs = state.shape[0]
    A, E = n_agents, n_enemies
    agent_features = agent_feat * A
    enemy_features = enemy_feat * E
    entity_features = agent_features + enemy_features

    agent_state = state[:, :agent_features].reshape(bs, A, agent_feat)
    enemy_state = state[:, agent_features:entity_features].reshape(bs, E, enemy_feat)

    if state_last_action:
        action_features = n_actions * A
        la = state[:, entity_features:entity_features + action_features]
        la = la.reshape(bs * A, n_actions)
        nz = la != 0
        col = jnp.arange(n_actions, dtype=jnp.int32)
        last_idx = jnp.max(jnp.where(nz, col, -1), axis=1)     # last nonzero column
        last_actions = jnp.where(jnp.any(nz, axis=1), last_idx, -1)
        last_actions = last_actions.astype(jnp.float32).reshape(bs, A, 1)
        agent_state = jnp.concatenate([agent_state, last_actions], axis=-1)

    if state_timestep_number:
        ts = state[:, -1].reshape(bs, 1, 1)
        ts = jnp.broadcast_to(ts, (bs, A, 1))
        agent_state = jnp.concatenate([agent_state, ts], axis=-1)

    return agent_state, enemy_state


# ----------------------------------------------------------------- wrapper ---

def hypernetwork_forward(state, params, *,
                         n_agents, n_enemies, agent_feat, enemy_feat,
                         n_actions, hypernet_embed, n_head,
                         state_last_action=True, state_timestep_number=True,
                         block_bs=32, sub_bs=8):
    A, E, d, H = n_agents, n_enemies, hypernet_embed, n_head
    bs = state.shape[0]

    agent_state, enemy_state = _prepare_entities(
        state, n_agents=A, n_enemies=E, agent_feat=agent_feat,
        enemy_feat=enemy_feat, n_actions=n_actions,
        state_last_action=state_last_action,
        state_timestep_number=state_timestep_number)
    agent_in_dim = agent_state.shape[-1]

    W_slab, B_slab, offs, boffs, a_in_pad, e_in_pad = pack_params(
        params, agent_in_dim, enemy_feat, d)

    Bt, Sb = block_bs, sub_bs
    assert Bt % Sb == 0, "block_bs must be a multiple of sub_bs"
    assert (Sb * A) % 8 == 0 and (Sb * E) % 8 == 0, "sub_bs*A and sub_bs*E must be 8-aligned"
    bs_pad = _round_up(bs, Bt)
    nb = bs_pad // Bt
    nA, nE = Bt * A, Bt * E
    assert nb == 1 or (nA % 128 == 0 and nE % 8 == 0), \
        "block_bs*A must be a multiple of 128 when the grid has more than one step"

    # append ones column (bias fold), zero-pad feature dims + padded batches
    a_aug = jnp.concatenate(
        [agent_state, jnp.ones(agent_state.shape[:-1] + (1,), agent_state.dtype)], -1)
    e_aug = jnp.concatenate(
        [enemy_state, jnp.ones(enemy_state.shape[:-1] + (1,), enemy_state.dtype)], -1)
    a_aug = jnp.pad(a_aug, ((0, bs_pad - bs), (0, 0), (0, a_in_pad - a_aug.shape[-1])))
    e_aug = jnp.pad(e_aug, ((0, bs_pad - bs), (0, 0), (0, e_in_pad - e_aug.shape[-1])))
    a_flat = a_aug.reshape(bs_pad * A, a_in_pad).astype(jnp.bfloat16)
    e_flat = e_aug.reshape(bs_pad * E, e_in_pad).astype(jnp.bfloat16)

    mask_a01, mask_e01, sel = _build_constants(Sb, A, E)

    cfg = dict(A=A, E=E, d=d, H=H, Bt=Bt, Sb=Sb)
    kernel = functools.partial(hypernet_kernel, cfg, offs, boffs)

    G = Bt // Sb
    sqA, sqE = Sb * A, Sb * E
    macs = (nA * a_in_pad * d + nE * e_in_pad * d
            + nA * 3 * d * d + nE * 2 * d * d
            + 2 * G * H * sqA * (sqA + sqE) * d
            + nA * d * d + nA * 2 * d * d + nA * 2 * d * 2 * d + nA * 2 * d * d
            + G * (sqA * sqA * d + A * sqA * sqA) + nA * d)
    cost = pl.CostEstimate(
        flops=int(2 * nb * macs),
        transcendentals=int(nb * G * H * sqA * (sqA + sqE)),
        bytes_accessed=int(2 * (a_flat.size + e_flat.size + W_slab.size)
                           + 4 * (B_slab.size + mask_a01.size + mask_e01.size + sel.size)
                           + 4 * (A + 1) * bs_pad * A),
    )

    wout, bout = pl.pallas_call(
        kernel,
        grid=(nb,),
        in_specs=[
            pl.BlockSpec((nA, a_in_pad), lambda g: (g, 0)),
            pl.BlockSpec((nE, e_in_pad), lambda g: (g, 0)),
            pl.BlockSpec(mask_a01.shape, lambda g: (0, 0)),
            pl.BlockSpec(mask_e01.shape, lambda g: (0, 0)),
            pl.BlockSpec(sel.shape, lambda g: (0, 0)),
            pl.BlockSpec(W_slab.shape, lambda g: (0, 0)),
            pl.BlockSpec(B_slab.shape, lambda g: (0, 0)),
        ],
        out_specs=(
            pl.BlockSpec((A, nA), lambda g: (0, g)),
            pl.BlockSpec((1, nA), lambda g: (0, g)),
        ),
        out_shape=(
            jax.ShapeDtypeStruct((A, bs_pad * A), jnp.float32),
            jax.ShapeDtypeStruct((1, bs_pad * A), jnp.float32),
        ),
        compiler_params=pltpu.CompilerParams(dimension_semantics=("parallel",)),
        cost_estimate=cost,
    )(a_flat, e_flat, mask_a01, mask_e01, sel, W_slab, B_slab)

    # wout[j, b*A + i] == weight[b, i, j]
    weight = jnp.transpose(wout.reshape(A, bs_pad, A), (1, 2, 0))[:bs]
    bias = bout.reshape(bs_pad, A)[:bs].reshape(bs, 1, A)
    return weight, bias


# ---------------------------------------------------------------- reference ---

def reference_forward(state, params, *,
                      n_agents, n_enemies, agent_feat, enemy_feat,
                      n_actions, hypernet_embed, n_head,
                      state_last_action=True, state_timestep_number=True):
    A, E, d, H = n_agents, n_enemies, hypernet_embed, n_head
    dk = d // H
    scale = 1.0 / float(np.sqrt(dk))

    agent_state, enemy_state = _prepare_entities(
        state, n_agents=A, n_enemies=E, agent_feat=agent_feat,
        enemy_feat=enemy_feat, n_actions=n_actions,
        state_last_action=state_last_action,
        state_timestep_number=state_timestep_number)

    a = agent_state @ params["w_ae"] + params["b_ae"]
    e = enemy_state @ params["w_ee"] + params["b_ee"]
    embed = jnp.concatenate([a, e], axis=1)

    q = a @ params["ca_wq"] + params["ca_bq"]
    k = embed @ params["ca_wk"] + params["ca_bk"]
    v = embed @ params["ca_wv"] + params["ca_bv"]

    outs = []
    for h in range(H):
        sl = slice(h * dk, (h + 1) * dk)
        s = jnp.einsum("bqd,bkd->bqk", q[..., sl], k[..., sl]) * scale
        p = jax.nn.softmax(s, axis=-1)
        outs.append(jnp.einsum("bqk,bkd->bqd", p, v[..., sl]))
    x = jnp.concatenate(outs, axis=-1) @ params["ca_wo"] + params["ca_bo"]

    we = jax.nn.relu(x @ params["we1"] + params["be1"])
    we = jax.nn.relu(we @ params["we2"] + params["be2"])
    be = jax.nn.relu(x @ params["wb1"] + params["bb1"])
    be = jax.nn.relu(be @ params["wb2"] + params["bb2"])

    wq = we @ params["wg_wq"]
    wk = we @ params["wg_wk"]
    weight = 0.0
    for h in range(H):
        sl = slice(h * dk, (h + 1) * dk)
        weight = weight + jnp.einsum("bqd,bkd->bqk", wq[..., sl], wk[..., sl]) * scale
    weight = weight / H

    bq = params["bg_query"] @ params["bg_wq"]
    bk = be @ params["bg_wk"]
    bias = 0.0
    for h in range(H):
        sl = slice(h * dk, (h + 1) * dk)
        bias = bias + jnp.einsum("od,bkd->bok", bq[..., sl], bk[..., sl]) * scale
    bias = bias / H
    return weight, bias


# -------------------------------------------------------------------- main ---

if __name__ == "__main__":
    n_agents, n_enemies = 4, 5
    agent_feat, enemy_feat, n_actions = 8, 6, 5     # input_shape = (8, 6, 5)
    hypernet_embed, n_head = 32, 4
    bs = 2

    key = jax.random.PRNGKey(0)
    k_ag, k_en, k_act, k_param = jax.random.split(key, 4)

    agent_part = jax.random.normal(k_ag, (bs, n_agents * agent_feat), jnp.float32)
    enemy_part = jax.random.normal(k_en, (bs, n_enemies * enemy_feat), jnp.float32)
    acts = jax.random.randint(k_act, (bs * n_agents,), 0, n_actions)
    onehot = jax.nn.one_hot(acts, n_actions, dtype=jnp.float32)
    onehot = onehot.reshape(bs, n_agents * n_actions)
    onehot = onehot.at[0, :n_actions].set(0.0)      # exercise the "-1 / no action" branch
    timestep = jnp.arange(bs, dtype=jnp.float32).reshape(bs, 1) / 10.0
    state = jnp.concatenate([agent_part, enemy_part, onehot, timestep], axis=1)

    # agent embedding input dim = agent_feat + last_action(1) + timestep(1)
    params = init_params(k_param, agent_feat + 2, enemy_feat, hypernet_embed)

    cfg = dict(n_agents=n_agents, n_enemies=n_enemies,
               agent_feat=agent_feat, enemy_feat=enemy_feat, n_actions=n_actions,
               hypernet_embed=hypernet_embed, n_head=n_head,
               state_last_action=True, state_timestep_number=True)

    weight, bias = hypernetwork_forward(state, params, **cfg)
    jax.block_until_ready((weight, bias))

    assert weight.shape == (bs, n_agents, n_agents)
    assert bias.shape == (bs, 1, n_agents)
    assert bool(jnp.all(jnp.isfinite(weight))) and bool(jnp.all(jnp.isfinite(bias)))

    # pure-JAX f32 reference; tolerance covers bf16 MXU operands / reassociation
    # (real bugs produce O(1) mismatches)
    with jax.default_matmul_precision("float32"):
        w_ref, b_ref = reference_forward(state, params, **cfg)
    assert bool(jnp.allclose(weight, w_ref, rtol=3e-2, atol=3e-2)), \
        f"weight mismatch, max abs diff {float(jnp.max(jnp.abs(weight - w_ref)))}"
    assert bool(jnp.allclose(bias, b_ref, rtol=3e-2, atol=3e-2)), \
        f"bias mismatch, max abs diff {float(jnp.max(jnp.abs(bias - b_ref)))}"

    print("KERNEL_OK")
</pallas_src>

<mosaic_0001>
module attributes {stable_mosaic.version = 11 : i64} {
  func.func @hypernet_kernel(%arg0: i32, %arg1: memref<128x16xbf16, #tpu.memory_space<vmem>>, %arg2: memref<160x16xbf16, #tpu.memory_space<vmem>>, %arg3: memref<32x32xf32, #tpu.memory_space<vmem>>, %arg4: memref<32x40xf32, #tpu.memory_space<vmem>>, %arg5: memref<4x32xf32, #tpu.memory_space<vmem>>, %arg6: memref<256x96xbf16, #tpu.memory_space<vmem>>, %arg7: memref<8x96xf32, #tpu.memory_space<vmem>>, %arg8: memref<4x128xf32, #tpu.memory_space<vmem>>, %arg9: memref<1x128xf32, #tpu.memory_space<vmem>>) attributes {dimension_semantics = [#tpu.dimension_semantics<parallel>], iteration_bounds = array<i64: 1>, scalar_prefetch = 0 : i64, scratch_operands = 0 : i64, tpu.core_type = #tpu.core_type<tc>, window_params = [{transform_indices = @transform_0, window_bounds = array<i64: 128, 16>}, {transform_indices = @transform_1, window_bounds = array<i64: 160, 16>}, {pipeline_mode = #tpu.pipeline_mode<synchronous>, transform_indices = @transform_2, window_bounds = array<i64: 32, 32>}, {pipeline_mode = #tpu.pipeline_mode<synchronous>, transform_indices = @transform_3, window_bounds = array<i64: 32, 40>}, {pipeline_mode = #tpu.pipeline_mode<synchronous>, transform_indices = @transform_4, window_bounds = array<i64: 4, 32>}, {pipeline_mode = #tpu.pipeline_mode<synchronous>, transform_indices = @transform_5, window_bounds = array<i64: 256, 96>}, {pipeline_mode = #tpu.pipeline_mode<synchronous>, transform_indices = @transform_6, window_bounds = array<i64: 8, 96>}, {transform_indices = @transform_7, window_bounds = array<i64: 4, 128>}, {transform_indices = @transform_8, window_bounds = array<i64: 1, 128>}]} {
    %c0 = arith.constant 0 : index
    %c0_0 = arith.constant 0 : index
    %0 = vector.load %arg1[%c0, %c0_0] : memref<128x16xbf16, #tpu.memory_space<vmem>>, vector<128x16xbf16>
    %c0_1 = arith.constant 0 : index
    %c0_2 = arith.constant 0 : index
    %1 = vector.load %arg6[%c0_1, %c0_2] : memref<256x96xbf16, #tpu.memory_space<vmem>>, vector<16x32xbf16>
    %cst = arith.constant dense<0.000000e+00> : vector<128x32xf32>
    %2 = tpu.matmul %0, %1, %cst {dimension_numbers = #tpu.dot_dimension_numbers<[1], [0], [0], [1], [0, 0, 1, 1], [], []>} : vector<128x16xbf16>, vector<16x32xbf16>, vector<128x32xf32> -> vector<128x32xf32>
    %c0_3 = arith.constant 0 : index
    %c0_4 = arith.constant 0 : index
    %3 = vector.load %arg2[%c0_3, %c0_4] : memref<160x16xbf16, #tpu.memory_space<vmem>>, vector<160x16xbf16>
    %c16 = arith.constant 16 : index
    %c0_5 = arith.constant 0 : index
    %4 = vector.load %arg6[%c16, %c0_5] : memref<256x96xbf16, #tpu.memory_space<vmem>>, vector<16x32xbf16>
    %cst_6 = arith.constant dense<0.000000e+00> : vector<160x32xf32>
    %5 = tpu.matmul %3, %4, %cst_6 {dimension_numbers = #tpu.dot_dimension_numbers<[1], [0], [0], [1], [0, 0, 1, 1], [], []>} : vector<160x16xbf16>, vector<16x32xbf16>, vector<160x32xf32> -> vector<160x32xf32>
    %c32 = arith.constant 32 : index
    %c0_7 = arith.constant 0 : index
    %6 = vector.load %arg6[%c32, %c0_7] : memref<256x96xbf16, #tpu.memory_space<vmem>>, vector<32x96xbf16>
    %7 = arith.truncf %2 : vector<128x32xf32> to vector<128x32xbf16>
    %cst_8 = arith.constant dense<0.000000e+00> : vector<128x96xf32>
    %8 = tpu.matmul %7, %6, %cst_8 {dimension_numbers = #tpu.dot_dimension_numbers<[1], [0], [0], [1], [0, 0, 1, 1], [], []>} : vector<128x32xbf16>, vector<32x96xbf16>, vector<128x96xf32> -> vector<128x96xf32>
    %c0_9 = arith.constant 0 : index
    %c0_10 = arith.constant 0 : index
    %9 = vector.load %arg7[%c0_9, %c0_10] : memref<8x96xf32, #tpu.memory_space<vmem>>, vector<1x96xf32>
    %10 = vector.broadcast %9 : vector<1x96xf32> to vector<128x96xf32>
    %11 = arith.addf %8, %10 : vector<128x96xf32>
    %c64 = arith.constant 64 : index
    %c0_11 = arith.constant 0 : index
    %12 = vector.load %arg6[%c64, %c0_11] : memref<256x96xbf16, #tpu.memory_space<vmem>>, vector<32x64xbf16>
    %13 = arith.truncf %5 : vector<160x32xf32> to vector<160x32xbf16>
    %cst_12 = arith.constant dense<0.000000e+00> : vector<160x64xf32>
    %14 = tpu.matmul %13, %12, %cst_12 {dimension_numbers = #tpu.dot_dimension_numbers<[1], [0], [0], [1], [0, 0, 1, 1], [], []>} : vector<160x32xbf16>, vector<32x64xbf16>, vector<160x64xf32> -> vector<160x64xf32>
    %c1 = arith.constant 1 : index
    %c0_13 = arith.constant 0 : index
    %15 = vector.load %arg7[%c1, %c0_13] : memref<8x96xf32, #tpu.memory_space<vmem>>, vector<1x64xf32>
    %16 = vector.broadcast %15 : vector<1x64xf32> to vector<160x64xf32>
    %17 = arith.addf %14, %16 : vector<160x64xf32>
    %18 = vector.extract_strided_slice %11 {offsets = [0, 0], sizes = [128, 32], strides = [1, 1]} : vector<128x96xf32> to vector<128x32xf32>
    %19 = vector.extract_strided_slice %11 {offsets = [0, 32], sizes = [128, 32], strides = [1, 1]} : vector<128x96xf32> to vector<128x32xf32>
    %20 = vector.extract_strided_slice %11 {offsets = [0, 64], sizes = [128, 32], strides = [1, 1]} : vector<128x96xf32> to vector<128x32xf32>
    %21 = vector.extract_strided_slice %17 {offsets = [0, 0], sizes = [160, 32], strides = [1, 1]} : vector<160x64xf32> to vector<160x32xf32>
    %22 = vector.extract_strided_slice %17 {offsets = [0, 32], sizes = [160, 32], strides = [1, 1]} : vector<160x64xf32> to vector<160x32xf32>
    %23 = tpu.iota {dimensions = array<i32: 1>} : vector<1x32xi32>
    %c0_i32 = arith.constant 0 : i32
    %24 = vector.broadcast %c0_i32 : i32 to vector<1x32xi32>
    %25 = arith.cmpi sge, %23, %24 : vector<1x32xi32>
    %c8_i32 = arith.constant 8 : i32
    %26 = vector.broadcast %c8_i32 : i32 to vector<1x32xi32>
    %27 = arith.cmpi slt, %23, %26 : vector<1x32xi32>
    %28 = arith.andi %25, %27 : vector<1x32xi1>
    %29 = arith.extui %28 : vector<1x32xi1> to vector<1x32xi32>
    %30 = arith.sitofp %29 : vector<1x32xi32> to vector<1x32xf32>
    %c8_i32_14 = arith.constant 8 : i32
    %31 = vector.broadcast %c8_i32_14 : i32 to vector<1x32xi32>
    %32 = arith.cmpi sge, %23, %31 : vector<1x32xi32>
    %c16_i32 = arith.constant 16 : i32
    %33 = vector.broadcast %c16_i32 : i32 to vector<1x32xi32>
    %34 = arith.cmpi slt, %23, %33 : vector<1x32xi32>
    %35 = arith.andi %32, %34 : vector<1x32xi1>
    %36 = arith.extui %35 : vector<1x32xi1> to vector<1x32xi32>
    %37 = arith.sitofp %36 : vector<1x32xi32> to vector<1x32xf32>
    %c16_i32_15 = arith.constant 16 : i32
    %38 = vector.broadcast %c16_i32_15 : i32 to vector<1x32xi32>
    %39 = arith.cmpi sge, %23, %38 : vector<1x32xi32>
    %c24_i32 = arith.constant 24 : i32
    %40 = vector.broadcast %c24_i32 : i32 to vector<1x32xi32>
    %41 = arith.cmpi slt, %23, %40 : vector<1x32xi32>
    %42 = arith.andi %39, %41 : vector<1x32xi1>
    %43 = arith.extui %42 : vector<1x32xi1> to vector<1x32xi32>
    %44 = arith.sitofp %43 : vector<1x32xi32> to vector<1x32xf32>
    %c24_i32_16 = arith.constant 24 : i32
    %45 = vector.broadcast %c24_i32_16 : i32 to vector<1x32xi32>
    %46 = arith.cmpi sge, %23, %45 : vector<1x32xi32>
    %c32_i32 = arith.constant 32 : i32
    %47 = vector.broadcast %c32_i32 : i32 to vector<1x32xi32>
    %48 = arith.cmpi slt, %23, %47 : vector<1x32xi32>
    %49 = arith.andi %46, %48 : vector<1x32xi1>
    %50 = arith.extui %49 : vector<1x32xi1> to vector<1x32xi32>
    %51 = arith.sitofp %50 : vector<1x32xi32> to vector<1x32xf32>
    %c0_17 = arith.constant 0 : index
    %c0_18 = arith.constant 0 : index
    %52 = vector.load %arg3[%c0_17, %c0_18] : memref<32x32xf32, #tpu.memory_space<vmem>>, vector<32x32xf32>
    %c0_19 = arith.constant 0 : index
    %c0_20 = arith.constant 0 : index
    %53 = vector.load %arg4[%c0_19, %c0_20] : memref<32x40xf32, #tpu.memory_space<vmem>>, vector<32x40xf32>
    %cst_21 = arith.constant 1.000000e+00 : f32
    %54 = vector.broadcast %cst_21 : f32 to vector<32x32xf32>
    %55 = arith.subf %52, %54 : vector<32x32xf32>
    %cst_22 = arith.constant 1.000000e+30 : f32
    %56 = vector.broadcast %cst_22 : f32 to vector<32x32xf32>
    %57 = arith.mulf %55, %56 : vector<32x32xf32>
    %cst_23 = arith.constant 1.000000e+00 : f32
    %58 = vector.broadcast %cst_23 : f32 to vector<32x40xf32>
    %59 = arith.subf %53, %58 : vector<32x40xf32>
    %cst_24 = arith.constant 1.000000e+30 : f32
    %60 = vector.broadcast %cst_24 : f32 to vector<32x40xf32>
    %61 = arith.mulf %59, %60 : vector<32x40xf32>
    %62 = vector.extract_strided_slice %18 {offsets = [0, 0], sizes = [32, 32], strides = [1, 1]} : vector<128x32xf32> to vector<32x32xf32>
    %63 = vector.extract_strided_slice %19 {offsets = [0, 0], sizes = [32, 32], strides = [1, 1]} : vector<128x32xf32> to vector<32x32xf32>
    %64 = vector.extract_strided_slice %20 {offsets = [0, 0], sizes = [32, 32], strides = [1, 1]} : vector<128x32xf32> to vector<32x32xf32>
    %65 = vector.extract_strided_slice %21 {offsets = [0, 0], sizes = [40, 32], strides = [1, 1]} : vector<160x32xf32> to vector<40x32xf32>
    %66 = vector.extract_strided_slice %22 {offsets = [0, 0], sizes = [40, 32], strides = [1, 1]} : vector<160x32xf32> to vector<40x32xf32>
    %67 = arith.truncf %63 : vector<32x32xf32> to vector<32x32xbf16>
    %68 = arith.truncf %65 : vector<40x32xf32> to vector<40x32xbf16>
    %cst_25 = arith.constant 0.000000e+00 : f32
    %69 = vector.broadcast %cst_25 : f32 to vector<32x32xf32>
    %70 = vector.broadcast %30 : vector<1x32xf32> to vector<32x32xf32>
    %71 = arith.mulf %62, %70 : vector<32x32xf32>
    %72 = arith.truncf %71 : vector<32x32xf32> to vector<32x32xbf16>
    "tpu.trace_start"() <{level = 10 : i32, message = "qd,kd->qk"}> : () -> ()
    %cst_26 = arith.constant dense<0.000000e+00> : vector<32x32xf32>
    %73 = tpu.matmul %72, %67, %cst_26 {dimension_numbers = #tpu.dot_dimension_numbers<[1], [1], [0], [0], [0, 0, 1, 0], [], []>} : vector<32x32xbf16>, vector<32x32xbf16>, vector<32x32xf32> -> vector<32x32xf32>
    "tpu.trace_stop"() : () -> ()
    %cst_27 = arith.constant 0.353553385 : f32
    %74 = vector.broadcast %cst_27 : f32 to vector<32x32xf32>
    %75 = arith.mulf %73, %74 : vector<32x32xf32>
    %76 = arith.addf %75, %57 : vector<32x32xf32>
    "tpu.trace_start"() <{level = 10 : i32, message = "qd,kd->qk"}> : () -> ()
    %cst_28 = arith.constant dense<0.000000e+00> : vector<32x40xf32>
    %77 = tpu.matmul %72, %68, %cst_28 {dimension_numbers = #tpu.dot_dimension_numbers<[1], [1], [0], [0], [0, 0, 1, 0], [], []>} : vector<32x32xbf16>, vector<40x32xbf16>, vector<32x40xf32> -> vector<32x40xf32>
    "tpu.trace_stop"() : () -> ()
    %cst_29 = arith.constant 0.353553385 : f32
    %78 = vector.broadcast %cst_29 : f32 to vector<32x40xf32>
    %79 = arith.mulf %77, %78 : vector<32x40xf32>
    %80 = arith.addf %79, %61 : vector<32x40xf32>
    %cst_30 = arith.constant dense<0xFF800000> : vector<32xf32>
    %81 = vector.multi_reduction <maximumf>, %76, %cst_30 [1] : vector<32x32xf32> to vector<32xf32>
    %82 = vector.shape_cast %81 : vector<32xf32> to vector<32x1xf32>
    %cst_31 = arith.constant dense<0xFF800000> : vector<32xf32>
    %83 = vector.multi_reduction <maximumf>, %80, %cst_31 [1] : vector<32x40xf32> to vector<32xf32>
    %84 = vector.shape_cast %83 : vector<32xf32> to vector<32x1xf32>
    %85 = arith.maximumf %82, %84 : vector<32x1xf32>
    %86 = vector.broadcast %85 : vector<32x1xf32> to vector<32x32xf32>
    %87 = arith.subf %76, %86 : vector<32x32xf32>
    %88 = math.exp %87 : vector<32x32xf32>
    %89 = vector.broadcast %85 : vector<32x1xf32> to vector<32x40xf32>
    %90 = arith.subf %80, %89 : vector<32x40xf32>
    %91 = math.exp %90 : vector<32x40xf32>
    %cst_32 = arith.constant dense<0.000000e+00> : vector<32xf32>
    %92 = vector.multi_reduction <add>, %88, %cst_32 [1] : vector<32x32xf32> to vector<32xf32>
    %93 = vector.shape_cast %92 : vector<32xf32> to vector<32x1xf32>
    %cst_33 = arith.constant dense<0.000000e+00> : vector<32xf32>
    %94 = vector.multi_reduction <add>, %91, %cst_33 [1] : vector<32x40xf32> to vector<32xf32>
    %95 = vector.shape_cast %94 : vector<32xf32> to vector<32x1xf32>
    %96 = arith.addf %93, %95 : vector<32x1xf32>
    %cst_34 = arith.constant 1.000000e+00 : f32
    %97 = vector.broadcast %cst_34 : f32 to vector<32x1xf32>
    %98 = arith.divf %97, %96 : vector<32x1xf32>
    %99 = arith.truncf %88 : vector<32x32xf32> to vector<32x32xbf16>
    %100 = vector.broadcast %30 : vector<1x32xf32> to vector<32x32xf32>
    %101 = arith.mulf %64, %100 : vector<32x32xf32>
    %102 = arith.truncf %101 : vector<32x32xf32> to vector<32x32xbf16>
    %cst_35 = arith.constant dense<0.000000e+00> : vector<32x32xf32>
    %103 = tpu.matmul %99, %102, %cst_35 {dimension_numbers = #tpu.dot_dimension_numbers<[1], [0], [0], [1], [0, 0, 1, 1], [], []>} : vector<32x32xbf16>, vector<32x32xbf16>, vector<32x32xf32> -> vector<32x32xf32>
    %104 = arith.truncf %91 : vector<32x40xf32> to vector<32x40xbf16>
    %105 = vector.broadcast %30 : vector<1x32xf32> to vector<40x32xf32>
    %106 = arith.mulf %66, %105 : vector<40x32xf32>
    %107 = arith.truncf %106 : vector<40x32xf32> to vector<40x32xbf16>
    %cst_36 = arith.constant dense<0.000000e+00> : vector<32x32xf32>
    %108 = tpu.matmul %104, %107, %cst_36 {dimension_numbers = #tpu.dot_dimension_numbers<[1], [0], [0], [1], [0, 0, 1, 1], [], []>} : vector<32x40xbf16>, vector<40x32xbf16>, vector<32x32xf32> -> vector<32x32xf32>
    %109 = arith.addf %103, %108 : vector<32x32xf32>
    %110 = vector.broadcast %98 : vector<32x1xf32> to vector<32x32xf32>
    %111 = arith.mulf %109, %110 : vector<32x32xf32>
    %112 = arith.addf %69, %111 : vector<32x32xf32>
    %113 = vector.broadcast %37 : vector<1x32xf32> to vector<32x32xf32>
    %114 = arith.mulf %62, %113 : vector<32x32xf32>
    %115 = arith.truncf %114 : vector<32x32xf32> to vector<32x32xbf16>
    "tpu.trace_start"() <{level = 10 : i32, message = "qd,kd->qk"}> : () -> ()
    %cst_37 = arith.constant dense<0.000000e+00> : vector<32x32xf32>
    %116 = tpu.matmul %115, %67, %cst_37 {dimension_numbers = #tpu.dot_dimension_numbers<[1], [1], [0], [0], [0, 0, 1, 0], [], []>} : vector<32x32xbf16>, vector<32x32xbf16>, vector<32x32xf32> -> vector<32x32xf32>
    "tpu.trace_stop"() : () -> ()
    %cst_38 = arith.constant 0.353553385 : f32
    %117 = vector.broadcast %cst_38 : f32 to vector<32x32xf32>
    %118 = arith.mulf %116, %117 : vector<32x32xf32>
    %119 = arith.addf %118, %57 : vector<32x32xf32>
    "tpu.trace_start"() <{level = 10 : i32, message = "qd,kd->qk"}> : () -> ()
    %cst_39 = arith.constant dense<0.000000e+00> : vector<32x40xf32>
    %120 = tpu.matmul %115, %68, %cst_39 {dimension_numbers = #tpu.dot_dimension_numbers<[1], [1], [0], [0], [0, 0, 1, 0], [], []>} : vector<32x32xbf16>, vector<40x32xbf16>, vector<32x40xf32> -> vector<32x40xf32>
    "tpu.trace_stop"() : () -> ()
    %cst_40 = arith.constant 0.353553385 : f32
    %121 = vector.broadcast %cst_40 : f32 to vector<32x40xf32>
    %122 = arith.mulf %120, %121 : vector<32x40xf32>
    %123 = arith.addf %122, %61 : vector<32x40xf32>
    %cst_41 = arith.constant dense<0xFF800000> : vector<32xf32>
    %124 = vector.multi_reduction <maximumf>, %119, %cst_41 [1] : vector<32x32xf32> to vector<32xf32>
    %125 = vector.shape_cast %124 : vector<32xf32> to vector<32x1xf32>
    %cst_42 = arith.constant dense<0xFF800000> : vector<32xf32>
    %126 = vector.multi_reduction <maximumf>, %123, %cst_42 [1] : vector<32x40xf32> to vector<32xf32>
    %127 = vector.shape_cast %126 : vector<32xf32> to vector<32x1xf32>
    %128 = arith.maximumf %125, %127 : vector<32x1xf32>
    %129 = vector.broadcast %128 : vector<32x1xf32> to vector<32x32xf32>
    %130 = arith.subf %119, %129 : vector<32x32xf32>
    %131 = math.exp %130 : vector<32x32xf32>
    %132 = vector.broadcast %128 : vector<32x1xf32> to vector<32x40xf32>
    %133 = arith.subf %123, %132 : vector<32x40xf32>
    %134 = math.exp %133 : vector<32x40xf32>
    %cst_43 = arith.constant dense<0.000000e+00> : vector<32xf32>
    %135 = vector.multi_reduction <add>, %131, %cst_43 [1] : vector<32x32xf32> to vector<32xf32>
    %136 = vector.shape_cast %135 : vector<32xf32> to vector<32x1xf32>
    %cst_44 = arith.constant dense<0.000000e+00> : vector<32xf32>
    %137 = vector.multi_reduction <add>, %134, %cst_44 [1] : vector<32x40xf32> to vector<32xf32>
    %138 = vector.shape_cast %137 : vector<32xf32> to vector<32x1xf32>
    %139 = arith.addf %136, %138 : vector<32x1xf32>
    %cst_45 = arith.constant 1.000000e+00 : f32
    %140 = vector.broadcast %cst_45 : f32 to vector<32x1xf32>
    %141 = arith.divf %140, %139 : vector<32x1xf32>
    %142 = arith.truncf %131 : vector<32x32xf32> to vector<32x32xbf16>
    %143 = vector.broadcast %37 : vector<1x32xf32> to vector<32x32xf32>
    %144 = arith.mulf %64, %143 : vector<32x32xf32>
    %145 = arith.truncf %144 : vector<32x32xf32> to vector<32x32xbf16>
    %cst_46 = arith.constant dense<0.000000e+00> : vector<32x32xf32>
    %146 = tpu.matmul %142, %145, %cst_46 {dimension_numbers = #tpu.dot_dimension_numbers<[1], [0], [0], [1], [0, 0, 1, 1], [], []>} : vector<32x32xbf16>, vector<32x32xbf16>, vector<32x32xf32> -> vector<32x32xf32>
    %147 = arith.truncf %134 : vector<32x40xf32> to vector<32x40xbf16>
    %148 = vector.broadcast %37 : vector<1x32xf32> to vector<40x32xf32>
    %149 = arith.mulf %66, %148 : vector<40x32xf32>
    %150 = arith.truncf %149 : vector<40x32xf32> to vector<40x32xbf16>
    %cst_47 = arith.constant dense<0.000000e+00> : vector<32x32xf32>
    %151 = tpu.matmul %147, %150, %cst_47 {dimension_numbers = #tpu.dot_dimension_numbers<[1], [0], [0], [1], [0, 0, 1, 1], [], []>} : vector<32x40xbf16>, vector<40x32xbf16>, vector<32x32xf32> -> vector<32x32xf32>
    %152 = arith.addf %146, %151 : vector<32x32xf32>
    %153 = vector.broadcast %141 : vector<32x1xf32> to vector<32x32xf32>
    %154 = arith.mulf %152, %153 : vector<32x32xf32>
    %155 = arith.addf %112, %154 : vector<32x32xf32>
    %156 = vector.broadcast %44 : vector<1x32xf32> to vector<32x32xf32>
    %157 = arith.mulf %62, %156 : vector<32x32xf32>
    %158 = arith.truncf %157 : vector<32x32xf32> to vector<32x32xbf16>
    "tpu.trace_start"() <{level = 10 : i32, message = "qd,kd->qk"}> : () -> ()
    %cst_48 = arith.constant dense<0.000000e+00> : vector<32x32xf32>
    %159 = tpu.matmul %158, %67, %cst_48 {dimension_numbers = #tpu.dot_dimension_numbers<[1], [1], [0], [0], [0, 0, 1, 0], [], []>} : vector<32x32xbf16>, vector<32x32xbf16>, vector<32x32xf32> -> vector<32x32xf32>
    "tpu.trace_stop"() : () -> ()
    %cst_49 = arith.constant 0.353553385 : f32
    %160 = vector.broadcast %cst_49 : f32 to vector<32x32xf32>
    %161 = arith.mulf %159, %160 : vector<32x32xf32>
    %162 = arith.addf %161, %57 : vector<32x32xf32>
    "tpu.trace_start"() <{level = 10 : i32, message = "qd,kd->qk"}> : () -> ()
    %cst_50 = arith.constant dense<0.000000e+00> : vector<32x40xf32>
    %163 = tpu.matmul %158, %68, %cst_50 {dimension_numbers = #tpu.dot_dimension_numbers<[1], [1], [0], [0], [0, 0, 1, 0], [], []>} : vector<32x32xbf16>, vector<40x32xbf16>, vector<32x40xf32> -> vector<32x40xf32>
    "tpu.trace_stop"() : () -> ()
    %cst_51 = arith.constant 0.353553385 : f32
    %164 = vector.broadcast %cst_51 : f32 to vector<32x40xf32>
    %165 = arith.mulf %163, %164 : vector<32x40xf32>
    %166 = arith.addf %165, %61 : vector<32x40xf32>
    %cst_52 = arith.constant dense<0xFF800000> : vector<32xf32>
    %167 = vector.multi_reduction <maximumf>, %162, %cst_52 [1] : vector<32x32xf32> to vector<32xf32>
    %168 = vector.shape_cast %167 : vector<32xf32> to vector<32x1xf32>
    %cst_53 = arith.constant dense<0xFF800000> : vector<32xf32>
    %169 = vector.multi_reduction <maximumf>, %166, %cst_53 [1] : vector<32x40xf32> to vector<32xf32>
    %170 = vector.shape_cast %169 : vector<32xf32> to vector<32x1xf32>
    %171 = arith.maximumf %168, %170 : vector<32x1xf32>
    %172 = vector.broadcast %171 : vector<32x1xf32> to vector<32x32xf32>
    %173 = arith.subf %162, %172 : vector<32x32xf32>
    %174 = math.exp %173 : vector<32x32xf32>
    %175 = vector.broadcast %171 : vector<32x1xf32> to vector<32x40xf32>
    %176 = arith.subf %166, %175 : vector<32x40xf32>
    %177 = math.exp %176 : vector<32x40xf32>
    %cst_54 = arith.constant dense<0.000000e+00> : vector<32xf32>
    %178 = vector.multi_reduction <add>, %174, %cst_54 [1] : vector<32x32xf32> to vector<32xf32>
    %179 = vector.shape_cast %178 : vector<32xf32> to vector<32x1xf32>
    %cst_55 = arith.constant dense<0.000000e+00> : vector<32xf32>
    %180 = vector.multi_reduction <add>, %177, %cst_55 [1] : vector<32x40xf32> to vector<32xf32>
    %181 = vector.shape_cast %180 : vector<32xf32> to vector<32x1xf32>
    %182 = arith.addf %179, %181 : vector<32x1xf32>
    %cst_56 = arith.constant 1.000000e+00 : f32
    %183 = vector.broadcast %cst_56 : f32 to vector<32x1xf32>
    %184 = arith.divf %183, %182 : vector<32x1xf32>
    %185 = arith.truncf %174 : vector<32x32xf32> to vector<32x32xbf16>
    %186 = vector.broadcast %44 : vector<1x32xf32> to vector<32x32xf32>
    %187 = arith.mulf %64, %186 : vector<32x32xf32>
    %188 = arith.truncf %187 : vector<32x32xf32> to vector<32x32xbf16>
    %cst_57 = arith.constant dense<0.000000e+00> : vector<32x32xf32>
    %189 = tpu.matmul %185, %188, %cst_57 {dimension_numbers = #tpu.dot_dimension_numbers<[1], [0], [0], [1], [0, 0, 1, 1], [], []>} : vector<32x32xbf16>, vector<32x32xbf16>, vector<32x32xf32> -> vector<32x32xf32>
    %190 = arith.truncf %177 : vector<32x40xf32> to vector<32x40xbf16>
    %191 = vector.broadcast %44 : vector<1x32xf32> to vector<40x32xf32>
    %192 = arith.mulf %66, %191 : vector<40x32xf32>
    %193 = arith.truncf %192 : vector<40x32xf32> to vector<40x32xbf16>
    %cst_58 = arith.constant dense<0.000000e+00> : vector<32x32xf32>
    %194 = tpu.matmul %190, %193, %cst_58 {dimension_numbers = #tpu.dot_dimension_numbers<[1], [0], [0], [1], [0, 0, 1, 1], [], []>} : vector<32x40xbf16>, vector<40x32xbf16>, vector<32x32xf32> -> vector<32x32xf32>
    %195 = arith.addf %189, %194 : vector<32x32xf32>
    %196 = vector.broadcast %184 : vector<32x1xf32> to vector<32x32xf32>
    %197 = arith.mulf %195, %196 : vector<32x32xf32>
    %198 = arith.addf %155, %197 : vector<32x32xf32>
    %199 = vector.broadcast %51 : vector<1x32xf32> to vector<32x32xf32>
    %200 = arith.mulf %62, %199 : vector<32x32xf32>
    %201 = arith.truncf %200 : vector<32x32xf32> to vector<32x32xbf16>
    "tpu.trace_start"() <{level = 10 : i32, message = "qd,kd->qk"}> : () -> ()
    %cst_59 = arith.constant dense<0.000000e+00> : vector<32x32xf32>
    %202 = tpu.matmul %201, %67, %cst_59 {dimension_numbers = #tpu.dot_dimension_numbers<[1], [1], [0], [0], [0, 0, 1, 0], [], []>} : vector<32x32xbf16>, vector<32x32xbf16>, vector<32x32xf32> -> vector<32x32xf32>
    "tpu.trace_stop"() : () -> ()
    %cst_60 = arith.constant 0.353553385 : f32
    %203 = vector.broadcast %cst_60 : f32 to vector<32x32xf32>
    %204 = arith.mulf %202, %203 : vector<32x32xf32>
    %205 = arith.addf %204, %57 : vector<32x32xf32>
    "tpu.trace_start"() <{level = 10 : i32, message = "qd,kd->qk"}> : () -> ()
    %cst_61 = arith.constant dense<0.000000e+00> : vector<32x40xf32>
    %206 = tpu.matmul %201, %68, %cst_61 {dimension_numbers = #tpu.dot_dimension_numbers<[1], [1], [0], [0], [0, 0, 1, 0], [], []>} : vector<32x32xbf16>, vector<40x32xbf16>, vector<32x40xf32> -> vector<32x40xf32>
    "tpu.trace_stop"() : () -> ()
    %cst_62 = arith.constant 0.353553385 : f32
    %207 = vector.broadcast %cst_62 : f32 to vector<32x40xf32>
    %208 = arith.mulf %206, %207 : vector<32x40xf32>
    %209 = arith.addf %208, %61 : vector<32x40xf32>
    %cst_63 = arith.constant dense<0xFF800000> : vector<32xf32>
    %210 = vector.multi_reduction <maximumf>, %205, %cst_63 [1] : vector<32x32xf32> to vector<32xf32>
    %211 = vector.shape_cast %210 : vector<32xf32> to vector<32x1xf32>
    %cst_64 = arith.constant dense<0xFF800000> : vector<32xf32>
    %212 = vector.multi_reduction <maximumf>, %209, %cst_64 [1] : vector<32x40xf32> to vector<32xf32>
    %213 = vector.shape_cast %212 : vector<32xf32> to vector<32x1xf32>
    %214 = arith.maximumf %211, %213 : vector<32x1xf32>
    %215 = vector.broadcast %214 : vector<32x1xf32> to vector<32x32xf32>
    %216 = arith.subf %205, %215 : vector<32x32xf32>
    %217 = math.exp %216 : vector<32x32xf32>
    %218 = vector.broadcast %214 : vector<32x1xf32> to vector<32x40xf32>
    %219 = arith.subf %209, %218 : vector<32x40xf32>
    %220 = math.exp %219 : vector<32x40xf32>
    %cst_65 = arith.constant dense<0.000000e+00> : vector<32xf32>
    %221 = vector.multi_reduction <add>, %217, %cst_65 [1] : vector<32x32xf32> to vector<32xf32>
    %222 = vector.shape_cast %221 : vector<32xf32> to vector<32x1xf32>
    %cst_66 = arith.constant dense<0.000000e+00> : vector<32xf32>
    %223 = vector.multi_reduction <add>, %220, %cst_66 [1] : vector<32x40xf32> to vector<32xf32>
    %224 = vector.shape_cast %223 : vector<32xf32> to vector<32x1xf32>
    %225 = arith.addf %222, %224 : vector<32x1xf32>
    %cst_67 = arith.constant 1.000000e+00 : f32
    %226 = vector.broadcast %cst_67 : f32 to vector<32x1xf32>
    %227 = arith.divf %226, %225 : vector<32x1xf32>
    %228 = arith.truncf %217 : vector<32x32xf32> to vector<32x32xbf16>
    %229 = vector.broadcast %51 : vector<1x32xf32> to vector<32x32xf32>
    %230 = arith.mulf %64, %229 : vector<32x32xf32>
    %231 = arith.truncf %230 : vector<32x32xf32> to vector<32x32xbf16>
    %cst_68 = arith.constant dense<0.000000e+00> : vector<32x32xf32>
    %232 = tpu.matmul %228, %231, %cst_68 {dimension_numbers = #tpu.dot_dimension_numbers<[1], [0], [0], [1], [0, 0, 1, 1], [], []>} : vector<32x32xbf16>, vector<32x32xbf16>, vector<32x32xf32> -> vector<32x32xf32>
    %233 = arith.truncf %220 : vector<32x40xf32> to vector<32x40xbf16>
    %234 = vector.broadcast %51 : vector<1x32xf32> to vector<40x32xf32>
    %235 = arith.mulf %66, %234 : vector<40x32xf32>
    %236 = arith.truncf %235 : vector<40x32xf32> to vector<40x32xbf16>
    %cst_69 = arith.constant dense<0.000000e+00> : vector<32x32xf32>
    %237 = tpu.matmul %233, %236, %cst_69 {dimension_numbers = #tpu.dot_dimension_numbers<[1], [0], [0], [1], [0, 0, 1, 1], [], []>} : vector<32x40xbf16>, vector<40x32xbf16>, vector<32x32xf32> -> vector<32x32xf32>
    %238 = arith.addf %232, %237 : vector<32x32xf32>
    %239 = vector.broadcast %227 : vector<32x1xf32> to vector<32x32xf32>
    %240 = arith.mulf %238, %239 : vector<32x32xf32>
    %241 = arith.addf %198, %240 : vector<32x32xf32>
    %242 = vector.extract_strided_slice %18 {offsets = [32, 0], sizes = [32, 32], strides = [1, 1]} : vector<128x32xf32> to vector<32x32xf32>
    %243 = vector.extract_strided_slice %19 {offsets = [32, 0], sizes = [32, 32], strides = [1, 1]} : vector<128x32xf32> to vector<32x32xf32>
    %244 = vector.extract_strided_slice %20 {offsets = [32, 0], sizes = [32, 32], strides = [1, 1]} : vector<128x32xf32> to vector<32x32xf32>
    %245 = vector.extract_strided_slice %21 {offsets = [40, 0], sizes = [40, 32], strides = [1, 1]} : vector<160x32xf32> to vector<40x32xf32>
    %246 = vector.extract_strided_slice %22 {offsets = [40, 0], sizes = [40, 32], strides = [1, 1]} : vector<160x32xf32> to vector<40x32xf32>
    %247 = arith.truncf %243 : vector<32x32xf32> to vector<32x32xbf16>
    %248 = arith.truncf %245 : vector<40x32xf32> to vector<40x32xbf16>
    %cst_70 = arith.constant 0.000000e+00 : f32
    %249 = vector.broadcast %cst_70 : f32 to vector<32x32xf32>
    %250 = vector.broadcast %30 : vector<1x32xf32> to vector<32x32xf32>
    %251 = arith.mulf %242, %250 : vector<32x32xf32>
    %252 = arith.truncf %251 : vector<32x32xf32> to vector<32x32xbf16>
    "tpu.trace_start"() <{level = 10 : i32, message = "qd,kd->qk"}> : () -> ()
    %cst_71 = arith.constant dense<0.000000e+00> : vector<32x32xf32>
    %253 = tpu.matmul %252, %247, %cst_71 {dimension_numbers = #tpu.dot_dimension_numbers<[1], [1], [0], [0], [0, 0, 1, 0], [], []>} : vector<32x32xbf16>, vector<32x32xbf16>, vector<32x32xf32> -> vector<32x32xf32>
    "tpu.trace_stop"() : () -> ()
    %cst_72 = arith.constant 0.353553385 : f32
    %254 = vector.broadcast %cst_72 : f32 to vector<32x32xf32>
    %255 = arith.mulf %253, %254 : vector<32x32xf32>
    %256 = arith.addf %255, %57 : vector<32x32xf32>
    "tpu.trace_start"() <{level = 10 : i32, message = "qd,kd->qk"}> : () -> ()
    %cst_73 = arith.constant dense<0.000000e+00> : vector<32x40xf32>
    %257 = tpu.matmul %252, %248, %cst_73 {dimension_numbers = #tpu.dot_dimension_numbers<[1], [1], [0], [0], [0, 0, 1, 0], [], []>} : vector<32x32xbf16>, vector<40x32xbf16>, vector<32x40xf32> -> vector<32x40xf32>
    "tpu.trace_stop"() : () -> ()
    %cst_74 = arith.constant 0.353553385 : f32
    %258 = vector.broadcast %cst_74 : f32 to vector<32x40xf32>
    %259 = arith.mulf %257, %258 : vector<32x40xf32>
    %260 = arith.addf %259, %61 : vector<32x40xf32>
    %cst_75 = arith.constant dense<0xFF800000> : vector<32xf32>
    %261 = vector.multi_reduction <maximumf>, %256, %cst_75 [1] : vector<32x32xf32> to vector<32xf32>
    %262 = vector.shape_cast %261 : vector<32xf32> to vector<32x1xf32>
    %cst_76 = arith.constant dense<0xFF800000> : vector<32xf32>
    %263 = vector.multi_reduction <maximumf>, %260, %cst_76 [1] : vector<32x40xf32> to vector<32xf32>
    %264 = vector.shape_cast %263 : vector<32xf32> to vector<32x1xf32>
    %265 = arith.maximumf %262, %264 : vector<32x1xf32>
    %266 = vector.broadcast %265 : vector<32x1xf32> to vector<32x32xf32>
    %267 = arith.subf %256, %266 : vector<32x32xf32>
    %268 = math.exp %267 : vector<32x32xf32>
    %269 = vector.broadcast %265 : vector<32x1xf32> to vector<32x40xf32>
    %270 = arith.subf %260, %269 : vector<32x40xf32>
    %271 = math.exp %270 : vector<32x40xf32>
    %cst_77 = arith.constant dense<0.000000e+00> : vector<32xf32>
    %272 = vector.multi_reduction <add>, %268, %cst_77 [1] : vector<32x32xf32> to vector<32xf32>
    %273 = vector.shape_cast %272 : vector<32xf32> to vector<32x1xf32>
    %cst_78 = arith.constant dense<0.000000e+00> : vector<32xf32>
    %274 = vector.multi_reduction <add>, %271, %cst_78 [1] : vector<32x40xf32> to vector<32xf32>
    %275 = vector.shape_cast %274 : vector<32xf32> to vector<32x1xf32>
    %276 = arith.addf %273, %275 : vector<32x1xf32>
    %cst_79 = arith.constant 1.000000e+00 : f32
    %277 = vector.broadcast %cst_79 : f32 to vector<32x1xf32>
    %278 = arith.divf %277, %276 : vector<32x1xf32>
    %279 = arith.truncf %268 : vector<32x32xf32> to vector<32x32xbf16>
    %280 = vector.broadcast %30 : vector<1x32xf32> to vector<32x32xf32>
    %281 = arith.mulf %244, %280 : vector<32x32xf32>
    %282 = arith.truncf %281 : vector<32x32xf32> to vector<32x32xbf16>
    %cst_80 = arith.constant dense<0.000000e+00> : vector<32x32xf32>
    %283 = tpu.matmul %279, %282, %cst_80 {dimension_numbers = #tpu.dot_dimension_numbers<[1], [0], [0], [1], [0, 0, 1, 1], [], []>} : vector<32x32xbf16>, vector<32x32xbf16>, vector<32x32xf32> -> vector<32x32xf32>
    %284 = arith.truncf %271 : vector<32x40xf32> to vector<32x40xbf16>
    %285 = vector.broadcast %30 : vector<1x32xf32> to vector<40x32xf32>
    %286 = arith.mulf %246, %285 : vector<40x32xf32>
    %287 = arith.truncf %286 : vector<40x32xf32> to vector<40x32xbf16>
    %cst_81 = arith.constant dense<0.000000e+00> : vector<32x32xf32>
    %288 = tpu.matmul %284, %287, %cst_81 {dimension_numbers = #tpu.dot_dimension_numbers<[1], [0], [0], [1], [0, 0, 1, 1], [], []>} : vector<32x40xbf16>, vector<40x32xbf16>, vector<32x32xf32> -> vector<32x32xf32>
    %289 = arith.addf %283, %288 : vector<32x32xf32>
    %290 = vector.broadcast %278 : vector<32x1xf32> to vector<32x32xf32>
    %291 = arith.mulf %289, %290 : vector<32x32xf32>
    %292 = arith.addf %249, %291 : vector<32x32xf32>
    %293 = vector.broadcast %37 : vector<1x32xf32> to vector<32x32xf32>
    %294 = arith.mulf %242, %293 : vector<32x32xf32>
    %295 = arith.truncf %294 : vector<32x32xf32> to vector<32x32xbf16>
    "tpu.trace_start"() <{level = 10 : i32, message = "qd,kd->qk"}> : () -> ()
    %cst_82 = arith.constant dense<0.000000e+00> : vector<32x32xf32>
    %296 = tpu.matmul %295, %247, %cst_82 {dimension_numbers = #tpu.dot_dimension_numbers<[1], [1], [0], [0], [0, 0, 1, 0], [], []>} : vector<32x32xbf16>, vector<32x32xbf16>, vector<32x32xf32> -> vector<32x32xf32>
    "tpu.trace_stop"() : () -> ()
    %cst_83 = arith.constant 0.353553385 : f32
    %297 = vector.broadcast %cst_83 : f32 to vector<32x32xf32>
    %298 = arith.mulf %296, %297 : vector<32x32xf32>
    %299 = arith.addf %298, %57 : vector<32x32xf32>
    "tpu.trace_start"() <{level = 10 : i32, message = "qd,kd->qk"}> : () -> ()
    %cst_84 = arith.constant dense<0.000000e+00> : vector<32x40xf32>
    %300 = tpu.matmul %295, %248, %cst_84 {dimension_numbers = #tpu.dot_dimension_numbers<[1], [1], [0], [0], [0, 0, 1, 0], [], []>} : vector<32x32xbf16>, vector<40x32xbf16>, vector<32x40xf32> -> vector<32x40xf32>
    "tpu.trace_stop"() : () -> ()
    %cst_85 = arith.constant 0.353553385 : f32
    %301 = vector.broadcast %cst_85 : f32 to vector<32x40xf32>
    %302 = arith.mulf %300, %301 : vector<32x40xf32>
    %303 = arith.addf %302, %61 : vector<32x40xf32>
    %cst_86 = arith.constant dense<0xFF800000> : vector<32xf32>
    %304 = vector.multi_reduction <maximumf>, %299, %cst_86 [1] : vector<32x32xf32> to vector<32xf32>
    %305 = vector.shape_cast %304 : vector<32xf32> to vector<32x1xf32>
    %cst_87 = arith.constant dense<0xFF800000> : vector<32xf32>
    %306 = vector.multi_reduction <maximumf>, %303, %cst_87 [1] : vector<32x40xf32> to vector<32xf32>
    %307 = vector.shape_cast %306 : vector<32xf32> to vector<32x1xf32>
    %308 = arith.maximumf %305, %307 : vector<32x1xf32>
    %309 = vector.broadcast %308 : vector<32x1xf32> to vector<32x32xf32>
    %310 = arith.subf %299, %309 : vector<32x32xf32>
    %311 = math.exp %310 : vector<32x32xf32>
    %312 = vector.broadcast %308 : vector<32x1xf32> to vector<32x40xf32>
    %313 = arith.subf %303, %312 : vector<32x40xf32>
    %314 = math.exp %313 : vector<32x40xf32>
    %cst_88 = arith.constant dense<0.000000e+00> : vector<32xf32>
    %315 = vector.multi_reduction <add>, %311, %cst_88 [1] : vector<32x32xf32> to vector<32xf32>
    %316 = vector.shape_cast %315 : vector<32xf32> to vector<32x1xf32>
    %cst_89 = arith.constant dense<0.000000e+00> : vector<32xf32>
    %317 = vector.multi_reduction <add>, %314, %cst_89 [1] : vector<32x40xf32> to vector<32xf32>
    %318 = vector.shape_cast %317 : vector<32xf32> to vector<32x1xf32>
    %319 = arith.addf %316, %318 : vector<32x1xf32>
    %cst_90 = arith.constant 1.000000e+00 : f32
    %320 = vector.broadcast %cst_90 : f32 to vector<32x1xf32>
    %321 = arith.divf %320, %319 : vector<32x1xf32>
    %322 = arith.truncf %311 : vector<32x32xf32> to vector<32x32xbf16>
    %323 = vector.broadcast %37 : vector<1x32xf32> to vector<32x32xf32>
    %324 = arith.mulf %244, %323 : vector<32x32xf32>
    %325 = arith.truncf %324 : vector<32x32xf32> to vector<32x32xbf16>
    %cst_91 = arith.constant dense<0.000000e+00> : vector<32x32xf32>
    %326 = tpu.matmul %322, %325, %cst_91 {dimension_numbers = #tpu.dot_dimension_numbers<[1], [0], [0], [1], [0, 0, 1, 1], [], []>} : vector<32x32xbf16>, vector<32x32xbf16>, vector<32x32xf32> -> vector<32x32xf32>
    %327 = arith.truncf %314 : vector<32x40xf32> to vector<32x40xbf16>
    %328 = vector.broadcast %37 : vector<1x32xf32> to vector<40x32xf32>
    %329 = arith.mulf %246, %328 : vector<40x32xf32>
    %330 = arith.truncf %329 : vector<40x32xf32> to vector<40x32xbf16>
    %cst_92 = arith.constant dense<0.000000e+00> : vector<32x32xf32>
    %331 = tpu.matmul %327, %330, %cst_92 {dimension_numbers = #tpu.dot_dimension_numbers<[1], [0], [0], [1], [0, 0, 1, 1], [], []>} : vector<32x40xbf16>, vector<40x32xbf16>, vector<32x32xf32> -> vector<32x32xf32>
    %332 = arith.addf %326, %331 : vector<32x32xf32>
    %333 = vector.broadcast %321 : vector<32x1xf32> to vector<32x32xf32>
    %334 = arith.mulf %332, %333 : vector<32x32xf32>
    %335 = arith.addf %292, %334 : vector<32x32xf32>
    %336 = vector.broadcast %44 : vector<1x32xf32> to vector<32x32xf32>
    %337 = arith.mulf %242, %336 : vector<32x32xf32>
    %338 = arith.truncf %337 : vector<32x32xf32> to vector<32x32xbf16>
    "tpu.trace_start"() <{level = 10 : i32, message = "qd,kd->qk"}> : () -> ()
    %cst_93 = arith.constant dense<0.000000e+00> : vector<32x32xf32>
    %339 = tpu.matmul %338, %247, %cst_93 {dimension_numbers = #tpu.dot_dimension_numbers<[1], [1], [0], [0], [0, 0, 1, 0], [], []>} : vector<32x32xbf16>, vector<32x32xbf16>, vector<32x32xf32> -> vector<32x32xf32>
    "tpu.trace_stop"() : () -> ()
    %cst_94 = arith.constant 0.353553385 : f32
    %340 = vector.broadcast %cst_94 : f32 to vector<32x32xf32>
    %341 = arith.mulf %339, %340 : vector<32x32xf32>
    %342 = arith.addf %341, %57 : vector<32x32xf32>
    "tpu.trace_start"() <{level = 10 : i32, message = "qd,kd->qk"}> : () -> ()
    %cst_95 = arith.constant dense<0.000000e+00> : vector<32x40xf32>
    %343 = tpu.matmul %338, %248, %cst_95 {dimension_numbers = #tpu.dot_dimension_numbers<[1], [1], [0], [0], [0, 0, 1, 0], [], []>} : vector<32x32xbf16>, vector<40x32xbf16>, vector<32x40xf32> -> vector<32x40xf32>
    "tpu.trace_stop"() : () -> ()
    %cst_96 = arith.constant 0.353553385 : f32
    %344 = vector.broadcast %cst_96 : f32 to vector<32x40xf32>
    %345 = arith.mulf %343, %344 : vector<32x40xf32>
    %346 = arith.addf %345, %61 : vector<32x40xf32>
    %cst_97 = arith.constant dense<0xFF800000> : vector<32xf32>
    %347 = vector.multi_reduction <maximumf>, %342, %cst_97 [1] : vector<32x32xf32> to vector<32xf32>
    %348 = vector.shape_cast %347 : vector<32xf32> to vector<32x1xf32>
    %cst_98 = arith.constant dense<0xFF800000> : vector<32xf32>
    %349 = vector.multi_reduction <maximumf>, %346, %cst_98 [1] : vector<32x40xf32> to vector<32xf32>
    %350 = vector.shape_cast %349 : vector<32xf32> to vector<32x1xf32>
    %351 = arith.maximumf %348, %350 : vector<32x1xf32>
    %352 = vector.broadcast %351 : vector<32x1xf32> to vector<32x32xf32>
    %353 = arith.subf %342, %352 : vector<32x32xf32>
    %354 = math.exp %353 : vector<32x32xf32>
    %355 = vector.broadcast %351 : vector<32x1xf32> to vector<32x40xf32>
    %356 = arith.subf %346, %355 : vector<32x40xf32>
    %357 = math.exp %356 : vector<32x40xf32>
    %cst_99 = arith.constant dense<0.000000e+00> : vector<32xf32>
    %358 = vector.multi_reduction <add>, %354, %cst_99 [1] : vector<32x32xf32> to vector<32xf32>
    %359 = vector.shape_cast %358 : vector<32xf32> to vector<32x1xf32>
    %cst_100 = arith.constant dense<0.000000e+00> : vector<32xf32>
    %360 = vector.multi_reduction <add>, %357, %cst_100 [1] : vector<32x40xf32> to vector<32xf32>
    %361 = vector.shape_cast %360 : vector<32xf32> to vector<32x1xf32>
    %362 = arith.addf %359, %361 : vector<32x1xf32>
    %cst_101 = arith.constant 1.000000e+00 : f32
    %363 = vector.broadcast %cst_101 : f32 to vector<32x1xf32>
    %364 = arith.divf %363, %362 : vector<32x1xf32>
    %365 = arith.truncf %354 : vector<32x32xf32> to vector<32x32xbf16>
    %366 = vector.broadcast %44 : vector<1x32xf32> to vector<32x32xf32>
    %367 = arith.mulf %244, %366 : vector<32x32xf32>
    %368 = arith.truncf %367 : vector<32x32xf32> to vector<32x32xbf16>
    %cst_102 = arith.constant dense<0.000000e+00> : vector<32x32xf32>
    %369 = tpu.matmul %365, %368, %cst_102 {dimension_numbers = #tpu.dot_dimension_numbers<[1], [0], [0], [1], [0, 0, 1, 1], [], []>} : vector<32x32xbf16>, vector<32x32xbf16>, vector<32x32xf32> -> vector<32x32xf32>
    %370 = arith.truncf %357 : vector<32x40xf32> to vector<32x40xbf16>
    %371 = vector.broadcast %44 : vector<1x32xf32> to vector<40x32xf32>
    %372 = arith.mulf %246, %371 : vector<40x32xf32>
    %373 = arith.truncf %372 : vector<40x32xf32> to vector<40x32xbf16>
    %cst_103 = arith.constant dense<0.000000e+00> : vector<32x32xf32>
    %374 = tpu.matmul %370, %373, %cst_103 {dimension_numbers = #tpu.dot_dimension_numbers<[1], [0], [0], [1], [0, 0, 1, 1], [], []>} : vector<32x40xbf16>, vector<40x32xbf16>, vector<32x32xf32> -> vector<32x32xf32>
    %375 = arith.addf %369, %374 : vector<32x32xf32>
    %376 = vector.broadcast %364 : vector<32x1xf32> to vector<32x32xf32>
    %377 = arith.mulf %375, %376 : vector<32x32xf32>
    %378 = arith.addf %335, %377 : vector<32x32xf32>
    %379 = vector.broadcast %51 : vector<1x32xf32> to vector<32x32xf32>
    %380 = arith.mulf %242, %379 : vector<32x32xf32>
    %381 = arith.truncf %380 : vector<32x32xf32> to vector<32x32xbf16>
    "tpu.trace_start"() <{level = 10 : i32, message = "qd,kd->qk"}> : () -> ()
    %cst_104 = arith.constant dense<0.000000e+00> : vector<32x32xf32>
    %382 = tpu.matmul %381, %247, %cst_104 {dimension_numbers = #tpu.dot_dimension_numbers<[1], [1], [0], [0], [0, 0, 1, 0], [], []>} : vector<32x32xbf16>, vector<32x32xbf16>, vector<32x32xf32> -> vector<32x32xf32>
    "tpu.trace_stop"() : () -> ()
    %cst_105 = arith.constant 0.353553385 : f32
    %383 = vector.broadcast %cst_105 : f32 to vector<32x32xf32>
    %384 = arith.mulf %382, %383 : vector<32x32xf32>
    %385 = arith.addf %384, %57 : vector<32x32xf32>
    "tpu.trace_start"() <{level = 10 : i32, message = "qd,kd->qk"}> : () -> ()
    %cst_106 = arith.constant dense<0.000000e+00> : vector<32x40xf32>
    %386 = tpu.matmul %381, %248, %cst_106 {dimension_numbers = #tpu.dot_dimension_numbers<[1], [1], [0], [0], [0, 0, 1, 0], [], []>} : vector<32x32xbf16>, vector<40x32xbf16>, vector<32x40xf32> -> vector<32x40xf32>
    "tpu.trace_stop"() : () -> ()
    %cst_107 = arith.constant 0.353553385 : f32
    %387 = vector.broadcast %cst_107 : f32 to vector<32x40xf32>
    %388 = arith.mulf %386, %387 : vector<32x40xf32>
    %389 = arith.addf %388, %61 : vector<32x40xf32>
    %cst_108 = arith.constant dense<0xFF800000> : vector<32xf32>
    %390 = vector.multi_reduction <maximumf>, %385, %cst_108 [1] : vector<32x32xf32> to vector<32xf32>
    %391 = vector.shape_cast %390 : vector<32xf32> to vector<32x1xf32>
    %cst_109 = arith.constant dense<0xFF800000> : vector<32xf32>
    %392 = vector.multi_reduction <maximumf>, %389, %cst_109 [1] : vector<32x40xf32> to vector<32xf32>
    %393 = vector.shape_cast %392 : vector<32xf32> to vector<32x1xf32>
    %394 = arith.maximumf %391, %393 : vector<32x1xf32>
    %395 = vector.broadcast %394 : vector<32x1xf32> to vector<32x32xf32>
    %396 = arith.subf %385, %395 : vector<32x32xf32>
    %397 = math.exp %396 : vector<32x32xf32>
    %398 = vector.broadcast %394 : vector<32x1xf32> to vector<32x40xf32>
    %399 = arith.subf %389, %398 : vector<32x40xf32>
    %400 = math.exp %399 : vector<32x40xf32>
    %cst_110 = arith.constant dense<0.000000e+00> : vector<32xf32>
    %401 = vector.multi_reduction <add>, %397, %cst_110 [1] : vector<32x32xf32> to vector<32xf32>
    %402 = vector.shape_cast %401 : vector<32xf32> to vector<32x1xf32>
    %cst_111 = arith.constant dense<0.000000e+00> : vector<32xf32>
    %403 = vector.multi_reduction <add>, %400, %cst_111 [1] : vector<32x40xf32> to vector<32xf32>
    %404 = vector.shape_cast %403 : vector<32xf32> to vector<32x1xf32>
    %405 = arith.addf %402, %404 : vector<32x1xf32>
    %cst_112 = arith.constant 1.000000e+00 : f32
    %406 = vector.broadcast %cst_112 : f32 to vector<32x1xf32>
    %407 = arith.divf %406, %405 : vector<32x1xf32>
    %408 = arith.truncf %397 : vector<32x32xf32> to vector<32x32xbf16>
    %409 = vector.broadcast %51 : vector<1x32xf32> to vector<32x32xf32>
    %410 = arith.mulf %244, %409 : vector<32x32xf32>
    %411 = arith.truncf %410 : vector<32x32xf32> to vector<32x32xbf16>
    %cst_113 = arith.constant dense<0.000000e+00> : vector<32x32xf32>
    %412 = tpu.matmul %408, %411, %cst_113 {dimension_numbers = #tpu.dot_dimension_numbers<[1], [0], [0], [1], [0, 0, 1, 1], [], []>} : vector<32x32xbf16>, vector<32x32xbf16>, vector<32x32xf32> -> vector<32x32xf32>
    %413 = arith.truncf %400 : vector<32x40xf32> to vector<32x40xbf16>
    %414 = vector.broadcast %51 : vector<1x32xf32> to vector<40x32xf32>
    %415 = arith.mulf %246, %414 : vector<40x32xf32>
    %416 = arith.truncf %415 : vector<40x32xf32> to vector<40x32xbf16>
    %cst_114 = arith.constant dense<0.000000e+00> : vector<32x32xf32>
    %417 = tpu.matmul %413, %416, %cst_114 {dimension_numbers = #tpu.dot_dimension_numbers<[1], [0], [0], [1], [0, 0, 1, 1], [], []>} : vector<32x40xbf16>, vector<40x32xbf16>, vector<32x32xf32> -> vector<32x32xf32>
    %418 = arith.addf %412, %417 : vector<32x32xf32>
    %419 = vector.broadcast %407 : vector<32x1xf32> to vector<32x32xf32>
    %420 = arith.mulf %418, %419 : vector<32x32xf32>
    %421 = arith.addf %378, %420 : vector<32x32xf32>
    %422 = vector.extract_strided_slice %18 {offsets = [64, 0], sizes = [32, 32], strides = [1, 1]} : vector<128x32xf32> to vector<32x32xf32>
    %423 = vector.extract_strided_slice %19 {offsets = [64, 0], sizes = [32, 32], strides = [1, 1]} : vector<128x32xf32> to vector<32x32xf32>
    %424 = vector.extract_strided_slice %20 {offsets = [64, 0], sizes = [32, 32], strides = [1, 1]} : vector<128x32xf32> to vector<32x32xf32>
    %425 = vector.extract_strided_slice %21 {offsets = [80, 0], sizes = [40, 32], strides = [1, 1]} : vector<160x32xf32> to vector<40x32xf32>
    %426 = vector.extract_strided_slice %22 {offsets = [80, 0], sizes = [40, 32], strides = [1, 1]} : vector<160x32xf32> to vector<40x32xf32>
    %427 = arith.truncf %423 : vector<32x32xf32> to vector<32x32xbf16>
    %428 = arith.truncf %425 : vector<40x32xf32> to vector<40x32xbf16>
    %cst_115 = arith.constant 0.000000e+00 : f32
    %429 = vector.broadcast %cst_115 : f32 to vector<32x32xf32>
    %430 = vector.broadcast %30 : vector<1x32xf32> to vector<32x32xf32>
    %431 = arith.mulf %422, %430 : vector<32x32xf32>
    %432 = arith.truncf %431 : vector<32x32xf32> to vector<32x32xbf16>
    "tpu.trace_start"() <{level = 10 : i32, message = "qd,kd->qk"}> : () -> ()
    %cst_116 = arith.constant dense<0.000000e+00> : vector<32x32xf32>
    %433 = tpu.matmul %432, %427, %cst_116 {dimension_numbers = #tpu.dot_dimension_numbers<[1], [1], [0], [0], [0, 0, 1, 0], [], []>} : vector<32x32xbf16>, vector<32x32xbf16>, vector<32x32xf32> -> vector<32x32xf32>
    "tpu.trace_stop"() : () -> ()
    %cst_117 = arith.constant 0.353553385 : f32
    %434 = vector.broadcast %cst_117 : f32 to vector<32x32xf32>
    %435 = arith.mulf %433, %434 : vector<32x32xf32>
    %436 = arith.addf %435, %57 : vector<32x32xf32>
    "tpu.trace_start"() <{level = 10 : i32, message = "qd,kd->qk"}> : () -> ()
    %cst_118 = arith.constant dense<0.000000e+00> : vector<32x40xf32>
    %437 = tpu.matmul %432, %428, %cst_118 {dimension_numbers = #tpu.dot_dimension_numbers<[1], [1], [0], [0], [0, 0, 1, 0], [], []>} : vector<32x32xbf16>, vector<40x32xbf16>, vector<32x40xf32> -> vector<32x40xf32>
    "tpu.trace_stop"() : () -> ()
    %cst_119 = arith.constant 0.353553385 : f32
    %438 = vector.broadcast %cst_119 : f32 to vector<32x40xf32>
    %439 = arith.mulf %437, %438 : vector<32x40xf32>
    %440 = arith.addf %439, %61 : vector<32x40xf32>
    %cst_120 = arith.constant dense<0xFF800000> : vector<32xf32>
    %441 = vector.multi_reduction <maximumf>, %436, %cst_120 [1] : vector<32x32xf32> to vector<32xf32>
    %442 = vector.shape_cast %441 : vector<32xf32> to vector<32x1xf32>
    %cst_121 = arith.constant dense<0xFF800000> : vector<32xf32>
    %443 = vector.multi_reduction <maximumf>, %440, %cst_121 [1] : vector<32x40xf32> to vector<32xf32>
    %444 = vector.shape_cast %443 : vector<32xf32> to vector<32x1xf32>
    %445 = arith.maximumf %442, %444 : vector<32x1xf32>
    %446 = vector.broadcast %445 : vector<32x1xf32> to vector<32x32xf32>
    %447 = arith.subf %436, %446 : vector<32x32xf32>
    %448 = math.exp %447 : vector<32x32xf32>
    %449 = vector.broadcast %445 : vector<32x1xf32> to vector<32x40xf32>
    %450 = arith.subf %440, %449 : vector<32x40xf32>
    %451 = math.exp %450 : vector<32x40xf32>
    %cst_122 = arith.constant dense<0.000000e+00> : vector<32xf32>
    %452 = vector.multi_reduction <add>, %448, %cst_122 [1] : vector<32x32xf32> to vector<32xf32>
    %453 = vector.shape_cast %452 : vector<32xf32> to vector<32x1xf32>
    %cst_123 = arith.constant dense<0.000000e+00> : vector<32xf32>
    %454 = vector.multi_reduction <add>, %451, %cst_123 [1] : vector<32x40xf32> to vector<32xf32>
    %455 = vector.shape_cast %454 : vector<32xf32> to vector<32x1xf32>
    %456 = arith.addf %453, %455 : vector<32x1xf32>
    %cst_124 = arith.constant 1.000000e+00 : f32
    %457 = vector.broadcast %cst_124 : f32 to vector<32x1xf32>
    %458 = arith.divf %457, %456 : vector<32x1xf32>
    %459 = arith.truncf %448 : vector<32x32xf32> to vector<32x32xbf16>
    %460 = vector.broadcast %30 : vector<1x32xf32> to vector<32x32xf32>
    %461 = arith.mulf %424, %460 : vector<32x32xf32>
    %462 = arith.truncf %461 : vector<32x32xf32> to vector<32x32xbf16>
    %cst_125 = arith.constant dense<0.000000e+00> : vector<32x32xf32>
    %463 = tpu.matmul %459, %462, %cst_125 {dimension_numbers = #tpu.dot_dimension_numbers<[1], [0], [0], [1], [0, 0, 1, 1], [], []>} : vector<32x32xbf16>, vector<32x32xbf16>, vector<32x32xf32> -> vector<32x32xf32>
    %464 = arith.truncf %451 : vector<32x40xf32> to vector<32x40xbf16>
    %465 = vector.broadcast %30 : vector<1x32xf32> to vector<40x32xf32>
    %466 = arith.mulf %426, %465 : vector<40x32xf32>
    %467 = arith.truncf %466 : vector<40x32xf32> to vector<40x32xbf16>
    %cst_126 = arith.constant dense<0.000000e+00> : vector<32x32xf32>
    %468 = tpu.matmul %464, %467, %cst_126 {dimension_numbers = #tpu.dot_dimension_numbers<[1], [0], [0], [1], [0, 0, 1, 1], [], []>} : vector<32x40xbf16>, vector<40x32xbf16>, vector<32x32xf32> -> vector<32x32xf32>
    %469 = arith.addf %463, %468 : vector<32x32xf32>
    %470 = vector.broadcast %458 : vector<32x1xf32> to vector<32x32xf32>
    %471 = arith.mulf %469, %470 : vector<32x32xf32>
    %472 = arith.addf %429, %471 : vector<32x32xf32>
    %473 = vector.broadcast %37 : vector<1x32xf32> to vector<32x32xf32>
    %474 = arith.mulf %422, %473 : vector<32x32xf32>
    %475 = arith.truncf %474 : vector<32x32xf32> to vector<32x32xbf16>
    "tpu.trace_start"() <{level = 10 : i32, message = "qd,kd->qk"}> : () -> ()
    %cst_127 = arith.constant dense<0.000000e+00> : vector<32x32xf32>
    %476 = tpu.matmul %475, %427, %cst_127 {dimension_numbers = #tpu.dot_dimension_numbers<[1], [1], [0], [0], [0, 0, 1, 0], [], []>} : vector<32x32xbf16>, vector<32x32xbf16>, vector<32x32xf32> -> vector<32x32xf32>
    "tpu.trace_stop"() : () -> ()
    %cst_128 = arith.constant 0.353553385 : f32
    %477 = vector.broadcast %cst_128 : f32 to vector<32x32xf32>
    %478 = arith.mulf %476, %477 : vector<32x32xf32>
    %479 = arith.addf %478, %57 : vector<32x32xf32>
    "tpu.trace_start"() <{level = 10 : i32, message = "qd,kd->qk"}> : () -> ()
    %cst_129 = arith.constant dense<0.000000e+00> : vector<32x40xf32>
    %480 = tpu.matmul %475, %428, %cst_129 {dimension_numbers = #tpu.dot_dimension_numbers<[1], [1], [0], [0], [0, 0, 1, 0], [], []>} : vector<32x32xbf16>, vector<40x32xbf16>, vector<32x40xf32> -> vector<32x40xf32>
    "tpu.trace_stop"() : () -> ()
    %cst_130 = arith.constant 0.353553385 : f32
    %481 = vector.broadcast %cst_130 : f32 to vector<32x40xf32>
    %482 = arith.mulf %480, %481 : vector<32x40xf32>
    %483 = arith.addf %482, %61 : vector<32x40xf32>
    %cst_131 = arith.constant dense<0xFF800000> : vector<32xf32>
    %484 = vector.multi_reduction <maximumf>, %479, %cst_131 [1] : vector<32x32xf32> to vector<32xf32>
    %485 = vector.shape_cast %484 : vector<32xf32> to vector<32x1xf32>
    %cst_132 = arith.constant dense<0xFF800000> : vector<32xf32>
    %486 = vector.multi_reduction <maximumf>, %483, %cst_132 [1] : vector<32x40xf32> to vector<32xf32>
    %487 = vector.shape_cast %486 : vector<32xf32> to vector<32x1xf32>
    %488 = arith.maximumf %485, %487 : vector<32x1xf32>
    %489 = vector.broadcast %488 : vector<32x1xf32> to vector<32x32xf32>
    %490 = arith.subf %479, %489 : vector<32x32xf32>
    %491 = math.exp %490 : vector<32x32xf32>
    %492 = vector.broadcast %488 : vector<32x1xf32> to vector<32x40xf32>
    %493 = arith.subf %483, %492 : vector<32x40xf32>
    %494 = math.exp %493 : vector<32x40xf32>
    %cst_133 = arith.constant dense<0.000000e+00> : vector<32xf32>
    %495 = vector.multi_reduction <add>, %491, %cst_133 [1] : vector<32x32xf32> to vector<32xf32>
    %496 = vector.shape_cast %495 : vector<32xf32> to vector<32x1xf32>
    %cst_134 = arith.constant dense<0.000000e+00> : vector<32xf32>
    %497 = vector.multi_reduction <add>, %494, %cst_134 [1] : vector<32x40xf32> to vector<32xf32>
    %498 = vector.shape_cast %497 : vector<32xf32> to vector<32x1xf32>
    %499 = arith.addf %496, %498 : vector<32x1xf32>
    %cst_135 = arith.constant 1.000000e+00 : f32
    %500 = vector.broadcast %cst_135 : f32 to vector<32x1xf32>
    %501 = arith.divf %500, %499 : vector<32x1xf32>
    %502 = arith.truncf %491 : vector<32x32xf32> to vector<32x32xbf16>
    %503 = vector.broadcast %37 : vector<1x32xf32> to vector<32x32xf32>
    %504 = arith.mulf %424, %503 : vector<32x32xf32>
    %505 = arith.truncf %504 : vector<32x32xf32> to vector<32x32xbf16>
    %cst_136 = arith.constant dense<0.000000e+00> : vector<32x32xf32>
    %506 = tpu.matmul %502, %505, %cst_136 {dimension_numbers = #tpu.dot_dimension_numbers<[1], [0], [0], [1], [0, 0, 1, 1], [], []>} : vector<32x32xbf16>, vector<32x32xbf16>, vector<32x32xf32> -> vector<32x32xf32>
    %507 = arith.truncf %494 : vector<32x40xf32> to vector<32x40xbf16>
    %508 = vector.broadcast %37 : vector<1x32xf32> to vector<40x32xf32>
    %509 = arith.mulf %426, %508 : vector<40x32xf32>
    %510 = arith.truncf %509 : vector<40x32xf32> to vector<40x32xbf16>
    %cst_137 = arith.constant dense<0.000000e+00> : vector<32x32xf32>
    %511 = tpu.matmul %507, %510, %cst_137 {dimension_numbers = #tpu.dot_dimension_numbers<[1], [0], [0], [1], [0, 0, 1, 1], [], []>} : vector<32x40xbf16>, vector<40x32xbf16>, vector<32x32xf32> -> vector<32x32xf32>
    %512 = arith.addf %506, %511 : vector<32x32xf32>
    %513 = vector.broadcast %501 : vector<32x1xf32> to vector<32x32xf32>
    %514 = arith.mulf %512, %513 : vector<32x32xf32>
    %515 = arith.addf %472, %514 : vector<32x32xf32>
    %516 = vector.broadcast %44 : vector<1x32xf32> to vector<32x32xf32>
    %517 = arith.mulf %422, %516 : vector<32x32xf32>
    %518 = arith.truncf %517 : vector<32x32xf32> to vector<32x32xbf16>
    "tpu.trace_start"() <{level = 10 : i32, message = "qd,kd->qk"}> : () -> ()
    %cst_138 = arith.constant dense<0.000000e+00> : vector<32x32xf32>
    %519 = tpu.matmul %518, %427, %cst_138 {dimension_numbers = #tpu.dot_dimension_numbers<[1], [1], [0], [0], [0, 0, 1, 0], [], []>} : vector<32x32xbf16>, vector<32x32xbf16>, vector<32x32xf32> -> vector<32x32xf32>
    "tpu.trace_stop"() : () -> ()
    %cst_139 = arith.constant 0.353553385 : f32
    %520 = vector.broadcast %cst_139 : f32 to vector<32x32xf32>
    %521 = arith.mulf %519, %520 : vector<32x32xf32>
    %522 = arith.addf %521, %57 : vector<32x32xf32>
    "tpu.trace_start"() <{level = 10 : i32, message = "qd,kd->qk"}> : () -> ()
    %cst_140 = arith.constant dense<0.000000e+00> : vector<32x40xf32>
    %523 = tpu.matmul %518, %428, %cst_140 {dimension_numbers = #tpu.dot_dimension_numbers<[1], [1], [0], [0], [0, 0, 1, 0], [], []>} : vector<32x32xbf16>, vector<40x32xbf16>, vector<32x40xf32> -> vector<32x40xf32>
    "tpu.trace_stop"() : () -> ()
    %cst_141 = arith.constant 0.353553385 : f32
    %524 = vector.broadcast %cst_141 : f32 to vector<32x40xf32>
    %525 = arith.mulf %523, %524 : vector<32x40xf32>
    %526 = arith.addf %525, %61 : vector<32x40xf32>
    %cst_142 = arith.constant dense<0xFF800000> : vector<32xf32>
    %527 = vector.multi_reduction <maximumf>, %522, %cst_142 [1] : vector<32x32xf32> to vector<32xf32>
    %528 = vector.shape_cast %527 : vector<32xf32> to vector<32x1xf32>
    %cst_143 = arith.constant dense<0xFF800000> : vector<32xf32>
    %529 = vector.multi_reduction <maximumf>, %526, %cst_143 [1] : vector<32x40xf32> to vector<32xf32>
    %530 = vector.shape_cast %529 : vector<32xf32> to vector<32x1xf32>
    %531 = arith.maximumf %528, %530 : vector<32x1xf32>
    %532 = vector.broadcast %531 : vector<32x1xf32> to vector<32x32xf32>
    %533 = arith.subf %522, %532 : vector<32x32xf32>
    %534 = math.exp %533 : vector<32x32xf32>
    %535 = vector.broadcast %531 : vector<32x1xf32> to vector<32x40xf32>
    %536 = arith.subf %526, %535 : vector<32x40xf32>
    %537 = math.exp %536 : vector<32x40xf32>
    %cst_144 = arith.constant dense<0.000000e+00> : vector<32xf32>
    %538 = vector.multi_reduction <add>, %534, %cst_144 [1] : vector<32x32xf32> to vector<32xf32>
    %539 = vector.shape_cast %538 : vector<32xf32> to vector<32x1xf32>
    %cst_145 = arith.constant dense<0.000000e+00> : vector<32xf32>
    %540 = vector.multi_reduction <add>, %537, %cst_145 [1] : vector<32x40xf32> to vector<32xf32>
    %541 = vector.shape_cast %540 : vector<32xf32> to vector<32x1xf32>
    %542 = arith.addf %539, %541 : vector<32x1xf32>
    %cst_146 = arith.constant 1.000000e+00 : f32
    %543 = vector.broadcast %cst_146 : f32 to vector<32x1xf32>
    %544 = arith.divf %543, %542 : vector<32x1xf32>
    %545 = arith.truncf %534 : vector<32x32xf32> to vector<32x32xbf16>
    %546 = vector.broadcast %44 : vector<1x32xf32> to vector<32x32xf32>
    %547 = arith.mulf %424, %546 : vector<32x32xf32>
    %548 = arith.truncf %547 : vector<32x32xf32> to vector<32x32xbf16>
    %cst_147 = arith.constant dense<0.000000e+00> : vector<32x32xf32>
    %549 = tpu.matmul %545, %548, %cst_147 {dimension_numbers = #tpu.dot_dimension_numbers<[1], [0], [0], [1], [0, 0, 1, 1], [], []>} : vector<32x32xbf16>, vector<32x32xbf16>, vector<32x32xf32> -> vector<32x32xf32>
    %550 = arith.truncf %537 : vector<32x40xf32> to vector<32x40xbf16>
    %551 = vector.broadcast %44 : vector<1x32xf32> to vector<40x32xf32>
    %552 = arith.mulf %426, %551 : vector<40x32xf32>
    %553 = arith.truncf %552 : vector<40x32xf32> to vector<40x32xbf16>
    %cst_148 = arith.constant dense<0.000000e+00> : vector<32x32xf32>
    %554 = tpu.matmul %550, %553, %cst_148 {dimension_numbers = #tpu.dot_dimension_numbers<[1], [0], [0], [1], [0, 0, 1, 1], [], []>} : vector<32x40xbf16>, vector<40x32xbf16>, vector<32x32xf32> -> vector<32x32xf32>
    %555 = arith.addf %549, %554 : vector<32x32xf32>
    %556 = vector.broadcast %544 : vector<32x1xf32> to vector<32x32xf32>
    %557 = arith.mulf %555, %556 : vector<32x32xf32>
    %558 = arith.addf %515, %557 : vector<32x32xf32>
    %559 = vector.broadcast %51 : vector<1x32xf32> to vector<32x32xf32>
    %560 = arith.mulf %422, %559 : vector<32x32xf32>
    %561 = arith.truncf %560 : vector<32x32xf32> to vector<32x32xbf16>
    "tpu.trace_start"() <{level = 10 : i32, message = "qd,kd->qk"}> : () -> ()
    %cst_149 = arith.constant dense<0.000000e+00> : vector<32x32xf32>
    %562 = tpu.matmul %561, %427, %cst_149 {dimension_numbers = #tpu.dot_dimension_numbers<[1], [1], [0], [0], [0, 0, 1, 0], [], []>} : vector<32x32xbf16>, vector<32x32xbf16>, vector<32x32xf32> -> vector<32x32xf32>
    "tpu.trace_stop"() : () -> ()
    %cst_150 = arith.constant 0.353553385 : f32
    %563 = vector.broadcast %cst_150 : f32 to vector<32x32xf32>
    %564 = arith.mulf %562, %563 : vector<32x32xf32>
    %565 = arith.addf %564, %57 : vector<32x32xf32>
    "tpu.trace_start"() <{level = 10 : i32, message = "qd,kd->qk"}> : () -> ()
    %cst_151 = arith.constant dense<0.000000e+00> : vector<32x40xf32>
    %566 = tpu.matmul %561, %428, %cst_151 {dimension_numbers = #tpu.dot_dimension_numbers<[1], [1], [0], [0], [0, 0, 1, 0], [], []>} : vector<32x32xbf16>, vector<40x32xbf16>, vector<32x40xf32> -> vector<32x40xf32>
    "tpu.trace_stop"() : () -> ()
    %cst_152 = arith.constant 0.353553385 : f32
    %567 = vector.broadcast %cst_152 : f32 to vector<32x40xf32>
    %568 = arith.mulf %566, %567 : vector<32x40xf32>
    %569 = arith.addf %568, %61 : vector<32x40xf32>
    %cst_153 = arith.constant dense<0xFF800000> : vector<32xf32>
    %570 = vector.multi_reduction <maximumf>, %565, %cst_153 [1] : vector<32x32xf32> to vector<32xf32>
    %571 = vector.shape_cast %570 : vector<32xf32> to vector<32x1xf32>
    %cst_154 = arith.constant dense<0xFF800000> : vector<32xf32>
    %572 = vector.multi_reduction <maximumf>, %569, %cst_154 [1] : vector<32x40xf32> to vector<32xf32>
    %573 = vector.shape_cast %572 : vector<32xf32> to vector<32x1xf32>
    %574 = arith.maximumf %571, %573 : vector<32x1xf32>
    %575 = vector.broadcast %574 : vector<32x1xf32> to vector<32x32xf32>
    %576 = arith.subf %565, %575 : vector<32x32xf32>
    %577 = math.exp %576 : vector<32x32xf32>
    %578 = vector.broadcast %574 : vector<32x1xf32> to vector<32x40xf32>
    %579 = arith.subf %569, %578 : vector<32x40xf32>
    %580 = math.exp %579 : vector<32x40xf32>
    %cst_155 = arith.constant dense<0.000000e+00> : vector<32xf32>
    %581 = vector.multi_reduction <add>, %577, %cst_155 [1] : vector<32x32xf32> to vector<32xf32>
    %582 = vector.shape_cast %581 : vector<32xf32> to vector<32x1xf32>
    %cst_156 = arith.constant dense<0.000000e+00> : vector<32xf32>
    %583 = vector.multi_reduction <add>, %580, %cst_156 [1] : vector<32x40xf32> to vector<32xf32>
    %584 = vector.shape_cast %583 : vector<32xf32> to vector<32x1xf32>
    %585 = arith.addf %582, %584 : vector<32x1xf32>
    %cst_157 = arith.constant 1.000000e+00 : f32
    %586 = vector.broadcast %cst_157 : f32 to vector<32x1xf32>
    %587 = arith.divf %586, %585 : vector<32x1xf32>
    %588 = arith.truncf %577 : vector<32x32xf32> to vector<32x32xbf16>
    %589 = vector.broadcast %51 : vector<1x32xf32> to vector<32x32xf32>
    %590 = arith.mulf %424, %589 : vector<32x32xf32>
    %591 = arith.truncf %590 : vector<32x32xf32> to vector<32x32xbf16>
    %cst_158 = arith.constant dense<0.000000e+00> : vector<32x32xf32>
    %592 = tpu.matmul %588, %591, %cst_158 {dimension_numbers = #tpu.dot_dimension_numbers<[1], [0], [0], [1], [0, 0, 1, 1], [], []>} : vector<32x32xbf16>, vector<32x32xbf16>, vector<32x32xf32> -> vector<32x32xf32>
    %593 = arith.truncf %580 : vector<32x40xf32> to vector<32x40xbf16>
    %594 = vector.broadcast %51 : vector<1x32xf32> to vector<40x32xf32>
    %595 = arith.mulf %426, %594 : vector<40x32xf32>
    %596 = arith.truncf %595 : vector<40x32xf32> to vector<40x32xbf16>
    %cst_159 = arith.constant dense<0.000000e+00> : vector<32x32xf32>
    %597 = tpu.matmul %593, %596, %cst_159 {dimension_numbers = #tpu.dot_dimension_numbers<[1], [0], [0], [1], [0, 0, 1, 1], [], []>} : vector<32x40xbf16>, vector<40x32xbf16>, vector<32x32xf32> -> vector<32x32xf32>
    %598 = arith.addf %592, %597 : vector<32x32xf32>
    %599 = vector.broadcast %587 : vector<32x1xf32> to vector<32x32xf32>
    %600 = arith.mulf %598, %599 : vector<32x32xf32>
    %601 = arith.addf %558, %600 : vector<32x32xf32>
    %602 = vector.extract_strided_slice %18 {offsets = [96, 0], sizes = [32, 32], strides = [1, 1]} : vector<128x32xf32> to vector<32x32xf32>
    %603 = vector.extract_strided_slice %19 {offsets = [96, 0], sizes = [32, 32], strides = [1, 1]} : vector<128x32xf32> to vector<32x32xf32>
    %604 = vector.extract_strided_slice %20 {offsets = [96, 0], sizes = [32, 32], strides = [1, 1]} : vector<128x32xf32> to vector<32x32xf32>
    %605 = vector.extract_strided_slice %21 {offsets = [120, 0], sizes = [40, 32], strides = [1, 1]} : vector<160x32xf32> to vector<40x32xf32>
    %606 = vector.extract_strided_slice %22 {offsets = [120, 0], sizes = [40, 32], strides = [1, 1]} : vector<160x32xf32> to vector<40x32xf32>
    %607 = arith.truncf %603 : vector<32x32xf32> to vector<32x32xbf16>
    %608 = arith.truncf %605 : vector<40x32xf32> to vector<40x32xbf16>
    %cst_160 = arith.constant 0.000000e+00 : f32
    %609 = vector.broadcast %cst_160 : f32 to vector<32x32xf32>
    %610 = vector.broadcast %30 : vector<1x32xf32> to vector<32x32xf32>
    %611 = arith.mulf %602, %610 : vector<32x32xf32>
    %612 = arith.truncf %611 : vector<32x32xf32> to vector<32x32xbf16>
    "tpu.trace_start"() <{level = 10 : i32, message = "qd,kd->qk"}> : () -> ()
    %cst_161 = arith.constant dense<0.000000e+00> : vector<32x32xf32>
    %613 = tpu.matmul %612, %607, %cst_161 {dimension_numbers = #tpu.dot_dimension_numbers<[1], [1], [0], [0], [0, 0, 1, 0], [], []>} : vector<32x32xbf16>, vector<32x32xbf16>, vector<32x32xf32> -> vector<32x32xf32>
    "tpu.trace_stop"() : () -> ()
    %cst_162 = arith.constant 0.353553385 : f32
    %614 = vector.broadcast %cst_162 : f32 to vector<32x32xf32>
    %615 = arith.mulf %613, %614 : vector<32x32xf32>
    %616 = arith.addf %615, %57 : vector<32x32xf32>
    "tpu.trace_start"() <{level = 10 : i32, message = "qd,kd->qk"}> : () -> ()
    %cst_163 = arith.constant dense<0.000000e+00> : vector<32x40xf32>
    %617 = tpu.matmul %612, %608, %cst_163 {dimension_numbers = #tpu.dot_dimension_numbers<[1], [1], [0], [0], [0, 0, 1, 0], [], []>} : vector<32x32xbf16>, vector<40x32xbf16>, vector<32x40xf32> -> vector<32x40xf32>
    "tpu.trace_stop"() : () -> ()
    %cst_164 = arith.constant 0.353553385 : f32
    %618 = vector.broadcast %cst_164 : f32 to vector<32x40xf32>
    %619 = arith.mulf %617, %618 : vector<32x40xf32>
    %620 = arith.addf %619, %61 : vector<32x40xf32>
    %cst_165 = arith.constant dense<0xFF800000> : vector<32xf32>
    %621 = vector.multi_reduction <maximumf>, %616, %cst_165 [1] : vector<32x32xf32> to vector<32xf32>
    %622 = vector.shape_cast %621 : vector<32xf32> to vector<32x1xf32>
    %cst_166 = arith.constant dense<0xFF800000> : vector<32xf32>
    %623 = vector.multi_reduction <maximumf>, %620, %cst_166 [1] : vector<32x40xf32> to vector<32xf32>
    %624 = vector.shape_cast %623 : vector<32xf32> to vector<32x1xf32>
    %625 = arith.maximumf %622, %624 : vector<32x1xf32>
    %626 = vector.broadcast %625 : vector<32x1xf32> to vector<32x32xf32>
    %627 = arith.subf %616, %626 : vector<32x32xf32>
    %628 = math.exp %627 : vector<32x32xf32>
    %629 = vector.broadcast %625 : vector<32x1xf32> to vector<32x40xf32>
    %630 = arith.subf %620, %629 : vector<32x40xf32>
    %631 = math.exp %630 : vector<32x40xf32>
    %cst_167 = arith.constant dense<0.000000e+00> : vector<32xf32>
    %632 = vector.multi_reduction <add>, %628, %cst_167 [1] : vector<32x32xf32> to vector<32xf32>
    %633 = vector.shape_cast %632 : vector<32xf32> to vector<32x1xf32>
    %cst_168 = arith.constant dense<0.000000e+00> : vector<32xf32>
    %634 = vector.multi_reduction <add>, %631, %cst_168 [1] : vector<32x40xf32> to vector<32xf32>
    %635 = vector.shape_cast %634 : vector<32xf32> to vector<32x1xf32>
    %636 = arith.addf %633, %635 : vector<32x1xf32>
    %cst_169 = arith.constant 1.000000e+00 : f32
    %637 = vector.broadcast %cst_169 : f32 to vector<32x1xf32>
    %638 = arith.divf %637, %636 : vector<32x1xf32>
    %639 = arith.truncf %628 : vector<32x32xf32> to vector<32x32xbf16>
    %640 = vector.broadcast %30 : vector<1x32xf32> to vector<32x32xf32>
    %641 = arith.mulf %604, %640 : vector<32x32xf32>
    %642 = arith.truncf %641 : vector<32x32xf32> to vector<32x32xbf16>
    %cst_170 = arith.constant dense<0.000000e+00> : vector<32x32xf32>
    %643 = tpu.matmul %639, %642, %cst_170 {dimension_numbers = #tpu.dot_dimension_numbers<[1], [0], [0], [1], [0, 0, 1, 1], [], []>} : vector<32x32xbf16>, vector<32x32xbf16>, vector<32x32xf32> -> vector<32x32xf32>
    %644 = arith.truncf %631 : vector<32x40xf32> to vector<32x40xbf16>
    %645 = vector.broadcast %30 : vector<1x32xf32> to vector<40x32xf32>
    %646 = arith.mulf %606, %645 : vector<40x32xf32>
    %647 = arith.truncf %646 : vector<40x32xf32> to vector<40x32xbf16>
    %cst_171 = arith.constant dense<0.000000e+00> : vector<32x32xf32>
    %648 = tpu.matmul %644, %647, %cst_171 {dimension_numbers = #tpu.dot_dimension_numbers<[1], [0], [0], [1], [0, 0, 1, 1], [], []>} : vector<32x40xbf16>, vector<40x32xbf16>, vector<32x32xf32> -> vector<32x32xf32>
    %649 = arith.addf %643, %648 : vector<32x32xf32>
    %650 = vector.broadcast %638 : vector<32x1xf32> to vector<32x32xf32>
    %651 = arith.mulf %649, %650 : vector<32x32xf32>
    %652 = arith.addf %609, %651 : vector<32x32xf32>
    %653 = vector.broadcast %37 : vector<1x32xf32> to vector<32x32xf32>
    %654 = arith.mulf %602, %653 : vector<32x32xf32>
    %655 = arith.truncf %654 : vector<32x32xf32> to vector<32x32xbf16>
    "tpu.trace_start"() <{level = 10 : i32, message = "qd,kd->qk"}> : () -> ()
    %cst_172 = arith.constant dense<0.000000e+00> : vector<32x32xf32>
    %656 = tpu.matmul %655, %607, %cst_172 {dimension_numbers = #tpu.dot_dimension_numbers<[1], [1], [0], [0], [0, 0, 1, 0], [], []>} : vector<32x32xbf16>, vector<32x32xbf16>, vector<32x32xf32> -> vector<32x32xf32>
    "tpu.trace_stop"() : () -> ()
    %cst_173 = arith.constant 0.353553385 : f32
    %657 = vector.broadcast %cst_173 : f32 to vector<32x32xf32>
    %658 = arith.mulf %656, %657 : vector<32x32xf32>
    %659 = arith.addf %658, %57 : vector<32x32xf32>
    "tpu.trace_start"() <{level = 10 : i32, message = "qd,kd->qk"}> : () -> ()
    %cst_174 = arith.constant dense<0.000000e+00> : vector<32x40xf32>
    %660 = tpu.matmul %655, %608, %cst_174 {dimension_numbers = #tpu.dot_dimension_numbers<[1], [1], [0], [0], [0, 0, 1, 0], [], []>} : vector<32x32xbf16>, vector<40x32xbf16>, vector<32x40xf32> -> vector<32x40xf32>
    "tpu.trace_stop"() : () -> ()
    %cst_175 = arith.constant 0.353553385 : f32
    %661 = vector.broadcast %cst_175 : f32 to vector<32x40xf32>
    %662 = arith.mulf %660, %661 : vector<32x40xf32>
    %663 = arith.addf %662, %61 : vector<32x40xf32>
    %cst_176 = arith.constant dense<0xFF800000> : vector<32xf32>
    %664 = vector.multi_reduction <maximumf>, %659, %cst_176 [1] : vector<32x32xf32> to vector<32xf32>
    %665 = vector.shape_cast %664 : vector<32xf32> to vector<32x1xf32>
    %cst_177 = arith.constant dense<0xFF800000> : vector<32xf32>
    %666 = vector.multi_reduction <maximumf>, %663, %cst_177 [1] : vector<32x40xf32> to vector<32xf32>
    %667 = vector.shape_cast %666 : vector<32xf32> to vector<32x1xf32>
    %668 = arith.maximumf %665, %667 : vector<32x1xf32>
    %669 = vector.broadcast %668 : vector<32x1xf32> to vector<32x32xf32>
    %670 = arith.subf %659, %669 : vector<32x32xf32>
    %671 = math.exp %670 : vector<32x32xf32>
    %672 = vector.broadcast %668 : vector<32x1xf32> to vector<32x40xf32>
    %673 = arith.subf %663, %672 : vector<32x40xf32>
    %674 = math.exp %673 : vector<32x40xf32>
    %cst_178 = arith.constant dense<0.000000e+00> : vector<32xf32>
    %675 = vector.multi_reduction <add>, %671, %cst_178 [1] : vector<32x32xf32> to vector<32xf32>
    %676 = vector.shape_cast %675 : vector<32xf32> to vector<32x1xf32>
    %cst_179 = arith.constant dense<0.000000e+00> : vector<32xf32>
    %677 = vector.multi_reduction <add>, %674, %cst_179 [1] : vector<32x40xf32> to vector<32xf32>
    %678 = vector.shape_cast %677 : vector<32xf32> to vector<32x1xf32>
    %679 = arith.addf %676, %678 : vector<32x1xf32>
    %cst_180 = arith.constant 1.000000e+00 : f32
    %680 = vector.broadcast %cst_180 : f32 to vector<32x1xf32>
    %681 = arith.divf %680, %679 : vector<32x1xf32>
    %682 = arith.truncf %671 : vector<32x32xf32> to vector<32x32xbf16>
    %683 = vector.broadcast %37 : vector<1x32xf32> to vector<32x32xf32>
    %684 = arith.mulf %604, %683 : vector<32x32xf32>
    %685 = arith.truncf %684 : vector<32x32xf32> to vector<32x32xbf16>
    %cst_181 = arith.constant dense<0.000000e+00> : vector<32x32xf32>
    %686 = tpu.matmul %682, %685, %cst_181 {dimension_numbers = #tpu.dot_dimension_numbers<[1], [0], [0], [1], [0, 0, 1, 1], [], []>} : vector<32x32xbf16>, vector<32x32xbf16>, vector<32x32xf32> -> vector<32x32xf32>
    %687 = arith.truncf %674 : vector<32x40xf32> to vector<32x40xbf16>
    %688 = vector.broadcast %37 : vector<1x32xf32> to vector<40x32xf32>
    %689 = arith.mulf %606, %688 : vector<40x32xf32>
    %690 = arith.truncf %689 : vector<40x32xf32> to vector<40x32xbf16>
    %cst_182 = arith.constant dense<0.000000e+00> : vector<32x32xf32>
    %691 = tpu.matmul %687, %690, %cst_182 {dimension_numbers = #tpu.dot_dimension_numbers<[1], [0], [0], [1], [0, 0, 1, 1], [], []>} : vector<32x40xbf16>, vector<40x32xbf16>, vector<32x32xf32> -> vector<32x32xf32>
    %692 = arith.addf %686, %691 : vector<32x32xf32>
    %693 = vector.broadcast %681 : vector<32x1xf32> to vector<32x32xf32>
    %694 = arith.mulf %692, %693 : vector<32x32xf32>
    %695 = arith.addf %652, %694 : vector<32x32xf32>
    %696 = vector.broadcast %44 : vector<1x32xf32> to vector<32x32xf32>
    %697 = arith.mulf %602, %696 : vector<32x32xf32>
    %698 = arith.truncf %697 : vector<32x32xf32> to vector<32x32xbf16>
    "tpu.trace_start"() <{level = 10 : i32, message = "qd,kd->qk"}> : () -> ()
    %cst_183 = arith.constant dense<0.000000e+00> : vector<32x32xf32>
    %699 = tpu.matmul %698, %607, %cst_183 {dimension_numbers = #tpu.dot_dimension_numbers<[1], [1], [0], [0], [0, 0, 1, 0], [], []>} : vector<32x32xbf16>, vector<32x32xbf16>, vector<32x32xf32> -> vector<32x32xf32>
    "tpu.trace_stop"() : () -> ()
    %cst_184 = arith.constant 0.353553385 : f32
    %700 = vector.broadcast %cst_184 : f32 to vector<32x32xf32>
    %701 = arith.mulf %699, %700 : vector<32x32xf32>
    %702 = arith.addf %701, %57 : vector<32x32xf32>
    "tpu.trace_start"() <{level = 10 : i32, message = "qd,kd->qk"}> : () -> ()
    %cst_185 = arith.constant dense<0.000000e+00> : vector<32x40xf32>
    %703 = tpu.matmul %698, %608, %cst_185 {dimension_numbers = #tpu.dot_dimension_numbers<[1], [1], [0], [0], [0, 0, 1, 0], [], []>} : vector<32x32xbf16>, vector<40x32xbf16>, vector<32x40xf32> -> vector<32x40xf32>
    "tpu.trace_stop"() : () -> ()
    %cst_186 = arith.constant 0.353553385 : f32
    %704 = vector.broadcast %cst_186 : f32 to vector<32x40xf32>
    %705 = arith.mulf %703, %704 : vector<32x40xf32>
    %706 = arith.addf %705, %61 : vector<32x40xf32>
    %cst_187 = arith.constant dense<0xFF800000> : vector<32xf32>
    %707 = vector.multi_reduction <maximumf>, %702, %cst_187 [1] : vector<32x32xf32> to vector<32xf32>
    %708 = vector.shape_cast %707 : vector<32xf32> to vector<32x1xf32>
    %cst_188 = arith.constant dense<0xFF800000> : vector<32xf32>
    %709 = vector.multi_reduction <maximumf>, %706, %cst_188 [1] : vector<32x40xf32> to vector<32xf32>
    %710 = vector.shape_cast %709 : vector<32xf32> to vector<32x1xf32>
    %711 = arith.maximumf %708, %710 : vector<32x1xf32>
    %712 = vector.broadcast %711 : vector<32x1xf32> to vector<32x32xf32>
    %713 = arith.subf %702, %712 : vector<32x32xf32>
    %714 = math.exp %713 : vector<32x32xf32>
    %715 = vector.broadcast %711 : vector<32x1xf32> to vector<32x40xf32>
    %716 = arith.subf %706, %715 : vector<32x40xf32>
    %717 = math.exp %716 : vector<32x40xf32>
    %cst_189 = arith.constant dense<0.000000e+00> : vector<32xf32>
    %718 = vector.multi_reduction <add>, %714, %cst_189 [1] : vector<32x32xf32> to vector<32xf32>
    %719 = vector.shape_cast %718 : vector<32xf32> to vector<32x1xf32>
    %cst_190 = arith.constant dense<0.000000e+00> : vector<32xf32>
    %720 = vector.multi_reduction <add>, %717, %cst_190 [1] : vector<32x40xf32> to vector<32xf32>
    %721 = vector.shape_cast %720 : vector<32xf32> to vector<32x1xf32>
    %722 = arith.addf %719, %721 : vector<32x1xf32>
    %cst_191 = arith.constant 1.000000e+00 : f32
    %723 = vector.broadcast %cst_191 : f32 to vector<32x1xf32>
    %724 = arith.divf %723, %722 : vector<32x1xf32>
    %725 = arith.truncf %714 : vector<32x32xf32> to vector<32x32xbf16>
    %726 = vector.broadcast %44 : vector<1x32xf32> to vector<32x32xf32>
    %727 = arith.mulf %604, %726 : vector<32x32xf32>
    %728 = arith.truncf %727 : vector<32x32xf32> to vector<32x32xbf16>
    %cst_192 = arith.constant dense<0.000000e+00> : vector<32x32xf32>
    %729 = tpu.matmul %725, %728, %cst_192 {dimension_numbers = #tpu.dot_dimension_numbers<[1], [0], [0], [1], [0, 0, 1, 1], [], []>} : vector<32x32xbf16>, vector<32x32xbf16>, vector<32x32xf32> -> vector<32x32xf32>
    %730 = arith.truncf %717 : vector<32x40xf32> to vector<32x40xbf16>
    %731 = vector.broadcast %44 : vector<1x32xf32> to vector<40x32xf32>
    %732 = arith.mulf %606, %731 : vector<40x32xf32>
    %733 = arith.truncf %732 : vector<40x32xf32> to vector<40x32xbf16>
    %cst_193 = arith.constant dense<0.000000e+00> : vector<32x32xf32>
    %734 = tpu.matmul %730, %733, %cst_193 {dimension_numbers = #tpu.dot_dimension_numbers<[1], [0], [0], [1], [0, 0, 1, 1], [], []>} : vector<32x40xbf16>, vector<40x32xbf16>, vector<32x32xf32> -> vector<32x32xf32>
    %735 = arith.addf %729, %734 : vector<32x32xf32>
    %736 = vector.broadcast %724 : vector<32x1xf32> to vector<32x32xf32>
    %737 = arith.mulf %735, %736 : vector<32x32xf32>
    %738 = arith.addf %695, %737 : vector<32x32xf32>
    %739 = vector.broadcast %51 : vector<1x32xf32> to vector<32x32xf32>
    %740 = arith.mulf %602, %739 : vector<32x32xf32>
    %741 = arith.truncf %740 : vector<32x32xf32> to vector<32x32xbf16>
    "tpu.trace_start"() <{level = 10 : i32, message = "qd,kd->qk"}> : () -> ()
    %cst_194 = arith.constant dense<0.000000e+00> : vector<32x32xf32>
    %742 = tpu.matmul %741, %607, %cst_194 {dimension_numbers = #tpu.dot_dimension_numbers<[1], [1], [0], [0], [0, 0, 1, 0], [], []>} : vector<32x32xbf16>, vector<32x32xbf16>, vector<32x32xf32> -> vector<32x32xf32>
    "tpu.trace_stop"() : () -> ()
    %cst_195 = arith.constant 0.353553385 : f32
    %743 = vector.broadcast %cst_195 : f32 to vector<32x32xf32>
    %744 = arith.mulf %742, %743 : vector<32x32xf32>
    %745 = arith.addf %744, %57 : vector<32x32xf32>
    "tpu.trace_start"() <{level = 10 : i32, message = "qd,kd->qk"}> : () -> ()
    %cst_196 = arith.constant dense<0.000000e+00> : vector<32x40xf32>
    %746 = tpu.matmul %741, %608, %cst_196 {dimension_numbers = #tpu.dot_dimension_numbers<[1], [1], [0], [0], [0, 0, 1, 0], [], []>} : vector<32x32xbf16>, vector<40x32xbf16>, vector<32x40xf32> -> vector<32x40xf32>
    "tpu.trace_stop"() : () -> ()
    %cst_197 = arith.constant 0.353553385 : f32
    %747 = vector.broadcast %cst_197 : f32 to vector<32x40xf32>
    %748 = arith.mulf %746, %747 : vector<32x40xf32>
    %749 = arith.addf %748, %61 : vector<32x40xf32>
    %cst_198 = arith.constant dense<0xFF800000> : vector<32xf32>
    %750 = vector.multi_reduction <maximumf>, %745, %cst_198 [1] : vector<32x32xf32> to vector<32xf32>
    %751 = vector.shape_cast %750 : vector<32xf32> to vector<32x1xf32>
    %cst_199 = arith.constant dense<0xFF800000> : vector<32xf32>
    %752 = vector.multi_reduction <maximumf>, %749, %cst_199 [1] : vector<32x40xf32> to vector<32xf32>
    %753 = vector.shape_cast %752 : vector<32xf32> to vector<32x1xf32>
    %754 = arith.maximumf %751, %753 : vector<32x1xf32>
    %755 = vector.broadcast %754 : vector<32x1xf32> to vector<32x32xf32>
    %756 = arith.subf %745, %755 : vector<32x32xf32>
    %757 = math.exp %756 : vector<32x32xf32>
    %758 = vector.broadcast %754 : vector<32x1xf32> to vector<32x40xf32>
    %759 = arith.subf %749, %758 : vector<32x40xf32>
    %760 = math.exp %759 : vector<32x40xf32>
    %cst_200 = arith.constant dense<0.000000e+00> : vector<32xf32>
    %761 = vector.multi_reduction <add>, %757, %cst_200 [1] : vector<32x32xf32> to vector<32xf32>
    %762 = vector.shape_cast %761 : vector<32xf32> to vector<32x1xf32>
    %cst_201 = arith.constant dense<0.000000e+00> : vector<32xf32>
    %763 = vector.multi_reduction <add>, %760, %cst_201 [1] : vector<32x40xf32> to vector<32xf32>
    %764 = vector.shape_cast %763 : vector<32xf32> to vector<32x1xf32>
    %765 = arith.addf %762, %764 : vector<32x1xf32>
    %cst_202 = arith.constant 1.000000e+00 : f32
    %766 = vector.broadcast %cst_202 : f32 to vector<32x1xf32>
    %767 = arith.divf %766, %765 : vector<32x1xf32>
    %768 = arith.truncf %757 : vector<32x32xf32> to vector<32x32xbf16>
    %769 = vector.broadcast %51 : vector<1x32xf32> to vector<32x32xf32>
    %770 = arith.mulf %604, %769 : vector<32x32xf32>
    %771 = arith.truncf %770 : vector<32x32xf32> to vector<32x32xbf16>
    %cst_203 = arith.constant dense<0.000000e+00> : vector<32x32xf32>
    %772 = tpu.matmul %768, %771, %cst_203 {dimension_numbers = #tpu.dot_dimension_numbers<[1], [0], [0], [1], [0, 0, 1, 1], [], []>} : vector<32x32xbf16>, vector<32x32xbf16>, vector<32x32xf32> -> vector<32x32xf32>
    %773 = arith.truncf %760 : vector<32x40xf32> to vector<32x40xbf16>
    %774 = vector.broadcast %51 : vector<1x32xf32> to vector<40x32xf32>
    %775 = arith.mulf %606, %774 : vector<40x32xf32>
    %776 = arith.truncf %775 : vector<40x32xf32> to vector<40x32xbf16>
    %cst_204 = arith.constant dense<0.000000e+00> : vector<32x32xf32>
    %777 = tpu.matmul %773, %776, %cst_204 {dimension_numbers = #tpu.dot_dimension_numbers<[1], [0], [0], [1], [0, 0, 1, 1], [], []>} : vector<32x40xbf16>, vector<40x32xbf16>, vector<32x32xf32> -> vector<32x32xf32>
    %778 = arith.addf %772, %777 : vector<32x32xf32>
    %779 = vector.broadcast %767 : vector<32x1xf32> to vector<32x32xf32>
    %780 = arith.mulf %778, %779 : vector<32x32xf32>
    %781 = arith.addf %738, %780 : vector<32x32xf32>
    %782 = tpu.concatenate %241, %421, %601, %781 in 0 : vector<32x32xf32>, vector<32x32xf32>, vector<32x32xf32>, vector<32x32xf32> -> vector<128x32xf32>
    %c96 = arith.constant 96 : index
    %c0_205 = arith.constant 0 : index
    %783 = vector.load %arg6[%c96, %c0_205] : memref<256x96xbf16, #tpu.memory_space<vmem>>, vector<32x32xbf16>
    %784 = arith.truncf %782 : vector<128x32xf32> to vector<128x32xbf16>
    %cst_206 = arith.constant dense<0.000000e+00> : vector<128x32xf32>
    %785 = tpu.matmul %784, %783, %cst_206 {dimension_numbers = #tpu.dot_dimension_numbers<[1], [0], [0], [1], [0, 0, 1, 1], [], []>} : vector<128x32xbf16>, vector<32x32xbf16>, vector<128x32xf32> -> vector<128x32xf32>
    %c2 = arith.constant 2 : index
    %c0_207 = arith.constant 0 : index
    %786 = vector.load %arg7[%c2, %c0_207] : memref<8x96xf32, #tpu.memory_space<vmem>>, vector<1x32xf32>
    %787 = vector.broadcast %786 : vector<1x32xf32> to vector<128x32xf32>
    %788 = arith.addf %785, %787 : vector<128x32xf32>
    %c128 = arith.constant 128 : index
    %c0_208 = arith.constant 0 : index
    %789 = vector.load %arg6[%c128, %c0_208] : memref<256x96xbf16, #tpu.memory_space<vmem>>, vector<32x64xbf16>
    %790 = arith.truncf %788 : vector<128x32xf32> to vector<128x32xbf16>
    %cst_209 = arith.constant dense<0.000000e+00> : vector<128x64xf32>
    %791 = tpu.matmul %790, %789, %cst_209 {dimension_numbers = #tpu.dot_dimension_numbers<[1], [0], [0], [1], [0, 0, 1, 1], [], []>} : vector<128x32xbf16>, vector<32x64xbf16>, vector<128x64xf32> -> vector<128x64xf32>
    %c3 = arith.constant 3 : index
    %c0_210 = arith.constant 0 : index
    %792 = vector.load %arg7[%c3, %c0_210] : memref<8x96xf32, #tpu.memory_space<vmem>>, vector<1x64xf32>
    %793 = vector.broadcast %792 : vector<1x64xf32> to vector<128x64xf32>
    %794 = arith.addf %791, %793 : vector<128x64xf32>
    %cst_211 = arith.constant 0.000000e+00 : f32
    %795 = vector.broadcast %cst_211 : f32 to vector<128x64xf32>
    %796 = arith.maximumf %794, %795 : vector<128x64xf32>
    %c160 = arith.constant 160 : index
    %c0_212 = arith.constant 0 : index
    %797 = vector.load %arg6[%c160, %c0_212] : memref<256x96xbf16, #tpu.memory_space<vmem>>, vector<64x64xbf16>
    %798 = arith.truncf %796 : vector<128x64xf32> to vector<128x64xbf16>
    %cst_213 = arith.constant dense<0.000000e+00> : vector<128x64xf32>
    %799 = tpu.matmul %798, %797, %cst_213 {dimension_numbers = #tpu.dot_dimension_numbers<[1], [0], [0], [1], [0, 0, 1, 1], [], []>} : vector<128x64xbf16>, vector<64x64xbf16>, vector<128x64xf32> -> vector<128x64xf32>
    %c4 = arith.constant 4 : index
    %c0_214 = arith.constant 0 : index
    %800 = vector.load %arg7[%c4, %c0_214] : memref<8x96xf32, #tpu.memory_space<vmem>>, vector<1x64xf32>
    %801 = vector.broadcast %800 : vector<1x64xf32> to vector<128x64xf32>
    %802 = arith.addf %799, %801 : vector<128x64xf32>
    %cst_215 = arith.constant 0.000000e+00 : f32
    %803 = vector.broadcast %cst_215 : f32 to vector<128x64xf32>
    %804 = arith.maximumf %802, %803 : vector<128x64xf32>
    %805 = vector.extract_strided_slice %804 {offsets = [0, 0], sizes = [128, 32], strides = [1, 1]} : vector<128x64xf32> to vector<128x32xf32>
    %806 = vector.extract_strided_slice %804 {offsets = [0, 32], sizes = [128, 32], strides = [1, 1]} : vector<128x64xf32> to vector<128x32xf32>
    %c224 = arith.constant 224 : index
    %c0_216 = arith.constant 0 : index
    %807 = vector.load %arg6[%c224, %c0_216] : memref<256x96xbf16, #tpu.memory_space<vmem>>, vector<32x64xbf16>
    %808 = arith.truncf %805 : vector<128x32xf32> to vector<128x32xbf16>
    %cst_217 = arith.constant dense<0.000000e+00> : vector<128x64xf32>
    %809 = tpu.matmul %808, %807, %cst_217 {dimension_numbers = #tpu.dot_dimension_numbers<[1], [0], [0], [1], [0, 0, 1, 1], [], []>} : vector<128x32xbf16>, vector<32x64xbf16>, vector<128x64xf32> -> vector<128x64xf32>
    %810 = vector.extract_strided_slice %809 {offsets = [0, 0], sizes = [128, 32], strides = [1, 1]} : vector<128x64xf32> to vector<128x32xf32>
    %811 = arith.truncf %810 : vector<128x32xf32> to vector<128x32xbf16>
    %812 = vector.extract_strided_slice %809 {offsets = [0, 32], sizes = [128, 32], strides = [1, 1]} : vector<128x64xf32> to vector<128x32xf32>
    %813 = arith.truncf %812 : vector<128x32xf32> to vector<128x32xbf16>
    %c0_218 = arith.constant 0 : index
    %c0_219 = arith.constant 0 : index
    %814 = vector.load %arg5[%c0_218, %c0_219] : memref<4x32xf32, #tpu.memory_space<vmem>>, vector<4x32xf32>
    %815 = vector.extract_strided_slice %811 {offsets = [0, 0], sizes = [32, 32], strides = [1, 1]} : vector<128x32xbf16> to vector<32x32xbf16>
    %816 = vector.extract_strided_slice %813 {offsets = [0, 0], sizes = [32, 32], strides = [1, 1]} : vector<128x32xbf16> to vector<32x32xbf16>
    "tpu.trace_start"() <{level = 10 : i32, message = "qd,kd->qk"}> : () -> ()
    %cst_220 = arith.constant dense<0.000000e+00> : vector<32x32xf32>
    %817 = tpu.matmul %815, %816, %cst_220 {dimension_numbers = #tpu.dot_dimension_numbers<[1], [1], [0], [0], [0, 0, 1, 0], [], []>} : vector<32x32xbf16>, vector<32x32xbf16>, vector<32x32xf32> -> vector<32x32xf32>
    "tpu.trace_stop"() : () -> ()
    %818 = arith.mulf %817, %52 : vector<32x32xf32>
    "tpu.trace_start"() <{level = 10 : i32, message = "jk,qk->jq"}> : () -> ()
    %cst_221 = arith.constant dense<0.000000e+00> : vector<4x32xf32>
    %819 = tpu.matmul %814, %818, %cst_221 {dimension_numbers = #tpu.dot_dimension_numbers<[1], [1], [0], [0], [0, 0, 1, 0], [], []>} : vector<4x32xf32>, vector<32x32xf32>, vector<4x32xf32> -> vector<4x32xf32>
    "tpu.trace_stop"() : () -> ()
    %820 = vector.extract_strided_slice %811 {offsets = [32, 0], sizes = [32, 32], strides = [1, 1]} : vector<128x32xbf16> to vector<32x32xbf16>
    %821 = vector.extract_strided_slice %813 {offsets = [32, 0], sizes = [32, 32], strides = [1, 1]} : vector<128x32xbf16> to vector<32x32xbf16>
    "tpu.trace_start"() <{level = 10 : i32, message = "qd,kd->qk"}> : () -> ()
    %cst_222 = arith.constant dense<0.000000e+00> : vector<32x32xf32>
    %822 = tpu.matmul %820, %821, %cst_222 {dimension_numbers = #tpu.dot_dimension_numbers<[1], [1], [0], [0], [0, 0, 1, 0], [], []>} : vector<32x32xbf16>, vector<32x32xbf16>, vector<32x32xf32> -> vector<32x32xf32>
    "tpu.trace_stop"() : () -> ()
    %823 = arith.mulf %822, %52 : vector<32x32xf32>
    "tpu.trace_start"() <{level = 10 : i32, message = "jk,qk->jq"}> : () -> ()
    %cst_223 = arith.constant dense<0.000000e+00> : vector<4x32xf32>
    %824 = tpu.matmul %814, %823, %cst_223 {dimension_numbers = #tpu.dot_dimension_numbers<[1], [1], [0], [0], [0, 0, 1, 0], [], []>} : vector<4x32xf32>, vector<32x32xf32>, vector<4x32xf32> -> vector<4x32xf32>
    "tpu.trace_stop"() : () -> ()
    %825 = vector.extract_strided_slice %811 {offsets = [64, 0], sizes = [32, 32], strides = [1, 1]} : vector<128x32xbf16> to vector<32x32xbf16>
    %826 = vector.extract_strided_slice %813 {offsets = [64, 0], sizes = [32, 32], strides = [1, 1]} : vector<128x32xbf16> to vector<32x32xbf16>
    "tpu.trace_start"() <{level = 10 : i32, message = "qd,kd->qk"}> : () -> ()
    %cst_224 = arith.constant dense<0.000000e+00> : vector<32x32xf32>
    %827 = tpu.matmul %825, %826, %cst_224 {dimension_numbers = #tpu.dot_dimension_numbers<[1], [1], [0], [0], [0, 0, 1, 0], [], []>} : vector<32x32xbf16>, vector<32x32xbf16>, vector<32x32xf32> -> vector<32x32xf32>
    "tpu.trace_stop"() : () -> ()
    %828 = arith.mulf %827, %52 : vector<32x32xf32>
    "tpu.trace_start"() <{level = 10 : i32, message = "jk,qk->jq"}> : () -> ()
    %cst_225 = arith.constant dense<0.000000e+00> : vector<4x32xf32>
    %829 = tpu.matmul %814, %828, %cst_225 {dimension_numbers = #tpu.dot_dimension_numbers<[1], [1], [0], [0], [0, 0, 1, 0], [], []>} : vector<4x32xf32>, vector<32x32xf32>, vector<4x32xf32> -> vector<4x32xf32>
    "tpu.trace_stop"() : () -> ()
    %830 = vector.extract_strided_slice %811 {offsets = [96, 0], sizes = [32, 32], strides = [1, 1]} : vector<128x32xbf16> to vector<32x32xbf16>
    %831 = vector.extract_strided_slice %813 {offsets = [96, 0], sizes = [32, 32], strides = [1, 1]} : vector<128x32xbf16> to vector<32x32xbf16>
    "tpu.trace_start"() <{level = 10 : i32, message = "qd,kd->qk"}> : () -> ()
    %cst_226 = arith.constant dense<0.000000e+00> : vector<32x32xf32>
    %832 = tpu.matmul %830, %831, %cst_226 {dimension_numbers = #tpu.dot_dimension_numbers<[1], [1], [0], [0], [0, 0, 1, 0], [], []>} : vector<32x32xbf16>, vector<32x32xbf16>, vector<32x32xf32> -> vector<32x32xf32>
    "tpu.trace_stop"() : () -> ()
    %833 = arith.mulf %832, %52 : vector<32x32xf32>
    "tpu.trace_start"() <{level = 10 : i32, message = "jk,qk->jq"}> : () -> ()
    %cst_227 = arith.constant dense<0.000000e+00> : vector<4x32xf32>
    %834 = tpu.matmul %814, %833, %cst_227 {dimension_numbers = #tpu.dot_dimension_numbers<[1], [1], [0], [0], [0, 0, 1, 0], [], []>} : vector<4x32xf32>, vector<32x32xf32>, vector<4x32xf32> -> vector<4x32xf32>
    "tpu.trace_stop"() : () -> ()
    %835 = tpu.concatenate %819, %824, %829, %834 in 1 : vector<4x32xf32>, vector<4x32xf32>, vector<4x32xf32>, vector<4x32xf32> -> vector<4x128xf32>
    %cst_228 = arith.constant 0.0883883461 : f32
    %836 = vector.broadcast %cst_228 : f32 to vector<4x128xf32>
    %837 = arith.mulf %835, %836 : vector<4x128xf32>
    %c0_229 = arith.constant 0 : index
    %c0_230 = arith.constant 0 : index
    %838 = vector.load %arg8[%c0_229, %c0_230] : memref<4x128xf32, #tpu.memory_space<vmem>>, vector<4x128xf32>
    tpu.vector_store %arg8[%c0_229, %c0_230], %837 {strides = array<i32>} : memref<4x128xf32, #tpu.memory_space<vmem>>, vector<4x128xf32>,
    %c5 = arith.constant 5 : index
    %c0_231 = arith.constant 0 : index
    %839 = vector.load %arg7[%c5, %c0_231] : memref<8x96xf32, #tpu.memory_space<vmem>>, vector<1x32xf32>
    %840 = arith.truncf %839 : vector<1x32xf32> to vector<1x32xbf16>
    %841 = arith.truncf %806 : vector<128x32xf32> to vector<128x32xbf16>
    "tpu.trace_start"() <{level = 10 : i32, message = "oe,ne->on"}> : () -> ()
    %cst_232 = arith.constant dense<0.000000e+00> : vector<1x128xf32>
    %842 = tpu.matmul %840, %841, %cst_232 {dimension_numbers = #tpu.dot_dimension_numbers<[1], [1], [0], [0], [0, 0, 1, 0], [], []>} : vector<1x32xbf16>, vector<128x32xbf16>, vector<1x128xf32> -> vector<1x128xf32>
    "tpu.trace_stop"() : () -> ()
    %cst_233 = arith.constant 0.0883883461 : f32
    %843 = vector.broadcast %cst_233 : f32 to vector<1x128xf32>
    %844 = arith.mulf %842, %843 : vector<1x128xf32>
    %c0_234 = arith.constant 0 : index
    %c0_235 = arith.constant 0 : index
    %845 = vector.load %arg9[%c0_234, %c0_235] : memref<1x128xf32, #tpu.memory_space<vmem>>, vector<1x128xf32>
    tpu.vector_store %arg9[%c0_234, %c0_235], %844 {strides = array<i32>} : memref<1x128xf32, #tpu.memory_space<vmem>>, vector<1x128xf32>,
    return
  }
  func.func @transform_0(%arg0: i32) -> (i32, i32) {
    %c0_i32 = arith.constant 0 : i32
    %c0_i32_0 = arith.constant 0 : i32
    return %arg0, %c0_i32 : i32, i32
  }
  func.func @transform_1(%arg0: i32) -> (i32, i32) {
    %c0_i32 = arith.constant 0 : i32
    %c0_i32_0 = arith.constant 0 : i32
    return %arg0, %c0_i32 : i32, i32
  }
  func.func @transform_2(%arg0: i32) -> (i32, i32) {
    %c0_i32 = arith.constant 0 : i32
    %c0_i32_0 = arith.constant 0 : i32
    %c0_i32_1 = arith.constant 0 : i32
    return %c0_i32, %c0_i32_0 : i32, i32
  }
  func.func @transform_3(%arg0: i32) -> (i32, i32) {
    %c0_i32 = arith.constant 0 : i32
    %c0_i32_0 = arith.constant 0 : i32
    %c0_i32_1 = arith.constant 0 : i32
    return %c0_i32, %c0_i32_0 : i32, i32
  }
  func.func @transform_4(%arg0: i32) -> (i32, i32) {
    %c0_i32 = arith.constant 0 : i32
    %c0_i32_0 = arith.constant 0 : i32
    %c0_i32_1 = arith.constant 0 : i32
    return %c0_i32, %c0_i32_0 : i32, i32
  }
  func.func @transform_5(%arg0: i32) -> (i32, i32) {
    %c0_i32 = arith.constant 0 : i32
    %c0_i32_0 = arith.constant 0 : i32
    %c0_i32_1 = arith.constant 0 : i32
    return %c0_i32, %c0_i32_0 : i32, i32
  }
  func.func @transform_6(%arg0: i32) -> (i32, i32) {
    %c0_i32 = arith.constant 0 : i32
    %c0_i32_0 = arith.constant 0 : i32
    %c0_i32_1 = arith.constant 0 : i32
    return %c0_i32, %c0_i32_0 : i32, i32
  }
  func.func @transform_7(%arg0: i32) -> (i32, i32) {
    %c0_i32 = arith.constant 0 : i32
    %c0_i32_0 = arith.constant 0 : i32
    return %c0_i32, %arg0 : i32, i32
  }
  func.func @transform_8(%arg0: i32) -> (i32, i32) {
    %c0_i32 = arith.constant 0 : i32
    %c0_i32_0 = arith.constant 0 : i32
    return %c0_i32, %arg0 : i32, i32
  }
}

</mosaic_0001>

<bundles_post_ra>
// kernel: tpu_custom_call.1
= control target key start
LH: loop header
LB: loop body
LE: loop exit
PB: predicated region body
PF: predicated region fallthrough
CT: control target
= control target key end

     0   :  { %14 = vsyncpa [#allocation3], 0  ;;  %vm95_vm0 = vcmask 130048   ;;  %s12385_s0 = inlined_call_operand.vmem [shape: bf16[128,16], index: 0, kind: input, shape index: {}]   ;;  %s12386_s1 = inlined_call_operand.vmem [shape: bf16[160,16], index: 1, kind: input, shape index: {}]   ;;  %s12387_s2 = inlined_call_operand.vmem [shape: f32[32,32], index: 2, kind: input, shape index: {}]   ;;  %s12388_s3 = inlined_call_operand.vmem [shape: f32[32,40], index: 3, kind: input, shape index: {}]   ;;  %s12389_s4 = inlined_call_operand.vmem [shape: f32[4,32], index: 4, kind: input, shape index: {}]   ;;  %s12390_s5 = inlined_call_operand.vmem [shape: bf16[256,96], index: 5, kind: input, shape index: {}]   ;;  %s12391_s6 = inlined_call_operand.vmem [shape: f32[8,96], index: 6, kind: input, shape index: {}]   ;;  %s12392_s7 = inlined_call_operand.hbm [shape: f32[4,128], index: 7, kind: output, shape index: {0}]   ;;  %s12393_s8 = inlined_call_operand.hbm [shape: f32[1,128], index: 8, kind: output, shape index: {1}]  }
   0x1   :  { %v6883_v0 = vld [vmem:[%s12390_s5] sm:$0xff]  ;;  %v6894_v1 = vld [vmem:[%s12390_s5 + $0x8] sm:$0xff] }
   0x2   :  { %v6875_v2 = vld [vmem:[%s12385_s0] sm:$0xff]  ;;  %127 = vmatpush.bf16.msra.mxu0 %v6883_v0  ;;  %284 = vmatpush.bf16.msra.mxu1 %v6894_v1 }
   0x3   :  { %v6884_v3 = vld [vmem:[%s12386_s1] sm:$0xff] }
   0x4   :  { %15 = vsyncpa [#allocation5], 0  ;;  %v6876_v4 = vld [vmem:[%s12385_s0 + $0x8] sm:$0xff]  ;;  %v6877_v6 = vld [vmem:[%s12385_s0 + $0x10] sm:$0xff]  ;;  %v553_v22 = vlaneseq  ;;  %v7386_v27 = vmov 0.0   ;;  %s7387_s28 = smov 32  }
   0x5   :  { %6538 = vmatmul.msk.bf16.vlgmr.msra.gmra.mxu0 %vm95_vm0, %v6875_v2  ;;  %6590 = vmatmul.msk.bf16.vlgmr.msra.gmra.mxu1 %vm95_vm0, %v6884_v3  ;;  %v6885_v5 = vld [vmem:[%s12386_s1 + $0x8] sm:$0xff]  ;;  %v6886_v7 = vld [vmem:[%s12386_s1 + $0x10] sm:$0xff]  ;;  %v6878_v8 = vld [vmem:[%s12385_s0 + $0x18] sm:$0xff]  ;;  %vm362_vm5 = vcmask 261120   ;;  %s7388_s29 = smov 64   ;;  %s7389_s11 = smov 96  }
   0x6   :  { %v6887_v9 = vld [vmem:[%s12386_s1 + $0x18] sm:$0xff]  ;;  %v6879_v10 = vld [vmem:[%s12385_s0 + $0x20] sm:$0xff]  ;;  %v6880_v12 = vld [vmem:[%s12385_s0 + $0x28] sm:$0xff]  ;;  %v554_v23 = vand.u32 127, %v553_v22  ;;  %vm874_vm12 = vcmask 1043456   ;;  %vm703_vm13 = vcmask 326656  }
   0x7   :  { %v6888_v11 = vld [vmem:[%s12386_s1 + $0x20] sm:$0xff]  ;;  %v6889_v13 = vld [vmem:[%s12386_s1 + $0x28] sm:$0xff]  ;;  %v6881_v14 = vld [vmem:[%s12385_s0 + $0x30] sm:$0xff]  ;;  %s6477_s12 = sshll.u32 %s12392_s7, 4  ;;  %s6478_s12 = int_to_ptr.hbm [resolvable:$true] %s6477_s12 }
   0x8   :  { %v6890_v15 = vld [vmem:[%s12386_s1 + $0x30] sm:$0xff]  ;;  %v6896_v16 = vld [vmem:[%s12390_s5 + $0x18] sm:$0xff]  ;;  %v6898_v20 = vld [vmem:[%s12390_s5 + $0x28] sm:$0xff]  ;;  %vm560_vm1 = vcmp.ge.s32.totalorder %v554_v23, 8  ;;  %vm561_vm2 = vcmp.lt.s32.totalorder %v554_v23, 16  ;;  %vm556_vm3 = vcmp.lt.s32.totalorder %v554_v23, 8 }
   0x9   :  { %393 = vmatpush.bf16.msra.mxu2 %v6896_v16  ;;  %v6895_v17 = vld [vmem:[%s12390_s5 + $0x10] sm:$0xff]  ;;  %v6882_v18 = vld [vmem:[%s12385_s0 + $0x38] sm:$0xff]  ;;  %6909 = vmatpush.bf16.msra.mxu3 %v6898_v20  ;;  %v6897_v21 = vld [vmem:[%s12390_s5 + $0x20] sm:$0xff]  ;;  %v7524_v28 = vsel %vm556_vm3, 1.0, %v7386_v27  ;;  %vm565_vm6 = vcmp.ge.s32.totalorder %v554_v23, 16  ;;  %vm566_vm7 = vcmp.lt.s32.totalorder %v554_v23, 24 }
   0xa   :  { %v6891_v19 = vld [vmem:[%s12386_s1 + $0x38] sm:$0xff]  ;;  %v6892_v24 = vld [vmem:[%s12386_s1 + $0x40] sm:$0xff]  ;;  %vm562_vm4 = vmand %vm560_vm1, %vm561_vm2  ;;  %vm570_vm8 = vcmp.ge.s32.totalorder %v554_v23, 24  ;;  %vm571_vm9 = vcmp.lt.s32.totalorder %v554_v23, 32 }
   0xb   :  { %v7526_v29 = vsel %vm562_vm4, 1.0, %v7386_v27  ;;  %v6893_v34 = vld [vmem:[%s12386_s1 + $0x48] sm:$0xff]  ;;  %vm567_vm10 = vmand %vm565_vm6, %vm566_vm7  ;;  %s6488_s1 = sshll.u32 %s12393_s8, 4  ;;  %s6489_s1 = int_to_ptr.hbm [resolvable:$true] %s6488_s1 }
   0xc   :  { %v6917_v30 = vpack.i.bf16 %v7526_v29, %v7524_v28  ;;  %v7539_v37 = vsel %vm567_vm10, 1.0, %v7386_v27  ;;  %vm572_vm11 = vmand %vm570_vm8, %vm571_vm9 }
   0xd   :  { %394 = vmatpush.bf16.msra.mxu2 %v6895_v17  ;;  %6910 = vmatpush.bf16.msra.mxu3 %v6897_v21  ;;  %v7541_v38 = vsel %vm572_vm11, 1.0, %v7386_v27 }
   0xe   :  { %6918 = vrot.lane.b32.xlu2 %v6917_v30, %s7387_s28  ;;  %v6932_v39 = vpack.i.bf16 %v7541_v38, %v7539_v37 }
  0x10   :  { %6928 = vrot.lane.b32.xlu0 %v6932_v39, %s7387_s28 }
  0x11   :  { %500 = vmatpush.bf16.msrb.mxu2 %v6898_v20 }
  0x15   :  { %6539 = vmatmul.msk.bf16.gmra.mxu0 %vm95_vm0, %v6876_v4  ;;  %6591 = vmatmul.msk.bf16.gmra.mxu1 %vm95_vm0, %v6885_v5 }
  0x16   :  { %501 = vmatpush.bf16.msrb.mxu2 %v6897_v21  ;;  %6923 = vrot.lane.b32.xlu2 %v6917_v30, %s7388_s29 }
  0x1e   :  { %6933 = vrot.lane.b32.xlu2 %v6932_v39, %s7388_s29 }
  0x25   :  { %6540 = vmatmul.msk.bf16.gmra.mxu0 %vm95_vm0, %v6877_v6  ;;  %6592 = vmatmul.msk.bf16.gmra.mxu1 %vm95_vm0, %v6886_v7 }
  0x35   :  { %6541 = vmatmul.msk.bf16.gmra.mxu0 %vm95_vm0, %v6878_v8  ;;  %6593 = vmatmul.msk.bf16.gmra.mxu1 %vm95_vm0, %v6887_v9 }
  0x45   :  { %6542 = vmatmul.msk.bf16.gmra.mxu0 %vm95_vm0, %v6879_v10  ;;  %6594 = vmatmul.msk.bf16.gmra.mxu1 %vm95_vm0, %v6888_v11 }
  0x55   :  { %6543 = vmatmul.msk.bf16.gmra.mxu0 %vm95_vm0, %v6880_v12  ;;  %6595 = vmatmul.msk.bf16.gmra.mxu1 %vm95_vm0, %v6889_v13 }
  0x65   :  { %6544 = vmatmul.msk.bf16.gmra.mxu0 %vm95_vm0, %v6881_v14  ;;  %6596 = vmatmul.msk.bf16.gmra.mxu1 %vm95_vm0, %v6890_v15 }
  0x68   :  { %v7562_v17 = vpop.permute.xlu2 %6918 }
  0x70   :  { %v6924_v21 = vpop.permute.xlu2 %6923 }
  0x75   :  { %6545 = vmatmul.msk.bf16.gmra.mxu0 %vm95_vm0, %v6882_v18  ;;  %6597 = vmatmul.msk.bf16.gmra.mxu1 %vm95_vm0, %v6891_v19 }
  0x82   :  { %v129_v25 = vpop.f32.mrf.mxu0  ;;  %v7522_v26 = vpop.f32.mrf.mxu1 }
  0x85   :  { %6598 = vmatmul.msk.bf16.gmra.mxu1 %vm95_vm0, %v6892_v24  ;;  %v7571_v24 = vld [vmem:[%s12391_s6] ss:$0 sm:$0xff] }
  0x8a   :  { %v131_v31 = vpop.f32.mrf.mxu0  ;;  %v7532_v32 = vpop.f32.mrf.mxu1 }
  0x8b   :  { %v340_v33 = vpack.c.bf16 %v131_v31, %v129_v25  ;;  %v440_v19 = vpack.c.bf16 %v7532_v32, %v7522_v26  ;;  %v7573_v25 = vunpack.i.l.bf16 %v6924_v21  ;;  %v6934_v31 = vpop.permute.xlu2 %6933 }
  0x8d   :  { %6608 = vmatmul.msk.bf16.vlgmr.msra.gmra.mxu2 %vm362_vm5, %v340_v33 }
  0x92   :  { %v134_v35 = vpop.f32.mrf.mxu0  ;;  %v291_v36 = vpop.f32.mrf.mxu1 }
  0x95   :  { %6599 = vmatmul.msk.bf16.gmra.mxu1 %vm95_vm0, %v6893_v34 }
  0x9a   :  { %v136_v40 = vpop.f32.mrf.mxu0  ;;  %v293_v41 = vpop.f32.mrf.mxu1 }
  0x9b   :  { %v341_v42 = vpack.c.bf16 %v136_v40, %v134_v35  ;;  %v441_v43 = vpack.c.bf16 %v293_v41, %v291_v36 }
  0x9d   :  { %6609 = vmatmul.msk.bf16.gmra.mxu2 %vm362_vm5, %v341_v42  ;;  %6625 = vmatmul.msk.bf16.vlgmr.msra.gmra.mxu3 %vm362_vm5, %v441_v43  ;;  %v7583_v43 = vunpack.i.h.bf16 %v6934_v31 }
  0xa2   :  { %v139_v44 = vpop.f32.mrf.mxu0  ;;  %v296_v45 = vpop.f32.mrf.mxu1 }
  0xaa   :  { %v141_v46 = vpop.f32.mrf.mxu0  ;;  %v298_v47 = vpop.f32.mrf.mxu1 }
  0xab   :  { %v342_v48 = vpack.c.bf16 %v141_v46, %v139_v44  ;;  %v442_v49 = vpack.c.bf16 %v298_v47, %v296_v45  ;;  %v7589_v47 = vunpack.i.h.bf16 %v6924_v21 }
  0xad   :  { %6610 = vmatmul.msk.bf16.gmra.mxu2 %vm362_vm5, %v342_v48  ;;  %6626 = vmatmul.msk.bf16.gmra.mxu3 %vm362_vm5, %v442_v49 }
  0xb2   :  { %v144_v50 = vpop.f32.mrf.mxu0  ;;  %v301_v51 = vpop.f32.mrf.mxu1 }
  0xba   :  { %v146_v52 = vpop.f32.mrf.mxu0  ;;  %v303_v53 = vpop.f32.mrf.mxu1 }
  0xbb   :  { %v343_v54 = vpack.c.bf16 %v146_v52, %v144_v50  ;;  %v443_v55 = vpack.c.bf16 %v303_v53, %v301_v51 }
  0xbd   :  { %6611 = vmatmul.msk.bf16.gmra.mxu2 %vm362_vm5, %v343_v54  ;;  %6627 = vmatmul.msk.bf16.gmra.mxu3 %vm362_vm5, %v443_v55 }
  0xc2   :  { %v149_v56 = vpop.f32.mrf.mxu0  ;;  %v306_v57 = vpop.f32.mrf.mxu1 }
  0xca   :  { %v151_v58 = vpop.f32.mrf.mxu0  ;;  %v308_v59 = vpop.f32.mrf.mxu1 }
  0xcb   :  { %v344_v60 = vpack.c.bf16 %v151_v58, %v149_v56  ;;  %v444_v61 = vpack.c.bf16 %v308_v59, %v306_v57  ;;  %v7608_v59 = vld [vmem:[%s12391_s6 + $0x1] ss:$0 sm:$0xff] }
  0xcd   :  { %6612 = vmatmul.msk.bf16.gmra.mxu2 %vm362_vm5, %v344_v60  ;;  %6628 = vmatmul.msk.bf16.gmra.mxu3 %vm362_vm5, %v444_v61 }
  0xd2   :  { %v154_v62 = vpop.f32.mrf.mxu0  ;;  %v311_v63 = vpop.f32.mrf.mxu1 }
  0xda   :  { %v156_v0 = vpop.f32.mrf.mxu0  ;;  %v313_v1 = vpop.f32.mrf.mxu1 }
  0xdb   :  { %v345_v2 = vpack.c.bf16 %v156_v0, %v154_v62  ;;  %v445_v3 = vpack.c.bf16 %v313_v1, %v311_v63  ;;  %v7612_v63 = vunpack.i.l.bf16 %v6934_v31  ;;  %v7619_v1 = vunpack.i.h.bf16 %v7562_v17 }
  0xdd   :  { %6613 = vmatmul.msk.bf16.gmra.mxu2 %vm362_vm5, %v345_v2  ;;  %6629 = vmatmul.msk.bf16.gmra.mxu3 %vm362_vm5, %v445_v3  ;;  %12603 = vst [vmem:[#allocation8_spill] sm:$0xff] %v7619_v1 }
  0xe2   :  { %v159_v4 = vpop.f32.mrf.mxu0  ;;  %v316_v5 = vpop.f32.mrf.mxu1 }
  0xea   :  { %v161_v6 = vpop.f32.mrf.mxu0  ;;  %v318_v7 = vpop.f32.mrf.mxu1 }
  0xeb   :  { %v346_v8 = vpack.c.bf16 %v161_v6, %v159_v4  ;;  %v446_v9 = vpack.c.bf16 %v318_v7, %v316_v5 }
  0xed   :  { %6614 = vmatmul.msk.bf16.gmra.mxu2 %vm362_vm5, %v346_v8  ;;  %6630 = vmatmul.msk.bf16.gmra.mxu3 %vm362_vm5, %v446_v9 }
  0xf2   :  { %v164_v10 = vpop.f32.mrf.mxu0  ;;  %v321_v11 = vpop.f32.mrf.mxu1 }
  0xfa   :  { %v166_v12 = vpop.f32.mrf.mxu0  ;;  %v323_v13 = vpop.f32.mrf.mxu1 }
  0xfb   :  { %v347_v14 = vpack.c.bf16 %v166_v12, %v164_v10  ;;  %v447_v15 = vpack.c.bf16 %v323_v13, %v321_v11  ;;  %v6929_v12 = vpop.permute.xlu0 %6928 }
  0xfc   :  { %v7652_v21 = vunpack.i.l.bf16 %v6929_v12 }
  0xfd   :  { %6615 = vmatmul.msk.bf16.gmra.mxu2 %vm362_vm5, %v347_v14  ;;  %6631 = vmatmul.msk.bf16.gmra.mxu3 %vm362_vm5, %v447_v15  ;;  %v7640_v15 = vunpack.i.l.bf16 %v7562_v17 }
  0xfe   :  { %12605 = vst [vmem:[#allocation10_spill] sm:$0xff] %v7652_v21 }
  0xff   :  { %12604 = vst [vmem:[#allocation9_spill] sm:$0xff] %v7640_v15 }
 0x102   :  { %v326_v16 = vpop.f32.mrf.mxu1 }
 0x10a   :  { %v328_v18 = vpop.f32.mrf.mxu1 }
 0x10b   :  { %v448_v20 = vpack.c.bf16 %v328_v18, %v326_v16 }
 0x10d   :  { %6624 = vmatmul.msk.bf16.vlgmr.msrb.gmra.mxu2 %vm362_vm5, %v440_v19  ;;  %6632 = vmatmul.msk.bf16.gmra.mxu3 %vm362_vm5, %v448_v20 }
 0x110   :  { %v396_v22 = vpop.f32.mrf.mxu2 }
 0x111   :  { %v397_v27 = vadd.f32 %v7571_v24, %v396_v22 }
 0x112   :  { %v331_v23 = vpop.f32.mrf.mxu1 }
 0x113   :  { %v838_v35 = vmul.f32 %v7573_v25, %v397_v27  ;;  %v604_v39 = vmul.f32 %v7524_v28, %v397_v27  ;;  %v938_v41 = vmul.f32 %v7526_v29, %v397_v27  ;;  %v1249_v45 = vmul.f32 %v7539_v37, %v397_v27 }
 0x114   :  { %v1560_v52 = vmul.f32 %v7541_v38, %v397_v27  ;;  %v1772_v56 = vmul.f32 %v7583_v43, %v397_v27  ;;  %v1150_v61 = vmul.f32 %v7589_v47, %v397_v27  ;;  %v1461_v11 = vmul.f32 %v7612_v63, %v397_v27 }
 0x118   :  { %v398_v30 = vpop.f32.mrf.mxu2 }
 0x119   :  { %v399_v26 = vadd.f32 %v7571_v24, %v398_v30 }
 0x11a   :  { %v333_v32 = vpop.f32.mrf.mxu1 }
 0x11b   :  { %v449_v33 = vpack.c.bf16 %v333_v32, %v331_v23  ;;  %v599_v34 = vpack.c.bf16 %v399_v26, %v397_v27  ;;  %v839_v36 = vmul.f32 %v7573_v25, %v399_v26  ;;  %v605_v40 = vmul.f32 %v7524_v28, %v399_v26 }
 0x11c   :  { %v939_v42 = vmul.f32 %v7526_v29, %v399_v26  ;;  %v1250_v46 = vmul.f32 %v7539_v37, %v399_v26  ;;  %v1773_v50 = vmul.f32 %v7583_v43, %v399_v26  ;;  %v1561_v53 = vmul.f32 %v7541_v38, %v399_v26 }
 0x11d   :  { %6633 = vmatmul.msk.bf16.gmra.mxu3 %vm362_vm5, %v449_v33  ;;  %612 = vrot.lane.b32.xlu0 %v599_v34, %s7389_s11  ;;  %v842_v44 = vpack.c.bf16 %v839_v36, %v838_v35  ;;  %v7591_v48 = vpack.c.bf16 %v605_v40, %v604_v39  ;;  %v1151_v57 = vmul.f32 %v7589_v47, %v399_v26 }
 0x11e   :  { %v7593_v49 = vpack.c.bf16 %v939_v42, %v938_v41  ;;  %v7597_v51 = vpack.c.bf16 %v1250_v46, %v1249_v45  ;;  %v7603_v58 = vpack.c.bf16 %v1561_v53, %v1560_v52  ;;  %v1776_v60 = vpack.c.bf16 %v1773_v50, %v1772_v56 }
 0x11f   :  { %899 = vrot.lane.b32.xlu2 %v842_v44, %s7388_s29  ;;  %v1154_v62 = vpack.c.bf16 %v1151_v57, %v1150_v61  ;;  %v1462_v7 = vmul.f32 %v7612_v63, %v399_v26  ;;  %v7678_v41 = vunpack.i.h.bf16 %v6929_v12 }
 0x120   :  { %v401_v54 = vpop.f32.mrf.mxu2  ;;  %v508_v55 = vpop.f32.mrf.mxu3 }
 0x121   :  { %v7615_v0 = vadd.f32 %v7608_v59, %v508_v55  ;;  %v7622_v4 = vadd.f32 %v7571_v24, %v401_v54  ;;  %v1465_v14 = vpack.c.bf16 %v1462_v7, %v1461_v11  ;;  %12606 = vst [vmem:[#allocation11_spill] sm:$0xff] %v7678_v41 }
 0x123   :  { %v1163_v9 = vmul.f32 %v7619_v1, %v7615_v0  ;;  %v840_v16 = vmul.f32 %v7573_v25, %v7622_v4  ;;  %v606_v18 = vmul.f32 %v7524_v28, %v7622_v4  ;;  %v940_v19 = vmul.f32 %v7526_v29, %v7622_v4 }
 0x124   :  { %v1251_v27 = vmul.f32 %v7539_v37, %v7622_v4  ;;  %v1562_v26 = vmul.f32 %v7541_v38, %v7622_v4  ;;  %v851_v42 = vmul.f32 %v7640_v15, %v7615_v0  ;;  %v1463_v44 = vmul.f32 %v7612_v63, %v7622_v4 }
 0x125   :  { %1832 = vrot.lane.b32.xlu0 %v1776_v60, %s7388_s29  ;;  %v1474_v50 = vmul.f32 %v7652_v21, %v7615_v0  ;;  %v1785_v54 = vmul.f32 %v7678_v41, %v7615_v0 }
 0x127   :  { %1210 = vrot.lane.b32.xlu2 %v1154_v62, %s7388_s29 }
 0x128   :  { %v403_v2 = vpop.f32.mrf.mxu2  ;;  %v510_v3 = vpop.f32.mrf.mxu3 }
 0x129   :  { %v7625_v5 = vadd.f32 %v7571_v24, %v403_v2  ;;  %v7628_v6 = vadd.f32 %v7608_v59, %v510_v3  ;;  %v1152_v2 = vmul.f32 %v7589_v47, %v7622_v4 }
 0x12b   :  { %v600_v8 = vpack.c.bf16 %v7625_v5, %v7622_v4  ;;  %v1164_v10 = vmul.f32 %v7619_v1, %v7628_v6  ;;  %v841_v20 = vmul.f32 %v7573_v25, %v7625_v5  ;;  %v607_v17 = vmul.f32 %v7524_v28, %v7625_v5 }
 0x12c   :  { %v941_v22 = vmul.f32 %v7526_v29, %v7625_v5  ;;  %v1252_v30 = vmul.f32 %v7539_v37, %v7625_v5  ;;  %v1563_v31 = vmul.f32 %v7541_v38, %v7625_v5  ;;  %v852_v32 = vmul.f32 %v7640_v15, %v7628_v6 }
 0x12d   :  { %614 = vrot.lane.b32.xlu0 %v600_v8, %s7389_s11  ;;  %v1167_v13 = vpack.c.bf16 %v1164_v10, %v1163_v9  ;;  %v1464_v33 = vmul.f32 %v7612_v63, %v7625_v5  ;;  %v7670_v34 = vpack.c.bf16 %v607_v17, %v606_v18  ;;  %v843_v40 = vpack.c.bf16 %v841_v20, %v840_v16 }
 0x12e   :  { %v7672_v35 = vpack.c.bf16 %v941_v22, %v940_v19  ;;  %v7674_v36 = vpack.c.bf16 %v1252_v30, %v1251_v27  ;;  %v7676_v39 = vpack.c.bf16 %v1563_v31, %v1562_v26  ;;  %v855_v45 = vpack.c.bf16 %v852_v32, %v851_v42 }
 0x12f   :  { %1174 = vrot.lane.b32.xlu1 %v1167_v13, %s7389_s11  ;;  %1521 = vrot.lane.b32.xlu2 %v1465_v14, %s7388_s29  ;;  %v1466_v46 = vpack.c.bf16 %v1464_v33, %v1463_v44  ;;  %v1475_v52 = vmul.f32 %v7652_v21, %v7628_v6  ;;  %v1786_v55 = vmul.f32 %v7678_v41, %v7628_v6 }
 0x130   :  { %v406_v23 = vpop.f32.mrf.mxu2  ;;  %v513_v53 = vpop.f32.mrf.mxu3  ;;  %v1153_v60 = vmul.f32 %v7589_v47, %v7625_v5  ;;  %v1775_v20 = vmul.f32 %v7583_v43, %v7625_v5  ;;  %v1774_v26 = vmul.f32 %v7583_v43, %v7622_v4 }
 0x131   :  { %v7696_v56 = vadd.f32 %v7571_v24, %v406_v23  ;;  %v1478_v62 = vpack.c.bf16 %v1475_v52, %v1474_v50  ;;  %v1789_v3 = vpack.c.bf16 %v1786_v55, %v1785_v54  ;;  %v514_v7 = vadd.f32 %v7608_v59, %v513_v53 }
 0x132   :  { %v1155_v8 = vpack.c.bf16 %v1153_v60, %v1152_v2  ;;  %v1777_v33 = vpack.c.bf16 %v1775_v20, %v1774_v26  ;;  %v602_v53 = vpack.c.bf16 %v7628_v6, %v7615_v0 }
 0x133   :  { %v1876_v9 = vmul.f32 %v7524_v28, %v7696_v56  ;;  %v2201_v11 = vmul.f32 %v7526_v29, %v7696_v56  ;;  %v2505_v13 = vmul.f32 %v7539_v37, %v7696_v56  ;;  %v2809_v18 = vmul.f32 %v7541_v38, %v7696_v56 }
 0x134   :  { %v1165_v31 = vmul.f32 %v7619_v1, %v514_v7  ;;  %v603_v32 = vpack.c.bf16 %v514_v7, %v514_v7  ;;  %v853_v4 = vmul.f32 %v7640_v15, %v514_v7  ;;  %v1476_v44 = vmul.f32 %v7652_v21, %v514_v7 }
 0x135   :  { %901 = vrot.lane.b32.xlu0 %v843_v40, %s7388_s29  ;;  %v2105_v60 = vmul.f32 %v7573_v25, %v7696_v56  ;;  %v2409_v26 = vmul.f32 %v7589_v47, %v7696_v56 }
 0x136   :  { %v7739_v40 = vsel %vm362_vm5, %v603_v32, 0  ;;  %v1168_v5 = vpack.c.bf16 %v1165_v31, %v1165_v31  ;;  %v856_v55 = vpack.c.bf16 %v853_v4, %v853_v4 }
 0x137   :  { %862 = vrot.lane.b32.xlu2 %v855_v45, %s7389_s11  ;;  %1523 = vrot.lane.b32.xlu1 %v1466_v46, %s7388_s29 }
 0x138   :  { %v408_v57 = vpop.f32.mrf.mxu2  ;;  %v515_v23 = vpop.f32.mrf.mxu3  ;;  %669 = vmatpush.bf16.xpose.msra.mxu2 %v7739_v40  ;;  %982 = vmatpush.bf16.xpose.msrb.mxu3 %v7739_v40 }
 0x139   :  { %v7701_v61 = vadd.f32 %v7571_v24, %v408_v57  ;;  %v1479_v57 = vpack.c.bf16 %v1476_v44, %v1476_v44  ;;  %v7766_v2 = vadd.f32 %v7608_v59, %v515_v23 }
 0x13b   :  { %v1877_v10 = vmul.f32 %v7524_v28, %v7701_v61  ;;  %v2202_v12 = vmul.f32 %v7526_v29, %v7701_v61  ;;  %v2506_v14 = vmul.f32 %v7539_v37, %v7701_v61  ;;  %v2810_v19 = vmul.f32 %v7541_v38, %v7701_v61 }
 0x13c   :  { %v1871_v42 = vpack.c.bf16 %v7701_v61, %v7696_v56  ;;  %v2106_v52 = vmul.f32 %v7573_v25, %v7701_v61 }
 0x13d   :  { %1485 = vrot.lane.b32.xlu0 %v1478_v62, %s7389_s11  ;;  %v7719_v16 = vpack.c.bf16 %v1877_v10, %v1876_v9  ;;  %v7729_v17 = vpack.c.bf16 %v2202_v12, %v2201_v11  ;;  %v7731_v22 = vpack.c.bf16 %v2506_v14, %v2505_v13  ;;  %v7733_v30 = vpack.c.bf16 %v2810_v19, %v2809_v18 }
 0x13e   :  { %v7763_v62 = vsel %vm362_vm5, %v602_v53, 0  ;;  %v2109_v6 = vpack.c.bf16 %v2106_v52, %v2105_v60  ;;  %v2714_v53 = vmul.f32 %v7612_v63, %v7701_v61 }
 0x13f   :  { %1796 = vrot.lane.b32.xlu1 %v1789_v3, %s7389_s11  ;;  %1212 = vrot.lane.b32.xlu2 %v1155_v8, %s7388_s29  ;;  %v2410_v3 = vmul.f32 %v7589_v47, %v7701_v61  ;;  %v1787_v8 = vmul.f32 %v7678_v41, %v514_v7 }
 0x140   :  { %v411_v27 = vpop.f32.mrf.mxu2  ;;  %v518_v54 = vpop.f32.mrf.mxu3  ;;  %670 = vmatpush.bf16.xpose.msra.mxu2 %v7763_v62  ;;  %983 = vmatpush.bf16.xpose.msrb.mxu3 %v7763_v62 }
 0x141   :  { %v7751_v46 = vadd.f32 %v7571_v24, %v411_v27  ;;  %v7774_v0 = vadd.f32 %v7608_v59, %v518_v54 }
 0x143   :  { %v1878_v9 = vmul.f32 %v7524_v28, %v7751_v46  ;;  %v2203_v11 = vmul.f32 %v7526_v29, %v7751_v46  ;;  %v2507_v12 = vmul.f32 %v7539_v37, %v7751_v46  ;;  %v2811_v18 = vmul.f32 %v7541_v38, %v7751_v46 }
 0x144   :  { %v2418_v31 = vmul.f32 %v7619_v1, %v7774_v0  ;;  %v2114_v52 = vmul.f32 %v7640_v15, %v7774_v0 }
 0x145   :  { %1834 = vrot.lane.b32.xlu0 %v1777_v33, %s7388_s29  ;;  %v2413_v33 = vpack.c.bf16 %v2410_v3, %v2409_v26 }
 0x147   :  { %1176 = vrot.lane.b32.xlu2 %v1168_v5, %s7389_s11  ;;  %1884 = vrot.lane.b32.xlu1 %v1871_v42, %s7389_s11  ;;  %v1790_v5 = vpack.c.bf16 %v1787_v8, %v1787_v8  ;;  %v2417_v42 = vmul.f32 %v7619_v1, %v7766_v2 }
 0x148   :  { %v413_v45 = vpop.f32.mrf.mxu2  ;;  %v520_v4 = vpop.f32.mrf.mxu3 }
 0x149   :  { %v7754_v50 = vadd.f32 %v7571_v24, %v413_v45  ;;  %v2422_v44 = vpack.c.bf16 %v2418_v31, %v2417_v42  ;;  %v2721_v31 = vmul.f32 %v7652_v21, %v7766_v2 }
 0x14b   :  { %v1879_v10 = vmul.f32 %v7524_v28, %v7754_v50  ;;  %v2204_v7 = vmul.f32 %v7526_v29, %v7754_v50  ;;  %v2508_v13 = vmul.f32 %v7539_v37, %v7754_v50  ;;  %v2812_v19 = vmul.f32 %v7541_v38, %v7754_v50 }
 0x14c   :  { %v1872_v26 = vpack.c.bf16 %v7754_v50, %v7751_v46 }
 0x14d   :  { %864 = vrot.lane.b32.xlu0 %v856_v55, %s7389_s11  ;;  %v7791_v14 = vpack.c.bf16 %v1879_v10, %v1878_v9  ;;  %v7797_v23 = vpack.c.bf16 %v2204_v7, %v2203_v11  ;;  %v7799_v27 = vpack.c.bf16 %v2508_v13, %v2507_v12  ;;  %v7805_v32 = vpack.c.bf16 %v2812_v19, %v2811_v18 }
 0x14e   :  { %v2113_v55 = vmul.f32 %v7640_v15, %v7766_v2 }
 0x14f   :  { %1487 = vrot.lane.b32.xlu2 %v1479_v57, %s7389_s11  ;;  %2162 = vrot.lane.b32.xlu1 %v2109_v6, %s7388_s29  ;;  %v2713_v57 = vmul.f32 %v7612_v63, %v7696_v56 }
 0x150   :  { %v416_v20 = vpop.f32.mrf.mxu2  ;;  %v2118_v3 = vpack.c.bf16 %v2114_v52, %v2113_v55 }
 0x151   :  { %v7811_v45 = vadd.f32 %v7571_v24, %v416_v20  ;;  %v2717_v8 = vpack.c.bf16 %v2714_v53, %v2713_v57 }
 0x153   :  { %v3118_v6 = vmul.f32 %v7524_v28, %v7811_v45  ;;  %v3443_v9 = vmul.f32 %v7526_v29, %v7811_v45  ;;  %v3747_v11 = vmul.f32 %v7539_v37, %v7811_v45  ;;  %v4051_v7 = vmul.f32 %v7541_v38, %v7811_v45 }
 0x154   :  { %v7838_v12 = vmul.f32 %v7573_v25, %v7811_v45 }
 0x155   :  { %2466 = vrot.lane.b32.xlu0 %v2413_v33, %s7388_s29  ;;  %v2722_v33 = vmul.f32 %v7652_v21, %v7774_v0 }
 0x156   :  { %12607 = vst [vmem:[#allocation12_spill] sm:$0xff] %v7838_v12 }
 0x157   :  { %1798 = vrot.lane.b32.xlu2 %v1790_v5, %s7389_s11  ;;  %2428 = vrot.lane.b32.xlu1 %v2422_v44, %s7389_s11 }
 0x158   :  { %v418_v54 = vpop.f32.mrf.mxu2 }
 0x159   :  { %v7824_v60 = vadd.f32 %v7571_v24, %v418_v54  ;;  %v523_v54 = vpop.f32.mrf.mxu3 }
 0x15b   :  { %v3119_v10 = vmul.f32 %v7524_v28, %v7824_v60  ;;  %v3444_v13 = vmul.f32 %v7526_v29, %v7824_v60  ;;  %v3748_v18 = vmul.f32 %v7539_v37, %v7824_v60  ;;  %v4052_v19 = vmul.f32 %v7541_v38, %v7824_v60 }
 0x15c   :  { %v7848_v20 = vmul.f32 %v7573_v25, %v7824_v60  ;;  %v7871_v55 = vmul.f32 %v7589_v47, %v7824_v60  ;;  %v7875_v57 = vmul.f32 %v7612_v63, %v7824_v60 }
 0x15d   :  { %2124 = vrot.lane.b32.xlu0 %v2118_v3, %s7389_s11  ;;  %v7857_v5 = vpack.c.bf16 %v3119_v10, %v3118_v6  ;;  %v7859_v42 = vpack.c.bf16 %v3444_v13, %v3443_v9  ;;  %v7861_v44 = vpack.c.bf16 %v3748_v18, %v3747_v11  ;;  %v7863_v52 = vpack.c.bf16 %v4052_v19, %v4051_v7 }
 0x15e   :  { %12608 = vst [vmem:[#allocation13_spill] sm:$0xff] %v7848_v20  ;;  %v7879_v6 = vmul.f32 %v7589_v47, %v7811_v45  ;;  %v7883_v9 = vmul.f32 %v7612_v63, %v7811_v45  ;;  %v7891_v10 = vmul.f32 %v7583_v43, %v7824_v60  ;;  %v2726_v11 = vpack.c.bf16 %v2722_v33, %v2721_v31 }
 0x15f   :  { %12609 = vst [vmem:[#allocation14_spill] sm:$0xff] %v7859_v42  ;;  %2770 = vrot.lane.b32.xlu2 %v2717_v8, %s7388_s29  ;;  %1886 = vrot.lane.b32.xlu1 %v1872_v26, %s7389_s11  ;;  %v7887_v8 = vmul.f32 %v7583_v43, %v7811_v45  ;;  %v3018_v7 = vmul.f32 %v7583_v43, %v7701_v61 }
 0x160   :  { %12610 = vst [vmem:[#allocation15_spill] sm:$0xff] %v7861_v44  ;;  %v421_v3 = vpop.f32.mrf.mxu2  ;;  %v2716_v13 = vmul.f32 %v7612_v63, %v7754_v50  ;;  %v7898_v18 = vadd.f32 %v7608_v59, %v523_v54  ;;  %v3017_v31 = vmul.f32 %v7583_v43, %v7696_v56  ;;  %v2715_v61 = vmul.f32 %v7612_v63, %v7751_v46 }
 0x161   :  { %12611 = vst [vmem:[#allocation16_spill] sm:$0xff] %v7863_v52  ;;  %v7911_v33 = vadd.f32 %v7608_v59, %v520_v4  ;;  %v3025_v19 = vmul.f32 %v7678_v41, %v7766_v2  ;;  %v3026_v26 = vmul.f32 %v7678_v41, %v7774_v0  ;;  %v7919_v53 = vadd.f32 %v7571_v24, %v421_v3 }
 0x162   :  { %12612 = vst [vmem:[#allocation17_spill] sm:$0xff] %v7871_v55  ;;  %v3021_v54 = vpack.c.bf16 %v3018_v7, %v3017_v31  ;;  %v2718_v12 = vpack.c.bf16 %v2716_v13, %v2715_v61  ;;  %v2420_v56 = vmul.f32 %v7619_v1, %v7898_v18  ;;  %v3020_v4 = vmul.f32 %v7583_v43, %v7754_v50 }
 0x163   :  { %12613 = vst [vmem:[#allocation18_spill] sm:$0xff] %v7875_v57  ;;  %v2419_v7 = vmul.f32 %v7619_v1, %v7911_v33  ;;  %v3019_v13 = vmul.f32 %v7583_v43, %v7751_v46  ;;  %v3030_v61 = vpack.c.bf16 %v3026_v26, %v3025_v19  ;;  %v3749_v19 = vmul.f32 %v7539_v37, %v7919_v53 }
 0x164   :  { %12614 = vst [vmem:[#allocation19_spill] sm:$0xff] %v7879_v6  ;;  %v7977_v42 = vmul.f32 %v7589_v47, %v7919_v53 }
 0x165   :  { %12615 = vst [vmem:[#allocation20_spill] sm:$0xff] %v7883_v9  ;;  %2732 = vrot.lane.b32.xlu0 %v2726_v11, %s7389_s11  ;;  %v3445_v9 = vmul.f32 %v7526_v29, %v7919_v53 }
 0x166   :  { %12616 = vst [vmem:[#allocation21_spill] sm:$0xff] %v7887_v8  ;;  %v2108_v8 = vmul.f32 %v7573_v25, %v7754_v50 }
 0x167   :  { %12617 = vst [vmem:[#allocation22_spill] sm:$0xff] %v7891_v10  ;;  %3074 = vrot.lane.b32.xlu2 %v3021_v54, %s7388_s29  ;;  %2772 = vrot.lane.b32.xlu1 %v2718_v12, %s7388_s29  ;;  %v2423_v54 = vpack.c.bf16 %v2420_v56, %v2419_v7  ;;  %v3022_v10 = vpack.c.bf16 %v3020_v4, %v3019_v13 }
 0x168   :  { %v423_v11 = vpop.f32.mrf.mxu2  ;;  %v3120_v12 = vmul.f32 %v7524_v28, %v7919_v53  ;;  %v4053_v56 = vmul.f32 %v7541_v38, %v7919_v53  ;;  %v2723_v13 = vmul.f32 %v7652_v21, %v7911_v33  ;;  %12621 = vst [vmem:[#allocation26_spill] sm:$0xff] %v7977_v42 }
 0x169   :  { %v7934_v31 = vadd.f32 %v7571_v24, %v423_v11  ;;  %v7956_v11 = vmul.f32 %v7573_v25, %v7919_v53 }
 0x16b   :  { %v3121_v57 = vmul.f32 %v7524_v28, %v7934_v31  ;;  %v3446_v3 = vmul.f32 %v7526_v29, %v7934_v31  ;;  %v3750_v26 = vmul.f32 %v7539_v37, %v7934_v31  ;;  %v4054_v4 = vmul.f32 %v7541_v38, %v7934_v31  ;;  %12618 = vst [vmem:[#allocation23_spill] sm:$0xff] %v7956_v11 }
 0x16c   :  { %v7960_v7 = vmul.f32 %v7573_v25, %v7934_v31  ;;  %v2115_v11 = vmul.f32 %v7640_v15, %v7911_v33 }
 0x16d   :  { %3036 = vrot.lane.b32.xlu0 %v3030_v61, %s7389_s11  ;;  %v7965_v6 = vpack.c.bf16 %v3121_v57, %v3120_v12  ;;  %v7967_v55 = vpack.c.bf16 %v3446_v3, %v3445_v9  ;;  %v7969_v20 = vpack.c.bf16 %v3750_v26, %v3749_v19  ;;  %v7971_v52 = vpack.c.bf16 %v4054_v4, %v4053_v56  ;;  %v525_v26 = vpop.f32.mrf.mxu3 }
 0x16e   :  { %12619 = vst [vmem:[#allocation24_spill] sm:$0xff] %v7960_v7  ;;  %v7981_v61 = vmul.f32 %v7589_v47, %v7934_v31  ;;  %v2724_v57 = vmul.f32 %v7652_v21, %v7898_v18  ;;  %v7989_v9 = vmul.f32 %v7612_v63, %v7919_v53  ;;  %v7993_v3 = vmul.f32 %v7612_v63, %v7934_v31 }
 0x16f   :  { %12620 = vst [vmem:[#allocation25_spill] sm:$0xff] %v7971_v52  ;;  %2430 = vrot.lane.b32.xlu2 %v2423_v54, %s7389_s11  ;;  %3076 = vrot.lane.b32.xlu1 %v3022_v10, %s7388_s29  ;;  %v2107_v54 = vmul.f32 %v7573_v25, %v7751_v46  ;;  %v2116_v10 = vmul.f32 %v7640_v15, %v7898_v18 }
 0x170   :  { %12622 = vst [vmem:[#allocation27_spill] sm:$0xff] %v7981_v61  ;;  %v426_v12 = vpop.f32.mrf.mxu2  ;;  %v8005_v4 = vmul.f32 %v7583_v43, %v7934_v31  ;;  %v2727_v7 = vpack.c.bf16 %v2724_v57, %v2723_v13  ;;  %v8011_v19 = vmul.f32 %v7583_v43, %v7919_v53  ;;  %v8014_v42 = vadd.f32 %v7608_v59, %v525_v26 }
 0x171   :  { %12623 = vst [vmem:[#allocation28_spill] sm:$0xff] %v7989_v9  ;;  %v2110_v44 = vpack.c.bf16 %v2108_v8, %v2107_v54  ;;  %v2119_v61 = vpack.c.bf16 %v2116_v10, %v2115_v11  ;;  %v2412_v56 = vmul.f32 %v7589_v47, %v7754_v50  ;;  %v427_v54 = vadd.f32 %v7571_v24, %v426_v12 }
 0x172   :  { %12624 = vst [vmem:[#allocation29_spill] sm:$0xff] %v7993_v3  ;;  %v3029_v13 = vmul.f32 %v7678_v41, %v8014_v42  ;;  %v2411_v57 = vmul.f32 %v7589_v47, %v7751_v46  ;;  %v3113_v50 = vpack.c.bf16 %v7824_v60, %v7811_v45 }
 0x173   :  { %12625 = vst [vmem:[#allocation30_spill] sm:$0xff] %v8005_v4  ;;  %v4360_v12 = vmul.f32 %v7524_v28, %v427_v54  ;;  %v4685_v8 = vmul.f32 %v7526_v29, %v427_v54  ;;  %v4989_v46 = vmul.f32 %v7539_v37, %v427_v54  ;;  %v5293_v45 = vmul.f32 %v7541_v38, %v427_v54 }
 0x174   :  { %12626 = vst [vmem:[#allocation31_spill] sm:$0xff] %v8011_v19  ;;  %v2414_v26 = vpack.c.bf16 %v2412_v56, %v2411_v57  ;;  %v3032_v10 = vpack.c.bf16 %v3029_v13, %v3029_v13  ;;  %v3028_v13 = vmul.f32 %v7678_v41, %v7898_v18  ;;  %v8055_v52 = vmul.f32 %v7573_v25, %v427_v54 }
 0x175   :  { %2164 = vrot.lane.b32.xlu0 %v2110_v44, %s7388_s29  ;;  %v8063_v56 = vmul.f32 %v7589_v47, %v427_v54 }
 0x176   :  { %12631 = vst [vmem:[#allocation36_spill] sm:$0xff] %v8055_v52 }
 0x177   :  { %2126 = vrot.lane.b32.xlu1 %v2119_v61, %s7389_s11  ;;  %2734 = vrot.lane.b32.xlu2 %v2727_v7, %s7389_s11  ;;  %12633 = vst [vmem:[#allocation38_spill] sm:$0xff] %v8063_v56 }
 0x178   :  { %v428_v44 = vpop.f32.mrf.mxu2 }
 0x179   :  { %v429_v11 = vadd.f32 %v7571_v24, %v428_v44  ;;  %v3027_v44 = vmul.f32 %v7678_v41, %v7911_v33 }
 0x17b   :  { %v4361_v19 = vmul.f32 %v7524_v28, %v429_v11  ;;  %v4686_v61 = vmul.f32 %v7526_v29, %v429_v11  ;;  %v4990_v7 = vmul.f32 %v7539_v37, %v429_v11  ;;  %v5294_v60 = vmul.f32 %v7541_v38, %v429_v11 }
 0x17d   :  { %2468 = vrot.lane.b32.xlu0 %v2414_v26, %s7388_s29  ;;  %v8046_v57 = vpack.c.bf16 %v4361_v19, %v4360_v12  ;;  %v8048_v4 = vpack.c.bf16 %v4686_v61, %v4685_v8  ;;  %v8050_v9 = vpack.c.bf16 %v4990_v7, %v4989_v46  ;;  %v8052_v3 = vpack.c.bf16 %v5294_v60, %v5293_v45 }
 0x17e   :  { %v8060_v26 = vmul.f32 %v7573_v25, %v429_v11  ;;  %v8066_v19 = vmul.f32 %v7612_v63, %v427_v54  ;;  %v8069_v12 = vmul.f32 %v7589_v47, %v429_v11  ;;  %v8072_v61 = vmul.f32 %v7612_v63, %v429_v11 }
 0x17f   :  { %12627 = vst [vmem:[#allocation32_spill] sm:$0xff] %v8046_v57  ;;  %3126 = vrot.lane.b32.xlu1 %v3113_v50, %s7389_s11  ;;  %3040 = vrot.lane.b32.xlu2 %v3032_v10, %s7389_s11  ;;  %v8075_v50 = vmul.f32 %v7583_v43, %v427_v54  ;;  %v8078_v10 = vmul.f32 %v7583_v43, %v429_v11 }
 0x180   :  { %12628 = vst [vmem:[#allocation33_spill] sm:$0xff] %v8048_v4  ;;  %v431_v8 = vpop.f32.mrf.mxu2  ;;  %v3031_v46 = vpack.c.bf16 %v3028_v13, %v3027_v44  ;;  %v2421_v7 = vmul.f32 %v7619_v1, %v8014_v42  ;;  %v8090_v4 = vpop.permute.xlu2 %899  ;;  %v2117_v13 = vmul.f32 %v7640_v15, %v8014_v42  ;;  %v4355_v45 = vpack.c.bf16 %v429_v11, %v427_v54 }
 0x181   :  { %12629 = vst [vmem:[#allocation34_spill] sm:$0xff] %v8050_v9  ;;  %v432_v57 = vadd.f32 %v7571_v24, %v431_v8  ;;  %v3114_v9 = vpack.c.bf16 %v7934_v31, %v7919_v53 }
 0x182   :  { %12630 = vst [vmem:[#allocation35_spill] sm:$0xff] %v8052_v3  ;;  %v2424_v44 = vpack.c.bf16 %v2421_v7, %v2421_v7 }
 0x183   :  { %12632 = vst [vmem:[#allocation37_spill] sm:$0xff] %v8060_v26  ;;  %v4362_v8 = vmul.f32 %v7524_v28, %v432_v57  ;;  %v4991_v7 = vmul.f32 %v7539_v37, %v432_v57  ;;  %v8106_v54 = vmul.f32 %v7573_v25, %v432_v57 }
 0x184   :  { %12634 = vst [vmem:[#allocation39_spill] sm:$0xff] %v8066_v19  ;;  %v2120_v19 = vpack.c.bf16 %v2117_v13, %v2117_v13  ;;  %v8122_v13 = vmul.f32 %v7612_v63, %v432_v57 }
 0x185   :  { %12635 = vst [vmem:[#allocation40_spill] sm:$0xff] %v8069_v12  ;;  %3038 = vrot.lane.b32.xlu0 %v3031_v46, %s7389_s11  ;;  %v4687_v46 = vmul.f32 %v7526_v29, %v432_v57 }
 0x186   :  { %12636 = vst [vmem:[#allocation41_spill] sm:$0xff] %v8072_v61 }
 0x187   :  { %12637 = vst [vmem:[#allocation42_spill] sm:$0xff] %v8075_v50  ;;  %2432 = vrot.lane.b32.xlu1 %v2424_v44, %s7389_s11  ;;  %4368 = vrot.lane.b32.xlu2 %v4355_v45, %s7389_s11  ;;  %v5295_v50 = vmul.f32 %v7541_v38, %v432_v57 }
 0x188   :  { %12638 = vst [vmem:[#allocation43_spill] sm:$0xff] %v8078_v10  ;;  %v433_v60 = vpop.f32.mrf.mxu2  ;;  %v8131_v61 = vpop.permute.xlu2 %1210 }
 0x189   :  { %v434_v3 = vadd.f32 %v7571_v24, %v433_v60  ;;  %12639 = vst [vmem:[#allocation44_spill] sm:$0xff] %v8106_v54  ;;  %v8112_v60 = vmul.f32 %v7589_v47, %v432_v57 }
 0x18a   :  { %12643 = vst [vmem:[#allocation48_spill] sm:$0xff] %v8122_v13 }
 0x18b   :  { %v4363_v11 = vmul.f32 %v7524_v28, %v434_v3  ;;  %v4688_v45 = vmul.f32 %v7526_v29, %v434_v3  ;;  %v4992_v24 = vmul.f32 %v7539_v37, %v434_v3  ;;  %12640 = vst [vmem:[#allocation45_spill] sm:$0xff] %v8112_v60  ;;  %v5296_v53 = vmul.f32 %v7541_v38, %v434_v3 }
 0x18c   :  { %v8116_v31 = vmul.f32 %v7573_v25, %v434_v3  ;;  %v8119_v44 = vmul.f32 %v7589_v47, %v434_v3  ;;  %v4356_v28 = vpack.c.bf16 %v434_v3, %v432_v57  ;;  %v8140_v56 = vmul.f32 %v7612_v63, %v434_v3 }
 0x18d   :  { %2128 = vrot.lane.b32.xlu0 %v2120_v19, %s7389_s11  ;;  %v8125_v29 = vpack.c.bf16 %v4363_v11, %v4362_v8  ;;  %v8127_v37 = vpack.c.bf16 %v4688_v45, %v4687_v46  ;;  %v8129_v10 = vpack.c.bf16 %v4992_v24, %v4991_v7  ;;  %v8133_v38 = vpack.c.bf16 %v5296_v53, %v5295_v50 }
 0x18e   :  { %12641 = vst [vmem:[#allocation46_spill] sm:$0xff] %v8116_v31  ;;  %v2725_v8 = vmul.f32 %v7652_v21, %v8014_v42  ;;  %v8147_v50 = vmul.f32 %v7583_v43, %v432_v57  ;;  %v8150_v46 = vmul.f32 %v7583_v43, %v434_v3 }
 0x18f   :  { %12642 = vst [vmem:[#allocation47_spill] sm:$0xff] %v8119_v44  ;;  %v613_v19 = vpop.permute.xlu0 %612  ;;  %3128 = vrot.lane.b32.xlu1 %v3114_v9, %s7389_s11  ;;  %4370 = vrot.lane.b32.xlu2 %v4356_v28, %s7389_s11 }
 0x190   :  { %12644 = vst [vmem:[#allocation49_spill] sm:$0xff] %v8125_v29  ;;  %v503_v7 = vpop.f32.mrf.mxu2  ;;  %v2728_v45 = vpack.c.bf16 %v2725_v8, %v2725_v8  ;;  %v8160_v53 = vpop.permute.xlu2 %1521 }
 0x191   :  { %12645 = vst [vmem:[#allocation50_spill] sm:$0xff] %v8127_v37  ;;  %v504_v9 = vadd.f32 %v7608_v59, %v503_v7 }
 0x192   :  { %12646 = vst [vmem:[#allocation51_spill] sm:$0xff] %v8129_v10 }
 0x193   :  { %12647 = vst [vmem:[#allocation52_spill] sm:$0xff] %v8133_v38  ;;  %v849_v3 = vmul.f32 %v7640_v15, %v504_v9  ;;  %v1161_v47 = vmul.f32 %v7619_v1, %v504_v9 }
 0x194   :  { %12648 = vst [vmem:[#allocation53_spill] sm:$0xff] %v8140_v56 }
 0x195   :  { %12649 = vst [vmem:[#allocation54_spill] sm:$0xff] %v8147_v50  ;;  %2736 = vrot.lane.b32.xlu0 %v2728_v45, %s7389_s11 }
 0x196   :  { %12650 = vst [vmem:[#allocation55_spill] sm:$0xff] %v8150_v46 }
 0x197   :  { %v8158_v24 = vpop.permute.xlu0 %1832 }
 0x198   :  { %v505_v57 = vpop.f32.mrf.mxu2  ;;  %v863_v50 = vpop.permute.xlu2 %862 }
 0x199   :  { %v506_v43 = vadd.f32 %v7608_v59, %v505_v57 }
 0x19b   :  { %v601_v28 = vpack.c.bf16 %v506_v43, %v504_v9  ;;  %v850_v11 = vmul.f32 %v7640_v15, %v506_v43  ;;  %v1162_v8 = vmul.f32 %v7619_v1, %v506_v43  ;;  %v1473_v57 = vmul.f32 %v7652_v21, %v506_v43 }
 0x19d   :  { %v656_v45 = vsel %vm362_vm5, %v601_v28, 0  ;;  %v854_v63 = vpack.c.bf16 %v850_v11, %v849_v3  ;;  %v1166_v7 = vpack.c.bf16 %v1162_v8, %v1161_v47  ;;  %v1784_v28 = vmul.f32 %v7678_v41, %v506_v43 }
 0x19e   :  { %671 = vmatpush.bf16.xpose.msra.mxu2 %v656_v45  ;;  %984 = vmatpush.bf16.xpose.msrb.mxu3 %v656_v45  ;;  %v1472_v47 = vmul.f32 %v7652_v21, %v504_v9  ;;  %v1783_v11 = vmul.f32 %v7678_v41, %v504_v9  ;;  %v623_v43 = vsel %vm362_vm5, %v613_v19, 0 }
 0x19f   :  { %v615_v25 = vpop.permute.xlu0 %614  ;;  %860 = vrot.lane.b32.xlu0 %v854_v63, %s7389_s11  ;;  %1172 = vrot.lane.b32.xlu2 %v1166_v7, %s7389_s11 }
 0x1a0   :  { %v626_v59 = vsel %vm362_vm5, %v615_v25, 0  ;;  %v1477_v25 = vpack.c.bf16 %v1473_v57, %v1472_v47  ;;  %v1788_v3 = vpack.c.bf16 %v1784_v28, %v1783_v11  ;;  %v1213_v9 = vpop.permute.xlu2 %1212 }
 0x1a1   :  { %634 = vmatpush.bf16.xpose.msrb.mxu0 %v626_v59  ;;  %v8180_v63 = vpop.permute.xlu1 %1174 }
 0x1a5   :  { %6648 = vmatmul.msk.bf16.vlgmr.msra.gmra.mxu2 %vm362_vm5, %v7591_v48  ;;  %6656 = vmatmul.msk.bf16.vlgmr.msrb.gmra.mxu3 %vm362_vm5, %v7593_v49 }
 0x1a6   :  { %1293 = vmatpush.bf16.xpose.msra.mxu3 %v7739_v40  ;;  %956 = vmatpush.bf16.xpose.msrb.mxu2 %v626_v59 }
 0x1a7   :  { %v902_v8 = vpop.permute.xlu0 %901  ;;  %1483 = vrot.lane.b32.xlu0 %v1477_v25, %s7389_s11  ;;  %1794 = vrot.lane.b32.xlu2 %v1788_v3, %s7389_s11 }
 0x1a8   :  { %917 = vmatpush.bf16.msrb.mxu1 %v902_v8  ;;  %v8201_v19 = vpop.permute.xlu2 %1176 }
 0x1a9   :  { %635 = vmatpush.bf16.xpose.msrb.mxu0 %v623_v43  ;;  %v8189_v57 = vpop.permute.xlu1 %1523 }
 0x1ac   :  { %918 = vmatpush.bf16.msrb.mxu1 %v8090_v4 }
 0x1ae   :  { %1294 = vmatpush.bf16.xpose.msra.mxu3 %v7763_v62  ;;  %957 = vmatpush.bf16.xpose.msrb.mxu2 %v623_v43 }
 0x1af   :  { %v8187_v7 = vpop.permute.xlu0 %1485 }
 0x1b0   :  { %1228 = vmatpush.bf16.msra.mxu1 %v1213_v9  ;;  %6646 = vmatmul.msk.bf16.vlgmr.msrb.gmra.mxu0 %vm362_vm5, %v7591_v48  ;;  %v8211_v47 = vpop.permute.xlu2 %1487 }
 0x1b1   :  { %v8204_v28 = vpop.permute.xlu1 %1796 }
 0x1b2   :  { %12651 = vst [vmem:[#allocation56_spill] sm:$0xff] %v8204_v28 }
 0x1b4   :  { %1229 = vmatpush.bf16.msra.mxu1 %v8131_v61  ;;  %v1875_v61 = vpack.c.bf16 %v8014_v42, %v8014_v42 }
 0x1b5   :  { %6649 = vmatmul.msk.bf16.gmra.mxu2 %vm362_vm5, %v7670_v34  ;;  %6657 = vmatmul.msk.bf16.gmra.mxu3 %vm362_vm5, %v7672_v35 }
 0x1b6   :  { %1267 = vmatpush.bf16.xpose.msra.mxu2 %v626_v59  ;;  %1295 = vmatpush.bf16.xpose.msra.mxu3 %v656_v45  ;;  %v8214_v25 = vsel %vm362_vm5, %v1875_v61, 0 }
 0x1b7   :  { %v8199_v4 = vpop.permute.xlu0 %1834 }
 0x1b8   :  { %v8225_v42 = vpop.permute.xlu2 %1798 }
 0x1b9   :  { %v1885_v11 = vpop.permute.xlu1 %1884 }
 0x1ba   :  { %v8279_v46 = vsel %vm362_vm5, %v1885_v11, 0 }
 0x1be   :  { %1604 = vmatpush.bf16.xpose.msrb.mxu3 %v7739_v40  ;;  %1268 = vmatpush.bf16.xpose.msra.mxu2 %v623_v43 }
 0x1bf   :  { %v865_v48 = vpop.permute.xlu0 %864 }
 0x1c0   :  { %v876_v40 = vsel %vm874_vm12, %v865_v48, 0  ;;  %6647 = vmatmul.msk.bf16.gmra.mxu0 %vm362_vm5, %v7670_v34  ;;  %v8242_v8 = vpop.permute.xlu2 %2770 }
 0x1c1   :  { %883 = vmatpush.bf16.msra.mxu0 %v876_v40  ;;  %12656 = vst [vmem:[#allocation60_spill] sm:$0xff] %v8242_v8 }
 0x1c5   :  { %884 = vmatpush.bf16.msra.mxu0 %v863_v50  ;;  %6654 = vmatmul.msk.bf16.vlgmr.msrb.gmra.mxu2 %vm362_vm5, %v7593_v49  ;;  %v12654_v50 = vpack.c.bf16 %v7898_v18, %v7911_v33  ;;  %v12657_v18 = vpack.c.bf16 %v7774_v0, %v7766_v2 }
 0x1c6   :  { %1605 = vmatpush.bf16.xpose.msrb.mxu3 %v7763_v62  ;;  %v8218_v62 = vpop.f32.mrf.mxu3  ;;  %1578 = vmatpush.bf16.xpose.msrb.mxu2 %v626_v59 }
 0x1c7   :  { %6664 = vmatmul.msk.bf16.vlgmr.msra.gmra.mxu3 %vm362_vm5, %v7597_v51  ;;  %v8223_v34 = vpop.permute.xlu0 %2466  ;;  %v8233_v49 = vsel %vm362_vm5, %v12654_v50, 0  ;;  %v8250_v33 = vsel %vm362_vm5, %v12657_v18, 0 }
 0x1c8   :  { %12652 = vst [vmem:[#allocation57_spill] sm:$0xff] %v8223_v34  ;;  %v8261_v40 = vpop.permute.xlu2 %3074 }
 0x1c9   :  { %12661 = vst [vmem:[#allocation64_spill] sm:$0xff] %v8261_v40 }
 0x1ce   :  { %1606 = vmatpush.bf16.xpose.msrb.mxu3 %v656_v45  ;;  %v8227_v45 = vpop.permute.xlu1 %2162  ;;  %1579 = vmatpush.bf16.xpose.msrb.mxu2 %v623_v43  ;;  %v8238_v59 = vpop.f32.mrf.mxu3 }
 0x1cf   :  { %12653 = vst [vmem:[#allocation58_spill] sm:$0xff] %v8227_v45  ;;  %v8236_v3 = vpop.permute.xlu0 %2124 }
 0x1d0   :  { %12655 = vst [vmem:[#allocation59_spill] sm:$0xff] %v8236_v3  ;;  %v8276_v18 = vpop.permute.xlu2 %2430 }
 0x1d1   :  { %12663 = vst [vmem:[#allocation66_spill] sm:$0xff] %v8276_v18 }
 0x1d5   :  { %6655 = vmatmul.msk.bf16.gmra.mxu2 %vm362_vm5, %v7672_v35 }
 0x1d6   :  { %1941 = vmatpush.bf16.xpose.msra.mxu3 %v8214_v25  ;;  %v8255_v9 = vpop.permute.xlu1 %2428  ;;  %v8257_v48 = vpop.f32.mrf.mxu3 }
 0x1d7   :  { %6665 = vmatmul.msk.bf16.gmra.mxu3 %vm362_vm5, %v7674_v36  ;;  %v8253_v43 = vpop.permute.xlu0 %2732  ;;  %12659 = vst [vmem:[#allocation62_spill] sm:$0xff] %v8255_v9 }
 0x1d8   :  { %12658 = vst [vmem:[#allocation61_spill] sm:$0xff] %v8253_v43 }
 0x1de   :  { %1942 = vmatpush.bf16.xpose.msra.mxu3 %v8233_v49  ;;  %v1887_v61 = vpop.permute.xlu1 %1886  ;;  %v8263_v50 = vpop.f32.mrf.mxu3 }
 0x1df   :  { %v8259_v35 = vpop.permute.xlu0 %3036  ;;  %v8266_v2 = vsel %vm362_vm5, %v1887_v61, 0  ;;  %v8287_v61 = vpop.permute.xlu2 %2734 }
 0x1e0   :  { %12660 = vst [vmem:[#allocation63_spill] sm:$0xff] %v8259_v35 }
 0x1e1   :  { %12665 = vst [vmem:[#allocation68_spill] sm:$0xff] %v8287_v61 }
 0x1e5   :  { %6662 = vmatmul.msk.bf16.vlgmr.msra.gmra.mxu2 %vm362_vm5, %v7597_v51 }
 0x1e6   :  { %1943 = vmatpush.bf16.xpose.msra.mxu3 %v8250_v33  ;;  %1906 = vmatpush.bf16.xpose.msra.mxu2 %v8266_v2  ;;  %v8281_v13 = vpop.f32.mrf.mxu3 }
 0x1e7   :  { %6672 = vmatmul.msk.bf16.vlgmr.msrb.gmra.mxu3 %vm362_vm5, %v7603_v58  ;;  %v8274_v0 = vpop.permute.xlu0 %2164  ;;  %v8298_v12 = vpop.permute.xlu2 %3040 }
 0x1e8   :  { %12662 = vst [vmem:[#allocation65_spill] sm:$0xff] %v8274_v0 }
 0x1e9   :  { %12667 = vst [vmem:[#allocation70_spill] sm:$0xff] %v8298_v12 }
 0x1ee   :  { %2245 = vmatpush.bf16.xpose.msrb.mxu3 %v8214_v25  ;;  %1907 = vmatpush.bf16.xpose.msra.mxu2 %v8279_v46  ;;  %v8296_v56 = vpop.f32.mrf.mxu3 }
 0x1ef   :  { %v8285_v51 = vpop.permute.xlu0 %2468 }
 0x1f0   :  { %12664 = vst [vmem:[#allocation67_spill] sm:$0xff] %v8285_v51 }
 0x1f5   :  { %6663 = vmatmul.msk.bf16.gmra.mxu2 %vm362_vm5, %v7674_v36  ;;  %v8310_v36 = vpop.permute.xlu2 %4368 }
 0x1f6   :  { %2246 = vmatpush.bf16.xpose.msrb.mxu3 %v8233_v49  ;;  %v8302_v44 = vpop.f32.mrf.mxu3  ;;  %12669 = vst [vmem:[#allocation72_spill] sm:$0xff] %v8310_v36 }
 0x1f7   :  { %6673 = vmatmul.msk.bf16.gmra.mxu3 %vm362_vm5, %v7676_v39  ;;  %v8294_v11 = vpop.permute.xlu0 %3038 }
 0x1f8   :  { %12666 = vst [vmem:[#allocation69_spill] sm:$0xff] %v8294_v11 }
 0x1fd   :  { %v8320_v26 = vpop.permute.xlu2 %4370 }
 0x1fe   :  { %2247 = vmatpush.bf16.xpose.msrb.mxu3 %v8250_v33  ;;  %v8314_v31 = vpop.f32.mrf.mxu3 }
 0x1ff   :  { %v8300_v60 = vpop.permute.xlu0 %2128 }
 0x200   :  { %12668 = vst [vmem:[#allocation71_spill] sm:$0xff] %v8300_v60 }
 0x205   :  { %6670 = vmatmul.msk.bf16.vlgmr.msrb.gmra.mxu2 %vm362_vm5, %v7603_v58  ;;  %v1187_v58 = vsel %vm874_vm12, %v8201_v19, 0  ;;  %v1173_v21 = vpop.permute.xlu2 %1172 }
 0x206   :  { %2219 = vmatpush.bf16.xpose.msrb.mxu2 %v8266_v2  ;;  %v8324_v41 = vpop.f32.mrf.mxu3 }
 0x207   :  { %6680 = vmatmul.msk.bf16.vlgmr.msra.gmra.mxu3 %vm362_vm5, %v7719_v16  ;;  %v8312_v54 = vpop.permute.xlu0 %2736 }
 0x208   :  { %2549 = vmatpush.bf16.xpose.msra.mxu3 %v8214_v25  ;;  %12670 = vst [vmem:[#allocation73_spill] sm:$0xff] %v8312_v54 }
 0x20e   :  { %2220 = vmatpush.bf16.xpose.msrb.mxu2 %v8279_v46  ;;  %v8330_v1 = vpop.f32.mrf.mxu3 }
 0x210   :  { %2550 = vmatpush.bf16.xpose.msra.mxu3 %v8233_v49 }
 0x211   :  { %v861_v52 = vpop.permute.xlu0 %860 }
 0x212   :  { %885 = vmatpush.bf16.msra.mxu0 %v861_v52  ;;  %v579_v52 = vld [vmem:[%s12388_s3] sm:$0xff] }
 0x213   :  { %v6642_v19 = vadd.f32 -1.0, %v579_v52  ;;  %v580_v52 = vld [vmem:[%s12388_s3 + $0x8] sm:$0xff] }
 0x214   :  { %v6643_v12 = vadd.f32 -1.0, %v580_v52 }
 0x215   :  { %6671 = vmatmul.msk.bf16.gmra.mxu2 %vm362_vm5, %v7676_v39  ;;  %v575_v39 = vld [vmem:[%s12387_s2] sm:$0xff] }
 0x216   :  { %1194 = vmatpush.bf16.msrb.mxu0 %v1187_v58  ;;  %v6638_v40 = vadd.f32 -1.0, %v575_v39  ;;  %v8362_v39 = vpop.permute.xlu1 %2772 }
 0x217   :  { %6681 = vmatmul.msk.bf16.gmra.mxu3 %vm362_vm5, %v7791_v14  ;;  %12673 = vst [vmem:[#allocation76_spill] sm:$0xff] %v8362_v39 }
 0x218   :  { %2551 = vmatpush.bf16.xpose.msra.mxu3 %v8250_v33  ;;  %v8359_v43 = vmul.f32 1e+30, %v6638_v40  ;;  %v581_v40 = vld [vmem:[%s12388_s3 + $0x10] sm:$0xff] }
 0x21a   :  { %1195 = vmatpush.bf16.msrb.mxu0 %v8180_v63  ;;  %12672 = vst [vmem:[#allocation75_spill] sm:$0xff] %v8359_v43 }
 0x21e   :  { %1196 = vmatpush.bf16.msrb.mxu0 %v1173_v21  ;;  %v8344_v21 = vmul.f32 1e+30, %v6642_v19 }
 0x220   :  { %12671 = vst [vmem:[#allocation74_spill] sm:$0xff] %v8344_v21 }
 0x225   :  { %6678 = vmatmul.msk.bf16.vlgmr.msra.gmra.mxu2 %vm362_vm5, %v7719_v16 }
 0x226   :  { %2523 = vmatpush.bf16.xpose.msra.mxu2 %v8266_v2 }
 0x227   :  { %6688 = vmatmul.msk.bf16.vlgmr.msrb.gmra.mxu3 %vm362_vm5, %v7729_v17 }
 0x228   :  { %2853 = vmatpush.bf16.xpose.msrb.mxu3 %v8214_v25  ;;  %v673_v63 = vpop.f32.mrf.mxu2  ;;  %v986_v58 = vpop.f32.mrf.mxu3 }
 0x229   :  { %v683_v16 = vmul.f32 0.35355338, %v673_v63  ;;  %v996_v35 = vmul.f32 0.35355338, %v986_v58  ;;  %v576_v58 = vld [vmem:[%s12387_s2 + $0x8] sm:$0xff] }
 0x22a   :  { %v6639_v8 = vadd.f32 -1.0, %v576_v58 }
 0x22b   :  { %v8350_v11 = vadd.f32 %v996_v35, %v8344_v21  ;;  %v8353_v38 = vadd.f32 %v683_v16, %v8344_v21  ;;  %v8365_v35 = vmul.f32 1e+30, %v6643_v12 }
 0x22d   :  { %v637_v25 = vpop.f32.mrf.mxu0  ;;  %v1016_v19 = vsel %vm703_vm13, %v8350_v11, -inf  ;;  %v704_v10 = vsel %vm703_vm13, %v8353_v38, -inf  ;;  %12674 = vst [vmem:[#allocation77_spill] sm:$0xff] %v8365_v35 }
 0x22e   :  { %v647_v63 = vmul.f32 0.35355338, %v637_v25  ;;  %2524 = vmatpush.bf16.xpose.msra.mxu2 %v8279_v46  ;;  %1017 = vmax.xlane.f32.xlu0 %v1016_v19 }
 0x22f   :  { %705 = vmax.xlane.f32.xlu2 %v704_v10 }
 0x230   :  { %2854 = vmatpush.bf16.xpose.msrb.mxu3 %v8233_v49  ;;  %v675_v52 = vpop.f32.mrf.mxu2  ;;  %v988_v16 = vpop.f32.mrf.mxu3  ;;  %v8374_v19 = vadd.f32 %v647_v63, %v8359_v43  ;;  %v6644_v49 = vadd.f32 -1.0, %v581_v40 }
 0x231   :  { %v684_v25 = vmul.f32 0.35355338, %v675_v52  ;;  %v997_v61 = vmul.f32 0.35355338, %v988_v16  ;;  %v577_v16 = vld [vmem:[%s12387_s2 + $0x10] sm:$0xff] }
 0x232   :  { %v691_v54 = vsel %vm362_vm5, %v8374_v19, -inf }
 0x233   :  { %v8377_v10 = vadd.f32 %v997_v61, %v8365_v35  ;;  %v8380_v12 = vadd.f32 %v684_v25, %v8365_v35  ;;  %v8392_v61 = vmul.f32 1e+30, %v6639_v8  ;;  %v8403_v8 = vpop.permute.xlu1 %3076 }
 0x234   :  { %12676 = vst [vmem:[#allocation79_spill] sm:$0xff] %v8403_v8 }
 0x235   :  { %v639_v39 = vpop.f32.mrf.mxu0  ;;  %6679 = vmatmul.msk.bf16.gmra.mxu2 %vm362_vm5, %v7791_v14  ;;  %v1019_v52 = vsel %vm703_vm13, %v8377_v10, -inf  ;;  %v707_v63 = vsel %vm703_vm13, %v8380_v12, -inf  ;;  %v8395_v14 = vmul.f32 1e+30, %v6644_v49  ;;  %v6640_v49 = vadd.f32 -1.0, %v577_v16 }
 0x236   :  { %v648_v58 = vmul.f32 0.35355338, %v639_v39  ;;  %692 = vmax.xlane.f32.xlu0 %v691_v54  ;;  %1020 = vmax.xlane.f32.xlu1 %v1019_v52  ;;  %v582_v39 = vld [vmem:[%s12388_s3 + $0x18] sm:$0xff] }
 0x237   :  { %6689 = vmatmul.msk.bf16.gmra.mxu3 %vm362_vm5, %v7797_v23  ;;  %12675 = vst [vmem:[#allocation78_spill] sm:$0xff] %v8395_v14  ;;  %708 = vmax.xlane.f32.xlu2 %v707_v63  ;;  %v6645_v63 = vadd.f32 -1.0, %v582_v39  ;;  %v8420_v16 = vmul.f32 1e+30, %v6640_v49 }
 0x238   :  { %2855 = vmatpush.bf16.xpose.msrb.mxu3 %v8250_v33  ;;  %v678_v40 = vpop.f32.mrf.mxu2  ;;  %v991_v25 = vpop.f32.mrf.mxu3  ;;  %v8406_v33 = vadd.f32 %v648_v58, %v8392_v61 }
 0x239   :  { %v685_v37 = vmul.f32 0.35355338, %v678_v40  ;;  %v998_v54 = vmul.f32 0.35355338, %v991_v25 }
 0x23a   :  { %v694_v58 = vsel %vm362_vm5, %v8406_v33, -inf }
 0x23b   :  { %v8409_v52 = vadd.f32 %v998_v54, %v8395_v14  ;;  %v8412_v15 = vadd.f32 %v685_v37, %v8395_v14  ;;  %v8422_v54 = vmul.f32 1e+30, %v6645_v63  ;;  %v8427_v37 = vld [vmem:[%s12391_s6 + $0x1] ss:$0 sm:$0xff] }
 0x23c   :  { %v8431_v39 = vadd.f32 %v8427_v37, %v8281_v13  ;;  %v8444_v13 = vpop.permute.xlu1 %2126 }
 0x23d   :  { %v642_v9 = vpop.f32.mrf.mxu0  ;;  %v1022_v18 = vsel %vm703_vm13, %v8409_v52, -inf  ;;  %v710_v40 = vsel %vm703_vm13, %v8412_v15, -inf  ;;  %12677 = vst [vmem:[#allocation80_spill] sm:$0xff] %v8422_v54 }
 0x23e   :  { %v649_v25 = vmul.f32 0.35355338, %v642_v9  ;;  %1023 = vmax.xlane.f32.xlu0 %v1022_v18  ;;  %695 = vmax.xlane.f32.xlu1 %v694_v58  ;;  %12678 = vst [vmem:[#allocation81_spill] sm:$0xff] %v8431_v39  ;;  %v578_v18 = vld [vmem:[%s12387_s2 + $0x18] sm:$0xff]  ;;  %v3117_v63 = vpack.c.bf16 %v8431_v39, %v8431_v39  ;;  %v8467_v39 = vadd.f32 %v8427_v37, %v8263_v50 }
 0x23f   :  { %711 = vmax.xlane.f32.xlu2 %v710_v40  ;;  %v6641_v51 = vadd.f32 -1.0, %v578_v18  ;;  %12679 = vst [vmem:[#allocation82_spill] sm:$0xff] %v8444_v13 }
 0x240   :  { %v680_v9 = vpop.f32.mrf.mxu2  ;;  %v993_v8 = vpop.f32.mrf.mxu3  ;;  %v8439_v58 = vadd.f32 %v649_v25, %v8420_v16  ;;  %v8454_v25 = vsel %vm362_vm5, %v3117_v63, 0  ;;  %12681 = vst [vmem:[#allocation84_spill] sm:$0xff] %v8467_v39 }
 0x241   :  { %v999_v49 = vmul.f32 0.35355338, %v993_v8  ;;  %v686_v8 = vmul.f32 0.35355338, %v680_v9  ;;  %v8463_v9 = vadd.f32 %v8427_v37, %v8257_v48 }
 0x242   :  { %v697_v18 = vsel %vm362_vm5, %v8439_v58, -inf }
 0x243   :  { %v8442_v34 = vadd.f32 %v999_v49, %v8422_v54  ;;  %12680 = vst [vmem:[#allocation83_spill] sm:$0xff] %v8463_v9  ;;  %v3116_v3 = vpack.c.bf16 %v8467_v39, %v8463_v9 }
 0x245   :  { %v644_v40 = vpop.f32.mrf.mxu0  ;;  %6686 = vmatmul.msk.bf16.vlgmr.msrb.gmra.mxu2 %vm362_vm5, %v7729_v17  ;;  %v1025_v29 = vsel %vm703_vm13, %v8442_v34, -inf  ;;  %v8459_v17 = vmul.f32 1e+30, %v6641_v51  ;;  %v8479_v48 = vsel %vm362_vm5, %v3116_v3, 0 }
 0x246   :  { %2827 = vmatpush.bf16.xpose.msrb.mxu2 %v8266_v2  ;;  %v650_v49 = vmul.f32 0.35355338, %v644_v40  ;;  %698 = vmax.xlane.f32.xlu1 %v697_v18  ;;  %v8472_v40 = vadd.f32 %v686_v8, %v8422_v54  ;;  %v3127_v18 = vpop.permute.xlu1 %3126 }
 0x247   :  { %6696 = vmatmul.msk.bf16.vlgmr.msra.gmra.mxu3 %vm362_vm5, %v7731_v22  ;;  %1026 = vmax.xlane.f32.xlu0 %v1025_v29 }
 0x248   :  { %3183 = vmatpush.bf16.xpose.msra.mxu3 %v8454_v25  ;;  %v959_v2 = vpop.f32.mrf.mxu2  ;;  %v8475_v51 = vadd.f32 %v650_v49, %v8459_v17  ;;  %v713_v29 = vsel %vm703_vm13, %v8472_v40, -inf  ;;  %v8488_v49 = vadd.f32 %v8427_v37, %v8218_v62 }
 0x249   :  { %v969_v13 = vmul.f32 0.35355338, %v959_v2 }
 0x24a   :  { %v1297_v63 = vpop.f32.mrf.mxu3  ;;  %v700_v8 = vsel %vm362_vm5, %v8475_v51, -inf  ;;  %12682 = vst [vmem:[#allocation85_spill] sm:$0xff] %v8488_v49 }
 0x24b   :  { %v1307_v50 = vmul.f32 0.35355338, %v1297_v63  ;;  %v8497_v9 = vadd.f32 %v969_v13, %v8359_v43 }
 0x24d   :  { %v8500_v39 = vadd.f32 %v1307_v50, %v8344_v21 }
 0x24e   :  { %2828 = vmatpush.bf16.xpose.msrb.mxu2 %v8279_v46  ;;  %714 = vmax.xlane.f32.xlu1 %v713_v29  ;;  %v8492_v46 = vadd.f32 %v8427_v37, %v8238_v59  ;;  %v1004_v29 = vsel %vm362_vm5, %v8497_v9, -inf  ;;  %v8514_v50 = vpop.permute.xlu1 %2432 }
 0x24f   :  { %701 = vmax.xlane.f32.xlu0 %v700_v8  ;;  %12684 = vst [vmem:[#allocation87_spill] sm:$0xff] %v8500_v39  ;;  %v1327_v13 = vsel %vm703_vm13, %v8500_v39, -inf }
 0x250   :  { %3184 = vmatpush.bf16.xpose.msra.mxu3 %v8479_v48  ;;  %12683 = vst [vmem:[#allocation86_spill] sm:$0xff] %v8492_v46  ;;  %v961_v3 = vpop.f32.mrf.mxu2  ;;  %v3115_v63 = vpack.c.bf16 %v8492_v46, %v8488_v49 }
 0x251   :  { %v970_v62 = vmul.f32 0.35355338, %v961_v3  ;;  %12685 = vst [vmem:[#allocation88_spill] sm:$0xff] %v8514_v50 }
 0x252   :  { %v1299_v2 = vpop.f32.mrf.mxu3  ;;  %v8507_v59 = vsel %vm362_vm5, %v3115_v63, 0 }
 0x253   :  { %v8517_v49 = vadd.f32 %v970_v62, %v8392_v61  ;;  %v1308_v46 = vmul.f32 0.35355338, %v1299_v2 }
 0x255   :  { %6687 = vmatmul.msk.bf16.gmra.mxu2 %vm362_vm5, %v7797_v23  ;;  %v1007_v45 = vsel %vm362_vm5, %v8517_v49, -inf }
 0x256   :  { %1005 = vmax.xlane.f32.xlu1 %v1004_v29  ;;  %v3129_v60 = vpop.permute.xlu1 %3128 }
 0x257   :  { %6697 = vmatmul.msk.bf16.gmra.mxu3 %vm362_vm5, %v7799_v27  ;;  %1328 = vmax.xlane.f32.xlu0 %v1327_v13  ;;  %v8533_v2 = vsel %vm362_vm5, %v3129_v60, 0 }
 0x258   :  { %3185 = vmatpush.bf16.xpose.msra.mxu3 %v8507_v59  ;;  %v964_v23 = vpop.f32.mrf.mxu2 }
 0x25a   :  { %v1302_v8 = vpop.f32.mrf.mxu3 }
 0x25b   :  { %v1309_v3 = vmul.f32 0.35355338, %v1302_v8  ;;  %v8527_v8 = vadd.f32 %v1308_v46, %v8365_v35 }
 0x25d   :  { %v8520_v63 = vadd.f32 %v1309_v3, %v8395_v14  ;;  %12687 = vst [vmem:[#allocation90_spill] sm:$0xff] %v8527_v8  ;;  %v1330_v46 = vsel %vm703_vm13, %v8527_v8, -inf }
 0x25e   :  { %1008 = vmax.xlane.f32.xlu1 %v1007_v45 }
 0x25f   :  { %12686 = vst [vmem:[#allocation89_spill] sm:$0xff] %v8520_v63  ;;  %v1333_v0 = vsel %vm703_vm13, %v8520_v63, -inf }
 0x260   :  { %1334 = vmax.xlane.f32.xlu2 %v1333_v0  ;;  %v966_v29 = vpop.f32.mrf.mxu2  ;;  %v971_v0 = vmul.f32 0.35355338, %v964_v23 }
 0x261   :  { %v972_v13 = vmul.f32 0.35355338, %v966_v29 }
 0x262   :  { %v1304_v50 = vpop.f32.mrf.mxu3 }
 0x263   :  { %v8530_v62 = vadd.f32 %v972_v13, %v8459_v17  ;;  %v8552_v13 = vsel %vm362_vm5, %v3127_v18, 0  ;;  %v1310_v39 = vmul.f32 0.35355338, %v1304_v50 }
 0x265   :  { %6694 = vmatmul.msk.bf16.vlgmr.msra.gmra.mxu2 %vm362_vm5, %v7731_v22  ;;  %v1013_v45 = vsel %vm362_vm5, %v8530_v62, -inf  ;;  %v8546_v22 = vadd.f32 %v971_v0, %v8420_v16 }
 0x266   :  { %3148 = vmatpush.bf16.xpose.msra.mxu2 %v8533_v2  ;;  %1331 = vmax.xlane.f32.xlu1 %v1330_v46 }
 0x267   :  { %6704 = vmatmul.msk.bf16.vlgmr.msrb.gmra.mxu3 %vm362_vm5, %v7733_v30 }
 0x268   :  { %3487 = vmatpush.bf16.xpose.msrb.mxu3 %v8454_v25  ;;  %1014 = vmax.xlane.f32.xlu2 %v1013_v45  ;;  %v1270_v60 = vpop.f32.mrf.mxu2  ;;  %v1010_v45 = vsel %vm362_vm5, %v8546_v22, -inf }
 0x269   :  { %v1280_v3 = vmul.f32 0.35355338, %v1270_v60 }
 0x26a   :  { %v1608_v29 = vpop.f32.mrf.mxu3 }
 0x26b   :  { %v8549_v23 = vadd.f32 %v1280_v3, %v8359_v43  ;;  %v8561_v3 = vadd.f32 %v1310_v39, %v8422_v54 }
 0x26d   :  { %v1315_v63 = vsel %vm362_vm5, %v8549_v23, -inf  ;;  %12688 = vst [vmem:[#allocation91_spill] sm:$0xff] %v8561_v3 }
 0x26e   :  { %3149 = vmatpush.bf16.xpose.msra.mxu2 %v8552_v13  ;;  %1316 = vmax.xlane.f32.xlu0 %v1315_v63  ;;  %v1618_v63 = vmul.f32 0.35355338, %v1608_v29 }
 0x26f   :  { %1011 = vmax.xlane.f32.xlu1 %v1010_v45  ;;  %v1336_v45 = vsel %vm703_vm13, %v8561_v3, -inf }
 0x270   :  { %3488 = vmatpush.bf16.xpose.msrb.mxu3 %v8479_v48  ;;  %v1272_v0 = vpop.f32.mrf.mxu2 }
 0x271   :  { %v1281_v46 = vmul.f32 0.35355338, %v1272_v0 }
 0x272   :  { %v1610_v60 = vpop.f32.mrf.mxu3 }
 0x273   :  { %v8564_v18 = vadd.f32 %v1281_v46, %v8392_v61  ;;  %v1619_v8 = vmul.f32 0.35355338, %v1610_v60 }
 0x275   :  { %12689 = vst [vmem:[#allocation92_spill] sm:$0xff] %v8564_v18  ;;  %6695 = vmatmul.msk.bf16.gmra.mxu2 %vm362_vm5, %v7799_v27  ;;  %v1318_v50 = vsel %vm362_vm5, %v8564_v18, -inf  ;;  %v8576_v46 = vadd.f32 %v1619_v8, %v8365_v35  ;;  %v8579_v27 = vadd.f32 %v1618_v63, %v8344_v21 }
 0x276   :  { %1319 = vmax.xlane.f32.xlu0 %v1318_v50 }
 0x277   :  { %6705 = vmatmul.msk.bf16.gmra.mxu3 %vm362_vm5, %v7805_v32  ;;  %1337 = vmax.xlane.f32.xlu1 %v1336_v45  ;;  %12690 = vst [vmem:[#allocation93_spill] sm:$0xff] %v8576_v46  ;;  %v1641_v29 = vsel %vm703_vm13, %v8576_v46, -inf  ;;  %v1638_v50 = vsel %vm703_vm13, %v8579_v27, -inf  ;;  %v8645_v46 = vpop.permute.xlu2 %1794 }
 0x278   :  { %3489 = vmatpush.bf16.xpose.msrb.mxu3 %v8507_v59  ;;  %v1275_v39 = vpop.f32.mrf.mxu2  ;;  %12691 = vst [vmem:[#allocation94_spill] sm:$0xff] %v8579_v27 }
 0x279   :  { %v1282_v3 = vmul.f32 0.35355338, %v1275_v39  ;;  %12701 = vst [vmem:[#allocation104_spill] sm:$0xff] %v8645_v46 }
 0x27a   :  { %v1613_v0 = vpop.f32.mrf.mxu3 }
 0x27b   :  { %v1620_v60 = vmul.f32 0.35355338, %v1613_v0  ;;  %v8589_v8 = vadd.f32 %v1282_v3, %v8420_v16 }
 0x27d   :  { %v8586_v28 = vadd.f32 %v1620_v60, %v8395_v14  ;;  %12693 = vst [vmem:[#allocation96_spill] sm:$0xff] %v8589_v8 }
 0x27e   :  { %1642 = vmax.xlane.f32.xlu0 %v1641_v29 }
 0x27f   :  { %1639 = vmax.xlane.f32.xlu1 %v1638_v50  ;;  %12692 = vst [vmem:[#allocation95_spill] sm:$0xff] %v8586_v28  ;;  %v1644_v39 = vsel %vm703_vm13, %v8586_v28, -inf }
 0x280   :  { %v1277_v18 = vpop.f32.mrf.mxu2 }
 0x281   :  { %v1283_v0 = vmul.f32 0.35355338, %v1277_v18 }
 0x282   :  { %v1615_v45 = vpop.f32.mrf.mxu3 }
 0x283   :  { %v1621_v36 = vmul.f32 0.35355338, %v1615_v45  ;;  %v8607_v60 = vadd.f32 %v1283_v0, %v8459_v17 }
 0x285   :  { %v8592_v63 = vadd.f32 %v1621_v36, %v8422_v54  ;;  %6702 = vmatmul.msk.bf16.vlgmr.msrb.gmra.mxu2 %vm362_vm5, %v7733_v30  ;;  %v1321_v36 = vsel %vm362_vm5, %v8589_v8, -inf  ;;  %12695 = vst [vmem:[#allocation98_spill] sm:$0xff] %v8607_v60 }
 0x286   :  { %3461 = vmatpush.bf16.xpose.msrb.mxu2 %v8533_v2  ;;  %1645 = vmax.xlane.f32.xlu0 %v1644_v39  ;;  %v1324_v39 = vsel %vm362_vm5, %v8607_v60, -inf }
 0x287   :  { %12694 = vst [vmem:[#allocation97_spill] sm:$0xff] %v8592_v63  ;;  %6712 = vmatmul.msk.bf16.vlgmr.msra.gmra.mxu3 %vm362_vm5, %v7857_v5  ;;  %v1647_v29 = vsel %vm703_vm13, %v8592_v63, -inf  ;;  %1322 = vmax.xlane.f32.xlu1 %v1321_v36 }
 0x288   :  { %3791 = vmatpush.bf16.xpose.msra.mxu3 %v8454_v25  ;;  %1648 = vmax.xlane.f32.xlu2 %v1647_v29  ;;  %v1581_v30 = vpop.f32.mrf.mxu2 }
 0x289   :  { %v1591_v45 = vmul.f32 0.35355338, %v1581_v30 }
 0x28a   :  { %v1945_v3 = vpop.f32.mrf.mxu3 }
 0x28b   :  { %v1955_v18 = vmul.f32 0.35355338, %v1945_v3 }
 0x28d   :  { %v8610_v50 = vadd.f32 %v1955_v18, %v8344_v21  ;;  %v8619_v18 = vadd.f32 %v1591_v45, %v8359_v43 }
 0x28e   :  { %3462 = vmatpush.bf16.xpose.msrb.mxu2 %v8552_v13  ;;  %1325 = vmax.xlane.f32.xlu0 %v1324_v39 }
 0x28f   :  { %12696 = vst [vmem:[#allocation99_spill] sm:$0xff] %v8610_v50  ;;  %v1975_v28 = vsel %vm703_vm13, %v8610_v50, -inf }
 0x290   :  { %3792 = vmatpush.bf16.xpose.msra.mxu3 %v8479_v48  ;;  %1976 = vmax.xlane.f32.xlu2 %v1975_v28  ;;  %v1583_v29 = vpop.f32.mrf.mxu2  ;;  %12697 = vst [vmem:[#allocation100_spill] sm:$0xff] %v8619_v18  ;;  %v1626_v28 = vsel %vm362_vm5, %v8619_v18, -inf }
 0x291   :  { %v1592_v36 = vmul.f32 0.35355338, %v1583_v29 }
 0x292   :  { %v1947_v0 = vpop.f32.mrf.mxu3 }
 0x293   :  { %v1956_v3 = vmul.f32 0.35355338, %v1947_v0  ;;  %v8622_v30 = vadd.f32 %v1592_v36, %v8392_v61  ;;  %v8638_v36 = vpop.permute.xlu0 %1483 }
 0x295   :  { %12698 = vst [vmem:[#allocation101_spill] sm:$0xff] %v8622_v30  ;;  %v8625_v63 = vadd.f32 %v1956_v3, %v8365_v35  ;;  %6703 = vmatmul.msk.bf16.gmra.mxu2 %vm362_vm5, %v7805_v32  ;;  %v1629_v39 = vsel %vm362_vm5, %v8622_v30, -inf }
 0x296   :  { %1627 = vmax.xlane.f32.xlu0 %v1626_v28 }
 0x297   :  { %12699 = vst [vmem:[#allocation102_spill] sm:$0xff] %v8625_v63  ;;  %6713 = vmatmul.msk.bf16.gmra.mxu3 %vm362_vm5, %v7965_v6  ;;  %v1978_v45 = vsel %vm703_vm13, %v8625_v63, -inf }
 0x298   :  { %3793 = vmatpush.bf16.xpose.msra.mxu3 %v8507_v59  ;;  %1979 = vmax.xlane.f32.xlu1 %v1978_v45  ;;  %v1586_v29 = vpop.f32.mrf.mxu2 }
 0x299   :  { %1630 = vmax.xlane.f32.xlu2 %v1629_v39  ;;  %v1593_v32 = vmul.f32 0.35355338, %v1586_v29 }
 0x29a   :  { %v1950_v0 = vpop.f32.mrf.mxu3 }
 0x29b   :  { %v8641_v3 = vadd.f32 %v1593_v32, %v8420_v16  ;;  %v1957_v30 = vmul.f32 0.35355338, %v1950_v0 }
 0x29d   :  { %12700 = vst [vmem:[#allocation103_spill] sm:$0xff] %v8641_v3  ;;  %v1632_v50 = vsel %vm362_vm5, %v8641_v3, -inf  ;;  %v8650_v39 = vadd.f32 %v1957_v30, %v8395_v14 }
 0x29f   :  { %12702 = vst [vmem:[#allocation105_spill] sm:$0xff] %v8650_v39 }
 0x2a0   :  { %1633 = vmax.xlane.f32.xlu1 %v1632_v50  ;;  %v1588_v63 = vpop.f32.mrf.mxu2  ;;  %v12704_v50 = vld [vmem:[#allocation14_spill] sm:$0xff] }
 0x2a1   :  { %v1594_v18 = vmul.f32 0.35355338, %v1588_v63  ;;  %v8647_v45 = vpop.xlane.xlu0 %1017  ;;  %v1981_v63 = vsel %vm703_vm13, %v8650_v39, -inf }
 0x2a2   :  { %v1952_v28 = vpop.f32.mrf.mxu3  ;;  %v706_v0 = vpop.xlane.xlu2 %705 }
 0x2a3   :  { %v8653_v29 = vadd.f32 %v1594_v18, %v8459_v17  ;;  %v1958_v3 = vmul.f32 0.35355338, %v1952_v28 }
 0x2a5   :  { %12703 = vst [vmem:[#allocation106_spill] sm:$0xff] %v8653_v29  ;;  %6710 = vmatmul.msk.bf16.vlgmr.msra.gmra.mxu2 %vm362_vm5, %v7857_v5  ;;  %v1635_v32 = vsel %vm362_vm5, %v8653_v29, -inf  ;;  %v8668_v28 = vadd.f32 %v1958_v3, %v8422_v54 }
 0x2a6   :  { %3765 = vmatpush.bf16.xpose.msra.mxu2 %v8533_v2  ;;  %1636 = vmax.xlane.f32.xlu2 %v1635_v32 }
 0x2a7   :  { %6720 = vmatmul.msk.bf16.vlgmr.msrb.gmra.mxu3 %vm362_vm5, %v12704_v50  ;;  %12705 = vst [vmem:[#allocation14_spill] sm:$0xff] %v8668_v28 }
 0x2a8   :  { %4095 = vmatpush.bf16.xpose.msrb.mxu3 %v8454_v25  ;;  %1982 = vmax.xlane.f32.xlu1 %v1981_v63  ;;  %v1909_v18 = vpop.f32.mrf.mxu2 }
 0x2a9   :  { %v1919_v30 = vmul.f32 0.35355338, %v1909_v18  ;;  %v693_v27 = vpop.xlane.xlu0 %692  ;;  %v8665_v29 = vpop.xlane.xlu1 %1020 }
 0x2aa   :  { %v2249_v5 = vpop.f32.mrf.mxu3  ;;  %v716_v60 = vmax.f32 %v693_v27, %v706_v0  ;;  %v1984_v27 = vsel %vm703_vm13, %v8668_v28, -inf  ;;  %v709_v3 = vpop.xlane.xlu2 %708 }
 0x2ab   :  { %v8671_v8 = vadd.f32 %v1919_v30, %v8359_v43  ;;  %v2259_v63 = vmul.f32 0.35355338, %v2249_v5 }
 0x2ac   :  { %v720_v25 = vsub.f32 %v8374_v19, %v716_v60  ;;  %v732_v46 = vsub.f32 %v8353_v38, %v716_v60 }
 0x2ad   :  { %12706 = vst [vmem:[#allocation107_spill] sm:$0xff] %v8671_v8  ;;  %v1963_v32 = vsel %vm362_vm5, %v8671_v8, -inf  ;;  %v8684_v5 = vadd.f32 %v2259_v63, %v8344_v21 }
 0x2ae   :  { %v724_v18 = vmul.f32 1.442695, %v720_v25  ;;  %3766 = vmatpush.bf16.xpose.msra.mxu2 %v8552_v13  ;;  %1985 = vmax.xlane.f32.xlu2 %v1984_v27  ;;  %v736_v19 = vmul.f32 1.442695, %v732_v46 }
 0x2af   :  { %12707 = vst [vmem:[#allocation108_spill] sm:$0xff] %v8684_v5  ;;  %v2279_v46 = vsel %vm703_vm13, %v8684_v5, -inf }
 0x2b0   :  { %4096 = vmatpush.bf16.xpose.msrb.mxu3 %v8479_v48  ;;  %6942 = vpow2.f32 %v724_v18  ;;  %1964 = vmax.xlane.f32.xlu1 %v1963_v32  ;;  %v1911_v0 = vpop.f32.mrf.mxu2 }
 0x2b1   :  { %v8681_v38 = vpop.xlane.xlu0 %1023  ;;  %v696_v60 = vpop.xlane.xlu1 %695  ;;  %6944 = vpow2.f32 %v736_v19  ;;  %v1920_v32 = vmul.f32 0.35355338, %v1911_v0 }
 0x2b2   :  { %v2251_v30 = vpop.f32.mrf.mxu3  ;;  %v717_v25 = vmax.f32 %v696_v60, %v709_v3  ;;  %v712_v0 = vpop.xlane.xlu2 %711 }
 0x2b3   :  { %v8701_v60 = vadd.f32 %v1920_v32, %v8392_v61 }
 0x2b4   :  { %v721_v39 = vsub.f32 %v8406_v33, %v717_v25  ;;  %v733_v28 = vsub.f32 %v8380_v12, %v717_v25  ;;  %v8706_v25 = vadd.f32 %v8427_v37, %v8330_v1 }
 0x2b5   :  { %6711 = vmatmul.msk.bf16.gmra.mxu2 %vm362_vm5, %v7965_v6  ;;  %12708 = vst [vmem:[#allocation109_spill] sm:$0xff] %v8701_v60 }
 0x2b6   :  { %v6943_v48 = vpop.eup %6942  ;;  %v726_v18 = vmul.f32 1.442695, %v721_v39  ;;  %v738_v63 = vmul.f32 1.442695, %v733_v28  ;;  %2280 = vmax.xlane.f32.xlu2 %v2279_v46  ;;  %12709 = vst [vmem:[#allocation110_spill] sm:$0xff] %v8706_v25 }
 0x2b7   :  { %6721 = vmatmul.msk.bf16.gmra.mxu3 %vm362_vm5, %v7967_v55  ;;  %v744_v33 = vsel %vm362_vm5, %v6943_v48, 0.0  ;;  %v6945_v3 = vpop.eup %6944 }
 0x2b8   :  { %4097 = vmatpush.bf16.xpose.msrb.mxu3 %v8507_v59  ;;  %v1914_v27 = vpop.f32.mrf.mxu2  ;;  %745 = vadd.xlane.f32.xlu0 %v744_v33  ;;  %6946 = vpow2.f32 %v726_v18  ;;  %v756_v59 = vsel %vm703_vm13, %v6945_v3, 0.0  ;;  %v1966_v18 = vsel %vm362_vm5, %v8701_v60, -inf  ;;  %v2260_v33 = vmul.f32 0.35355338, %v2251_v30 }
 0x2b9   :  { %6948 = vpow2.f32 %v738_v63  ;;  %v699_v6 = vpop.xlane.xlu1 %698  ;;  %v1921_v46 = vmul.f32 0.35355338, %v1914_v27  ;;  %v4359_v30 = vpack.c.bf16 %v8706_v25, %v8706_v25 }
 0x2ba   :  { %v8696_v12 = vpop.f32.mrf.mxu3  ;;  %v8698_v19 = vpop.xlane.xlu0 %1026  ;;  %v718_v39 = vmax.f32 %v699_v6, %v712_v0 }
 0x2bc   :  { %v722_v5 = vsub.f32 %v8439_v58, %v718_v39  ;;  %v734_v1 = vsub.f32 %v8412_v15, %v718_v39  ;;  %v1498_v58 = vsel %vm874_vm12, %v8211_v47, 0  ;;  %v8729_v39 = vadd.f32 %v2260_v33, %v8365_v35 }
 0x2be   :  { %v6947_v28 = vpop.eup %6946  ;;  %757 = vadd.xlane.f32.xlu2 %v756_v59  ;;  %v728_v15 = vmul.f32 1.442695, %v722_v5  ;;  %v8743_v5 = vadd.f32 %v8427_v37, %v8314_v31 }
 0x2bf   :  { %v8710_v63 = vpop.eup %6948  ;;  %v747_v6 = vsel %vm362_vm5, %v6947_v28, 0.0  ;;  %v832_v0 = vpack.c.bf16 %v6947_v28, %v6943_v48  ;;  %v8726_v48 = vadd.f32 %v1921_v46, %v8420_v16  ;;  %v740_v28 = vmul.f32 1.442695, %v734_v1 }
 0x2c0   :  { %v8713_v32 = vpop.f32.mrf.mxu2  ;;  %1967 = vmax.xlane.f32.xlu0 %v1966_v18  ;;  %v844_v8 = vpack.c.bf16 %v8710_v63, %v6945_v3  ;;  %748 = vadd.xlane.f32.xlu1 %v747_v6  ;;  %6950 = vpow2.f32 %v728_v15  ;;  %v2261_v15 = vmul.f32 0.35355338, %v8696_v12 }
 0x2c1   :  { %v715_v59 = vpop.xlane.xlu1 %714  ;;  %6652 = vmatmul.msk.bf16.vlgmr.msrb.gmra.mxu1 %vm362_vm5, %v832_v0  ;;  %6952 = vpow2.f32 %v740_v28  ;;  %v759_v28 = vsel %vm703_vm13, %v8710_v63, 0.0 }
 0x2c2   :  { %v2256_v27 = vpop.f32.mrf.mxu3  ;;  %v702_v60 = vpop.xlane.xlu0 %701  ;;  %6650 = vmatmul.msk.bf16.vlgmr.msra.gmra.mxu0 %vm703_vm13, %v844_v8  ;;  %1539 = vmatpush.bf16.msrb.mxu1 %v8189_v57  ;;  %v12710_v8 = vld [vmem:[#allocation15_spill] sm:$0xff]  ;;  %v8739_v57 = vsel %vm362_vm5, %v4359_v30, 0  ;;  %v8776_v30 = vadd.f32 %v8427_v37, %v8296_v56 }
 0x2c3   :  { %v719_v3 = vmax.f32 %v702_v60, %v715_v59  ;;  %1505 = vmatpush.bf16.msra.mxu0 %v1498_v58  ;;  %12711 = vst [vmem:[#allocation15_spill] sm:$0xff] %v8743_v5  ;;  %v8747_v60 = vadd.f32 %v8427_v37, %v8324_v41  ;;  %v2282_v41 = vsel %vm703_vm13, %v8729_v39, -inf }
 0x2c4   :  { %12713 = vst [vmem:[#allocation112_spill] sm:$0xff] %v8776_v30 }
 0x2c5   :  { %6718 = vmatmul.msk.bf16.vlgmr.msrb.gmra.mxu2 %vm362_vm5, %v12704_v50  ;;  %v723_v47 = vsub.f32 %v8475_v51, %v719_v3  ;;  %v735_v18 = vsub.f32 %v8472_v40, %v719_v3  ;;  %12712 = vst [vmem:[#allocation111_spill] sm:$0xff] %v8747_v60  ;;  %v2262_v50 = vmul.f32 0.35355338, %v2256_v27  ;;  %v1969_v40 = vsel %vm362_vm5, %v8726_v48, -inf }
 0x2c6   :  { %4069 = vmatpush.bf16.xpose.msrb.mxu2 %v8533_v2  ;;  %1540 = vmatpush.bf16.msrb.mxu1 %v8160_v53  ;;  %v4358_v33 = vpack.c.bf16 %v8747_v60, %v8743_v5  ;;  %v8766_v1 = vpop.eup %6950 }
 0x2c7   :  { %6728 = vmatmul.msk.bf16.vlgmr.msra.gmra.mxu3 %vm362_vm5, %v12710_v8  ;;  %v730_v51 = vmul.f32 1.442695, %v723_v47  ;;  %v742_v2 = vmul.f32 1.442695, %v735_v18  ;;  %1506 = vmatpush.bf16.msra.mxu0 %v8187_v7  ;;  %v8762_v0 = vadd.f32 %v2262_v50, %v8422_v54  ;;  %v8772_v59 = vpop.eup %6952 }
 0x2c8   :  { %4425 = vmatpush.bf16.xpose.msra.mxu3 %v8739_v57  ;;  %1970 = vmax.xlane.f32.xlu2 %v1969_v40  ;;  %v8754_v31 = vpop.f32.mrf.mxu2  ;;  %v8770_v27 = vsel %vm362_vm5, %v4358_v33, 0 }
 0x2c9   :  { %2283 = vmax.xlane.f32.xlu0 %v2282_v41  ;;  %6954 = vpow2.f32 %v730_v51  ;;  %v1006_v53 = vpop.xlane.xlu1 %1005 }
 0x2ca   :  { %v2553_v46 = vpop.f32.mrf.mxu3  ;;  %6956 = vpow2.f32 %v742_v2  ;;  %v1028_v6 = vmax.f32 %v1006_v53, %v8647_v45  ;;  %v8808_v2 = vadd.f32 %v2261_v15, %v8395_v14 }
 0x2cb   :  { %1507 = vmatpush.bf16.msra.mxu0 %v8638_v36  ;;  %v2563_v45 = vmul.f32 0.35355338, %v2553_v46 }
 0x2cc   :  { %v1032_v7 = vsub.f32 %v8497_v9, %v1028_v6  ;;  %v2288_v9 = vsel %vm703_vm13, %v8762_v0, -inf  ;;  %v1044_v3 = vsub.f32 %v8350_v11, %v1028_v6 }
 0x2cd   :  { %v8804_v63 = vadd.f32 %v2563_v45, %v8344_v21  ;;  %v1329_v45 = vpop.xlane.xlu0 %1328 }
 0x2ce   :  { %4070 = vmatpush.bf16.xpose.msrb.mxu2 %v8552_v13  ;;  %v1036_v58 = vmul.f32 1.442695, %v1032_v7  ;;  %v8785_v13 = vadd.f32 %v8427_v37, %v8302_v44  ;;  %v1048_v51 = vmul.f32 1.442695, %v1044_v3 }
 0x2cf   :  { %v8781_v36 = vpop.eup %6954 }
 0x2d0   :  { %4426 = vmatpush.bf16.xpose.msra.mxu3 %v8770_v27  ;;  %12714 = vst [vmem:[#allocation113_spill] sm:$0xff] %v8785_v13  ;;  %2289 = vmax.xlane.f32.xlu2 %v2288_v9  ;;  %v2224_v56 = vpop.f32.mrf.mxu2  ;;  %v8791_v47 = vpop.eup %6956  ;;  %6958 = vpow2.f32 %v1036_v58  ;;  %v833_v50 = vpack.c.bf16 %v8781_v36, %v8766_v1  ;;  %v4357_v11 = vpack.c.bf16 %v8785_v13, %v8776_v30  ;;  %v12727_v30 = vld [vmem:[#allocation89_spill] sm:$0xff] }
 0x2d1   :  { %760 = vadd.xlane.f32.xlu0 %v759_v28  ;;  %v1009_v40 = vpop.xlane.xlu1 %1008  ;;  %v845_v44 = vpack.c.bf16 %v8791_v47, %v8772_v59  ;;  %6960 = vpow2.f32 %v1048_v51  ;;  %v2233_v58 = vmul.f32 0.35355338, %v2224_v56  ;;  %v2232_v56 = vmul.f32 0.35355338, %v8754_v31 }
 0x2d2   :  { %v2555_v18 = vpop.f32.mrf.mxu3  ;;  %v1029_v12 = vmax.f32 %v1009_v40, %v8665_v29  ;;  %6653 = vmatmul.msk.bf16.gmra.mxu1 %vm362_vm5, %v833_v50  ;;  %v1922_v29 = vmul.f32 0.35355338, %v8713_v32  ;;  %v8818_v53 = vsel %vm362_vm5, %v4357_v11, 0 }
 0x2d3   :  { %v8797_v37 = vpop.xlane.xlu2 %1334  ;;  %6651 = vmatmul.msk.bf16.gmra.mxu0 %vm703_vm13, %v845_v44  ;;  %v8833_v40 = vadd.f32 %v2233_v58, %v8392_v61 }
 0x2d4   :  { %v1033_v41 = vsub.f32 %v8517_v49, %v1029_v12  ;;  %v1045_v46 = vsub.f32 %v8377_v10, %v1029_v12  ;;  %v2583_v49 = vsel %vm703_vm13, %v8804_v63, -inf  ;;  %v8829_v28 = vadd.f32 %v1922_v29, %v8459_v17 }
 0x2d5   :  { %6719 = vmatmul.msk.bf16.gmra.mxu2 %vm362_vm5, %v7967_v55  ;;  %v2285_v55 = vsel %vm703_vm13, %v8808_v2, -inf }
 0x2d6   :  { %v6959_v33 = vpop.eup %6958  ;;  %v1038_v6 = vmul.f32 1.442695, %v1033_v41  ;;  %v1050_v7 = vmul.f32 1.442695, %v1045_v46  ;;  %v1972_v12 = vsel %vm362_vm5, %v8829_v28, -inf }
 0x2d7   :  { %6729 = vmatmul.msk.bf16.gmra.mxu3 %vm362_vm5, %v7969_v20  ;;  %v1056_v32 = vsel %vm362_vm5, %v6959_v33, 0.0  ;;  %v8835_v44 = vpop.eup %6960 }
 0x2d8   :  { %4427 = vmatpush.bf16.xpose.msra.mxu3 %v8818_v53  ;;  %2584 = vmax.xlane.f32.xlu2 %v2583_v49  ;;  %v2227_v10 = vpop.f32.mrf.mxu2  ;;  %6962 = vpow2.f32 %v1038_v6 }
 0x2d9   :  { %2286 = vmax.xlane.f32.xlu0 %v2285_v55  ;;  %1057 = vadd.xlane.f32.xlu1 %v1056_v32  ;;  %6964 = vpow2.f32 %v1050_v7  ;;  %v8826_v15 = vpop.xlane.xlu1 %1331  ;;  %v2234_v46 = vmul.f32 0.35355338, %v2227_v10  ;;  %v2564_v7 = vmul.f32 0.35355338, %v2555_v18  ;;  %v1809_v32 = vsel %vm874_vm12, %v8225_v42, 0 }
 0x2da   :  { %v2558_v9 = vpop.f32.mrf.mxu3  ;;  %v8869_v42 = vadd.f32 %v2232_v56, %v8359_v43 }
 0x2db   :  { %v1015_v3 = vpop.xlane.xlu2 %1014 }
 0x2dc   :  { %v1031_v50 = vmax.f32 %v1015_v3, %v8698_v19 }
 0x2de   :  { %v6963_v11 = vpop.eup %6962  ;;  %v1035_v29 = vsub.f32 %v8530_v62, %v1031_v50  ;;  %v1047_v55 = vsub.f32 %v8442_v34, %v1031_v50  ;;  %v8861_v34 = vsel %vm362_vm5, %v8320_v26, 0  ;;  %v8866_v50 = vadd.f32 %v2234_v46, %v8420_v16  ;;  %v12716_v46 = vld [vmem:[#allocation56_spill] sm:$0xff] }
 0x2df   :  { %v8840_v51 = vpop.eup %6964  ;;  %v1144_v41 = vpack.c.bf16 %v6963_v11, %v6959_v33  ;;  %v1059_v19 = vsel %vm362_vm5, %v6963_v11, 0.0  ;;  %v2270_v33 = vsel %vm362_vm5, %v8833_v40, -inf  ;;  %v8876_v26 = vadd.f32 %v2564_v7, %v8365_v35 }
 0x2e0   :  { %v8843_v6 = vpop.f32.mrf.mxu2  ;;  %v1156_v49 = vpack.c.bf16 %v8840_v51, %v8835_v44  ;;  %1060 = vadd.xlane.f32.xlu2 %v1059_v19  ;;  %v1042_v3 = vmul.f32 1.442695, %v1035_v29 }
 0x2e1   :  { %1973 = vmax.xlane.f32.xlu0 %v1972_v12  ;;  %v1317_v10 = vpop.xlane.xlu0 %1316  ;;  %2271 = vmax.xlane.f32.xlu1 %v2270_v33  ;;  %v12715_v12 = vld [vmem:[#allocation16_spill] sm:$0xff]  ;;  %v2586_v19 = vsel %vm703_vm13, %v8876_v26, -inf }
 0x2e2   :  { %v8849_v31 = vpop.f32.mrf.mxu3  ;;  %v1012_v62 = vpop.xlane.xlu1 %1011  ;;  %v8855_v58 = vmax.f32 %v1317_v10, %v1329_v45  ;;  %6660 = vmatmul.msk.bf16.vlgmr.msra.gmra.mxu1 %vm362_vm5, %v1144_v41  ;;  %v1054_v45 = vmul.f32 1.442695, %v1047_v55  ;;  %6966 = vpow2.f32 %v1042_v3  ;;  %v12718_v33 = vld [vmem:[#allocation72_spill] sm:$0xff]  ;;  %v12720_v3 = vld [vmem:[#allocation90_spill] sm:$0xff] }
 0x2e3   :  { %v1030_v18 = vmax.f32 %v1012_v62, %v8681_v38  ;;  %6658 = vmatmul.msk.bf16.vlgmr.msrb.gmra.mxu0 %vm703_vm13, %v1156_v49  ;;  %1850 = vmatpush.bf16.msra.mxu1 %v8199_v4  ;;  %v8900_v10 = vsel %vm362_vm5, %v12718_v33, 0  ;;  %v12719_v62 = vld [vmem:[#allocation104_spill] sm:$0xff] }
 0x2e4   :  { %1816 = vmatpush.bf16.msrb.mxu0 %v1809_v32  ;;  %v1343_v4 = vsub.f32 %v8549_v23, %v8855_v58  ;;  %6968 = vpow2.f32 %v1054_v45  ;;  %v2267_v23 = vsel %vm362_vm5, %v8869_v42, -inf }
 0x2e5   :  { %v1034_v38 = vsub.f32 %v8546_v22, %v1030_v18  ;;  %v1046_v11 = vsub.f32 %v8409_v52, %v1030_v18  ;;  %6726 = vmatmul.msk.bf16.vlgmr.msra.gmra.mxu2 %vm362_vm5, %v12710_v8  ;;  %v2565_v52 = vmul.f32 0.35355338, %v2558_v9  ;;  %v2273_v8 = vsel %vm362_vm5, %v8866_v50, -inf }
 0x2e6   :  { %4390 = vmatpush.bf16.xpose.msra.mxu2 %v8861_v34  ;;  %v1347_v9 = vmul.f32 1.442695, %v1343_v4 }
 0x2e7   :  { %6736 = vmatmul.msk.bf16.vlgmr.msrb.gmra.mxu3 %vm362_vm5, %v12715_v12  ;;  %v1040_v56 = vmul.f32 1.442695, %v1034_v38  ;;  %v1052_v41 = vmul.f32 1.442695, %v1046_v11  ;;  %1851 = vmatpush.bf16.msra.mxu1 %v8158_v24  ;;  %v8896_v55 = vadd.f32 %v2565_v52, %v8395_v14  ;;  %v12721_v38 = vld [vmem:[#allocation92_spill] sm:$0xff] }
 0x2e8   :  { %4729 = vmatpush.bf16.xpose.msrb.mxu3 %v8739_v57  ;;  %v2526_v22 = vpop.f32.mrf.mxu2  ;;  %1817 = vmatpush.bf16.msrb.mxu0 %v12716_v46  ;;  %v8903_v32 = vpop.eup %6966  ;;  %v2566_v46 = vmul.f32 0.35355338, %v8849_v31  ;;  %v12722_v31 = vld [vmem:[#allocation87_spill] sm:$0xff] }
 0x2e9   :  { %2274 = vmax.xlane.f32.xlu2 %v2273_v8  ;;  %v1320_v7 = vpop.xlane.xlu0 %1319  ;;  %6970 = vpow2.f32 %v1040_v56  ;;  %2268 = vmax.xlane.f32.xlu0 %v2267_v23  ;;  %12717 = vst [vmem:[#allocation16_spill] sm:$0xff] %v8896_v55  ;;  %v2589_v56 = vsel %vm703_vm13, %v8896_v55, -inf  ;;  %v2235_v8 = vmul.f32 0.35355338, %v8843_v6  ;;  %v12751_v55 = vld [vmem:[#allocation95_spill] sm:$0xff] }
 0x2ea   :  { %v2857_v29 = vpop.f32.mrf.mxu3  ;;  %2587 = vmax.xlane.f32.xlu1 %v2586_v19  ;;  %v8892_v24 = vpop.xlane.xlu1 %1337  ;;  %6972 = vpow2.f32 %v1052_v41  ;;  %v1340_v49 = vmax.f32 %v1320_v7, %v8826_v15  ;;  %v1068_v41 = vsel %vm703_vm13, %v8835_v44, 0.0  ;;  %v1071_v19 = vsel %vm703_vm13, %v8840_v51, 0.0 }
 0x2eb   :  { %v8906_v18 = vpop.eup %6968  ;;  %6974 = vpow2.f32 %v1347_v9 }
 0x2ec   :  { %1818 = vmatpush.bf16.msrb.mxu0 %v12719_v62  ;;  %v1356_v45 = vsub.f32 %v12720_v3, %v1340_v49  ;;  %v1344_v11 = vsub.f32 %v12721_v38, %v1340_v49  ;;  %v1355_v49 = vsub.f32 %v12722_v31, %v8855_v58  ;;  %v8940_v3 = vadd.f32 %v2566_v46, %v8422_v54 }
 0x2ed   :  { %v8943_v38 = vadd.f32 %v2235_v8, %v8459_v17 }
 0x2ee   :  { %4391 = vmatpush.bf16.xpose.msra.mxu2 %v8900_v10  ;;  %v1361_v33 = vmul.f32 1.442695, %v1356_v45  ;;  %v1349_v62 = vmul.f32 1.442695, %v1344_v11  ;;  %12723 = vst [vmem:[#allocation56_spill] sm:$0xff] %v8940_v3  ;;  %v2592_v46 = vsel %vm703_vm13, %v8940_v3, -inf }
 0x2ef   :  { %v8910_v15 = vpop.eup %6970  ;;  %v1359_v58 = vmul.f32 1.442695, %v1355_v49  ;;  %v2276_v8 = vsel %vm362_vm5, %v8943_v38, -inf  ;;  %v12732_v3 = vld [vmem:[#allocation91_spill] sm:$0xff] }
 0x2f0   :  { %4730 = vmatpush.bf16.xpose.msrb.mxu3 %v8770_v27  ;;  %v2528_v4 = vpop.f32.mrf.mxu2  ;;  %v8917_v52 = vpop.eup %6972  ;;  %v1145_v9 = vpack.c.bf16 %v8903_v32, %v8910_v15  ;;  %6976 = vpow2.f32 %v1361_v33 }
 0x2f1   :  { %2590 = vmax.xlane.f32.xlu2 %v2589_v56  ;;  %v8925_v7 = vpop.xlane.xlu0 %1642  ;;  %1069 = vadd.xlane.f32.xlu0 %v1068_v41  ;;  %v1157_v6 = vpack.c.bf16 %v8906_v18, %v8917_v52  ;;  %v6975_v51 = vpop.eup %6974  ;;  %v12724_v56 = vld [vmem:[#allocation25_spill] sm:$0xff]  ;;  %6978 = vpow2.f32 %v1349_v62  ;;  %v2536_v41 = vmul.f32 0.35355338, %v2526_v22 }
 0x2f2   :  { %v8921_v23 = vpop.f32.mrf.mxu3  ;;  %1072 = vadd.xlane.f32.xlu1 %v1071_v19  ;;  %v8929_v44 = vpop.xlane.xlu1 %1639  ;;  %6661 = vmatmul.msk.bf16.gmra.mxu1 %vm362_vm5, %v1145_v9  ;;  %v1367_v11 = vsel %vm362_vm5, %v6975_v51, 0.0  ;;  %6980 = vpow2.f32 %v1359_v58 }
 0x2f3   :  { %6659 = vmatmul.msk.bf16.gmra.mxu0 %vm703_vm13, %v1157_v6  ;;  %v8964_v33 = vadd.f32 %v2536_v41, %v8359_v43 }
 0x2f5   :  { %6727 = vmatmul.msk.bf16.gmra.mxu2 %vm362_vm5, %v7969_v20  ;;  %v2867_v20 = vmul.f32 0.35355338, %v2857_v29 }
 0x2f6   :  { %v6977_v22 = vpop.eup %6976 }
 0x2f7   :  { %6737 = vmatmul.msk.bf16.gmra.mxu3 %vm362_vm5, %v12724_v56  ;;  %v8961_v29 = vadd.f32 %v2867_v20, %v8344_v21  ;;  %v8966_v62 = vpop.eup %6978  ;;  %v1382_v5 = vsel %vm703_vm13, %v6977_v22, 0.0  ;;  %v2571_v20 = vsel %vm362_vm5, %v8964_v33, -inf }
 0x2f8   :  { %4731 = vmatpush.bf16.xpose.msrb.mxu3 %v8818_v53  ;;  %v8948_v45 = vpop.f32.mrf.mxu2  ;;  %v6981_v60 = vpop.eup %6980 }
 0x2f9   :  { %1368 = vadd.xlane.f32.xlu2 %v1367_v11  ;;  %2593 = vmax.xlane.f32.xlu0 %v2592_v46  ;;  %v8955_v9 = vpop.xlane.xlu0 %1645  ;;  %12725 = vst [vmem:[#allocation72_spill] sm:$0xff] %v8961_v29  ;;  %v12726_v11 = vld [vmem:[#allocation96_spill] sm:$0xff]  ;;  %v2887_v41 = vsel %vm703_vm13, %v8961_v29, -inf  ;;  %v1467_v25 = vpack.c.bf16 %v6977_v22, %v6981_v60  ;;  %v12729_v29 = vld [vmem:[#allocation65_spill] sm:$0xff] }
 0x2fa   :  { %v2862_v19 = vpop.f32.mrf.mxu3  ;;  %2277 = vmax.xlane.f32.xlu1 %v2276_v8  ;;  %v1323_v6 = vpop.xlane.xlu1 %1322 }
 0x2fb   :  { %v8957_v31 = vpop.xlane.xlu2 %1648  ;;  %v1341_v49 = vmax.f32 %v1323_v6, %v8797_v37  ;;  %v2869_v8 = vmul.f32 0.35355338, %v2862_v19  ;;  %v1455_v37 = vpack.c.bf16 %v8966_v62, %v6975_v51  ;;  %v2537_v6 = vmul.f32 0.35355338, %v2528_v4  ;;  %v12728_v51 = vld [vmem:[#allocation71_spill] sm:$0xff] }
 0x2fd   :  { %v1345_v46 = vsub.f32 %v12726_v11, %v1341_v49  ;;  %v1357_v13 = vsub.f32 %v12727_v30, %v1341_v49  ;;  %v8987_v22 = vadd.f32 %v2869_v8, %v8395_v14  ;;  %v12744_v14 = vld [vmem:[#allocation49_spill] sm:$0xff] }
 0x2ff   :  { %v1351_v30 = vmul.f32 1.442695, %v1345_v46  ;;  %v1363_v4 = vmul.f32 1.442695, %v1357_v13  ;;  %12730 = vst [vmem:[#allocation104_spill] sm:$0xff] %v8987_v22  ;;  %v12733_v13 = vld [vmem:[#allocation32_spill] sm:$0xff] }
 0x300   :  { %v8970_v58 = vpop.f32.mrf.mxu2 }
 0x301   :  { %1383 = vadd.xlane.f32.xlu2 %v1382_v5  ;;  %2888 = vmax.xlane.f32.xlu0 %v2887_v41  ;;  %v1326_v19 = vpop.xlane.xlu0 %1325  ;;  %v2139_v5 = vsel %vm874_vm12, %v12728_v51, 0  ;;  %6982 = vpow2.f32 %v1351_v30  ;;  %v1379_v51 = vsel %vm703_vm13, %v6981_v60, 0.0 }
 0x302   :  { %2572 = vmax.xlane.f32.xlu1 %v2571_v20  ;;  %v1342_v49 = vmax.f32 %v1326_v19, %v8892_v24  ;;  %6668 = vmatmul.msk.bf16.vlgmr.msrb.gmra.mxu1 %vm362_vm5, %v1455_v37  ;;  %v2864_v41 = vpop.f32.mrf.mxu3  ;;  %v12731_v20 = vld [vmem:[#allocation98_spill] sm:$0xff]  ;;  %v8994_v37 = vadd.f32 %v2537_v6, %v8392_v61  ;;  %6984 = vpow2.f32 %v1363_v4  ;;  %v2868_v6 = vmul.f32 0.35355338, %v8921_v23 }
 0x303   :  { %v8980_v11 = vpop.xlane.xlu2 %1976  ;;  %6666 = vmatmul.msk.bf16.vlgmr.msra.gmra.mxu0 %vm703_vm13, %v1467_v25  ;;  %2180 = vmatpush.bf16.msrb.mxu1 %v12729_v29  ;;  %v2870_v8 = vmul.f32 0.35355338, %v2864_v41 }
 0x304   :  { %v1346_v46 = vsub.f32 %v12731_v20, %v1342_v49  ;;  %v1358_v24 = vsub.f32 %v12732_v3, %v1342_v49  ;;  %2146 = vmatpush.bf16.msra.mxu0 %v2139_v5  ;;  %v12734_v3 = vld [vmem:[#allocation58_spill] sm:$0xff]  ;;  %v2574_v30 = vsel %vm362_vm5, %v8994_v37, -inf  ;;  %v9022_v60 = vadd.f32 %v2868_v6, %v8365_v35 }
 0x305   :  { %6734 = vmatmul.msk.bf16.vlgmr.msrb.gmra.mxu2 %vm362_vm5, %v12715_v12  ;;  %v2893_v12 = vsel %vm703_vm13, %v8987_v22, -inf  ;;  %v12735_v49 = vld [vmem:[#allocation82_spill] sm:$0xff]  ;;  %v12742_v22 = vld [vmem:[#allocation93_spill] sm:$0xff] }
 0x306   :  { %4703 = vmatpush.bf16.xpose.msrb.mxu2 %v8861_v34  ;;  %v1353_v25 = vmul.f32 1.442695, %v1346_v46  ;;  %v1365_v29 = vmul.f32 1.442695, %v1358_v24  ;;  %v9015_v46 = vadd.f32 %v2870_v8, %v8422_v54  ;;  %12739 = vst [vmem:[#allocation92_spill] sm:$0xff] %v9022_v60 }
 0x307   :  { %6744 = vmatmul.msk.bf16.vlgmr.msra.gmra.mxu3 %vm362_vm5, %v12733_v13  ;;  %2181 = vmatpush.bf16.msrb.mxu1 %v12734_v3  ;;  %v9017_v24 = vpop.eup %6982 }
 0x308   :  { %5033 = vmatpush.bf16.xpose.msra.mxu3 %v8739_v57  ;;  %v9001_v19 = vpop.f32.mrf.mxu2  ;;  %6986 = vpow2.f32 %v1353_v25  ;;  %2147 = vmatpush.bf16.msra.mxu0 %v12735_v49  ;;  %12736 = vst [vmem:[#allocation90_spill] sm:$0xff] %v9015_v46  ;;  %v12737_v25 = vld [vmem:[#allocation94_spill] sm:$0xff]  ;;  %v12740_v49 = vld [vmem:[#allocation100_spill] sm:$0xff]  ;;  %v2896_v6 = vsel %vm703_vm13, %v9015_v46, -inf }
 0x309   :  { %2894 = vmax.xlane.f32.xlu2 %v2893_v12  ;;  %6988 = vpow2.f32 %v1365_v29  ;;  %2575 = vmax.xlane.f32.xlu0 %v2574_v30  ;;  %v1628_v5 = vpop.xlane.xlu0 %1627  ;;  %v12738_v12 = vld [vmem:[#allocation59_spill] sm:$0xff]  ;;  %v9024_v29 = vpop.eup %6984 }
 0x30a   :  { %1380 = vadd.xlane.f32.xlu1 %v1379_v51  ;;  %v1650_v4 = vmax.f32 %v1628_v5, %v8929_v44  ;;  %v2538_v51 = vmul.f32 0.35355338, %v8948_v45  ;;  %v12741_v5 = vld [vmem:[#allocation101_spill] sm:$0xff] }
 0x30b   :  { %v9011_v41 = vpop.xlane.xlu1 %1979 }
 0x30c   :  { %v1631_v20 = vpop.xlane.xlu2 %1630  ;;  %v1666_v3 = vsub.f32 %v12737_v25, %v1650_v4  ;;  %2148 = vmatpush.bf16.msra.mxu0 %v12738_v12 }
 0x30d   :  { %v1651_v23 = vmax.f32 %v1631_v20, %v8925_v7  ;;  %v1654_v7 = vsub.f32 %v12740_v49, %v1650_v4  ;;  %v1370_v4 = vsel %vm362_vm5, %v8966_v62, 0.0  ;;  %v2539_v49 = vmul.f32 0.35355338, %v8970_v58 }
 0x30e   :  { %4704 = vmatpush.bf16.xpose.msrb.mxu2 %v8900_v10  ;;  %v9027_v44 = vpop.eup %6986  ;;  %v1670_v30 = vmul.f32 1.442695, %v1666_v3  ;;  %v2890_v3 = vsel %vm703_vm13, %v9022_v60, -inf }
 0x30f   :  { %v9031_v8 = vpop.eup %6988  ;;  %v1655_v20 = vsub.f32 %v12741_v5, %v1651_v23  ;;  %v1456_v12 = vpack.c.bf16 %v9027_v44, %v9017_v24  ;;  %v1667_v54 = vsub.f32 %v12742_v22, %v1651_v23  ;;  %v1658_v5 = vmul.f32 1.442695, %v1654_v7 }
 0x310   :  { %5034 = vmatpush.bf16.xpose.msra.mxu3 %v8770_v27  ;;  %v2832_v25 = vpop.f32.mrf.mxu2  ;;  %v1468_v45 = vpack.c.bf16 %v9031_v8, %v9024_v29  ;;  %6990 = vpow2.f32 %v1670_v30  ;;  %v9050_v22 = vadd.f32 %v2538_v51, %v8420_v16  ;;  %v9057_v58 = vadd.f32 %v2539_v49, %v8459_v17 }
 0x311   :  { %2897 = vmax.xlane.f32.xlu2 %v2896_v6  ;;  %1371 = vadd.xlane.f32.xlu0 %v1370_v4  ;;  %v1660_v46 = vmul.f32 1.442695, %v1655_v20  ;;  %v1672_v62 = vmul.f32 1.442695, %v1667_v54  ;;  %v3187_v6 = vpop.f32.mrf.mxu3  ;;  %6992 = vpow2.f32 %v1658_v5 }
 0x312   :  { %2891 = vmax.xlane.f32.xlu1 %v2890_v3  ;;  %6669 = vmatmul.msk.bf16.gmra.mxu1 %vm362_vm5, %v1456_v12  ;;  %12743 = vst [vmem:[#allocation87_spill] sm:$0xff] %v9050_v22  ;;  %v2577_v54 = vsel %vm362_vm5, %v9050_v22, -inf  ;;  %v3197_v51 = vmul.f32 0.35355338, %v3187_v6  ;;  %v2840_v12 = vmul.f32 0.35355338, %v9001_v19 }
 0x313   :  { %6667 = vmatmul.msk.bf16.gmra.mxu0 %vm703_vm13, %v1468_v45  ;;  %v1634_v23 = vpop.xlane.xlu1 %1633  ;;  %12745 = vst [vmem:[#allocation25_spill] sm:$0xff] %v9057_v58  ;;  %6994 = vpow2.f32 %v1660_v46  ;;  %v2580_v4 = vsel %vm362_vm5, %v9057_v58, -inf }
 0x314   :  { %6996 = vpow2.f32 %v1672_v62  ;;  %v9073_v5 = vadd.f32 %v3197_v51, %v8344_v21  ;;  %v1652_v19 = vmax.f32 %v1634_v23, %v8955_v9  ;;  %v9079_v62 = vadd.f32 %v2840_v12, %v8359_v43  ;;  %v12750_v12 = vld [vmem:[#allocation103_spill] sm:$0xff] }
 0x315   :  { %6735 = vmatmul.msk.bf16.gmra.mxu2 %vm362_vm5, %v12724_v56  ;;  %v2841_v56 = vmul.f32 0.35355338, %v2832_v25 }
 0x316   :  { %v6991_v7 = vpop.eup %6990  ;;  %12746 = vst [vmem:[#allocation96_spill] sm:$0xff] %v9073_v5  ;;  %v3217_v9 = vsel %vm703_vm13, %v9073_v5, -inf  ;;  %v1656_v60 = vsub.f32 %v12750_v12, %v1652_v19  ;;  %v1668_v22 = vsub.f32 %v12751_v55, %v1652_v19  ;;  %v12754_v12 = vld [vmem:[#allocation33_spill] sm:$0xff] }
 0x317   :  { %6745 = vmatmul.msk.bf16.gmra.mxu3 %vm362_vm5, %v12744_v14  ;;  %v1690_v20 = vsel %vm703_vm13, %v6991_v7, 0.0  ;;  %v6993_v45 = vpop.eup %6992  ;;  %v9070_v49 = vadd.f32 %v2841_v56, %v8392_v61  ;;  %12747 = vst [vmem:[#allocation89_spill] sm:$0xff] %v9079_v62  ;;  %v12755_v19 = vld [vmem:[#allocation57_spill] sm:$0xff] }
 0x318   :  { %5035 = vmatpush.bf16.xpose.msra.mxu3 %v8818_v53  ;;  %v9060_v30 = vpop.f32.mrf.mxu2  ;;  %v1674_v55 = vmul.f32 1.442695, %v1668_v22 }
 0x319   :  { %1691 = vadd.xlane.f32.xlu2 %v1690_v20  ;;  %2578 = vmax.xlane.f32.xlu0 %v2577_v54  ;;  %v1637_v3 = vpop.xlane.xlu2 %1636  ;;  %v9075_v25 = vpop.eup %6994  ;;  %v12748_v20 = vld [vmem:[#allocation106_spill] sm:$0xff]  ;;  %v2878_v21 = vsel %vm362_vm5, %v9070_v49, -inf }
 0x31a   :  { %2581 = vmax.xlane.f32.xlu1 %v2580_v4  ;;  %v1653_v46 = vmax.f32 %v1637_v3, %v8957_v31  ;;  %v9081_v6 = vpop.eup %6996  ;;  %v1766_v56 = vpack.c.bf16 %v9075_v25, %v6993_v45  ;;  %v12749_v3 = vld [vmem:[#allocation97_spill] sm:$0xff] }
 0x31b   :  { %v9083_v54 = vpop.xlane.xlu1 %1982  ;;  %v1778_v23 = vpack.c.bf16 %v9081_v6, %v6991_v7  ;;  %v12753_v7 = vld [vmem:[#allocation67_spill] sm:$0xff] }
 0x31c   :  { %v1657_v31 = vsub.f32 %v12748_v20, %v1653_v46  ;;  %v1669_v51 = vsub.f32 %v12749_v3, %v1653_v46  ;;  %v2875_v20 = vsel %vm362_vm5, %v9079_v62, -inf  ;;  %v12752_v46 = vld [vmem:[#allocation88_spill] sm:$0xff] }
 0x31d   :  { %v2443_v3 = vsel %vm874_vm12, %v12752_v46, 0  ;;  %v3189_v46 = vpop.f32.mrf.mxu3 }
 0x31e   :  { %v1664_v5 = vmul.f32 1.442695, %v1657_v31 }
 0x320   :  { %v9086_v4 = vpop.f32.mrf.mxu2  ;;  %6998 = vpow2.f32 %v1664_v5  ;;  %v12757_v5 = vld [vmem:[#allocation62_spill] sm:$0xff] }
 0x321   :  { %2879 = vmax.xlane.f32.xlu2 %v2878_v21  ;;  %3218 = vmax.xlane.f32.xlu0 %v3217_v9  ;;  %v9098_v58 = vpop.xlane.xlu2 %1985  ;;  %v1676_v21 = vmul.f32 1.442695, %v1669_v51  ;;  %v1662_v9 = vmul.f32 1.442695, %v1656_v60  ;;  %v12756_v51 = vld [vmem:[#allocation66_spill] sm:$0xff]  ;;  %v753_v60 = vsel %vm362_vm5, %v8781_v36, 0.0 }
 0x322   :  { %2876 = vmax.xlane.f32.xlu1 %v2875_v20  ;;  %6676 = vmatmul.msk.bf16.vlgmr.msra.gmra.mxu1 %vm362_vm5, %v1766_v56 }
 0x323   :  { %6674 = vmatmul.msk.bf16.vlgmr.msrb.gmra.mxu0 %vm703_vm13, %v1778_v23  ;;  %2484 = vmatpush.bf16.msra.mxu1 %v12753_v7  ;;  %7000 = vpow2.f32 %v1676_v21  ;;  %v1965_v56 = vpop.xlane.xlu1 %1964 }
 0x324   :  { %2450 = vmatpush.bf16.msrb.mxu0 %v2443_v3  ;;  %7002 = vpow2.f32 %v1662_v9  ;;  %v1987_v22 = vmax.f32 %v1965_v56, %v8980_v11  ;;  %v12759_v3 = vld [vmem:[#allocation107_spill] sm:$0xff] }
 0x325   :  { %6742 = vmatmul.msk.bf16.vlgmr.msra.gmra.mxu2 %vm362_vm5, %v12733_v13  ;;  %v1678_v13 = vsel %vm362_vm5, %v6993_v45, 0.0  ;;  %7004 = vpow2.f32 %v1674_v55  ;;  %v12761_v11 = vld [vmem:[#allocation99_spill] sm:$0xff] }
 0x326   :  { %5007 = vmatpush.bf16.xpose.msra.mxu2 %v8861_v34  ;;  %v9125_v20 = vpop.eup %6998  ;;  %v1991_v7 = vsub.f32 %v12759_v3, %v1987_v22  ;;  %v2003_v55 = vsub.f32 %v12761_v11, %v1987_v22  ;;  %v12762_v3 = vld [vmem:[#allocation81_spill] sm:$0xff] }
 0x327   :  { %6752 = vmatmul.msk.bf16.vlgmr.msrb.gmra.mxu3 %vm362_vm5, %v12754_v12  ;;  %2485 = vmatpush.bf16.msra.mxu1 %v12755_v19  ;;  %12758 = vst [vmem:[#allocation71_spill] sm:$0xff] %v9125_v20  ;;  %v750_v19 = vsel %vm362_vm5, %v8766_v1, 0.0 }
 0x328   :  { %5337 = vmatpush.bf16.xpose.msrb.mxu3 %v8739_v57  ;;  %v9113_v31 = vpop.f32.mrf.mxu2  ;;  %2451 = vmatpush.bf16.msrb.mxu0 %v12756_v51  ;;  %v3198_v51 = vmul.f32 0.35355338, %v3189_v46  ;;  %v12763_v46 = vld [vmem:[#allocation9_spill] sm:$0xff] }
 0x329   :  { %1679 = vadd.xlane.f32.xlu0 %v1678_v13  ;;  %v9119_v23 = vpop.xlane.xlu2 %2280  ;;  %v9128_v45 = vpop.eup %7000  ;;  %v3359_v11 = vmul.f32 %v12763_v46, %v12762_v3 }
 0x32a   :  { %754 = vadd.xlane.f32.xlu1 %v753_v60  ;;  %v9131_v36 = vpop.eup %7002 }
 0x32b   :  { %v9121_v57 = vpop.xlane.xlu0 %745  ;;  %v9136_v9 = vpop.eup %7004  ;;  %v1767_v56 = vpack.c.bf16 %v9125_v20, %v9131_v36  ;;  %v2007_v20 = vmul.f32 1.442695, %v2003_v55  ;;  %v3362_v55 = vpack.c.bf16 %v3359_v11, %v3359_v11 }
 0x32c   :  { %2452 = vmatpush.bf16.msrb.mxu0 %v12757_v5  ;;  %12760 = vst [vmem:[#allocation65_spill] sm:$0xff] %v9136_v9  ;;  %v1779_v13 = vpack.c.bf16 %v9128_v45, %v9136_v9  ;;  %v1995_v5 = vmul.f32 1.442695, %v1991_v7  ;;  %v12765_v9 = vld [vmem:[#allocation102_spill] sm:$0xff]  ;;  %v9161_v7 = vadd.f32 %v3198_v51, %v8365_v35  ;;  %v1062_v35 = vsel %vm362_vm5, %v8910_v15, 0.0 }
 0x32e   :  { %5008 = vmatpush.bf16.xpose.msra.mxu2 %v8900_v10  ;;  %12767 = vst [vmem:[#allocation98_spill] sm:$0xff] %v9161_v7  ;;  %7006 = vpow2.f32 %v1995_v5 }
 0x32f   :  { %7008 = vpow2.f32 %v2007_v20 }
 0x330   :  { %5338 = vmatpush.bf16.xpose.msrb.mxu3 %v8770_v27  ;;  %v9134_v21 = vpop.f32.mrf.mxu2  ;;  %v765_v27 = vsel %vm703_vm13, %v8791_v47, 0.0  ;;  %v12764_v47 = vld [vmem:[#allocation109_spill] sm:$0xff] }
 0x331   :  { %751 = vadd.xlane.f32.xlu0 %v750_v19  ;;  %v9147_v60 = vpop.xlane.xlu2 %757 }
 0x332   :  { %766 = vadd.xlane.f32.xlu1 %v765_v27  ;;  %6677 = vmatmul.msk.bf16.gmra.mxu1 %vm362_vm5, %v1767_v56  ;;  %v12766_v27 = vld [vmem:[#allocation50_spill] sm:$0xff] }
 0x333   :  { %v1968_v22 = vpop.xlane.xlu0 %1967  ;;  %6675 = vmatmul.msk.bf16.gmra.mxu0 %vm703_vm13, %v1779_v13 }
 0x334   :  { %v1988_v1 = vmax.f32 %v1968_v22, %v9011_v41 }
 0x335   :  { %6743 = vmatmul.msk.bf16.gmra.mxu2 %vm362_vm5, %v12744_v14  ;;  %v762_v14 = vsel %vm703_vm13, %v8772_v59, 0.0 }
 0x336   :  { %v1992_v19 = vsub.f32 %v12764_v47, %v1988_v1  ;;  %v2004_v62 = vsub.f32 %v12765_v9, %v1988_v1  ;;  %v3220_v9 = vsel %vm703_vm13, %v9161_v7, -inf  ;;  %v2842_v47 = vmul.f32 0.35355338, %v9060_v30  ;;  %v12772_v30 = vld [vmem:[#allocation73_spill] sm:$0xff] }
 0x337   :  { %6753 = vmatmul.msk.bf16.gmra.mxu3 %vm362_vm5, %v12766_v27 }
 0x338   :  { %5339 = vmatpush.bf16.xpose.msrb.mxu3 %v8818_v53  ;;  %v1997_v41 = vmul.f32 1.442695, %v1992_v19  ;;  %v2009_v56 = vmul.f32 1.442695, %v2004_v62  ;;  %v9164_v13 = vpop.f32.mrf.mxu2  ;;  %v9173_v62 = vpop.eup %7006 }
 0x339   :  { %3370 = vrot.lane.b32.xlu2 %v3362_v55, %s7389_s11  ;;  %763 = vadd.xlane.f32.xlu0 %v762_v14  ;;  %12768 = vst [vmem:[#allocation91_spill] sm:$0xff] %v9173_v62  ;;  %v9175_v22 = vpop.eup %7008  ;;  %v1681_v14 = vsel %vm362_vm5, %v9075_v25, 0.0  ;;  %v9208_v25 = vadd.f32 %v2842_v47, %v8420_v16 }
 0x33a   :  { %7010 = vpow2.f32 %v1997_v41  ;;  %3221 = vmax.xlane.f32.xlu1 %v3220_v9  ;;  %12769 = vst [vmem:[#allocation32_spill] sm:$0xff] %v9175_v22  ;;  %v9194_v9 = vpop.f32.mrf.mxu3 }
 0x33b   :  { %7012 = vpow2.f32 %v2009_v56  ;;  %v1971_v53 = vpop.xlane.xlu2 %1970  ;;  %v1693_v56 = vsel %vm703_vm13, %v9081_v6, 0.0  ;;  %12774 = vst [vmem:[#allocation94_spill] sm:$0xff] %v9208_v25  ;;  %v2881_v47 = vsel %vm362_vm5, %v9208_v25, -inf  ;;  %v3161_v25 = vmul.f32 0.35355338, %v9113_v31 }
 0x33c   :  { %v9171_v51 = vpop.xlane.xlu0 %2283 }
 0x33e   :  { %v920_v20 = vpop.f32.mrf.mxu1 }
 0x33f   :  { %v887_v59 = vpop.f32.mrf.mxu0 }
 0x340   :  { %v9177_v5 = vpop.eup %7010  ;;  %v9179_v1 = vpop.f32.mrf.mxu2  ;;  %v9186_v41 = vadd.f32 %v920_v20, %v887_v59  ;;  %v2747_v20 = vsel %vm874_vm12, %v12772_v30, 0 }
 0x341   :  { %12770 = vst [vmem:[#allocation58_spill] sm:$0xff] %v9177_v5  ;;  %v9181_v11 = vpop.eup %7012  ;;  %v2103_v19 = vpack.c.bf16 %v9177_v5, %v9173_v62  ;;  %1694 = vadd.xlane.f32.xlu0 %v1693_v56  ;;  %v9201_v59 = vpop.xlane.xlu1 %748  ;;  %v12773_v56 = vld [vmem:[#allocation76_spill] sm:$0xff] }
 0x342   :  { %12771 = vst [vmem:[#allocation82_spill] sm:$0xff] %v9181_v11  ;;  %v2111_v55 = vpack.c.bf16 %v9181_v11, %v9175_v22  ;;  %1682 = vadd.xlane.f32.xlu1 %v1681_v14  ;;  %v12775_v14 = vld [vmem:[#allocation34_spill] sm:$0xff]  ;;  %v12778_v11 = vld [vmem:[#allocation60_spill] sm:$0xff]  ;;  %v12780_v22 = vld [vmem:[#allocation61_spill] sm:$0xff] }
 0x343   :  { %v9196_v7 = vpop.xlane.xlu2 %2289  ;;  %6684 = vmatmul.msk.bf16.vlgmr.msrb.gmra.mxu1 %vm362_vm5, %v2103_v19 }
 0x344   :  { %v9203_v6 = vpop.xlane.xlu0 %760  ;;  %6682 = vmatmul.msk.bf16.vlgmr.msra.gmra.mxu0 %vm703_vm13, %v2111_v55  ;;  %2788 = vmatpush.bf16.msrb.mxu1 %v12773_v56  ;;  %v12779_v56 = vld [vmem:[#allocation68_spill] sm:$0xff] }
 0x345   :  { %2754 = vmatpush.bf16.msra.mxu0 %v2747_v20  ;;  %6750 = vmatmul.msk.bf16.vlgmr.msrb.gmra.mxu2 %vm362_vm5, %v12754_v12  ;;  %v2843_v12 = vmul.f32 0.35355338, %v9086_v4  ;;  %v1065_v20 = vsel %vm362_vm5, %v8903_v32, 0.0 }
 0x346   :  { %5311 = vmatpush.bf16.xpose.msrb.mxu2 %v8861_v34  ;;  %v9215_v19 = vpop.f32.mrf.mxu1 }
 0x347   :  { %6760 = vmatmul.msk.bf16.vlgmr.msra.gmra.mxu3 %vm362_vm5, %v12775_v14  ;;  %12776 = vst [vmem:[#allocation59_spill] sm:$0xff] %v9215_v19  ;;  %v9217_v30 = vpop.f32.mrf.mxu0  ;;  %v9240_v4 = vadd.f32 %v2843_v12, %v8459_v17  ;;  %v12782_v19 = vld [vmem:[#allocation105_spill] sm:$0xff] }
 0x348   :  { %12777 = vst [vmem:[#allocation100_spill] sm:$0xff] %v9217_v30  ;;  %2789 = vmatpush.bf16.msrb.mxu1 %v12778_v11  ;;  %v9220_v55 = vpop.f32.mrf.mxu2  ;;  %v9234_v11 = vpop.f32.mrf.mxu3 }
 0x349   :  { %2755 = vmatpush.bf16.msra.mxu0 %v12779_v56  ;;  %2882 = vmax.xlane.f32.xlu0 %v2881_v47  ;;  %v1989_v56 = vmax.f32 %v1971_v53, %v9083_v54  ;;  %12781 = vst [vmem:[#allocation101_spill] sm:$0xff] %v9240_v4 }
 0x34a   :  { %1066 = vadd.xlane.f32.xlu1 %v1065_v20 }
 0x34b   :  { %v9228_v34 = vpop.xlane.xlu2 %2584  ;;  %v1993_v20 = vsub.f32 %v8726_v48, %v1989_v56  ;;  %v2005_v54 = vsub.f32 %v12782_v19, %v1989_v56  ;;  %v9265_v19 = vadd.f32 %v3161_v25, %v8359_v43  ;;  %v1077_v25 = vsel %vm703_vm13, %v8906_v18, 0.0 }
 0x34c   :  { %v9230_v62 = vpop.xlane.xlu0 %2286  ;;  %v9232_v5 = vpop.xlane.xlu1 %1057 }
 0x34d   :  { %2756 = vmatpush.bf16.msra.mxu0 %v12780_v22  ;;  %v9255_v22 = vadd.f32 %v9147_v60, %v9121_v57  ;;  %v1999_v30 = vmul.f32 1.442695, %v1993_v20  ;;  %12785 = vst [vmem:[#allocation49_spill] sm:$0xff] %v9265_v19  ;;  %v12786_v60 = vld [vmem:[#allocation14_spill] sm:$0xff] }
 0x34e   :  { %5312 = vmatpush.bf16.xpose.msrb.mxu2 %v8900_v10  ;;  %v2884_v10 = vsel %vm362_vm5, %v9240_v4, -inf }
 0x34f   :  { %v925_v47 = vpop.f32.mrf.mxu1  ;;  %7014 = vrcp.f32 %v9255_v22  ;;  %vm777_vm15 = vweird.f32 %v9255_v22 }
 0x350   :  { %v9242_v32 = vpop.f32.mrf.mxu2  ;;  %v892_v3 = vpop.f32.mrf.mxu0  ;;  %7016 = vpow2.f32 %v1999_v30 }
 0x351   :  { %v9249_v53 = vadd.f32 %v925_v47, %v892_v3  ;;  %1063 = vadd.xlane.f32.xlu0 %v1062_v35  ;;  %v2011_v3 = vmul.f32 1.442695, %v2005_v54  ;;  %v12784_v35 = vld [vmem:[#allocation51_spill] sm:$0xff]  ;;  %v9267_v56 = vpop.f32.mrf.mxu3 }
 0x352   :  { %2885 = vmax.xlane.f32.xlu1 %v2884_v10 }
 0x353   :  { %12783 = vst [vmem:[#allocation93_spill] sm:$0xff] %v9249_v53  ;;  %v9257_v12 = vpop.xlane.xlu2 %1060  ;;  %7018 = vpow2.f32 %v2011_v3 }
 0x354   :  { %v1974_v48 = vpop.xlane.xlu0 %1973  ;;  %v2272_v31 = vpop.xlane.xlu1 %2271 }
 0x355   :  { %v1990_v15 = vmax.f32 %v1974_v48, %v9098_v58  ;;  %6751 = vmatmul.msk.bf16.gmra.mxu2 %vm362_vm5, %v12766_v27  ;;  %v3162_v48 = vmul.f32 0.35355338, %v9134_v21  ;;  %v2292_v3 = vmax.f32 %v2272_v31, %v9171_v51  ;;  %v12796_v51 = vld [vmem:[#allocation108_spill] sm:$0xff] }
 0x357   :  { %6761 = vmatmul.msk.bf16.gmra.mxu3 %vm362_vm5, %v12784_v35  ;;  %v1994_v57 = vsub.f32 %v8829_v28, %v1990_v15  ;;  %v2006_v47 = vsub.f32 %v12786_v60, %v1990_v15  ;;  %v9272_v58 = vpop.f32.mrf.mxu1  ;;  %v3205_v28 = vsel %vm362_vm5, %v9265_v19, -inf  ;;  %v9289_v18 = vadd.f32 %v3162_v48, %v8392_v61 }
 0x358   :  { %12787 = vst [vmem:[#allocation106_spill] sm:$0xff] %v9272_v58  ;;  %v9274_v20 = vpop.f32.mrf.mxu2  ;;  %v9276_v10 = vpop.f32.mrf.mxu0  ;;  %v1376_v48 = vsel %vm362_vm5, %v9027_v44, 0.0 }
 0x359   :  { %12788 = vst [vmem:[#allocation97_spill] sm:$0xff] %v9274_v20  ;;  %v2001_v27 = vmul.f32 1.442695, %v1994_v57  ;;  %v2013_v54 = vmul.f32 1.442695, %v2006_v47  ;;  %1078 = vadd.xlane.f32.xlu0 %v1077_v25  ;;  %v9285_v57 = vpop.eup %7014  ;;  %v9307_v20 = vpop.f32.mrf.mxu3  ;;  %v3208_v19 = vsel %vm362_vm5, %v9289_v18, -inf }
 0x35a   :  { %12789 = vst [vmem:[#allocation103_spill] sm:$0xff] %v9276_v10  ;;  %3206 = vmax.xlane.f32.xlu1 %v3205_v28  ;;  %v9291_v21 = vpop.eup %7016  ;;  %v773_v58 = vmul.f32 %v9285_v57, %v9255_v22  ;;  %vm778_vm14 = vweird.f32 %v9285_v57 }
 0x35b   :  { %7020 = vpow2.f32 %v2001_v27  ;;  %12790 = vst [vmem:[#allocation95_spill] sm:$0xff] %v9289_v18  ;;  %v9294_v25 = vpop.eup %7018  ;;  %vm9365_vm0 = vmor %vm777_vm15, %vm778_vm14 }
 0x35c   :  { %7022 = vpow2.f32 %v2013_v54  ;;  %v2275_v15 = vpop.xlane.xlu2 %2274  ;;  %v2269_v60 = vpop.xlane.xlu0 %2268  ;;  %12791 = vst [vmem:[#allocation88_spill] sm:$0xff] %v9291_v21 }
 0x35d   :  { %v9283_v30 = vpop.xlane.xlu1 %2587  ;;  %v2291_v47 = vmax.f32 %v2269_v60, %v9119_v23  ;;  %12792 = vst [vmem:[#allocation67_spill] sm:$0xff] %v9294_v25 }
 0x35f   :  { %v1231_v27 = vpop.f32.mrf.mxu1  ;;  %v2295_v10 = vsub.f32 %v8869_v42, %v2291_v47  ;;  %v2307_v31 = vsub.f32 %v12796_v51, %v2291_v47  ;;  %v2296_v42 = vsub.f32 %v8833_v40, %v2292_v3  ;;  %v2308_v47 = vsub.f32 %v8729_v39, %v2292_v3 }
 0x360   :  { %v9296_v28 = vpop.f32.mrf.mxu2  ;;  %v1198_v23 = vpop.f32.mrf.mxu0 }
 0x361   :  { %12793 = vst [vmem:[#allocation33_spill] sm:$0xff] %v9296_v28  ;;  %v9298_v54 = vpop.eup %7020  ;;  %v9310_v53 = vadd.f32 %v1231_v27, %v1198_v23  ;;  %1377 = vadd.xlane.f32.xlu0 %v1376_v48  ;;  %v1373_v28 = vsel %vm362_vm5, %v9017_v24, 0.0  ;;  %v774_v23 = vsub.f32 1.0, %v773_v58  ;;  %v2299_v48 = vmul.f32 1.442695, %v2295_v10 }
 0x362   :  { %12794 = vst [vmem:[#allocation57_spill] sm:$0xff] %v9298_v54  ;;  %v9305_v60 = vpop.eup %7022  ;;  %1374 = vadd.xlane.f32.xlu1 %v1373_v28  ;;  %3209 = vmax.xlane.f32.xlu2 %v3208_v19  ;;  %v2104_v4 = vpack.c.bf16 %v9298_v54, %v9291_v21  ;;  %v2311_v40 = vmul.f32 1.442695, %v2307_v31  ;;  %v12797_v28 = vld [vmem:[#allocation35_spill] sm:$0xff]  ;;  %v2301_v39 = vmul.f32 1.442695, %v2296_v42 }
 0x363   :  { %12795 = vst [vmem:[#allocation66_spill] sm:$0xff] %v9305_v60  ;;  %v2112_v44 = vpack.c.bf16 %v9305_v60, %v9294_v25  ;;  %v2313_v58 = vmul.f32 1.442695, %v2308_v47  ;;  %v1074_v42 = vsel %vm703_vm13, %v8917_v52, 0.0 }
 0x364   :  { %v9322_v27 = vpop.xlane.xlu2 %2590  ;;  %v1070_v24 = vpop.xlane.xlu0 %1069  ;;  %6685 = vmatmul.msk.bf16.gmra.mxu1 %vm362_vm5, %v2104_v4  ;;  %v775_v4 = vmul.f32 %v9285_v57, %v774_v23 }
 0x365   :  { %v9324_v51 = vpop.xlane.xlu1 %1072  ;;  %6683 = vmatmul.msk.bf16.gmra.mxu0 %vm703_vm13, %v2112_v44  ;;  %v9329_v19 = vadd.f32 %v1070_v24, %v9232_v5  ;;  %6758 = vmatmul.msk.bf16.vlgmr.msra.gmra.mxu2 %vm362_vm5, %v12775_v14  ;;  %v1388_v5 = vsel %vm703_vm13, %v9031_v8, 0.0  ;;  %v1385_v14 = vsel %vm703_vm13, %v9024_v29, 0.0  ;;  %v9349_v44 = vpop.f32.mrf.mxu3  ;;  %v2293_v8 = vmax.f32 %v2275_v15, %v9230_v62 }
 0x366   :  { %12799 = vst [vmem:[#allocation107_spill] sm:$0xff] %v9349_v44  ;;  %v776_v23 = vadd.f32 %v9285_v57, %v775_v4  ;;  %v781_v62 = vand.u32 2147483647, %v9255_v22  ;;  %v783_v15 = vand.u32 2147483648, %v9255_v22 }
 0x367   :  { %6768 = vmatmul.msk.bf16.vlgmr.msrb.gmra.mxu3 %vm362_vm5, %v12797_v28  ;;  %7024 = vrcp.f32 %v9329_v19  ;;  %v9336_v10 = vpop.f32.mrf.mxu1  ;;  %v2297_v60 = vsub.f32 %v8866_v50, %v2293_v8  ;;  %v1095_v22 = vand.u32 2147483648, %v9329_v19  ;;  %v2309_v18 = vsub.f32 %v8808_v2, %v2293_v8 }
 0x368   :  { %v9338_v3 = vpop.f32.mrf.mxu2  ;;  %7026 = vpow2.f32 %v2299_v48  ;;  %v9341_v31 = vpop.f32.mrf.mxu0  ;;  %vm782_vm2 = vcmp.eq.f32.partialorder %v781_v62, 8.507059e+37  ;;  %vm1089_vm3 = vweird.f32 %v9329_v19 }
 0x369   :  { %12798 = vst [vmem:[#allocation62_spill] sm:$0xff] %v9338_v3  ;;  %7028 = vpow2.f32 %v2311_v40  ;;  %1389 = vadd.xlane.f32.xlu0 %v1388_v5  ;;  %v1096_v2 = vor.u32 1.1754944e-38, %v1095_v22 }
 0x36a   :  { %7030 = vpow2.f32 %v2301_v39  ;;  %1386 = vadd.xlane.f32.xlu1 %v1385_v14  ;;  %1075 = vadd.xlane.f32.xlu2 %v1074_v42 }
 0x36b   :  { %7032 = vpow2.f32 %v2313_v58 }
 0x36c   :  { %v9351_v47 = vpop.xlane.xlu2 %1368  ;;  %v9356_v48 = vpop.xlane.xlu0 %2593 }
 0x36d   :  { %v2278_v29 = vpop.xlane.xlu1 %2277  ;;  %v7025_v24 = vpop.eup %7024 }
 0x36e   :  { %v2294_v52 = vmax.f32 %v2278_v29, %v9196_v7  ;;  %v9359_v40 = vpop.eup %7026  ;;  %v1085_v39 = vmul.f32 %v7025_v24, %v9329_v19  ;;  %v1684_v7 = vsel %vm362_vm5, %v9131_v36, 0.0  ;;  %v780_v29 = vsel %vm9365_vm0, %v9285_v57, %v776_v23  ;;  %v9405_v8 = vpop.f32.mrf.mxu3 }
 0x36f   :  { %12800 = vst [vmem:[#allocation99_spill] sm:$0xff] %v9359_v40  ;;  %v9363_v58 = vpop.eup %7028  ;;  %v1236_v5 = vpop.f32.mrf.mxu1  ;;  %v1093_v36 = vand.u32 2147483647, %v9329_v19  ;;  %vm1090_vm1 = vweird.f32 %v7025_v24  ;;  %v2303_v19 = vmul.f32 1.442695, %v2297_v60 }
 0x370   :  { %12801 = vst [vmem:[#allocation109_spill] sm:$0xff] %v9363_v58  ;;  %v9371_v14 = vpop.f32.mrf.mxu2  ;;  %v9375_v42 = vpop.eup %7030  ;;  %v1086_v25 = vsub.f32 1.0, %v1085_v39  ;;  %v2298_v54 = vsub.f32 %v8943_v38, %v2294_v52  ;;  %v12807_v38 = vld [vmem:[#allocation70_spill] sm:$0xff]  ;;  %v784_v39 = vor.u32 1.1754944e-38, %v783_v15  ;;  %v12808_v15 = vld [vmem:[#allocation79_spill] sm:$0xff]  ;;  %vm1091_vm4 = vmor %vm1089_vm3, %vm1090_vm1 }
 0x371   :  { %12804 = vst [vmem:[#allocation102_spill] sm:$0xff] %v9371_v14  ;;  %v1203_v21 = vpop.f32.mrf.mxu0  ;;  %v9382_v3 = vpop.eup %7032  ;;  %v2310_v14 = vsub.f32 %v8762_v0, %v2294_v52  ;;  %v2407_v4 = vpack.c.bf16 %v9375_v42, %v9359_v40  ;;  %v3051_v23 = vsel %vm874_vm12, %v12807_v38, 0  ;;  %vm1094_vm6 = vcmp.eq.f32.partialorder %v1093_v36, 8.507059e+37  ;;  %v12815_v38 = vld [vmem:[#allocation64_spill] sm:$0xff]  ;;  %v12835_v40 = vld [vmem:[#allocation25_spill] sm:$0xff] }
 0x372   :  { %12805 = vst [vmem:[#allocation50_spill] sm:$0xff] %v9375_v42  ;;  %v9386_v44 = vadd.f32 %v1236_v5, %v1203_v21  ;;  %v2415_v50 = vpack.c.bf16 %v9382_v3, %v9363_v58  ;;  %v1087_v57 = vmul.f32 %v7025_v24, %v1086_v25  ;;  %1685 = vadd.xlane.f32.xlu2 %v1684_v7  ;;  %v2305_v21 = vmul.f32 1.442695, %v2298_v54  ;;  %v12810_v54 = vld [vmem:[#allocation52_spill] sm:$0xff] }
 0x373   :  { %12806 = vst [vmem:[#allocation73_spill] sm:$0xff] %v9382_v3  ;;  %v785_v7 = vsel %vm782_vm2, %v784_v39, %v780_v29  ;;  %v2317_v58 = vmul.f32 1.442695, %v2310_v14  ;;  %v12817_v39 = vld [vmem:[#allocation24_spill] sm:$0xff] }
 0x374   :  { %v9396_v0 = vpop.xlane.xlu2 %1383  ;;  %v9399_v52 = vpop.xlane.xlu0 %2888  ;;  %6692 = vmatmul.msk.bf16.vlgmr.msra.gmra.mxu1 %vm362_vm5, %v2407_v4  ;;  %v1088_v25 = vadd.f32 %v7025_v24, %v1087_v57  ;;  %12809 = vst [vmem:[#allocation76_spill] sm:$0xff] %v9405_v8  ;;  %v2315_v4 = vmul.f32 1.442695, %v2309_v18  ;;  %v930_v57 = vmul.f32 %v9186_v41, %v785_v7  ;;  %7034 = vpow2.f32 %v2305_v21  ;;  %v12818_v21 = vld [vmem:[#allocation23_spill] sm:$0xff] }
 0x375   :  { %v2573_v5 = vpop.xlane.xlu1 %2572  ;;  %6690 = vmatmul.msk.bf16.vlgmr.msrb.gmra.mxu0 %vm703_vm13, %v2415_v50  ;;  %3092 = vmatpush.bf16.msra.mxu1 %v12808_v15  ;;  %7036 = vpow2.f32 %v2317_v58  ;;  %v1699_v18 = vsel %vm703_vm13, %v9128_v45, 0.0  ;;  %v12816_v58 = vld [vmem:[#allocation63_spill] sm:$0xff]  ;;  %v12820_v45 = vld [vmem:[#allocation84_spill] sm:$0xff] }
 0x376   :  { %3058 = vmatpush.bf16.msrb.mxu0 %v3051_v23  ;;  %6759 = vmatmul.msk.bf16.gmra.mxu2 %vm362_vm5, %v12784_v35  ;;  %v1092_v62 = vsel %vm1091_vm4, %v7025_v24, %v1088_v25  ;;  %v12814_v35 = vld [vmem:[#allocation69_spill] sm:$0xff]  ;;  %7038 = vpow2.f32 %v2303_v19  ;;  %v12819_v25 = vpack.c.bf16 %v12817_v39, %v12818_v21  ;;  %v3358_v7 = vmul.f32 %v12763_v46, %v12820_v45 }
 0x377   :  { %6769 = vmatmul.msk.bf16.gmra.mxu3 %vm362_vm5, %v12810_v54  ;;  %v9411_v29 = vpop.f32.mrf.mxu1  ;;  %v1097_v50 = vsel %vm1094_vm6, %v1096_v2, %v1092_v62  ;;  %7040 = vpow2.f32 %v2315_v4  ;;  %v2595_v2 = vmax.f32 %v2573_v5, %v9228_v34  ;;  %v12823_v4 = vld [vmem:[#allocation83_spill] sm:$0xff] }
 0x378   :  { %12811 = vst [vmem:[#allocation34_spill] sm:$0xff] %v9411_v29  ;;  %v9413_v14 = vpop.f32.mrf.mxu2  ;;  %v1241_v60 = vmul.f32 %v9310_v53, %v1097_v50 }
 0x379   :  { %12812 = vst [vmem:[#allocation60_spill] sm:$0xff] %v9413_v14  ;;  %v9416_v22 = vpop.f32.mrf.mxu0  ;;  %3093 = vmatpush.bf16.msra.mxu1 %v12815_v38  ;;  %v2599_v5 = vsub.f32 %v8964_v33, %v2595_v2  ;;  %v2611_v39 = vsub.f32 %v8804_v63, %v2595_v2 }
 0x37a   :  { %12813 = vst [vmem:[#allocation68_spill] sm:$0xff] %v9416_v22  ;;  %3059 = vmatpush.bf16.msrb.mxu0 %v12814_v35  ;;  %1700 = vadd.xlane.f32.xlu2 %v1699_v18  ;;  %v9423_v24 = vadd.f32 %v1241_v60, %v930_v57  ;;  %v9437_v15 = vpop.eup %7034 }
 0x37b   :  { %12821 = vst [vmem:[#allocation61_spill] sm:$0xff] %v9437_v15  ;;  %v9440_v19 = vpop.eup %7036 }
 0x37c   :  { %v9425_v36 = vpop.xlane.xlu2 %2894  ;;  %v2576_v41 = vpop.xlane.xlu0 %2575  ;;  %12822 = vst [vmem:[#allocation105_spill] sm:$0xff] %v9440_v19 }
 0x37d   :  { %v9427_v23 = vpop.xlane.xlu1 %1380  ;;  %v2596_v53 = vmax.f32 %v2576_v41, %v9283_v30  ;;  %3406 = vrot.lane.b32.xlu0 %v12819_v25, %s7388_s29  ;;  %v3357_v30 = vmul.f32 %v12763_v46, %v12823_v4  ;;  %v9446_v50 = vpop.eup %7038 }
 0x37e   :  { %3060 = vmatpush.bf16.msrb.mxu0 %v12816_v58  ;;  %12824 = vst [vmem:[#allocation51_spill] sm:$0xff] %v9446_v50  ;;  %v9451_v35 = vpop.eup %7040  ;;  %v2408_v58 = vpack.c.bf16 %v9437_v15, %v9446_v50  ;;  %v12833_v15 = vld [vmem:[#allocation16_spill] sm:$0xff] }
 0x37f   :  { %v9442_v62 = vpop.f32.mrf.mxu1  ;;  %v2600_v57 = vsub.f32 %v8994_v37, %v2596_v53  ;;  %12825 = vst [vmem:[#allocation14_spill] sm:$0xff] %v9451_v35  ;;  %v2612_v38 = vsub.f32 %v8876_v26, %v2596_v53  ;;  %v3361_v34 = vpack.c.bf16 %v3358_v7, %v3357_v30  ;;  %v2416_v41 = vpack.c.bf16 %v9440_v19, %v9451_v35 }
 0x380   :  { %v9454_v18 = vpop.f32.mrf.mxu2  ;;  %v2603_v53 = vmul.f32 1.442695, %v2599_v5  ;;  %v2615_v7 = vmul.f32 1.442695, %v2611_v39 }
 0x381   :  { %v9449_v60 = vpop.f32.mrf.mxu0  ;;  %12826 = vst [vmem:[#allocation108_spill] sm:$0xff] %v9454_v18  ;;  %v2605_v21 = vmul.f32 1.442695, %v2600_v57  ;;  %v2617_v33 = vmul.f32 1.442695, %v2612_v38  ;;  %v12837_v18 = vld [vmem:[#allocation56_spill] sm:$0xff] }
 0x383   :  { %3368 = vrot.lane.b32.xlu1 %v3361_v34, %s7389_s11  ;;  %7042 = vpow2.f32 %v2605_v21  ;;  %v12830_v21 = vld [vmem:[#allocation85_spill] sm:$0xff] }
 0x384   :  { %v9463_v37 = vpop.xlane.xlu2 %2897  ;;  %v9465_v25 = vpop.xlane.xlu0 %1371  ;;  %6693 = vmatmul.msk.bf16.gmra.mxu1 %vm362_vm5, %v2408_v58  ;;  %7044 = vpow2.f32 %v2617_v33  ;;  %v3355_v33 = vmul.f32 %v12763_v46, %v12830_v21 }
 0x385   :  { %v2892_v26 = vpop.xlane.xlu1 %2891  ;;  %6691 = vmatmul.msk.bf16.gmra.mxu0 %vm703_vm13, %v2416_v41  ;;  %7046 = vpow2.f32 %v2603_v53  ;;  %v12828_v41 = vld [vmem:[#allocation86_spill] sm:$0xff] }
 0x386   :  { %6766 = vmatmul.msk.bf16.vlgmr.msrb.gmra.mxu2 %vm362_vm5, %v12797_v28  ;;  %7048 = vpow2.f32 %v2615_v7  ;;  %v3356_v38 = vmul.f32 %v12763_v46, %v12828_v41  ;;  %v12832_v7 = vld [vmem:[#allocation87_spill] sm:$0xff] }
 0x387   :  { %v9471_v30 = vpop.f32.mrf.mxu1 }
 0x388   :  { %v9475_v2 = vpop.f32.mrf.mxu2 }
 0x389   :  { %v9473_v63 = vpop.f32.mrf.mxu0  ;;  %12827 = vst [vmem:[#allocation35_spill] sm:$0xff] %v9475_v2  ;;  %v9482_v58 = vpop.eup %7042 }
 0x38a   :  { %12829 = vst [vmem:[#allocation70_spill] sm:$0xff] %v9482_v58  ;;  %v9487_v53 = vpop.eup %7044 }
 0x38b   :  { %12831 = vst [vmem:[#allocation79_spill] sm:$0xff] %v9487_v53  ;;  %v9491_v3 = vpop.eup %7046 }
 0x38c   :  { %v2579_v57 = vpop.xlane.xlu0 %2578  ;;  %v9477_v34 = vpop.xlane.xlu2 %1691  ;;  %12834 = vst [vmem:[#allocation52_spill] sm:$0xff] %v9491_v3  ;;  %v2711_v46 = vpack.c.bf16 %v9482_v58, %v9491_v3  ;;  %v12852_v58 = vld [vmem:[#allocation92_spill] sm:$0xff] }
 0x38d   :  { %v2597_v5 = vmax.f32 %v2579_v57, %v9322_v27  ;;  %v2582_v28 = vpop.xlane.xlu1 %2581  ;;  %v3360_v57 = vpack.c.bf16 %v3356_v38, %v3355_v33  ;;  %v9494_v2 = vpop.eup %7048 }
 0x38e   :  { %v2598_v39 = vmax.f32 %v2582_v28, %v9356_v48  ;;  %12836 = vst [vmem:[#allocation69_spill] sm:$0xff] %v9494_v2 }
 0x38f   :  { %v2601_v35 = vsub.f32 %v12832_v7, %v2597_v5  ;;  %v2613_v19 = vsub.f32 %v12833_v15, %v2597_v5  ;;  %v1547_v50 = vpop.f32.mrf.mxu1  ;;  %v2719_v7 = vpack.c.bf16 %v9487_v53, %v9494_v2 }
 0x390   :  { %v2602_v42 = vsub.f32 %v12835_v40, %v2598_v39  ;;  %v2614_v48 = vsub.f32 %v12837_v18, %v2598_v39  ;;  %v9508_v39 = vpop.f32.mrf.mxu2 }
 0x391   :  { %v1514_v27 = vpop.f32.mrf.mxu0  ;;  %v2607_v15 = vmul.f32 1.442695, %v2601_v35  ;;  %v2619_v5 = vmul.f32 1.442695, %v2613_v19  ;;  %12838 = vst [vmem:[#allocation64_spill] sm:$0xff] %v9508_v39  ;;  %v9514_v35 = vadd.f32 %v9203_v6, %v9201_v59  ;;  %v9520_v19 = vadd.f32 %v9324_v51, %v9257_v12 }
 0x392   :  { %v9497_v28 = vadd.f32 %v1547_v50, %v1514_v27  ;;  %3366 = vrot.lane.b32.xlu2 %v3360_v57, %s7389_s11  ;;  %v2609_v14 = vmul.f32 1.442695, %v2602_v42  ;;  %v2621_v50 = vmul.f32 1.442695, %v2614_v48  ;;  %v12842_v57 = vld [vmem:[#allocation12_spill] sm:$0xff] }
 0x393   :  { %7050 = vpow2.f32 %v2607_v15  ;;  %v12848_v15 = vld [vmem:[#allocation89_spill] sm:$0xff]  ;;  %vm792_vm7 = vweird.f32 %v9514_v35  ;;  %vm1104_vm11 = vweird.f32 %v9520_v19 }
 0x394   :  { %v9504_v40 = vpop.xlane.xlu0 %3218  ;;  %6700 = vmatmul.msk.bf16.vlgmr.msrb.gmra.mxu1 %vm362_vm5, %v2711_v46  ;;  %v2880_v18 = vpop.xlane.xlu2 %2879  ;;  %7052 = vpow2.f32 %v2619_v5 }
 0x395   :  { %6698 = vmatmul.msk.bf16.vlgmr.msra.gmra.mxu0 %vm703_vm13, %v2719_v7  ;;  %v2877_v38 = vpop.xlane.xlu1 %2876  ;;  %7054 = vpow2.f32 %v2609_v14  ;;  %v2900_v33 = vmax.f32 %v2880_v18, %v2892_v26 }
 0x396   :  { %6767 = vmatmul.msk.bf16.gmra.mxu2 %vm362_vm5, %v12810_v54  ;;  %7056 = vpow2.f32 %v2621_v50  ;;  %v2899_v27 = vmax.f32 %v2877_v38, %v9399_v52  ;;  %v12841_v54 = vld [vmem:[#allocation13_spill] sm:$0xff]  ;;  %v9546_v50 = vadd.f32 %v9427_v23, %v9351_v47  ;;  %v12850_v38 = vld [vmem:[#allocation72_spill] sm:$0xff] }
 0x397   :  { %v9516_v42 = vpop.f32.mrf.mxu1  ;;  %v12843_v48 = vpack.c.bf16 %v12841_v54, %v12842_v57  ;;  %7058 = vrcp.f32 %v9514_v35  ;;  %v2904_v14 = vsub.f32 %v9070_v49, %v2900_v33  ;;  %v9553_v49 = vadd.f32 %v9396_v0, %v9465_v25 }
 0x398   :  { %12839 = vst [vmem:[#allocation63_spill] sm:$0xff] %v9516_v42  ;;  %7060 = vrcp.f32 %v9520_v19  ;;  %v2903_v5 = vsub.f32 %v12848_v15, %v2899_v27  ;;  %v2915_v54 = vsub.f32 %v12850_v38, %v2899_v27  ;;  %v2916_v2 = vsub.f32 %v12852_v58, %v2900_v33 }
 0x399   :  { %v9522_v46 = vpop.f32.mrf.mxu0  ;;  %v9530_v59 = vpop.eup %7050  ;;  %7062 = vrcp.f32 %v9546_v50  ;;  %vm1400_vm3 = vweird.f32 %v9546_v50  ;;  %vm1415_vm6 = vweird.f32 %v9553_v49 }
 0x39a   :  { %12840 = vst [vmem:[#allocation24_spill] sm:$0xff] %v9522_v46  ;;  %3404 = vrot.lane.b32.xlu2 %v12843_v48, %s7388_s29  ;;  %v9533_v51 = vpop.eup %7052  ;;  %v9555_v48 = vpop.f32.mrf.mxu2  ;;  %v2907_v47 = vmul.f32 1.442695, %v2903_v5  ;;  %v2919_v0 = vmul.f32 1.442695, %v2915_v54  ;;  %7064 = vrcp.f32 %v9553_v49 }
 0x39b   :  { %12844 = vst [vmem:[#allocation23_spill] sm:$0xff] %v9530_v59  ;;  %v9539_v7 = vpop.eup %7054  ;;  %v2921_v5 = vmul.f32 1.442695, %v2916_v2  ;;  %v3164_v54 = vmul.f32 0.35355338, %v9179_v1  ;;  %v6900_v2 = vld [vmem:[%s12390_s5 + $0x38] sm:$0xff] }
 0x39c   :  { %v1680_v6 = vpop.xlane.xlu0 %1679  ;;  %v3371_v12 = vpop.permute.xlu2 %3370  ;;  %12845 = vst [vmem:[#allocation84_spill] sm:$0xff] %v9533_v51  ;;  %v2712_v27 = vpack.c.bf16 %v9539_v7, %v9530_v59  ;;  %5653 = vmatpush.bf16.msra.mxu2 %v6900_v2  ;;  %v3163_v59 = vmul.f32 0.35355338, %v9164_v13 }
 0x39d   :  { %v9536_v26 = vpop.xlane.xlu1 %754  ;;  %v3381_v52 = vsel %vm874_vm12, %v3371_v12, 0  ;;  %12847 = vst [vmem:[#allocation86_spill] sm:$0xff] %v9539_v7  ;;  %v9542_v18 = vpop.eup %7056  ;;  %v12854_v7 = vld [vmem:[#allocation65_spill] sm:$0xff] }
 0x39e   :  { %12846 = vst [vmem:[#allocation83_spill] sm:$0xff] %v9536_v26  ;;  %3388 = vmatpush.bf16.msra.mxu0 %v3381_v52  ;;  %v9559_v15 = vpop.eup %7058  ;;  %v2909_v52 = vmul.f32 1.442695, %v2904_v14  ;;  %v2720_v23 = vpack.c.bf16 %v9542_v18, %v9533_v51  ;;  %v9573_v14 = vadd.f32 %v9477_v34, %v1680_v6  ;;  %v1696_v34 = vsel %vm703_vm13, %v12854_v7, 0.0 }
 0x39f   :  { %12849 = vst [vmem:[#allocation85_spill] sm:$0xff] %v9542_v18  ;;  %v9549_v57 = vpop.f32.mrf.mxu1  ;;  %v9562_v53 = vpop.eup %7060  ;;  %v788_v25 = vmul.f32 %v9559_v15, %v9514_v35  ;;  %v3199_v7 = vmul.f32 0.35355338, %v9194_v9  ;;  %v3200_v18 = vmul.f32 0.35355338, %v9234_v11  ;;  %v12859_v9 = vld [vmem:[#allocation71_spill] sm:$0xff]  ;;  %v9639_v29 = vadd.f32 %v3163_v59, %v8420_v16 }
 0x3a0   :  { %12851 = vst [vmem:[#allocation87_spill] sm:$0xff] %v9555_v48  ;;  %v1100_v33 = vmul.f32 %v9562_v53, %v9520_v19  ;;  %7066 = vpow2.f32 %v2909_v52  ;;  %v9594_v52 = vpop.eup %7062  ;;  %vm793_vm8 = vweird.f32 %v9559_v15  ;;  %vm1105_vm9 = vweird.f32 %v9562_v53 }
 0x3a1   :  { %v9557_v12 = vpop.f32.mrf.mxu0  ;;  %7068 = vpow2.f32 %v2907_v47  ;;  %v9596_v47 = vpop.eup %7064  ;;  %v1396_v13 = vmul.f32 %v9594_v52, %v9546_v50  ;;  %12864 = vst [vmem:[#allocation65_spill] sm:$0xff] %v9639_v29  ;;  %vm9669_vm10 = vmor %vm792_vm7, %vm793_vm8  ;;  %vm1401_vm1 = vweird.f32 %v9594_v52 }
 0x3a2   :  { %7070 = vpow2.f32 %v2919_v0  ;;  %v1101_v1 = vsub.f32 1.0, %v1100_v33  ;;  %v9599_v0 = vpop.f32.mrf.mxu2  ;;  %vm9676_vm14 = vmor %vm1104_vm11, %vm1105_vm9  ;;  %vm1416_vm2 = vweird.f32 %v9596_v47 }
 0x3a3   :  { %7072 = vrcp.f32 %v9573_v14  ;;  %12855 = vst [vmem:[#allocation25_spill] sm:$0xff] %v9599_v0  ;;  %v1687_v0 = vsel %vm362_vm5, %v12859_v9, 0.0  ;;  %v1411_v9 = vmul.f32 %v9596_v47, %v9553_v49  ;;  %vm9731_vm4 = vmor %vm1400_vm3, %vm1401_vm1 }
 0x3a4   :  { %v9575_v58 = vpop.xlane.xlu0 %751  ;;  %6701 = vmatmul.msk.bf16.gmra.mxu1 %vm362_vm5, %v2712_v27  ;;  %7074 = vpow2.f32 %v2921_v5  ;;  %v3474_v5 = vmul.f32 0.35355338, %v9220_v55  ;;  %v1102_v11 = vmul.f32 %v9562_v53, %v1101_v1  ;;  %v3501_v1 = vmul.f32 0.35355338, %v9267_v56  ;;  %vm9740_vm7 = vmor %vm1415_vm6, %vm1416_vm2 }
 0x3a5   :  { %6699 = vmatmul.msk.bf16.gmra.mxu0 %vm703_vm13, %v2720_v23  ;;  %v9581_v38 = vpop.xlane.xlu1 %766  ;;  %v789_v23 = vsub.f32 1.0, %v788_v25  ;;  %v9602_v25 = vadd.f32 %v3164_v54, %v8459_v17  ;;  %v6899_v54 = vld [vmem:[%s12390_s5 + $0x30] sm:$0xff] }
 0x3a6   :  { %12853 = vst [vmem:[#allocation16_spill] sm:$0xff] %v9581_v38  ;;  %5654 = vmatpush.bf16.msra.mxu2 %v6899_v54  ;;  %v798_v54 = vand.u32 2147483648, %v9514_v35  ;;  %v1103_v59 = vadd.f32 %v9562_v53, %v1102_v11 }
 0x3a7   :  { %1697 = vadd.xlane.f32.xlu0 %v1696_v34  ;;  %v9586_v6 = vpop.f32.mrf.mxu1  ;;  %12856 = vst [vmem:[#allocation56_spill] sm:$0xff] %v9602_v25  ;;  %v9604_v34 = vpop.eup %7066  ;;  %v790_v33 = vmul.f32 %v9559_v15, %v789_v23  ;;  %v12861_v23 = vld [vmem:[#allocation78_spill] sm:$0xff]  ;;  %v3214_v42 = vsel %vm362_vm5, %v9602_v25, -inf  ;;  %v9651_v25 = vadd.f32 %v3474_v5, %v8359_v43 }
 0x3a8   :  { %12857 = vst [vmem:[#allocation13_spill] sm:$0xff] %v9604_v34  ;;  %v9608_v51 = vpop.eup %7068  ;;  %v9629_v39 = vadd.f32 %v3199_v7, %v12861_v23  ;;  %v12866_v7 = vld [vmem:[#allocation80_spill] sm:$0xff]  ;;  %v12869_v43 = vld [vmem:[#allocation74_spill] sm:$0xff] }
 0x3a9   :  { %v9589_v27 = vpop.f32.mrf.mxu0  ;;  %12858 = vst [vmem:[#allocation12_spill] sm:$0xff] %v9608_v51  ;;  %v9619_v2 = vpop.eup %7070  ;;  %v9645_v22 = vadd.f32 %v3200_v18, %v12866_v7  ;;  %v791_v8 = vadd.f32 %v9559_v15, %v790_v33  ;;  %v1412_v33 = vsub.f32 1.0, %v1411_v9  ;;  %v3015_v7 = vpack.c.bf16 %v9604_v34, %v9608_v51 }
 0x3aa   :  { %12860 = vst [vmem:[#allocation89_spill] sm:$0xff] %v9619_v2  ;;  %v9626_v55 = vpop.eup %7072  ;;  %v9665_v38 = vadd.f32 %v3501_v1, %v12869_v43  ;;  %v1108_v9 = vand.u32 2147483647, %v9520_v19  ;;  %v1107_v51 = vsel %vm9676_vm14, %v9562_v53, %v1103_v59  ;;  %v9710_v34 = vmul.f32 0.35355338, %v9307_v20 }
 0x3ab   :  { %12862 = vst [vmem:[#allocation72_spill] sm:$0xff] %v9629_v39  ;;  %v9635_v46 = vpop.eup %7074  ;;  %v1707_v18 = vmul.f32 %v9626_v55, %v9573_v14  ;;  %v1234_v20 = vadd.f32 %v9336_v10, %v9341_v31  ;;  %v1419_v10 = vand.u32 2147483647, %v9553_v49  ;;  %vm1712_vm8 = vweird.f32 %v9626_v55 }
 0x3ac   :  { %v9612_v3 = vpop.xlane.xlu0 %763  ;;  %12863 = vst [vmem:[#allocation92_spill] sm:$0xff] %v9635_v46  ;;  %v3023_v5 = vpack.c.bf16 %v9635_v46, %v9619_v2  ;;  %v9680_v46 = vpop.f32.mrf.mxu2  ;;  %v3211_v2 = vsel %vm362_vm5, %v9639_v29, -inf  ;;  %vm1109_vm0 = vcmp.eq.f32.partialorder %v1108_v9, 8.507059e+37  ;;  %v3521_v53 = vsel %vm703_vm13, %v9665_v38, -inf }
 0x3ad   :  { %v9624_v48 = vpop.xlane.xlu1 %3221  ;;  %1688 = vadd.xlane.f32.xlu1 %v1687_v0  ;;  %12867 = vst [vmem:[#allocation78_spill] sm:$0xff] %v9645_v22  ;;  %vm1420_vm11 = vcmp.eq.f32.partialorder %v1419_v10, 8.507059e+37 }
 0x3ae   :  { %12874 = vst [vmem:[#allocation74_spill] sm:$0xff] %v9680_v46 }
 0x3af   :  { %3215 = vmax.xlane.f32.xlu0 %v3214_v42  ;;  %v9642_v0 = vpop.f32.mrf.mxu1  ;;  %v1397_v42 = vsub.f32 1.0, %v1396_v13  ;;  %v796_v13 = vand.u32 2147483647, %v9514_v35  ;;  %v3226_v35 = vsel %vm703_vm13, %v9645_v22, -inf  ;;  %v1413_v22 = vmul.f32 %v9596_v47, %v1412_v33 }
 0x3b0   :  { %12865 = vst [vmem:[#allocation71_spill] sm:$0xff] %v9642_v0  ;;  %v1110_v0 = vand.u32 2147483648, %v9520_v19  ;;  %v9690_v19 = vsel %vm703_vm13, %v9629_v39, -inf  ;;  %v3509_v39 = vsel %vm362_vm5, %v9651_v25, -inf }
 0x3b1   :  { %v9653_v56 = vpop.f32.mrf.mxu0  ;;  %v1398_v46 = vmul.f32 %v9594_v52, %v1397_v42  ;;  %vm797_vm15 = vcmp.eq.f32.partialorder %v796_v13, 8.507059e+37  ;;  %v12875_v42 = vld [vmem:[#allocation100_spill] sm:$0xff] }
 0x3b2   :  { %12868 = vst [vmem:[#allocation114_spill] sm:$0xff] %v9653_v56  ;;  %v799_v56 = vor.u32 1.1754944e-38, %v798_v54  ;;  %v795_v54 = vsel %vm9669_vm10, %v9559_v15, %v791_v8  ;;  %v3475_v8 = vmul.f32 0.35355338, %v9242_v32  ;;  %v1406_v32 = vand.u32 2147483648, %v9546_v50 }
 0x3b3   :  { %v1399_v59 = vadd.f32 %v9594_v52, %v1398_v46  ;;  %v1404_v46 = vand.u32 2147483647, %v9546_v50  ;;  %vm1711_vm10 = vweird.f32 %v9573_v14 }
 0x3b4   :  { %v1695_v1 = vpop.xlane.xlu0 %1694  ;;  %6708 = vmatmul.msk.bf16.vlgmr.msra.gmra.mxu1 %vm362_vm5, %v3015_v7  ;;  %v1111_v7 = vor.u32 1.1754944e-38, %v1110_v0  ;;  %v9729_v11 = vadd.f32 %v3475_v8, %v8392_v61  ;;  %v1407_v50 = vor.u32 1.1754944e-38, %v1406_v32  ;;  %vm9764_vm14 = vmor %vm1711_vm10, %vm1712_vm8 }
 0x3b5   :  { %6706 = vmatmul.msk.bf16.vlgmr.msrb.gmra.mxu0 %vm703_vm13, %v3023_v5  ;;  %v1708_v5 = vsub.f32 1.0, %v1707_v18  ;;  %v1683_v29 = vpop.xlane.xlu1 %1682  ;;  %3212 = vmax.xlane.f32.xlu1 %v3211_v2  ;;  %v800_v2 = vsel %vm797_vm15, %v799_v56, %v795_v54  ;;  %v12876_v18 = vld [vmem:[#allocation59_spill] sm:$0xff]  ;;  %v1421_v56 = vand.u32 2147483648, %v9553_v49  ;;  %vm1405_vm9 = vcmp.eq.f32.partialorder %v1404_v46, 8.507059e+37 }
 0x3b6   :  { %v9700_v26 = vadd.f32 %v1695_v1, %v1683_v29  ;;  %v1112_v0 = vsel %vm1109_vm0, %v1111_v7, %v1107_v51  ;;  %v923_v33 = vadd.f32 %v12876_v18, %v12875_v42  ;;  %v1414_v51 = vadd.f32 %v9596_v47, %v1413_v22  ;;  %v12885_v1 = vld [vmem:[#allocation104_spill] sm:$0xff] }
 0x3b7   :  { %3510 = vmax.xlane.f32.xlu0 %v3509_v39  ;;  %v9705_v15 = vpop.f32.mrf.mxu1  ;;  %v1709_v39 = vmul.f32 %v9626_v55, %v1708_v5  ;;  %v1242_v9 = vmul.f32 %v1234_v20, %v1112_v0  ;;  %v1403_v22 = vsel %vm9731_vm4, %v9594_v52, %v1399_v59  ;;  %v1717_v52 = vand.u32 2147483648, %v9573_v14  ;;  %v9753_v0 = vpop.f32.mrf.mxu2 }
 0x3b8   :  { %7076 = vrcp.f32 %v9700_v26  ;;  %v931_v13 = vmul.f32 %v923_v33, %v800_v2  ;;  %v1418_v49 = vsel %vm9740_vm7, %v9596_v47, %v1414_v51  ;;  %v1715_v2 = vand.u32 2147483647, %v9573_v14 }
 0x3b9   :  { %v9713_v29 = vpop.f32.mrf.mxu0  ;;  %v1710_v5 = vadd.f32 %v9626_v55, %v1709_v39  ;;  %v1422_v32 = vor.u32 1.1754944e-38, %v1421_v56  ;;  %v1408_v42 = vsel %vm1405_vm9, %v1407_v50, %v1403_v22  ;;  %v1543_v47 = vadd.f32 %v9442_v62, %v9449_v60 }
 0x3ba   :  { %v1545_v18 = vadd.f32 %v9471_v30, %v9473_v63  ;;  %vm1716_vm15 = vcmp.eq.f32.partialorder %v1715_v2, 8.507059e+37  ;;  %v1718_v62 = vor.u32 1.1754944e-38, %v1717_v52  ;;  %v1732_v60 = vand.u32 2147483648, %v9700_v26  ;;  %v12884_v30 = vld [vmem:[#allocation94_spill] sm:$0xff] }
 0x3bb   :  { %v1423_v14 = vsel %vm1420_vm11, %v1422_v32, %v1418_v49  ;;  %v1730_v56 = vand.u32 2147483647, %v9700_v26  ;;  %v1552_v22 = vmul.f32 %v1543_v47, %v1408_v42  ;;  %v3512_v50 = vsel %vm362_vm5, %v9729_v11, -inf  ;;  %v12887_v47 = vld [vmem:[#allocation90_spill] sm:$0xff] }
 0x3bc   :  { %v2883_v31 = vpop.xlane.xlu0 %2882  ;;  %v1553_v54 = vmul.f32 %v1545_v18, %v1423_v14  ;;  %vm1726_vm1 = vweird.f32 %v9700_v26  ;;  %v1856_v52 = vadd.f32 %v9586_v6, %v9589_v27 }
 0x3bd   :  { %v9746_v7 = vpop.xlane.xlu1 %1066  ;;  %3227 = vmax.xlane.f32.xlu1 %v3226_v35  ;;  %v2901_v59 = vmax.f32 %v2883_v31, %v9425_v36  ;;  %v1246_v31 = vadd.f32 %v1242_v9, %v931_v13  ;;  %vm1731_vm3 = vcmp.eq.f32.partialorder %v1730_v56, 8.507059e+37  ;;  %v12888_v36 = vld [vmem:[#allocation77_spill] sm:$0xff]  ;;  %v1556_v27 = vadd.f32 %v1552_v22, %v9423_v24 }
 0x3be   :  { %v7077_v8 = vpop.eup %7076  ;;  %v9793_v6 = vadd.f32 %v9710_v34, %v12888_v36 }
 0x3bf   :  { %v1722_v39 = vmul.f32 %v7077_v8, %v9700_v26  ;;  %3522 = vmax.xlane.f32.xlu0 %v3521_v53  ;;  %v1714_v53 = vsel %vm9764_vm14, %v9626_v55, %v1710_v5  ;;  %v2905_v63 = vsub.f32 %v12884_v30, %v2901_v59  ;;  %vm1727_vm0 = vweird.f32 %v7077_v8  ;;  %v12886_v26 = vld [vmem:[#allocation101_spill] sm:$0xff] }
 0x3c0   :  { %v2183_v35 = vpop.f32.mrf.mxu1  ;;  %v2917_v10 = vsub.f32 %v12885_v1, %v2901_v59  ;;  %v1719_v55 = vsel %vm1716_vm15, %v1718_v62, %v1714_v53  ;;  %v1854_v5 = vadd.f32 %v9549_v57, %v9557_v12  ;;  %vm1728_vm2 = vmor %vm1726_vm1, %vm1727_vm0  ;;  %v9787_v57 = vpop.f32.mrf.mxu2  ;;  %v3524_v62 = vsel %vm703_vm13, %v9793_v6, -inf  ;;  %v12889_v30 = vld [vmem:[#allocation81_spill] sm:$0xff] }
 0x3c1   :  { %v2150_v33 = vpop.f32.mrf.mxu0  ;;  %v1723_v20 = vsub.f32 1.0, %v1722_v39  ;;  %v2911_v13 = vmul.f32 1.442695, %v2905_v63  ;;  %v12890_v63 = vld [vmem:[#allocation8_spill] sm:$0xff] }
 0x3c2   :  { %v9771_v51 = vadd.f32 %v2183_v35, %v2150_v33  ;;  %v1863_v59 = vmul.f32 %v1854_v5, %v1719_v55  ;;  %v2923_v39 = vmul.f32 1.442695, %v2917_v10  ;;  %v1557_v33 = vadd.f32 %v1553_v54, %v1246_v31 }
 0x3c3   :  { %v1724_v46 = vmul.f32 %v7077_v8, %v1723_v20  ;;  %3224 = vmax.xlane.f32.xlu2 %v9690_v19  ;;  %v1733_v19 = vor.u32 1.1754944e-38, %v1732_v60  ;;  %7078 = vpow2.f32 %v2911_v13  ;;  %v9800_v60 = vadd.f32 %v9612_v3, %v9575_v58 }
 0x3c4   :  { %12883 = vst [vmem:[#allocation100_spill] sm:$0xff] %v9771_v51  ;;  %v1064_v12 = vpop.xlane.xlu0 %1063  ;;  %v1867_v53 = vadd.f32 %v1863_v59, %v1556_v27  ;;  %7080 = vpow2.f32 %v2923_v39  ;;  %v12898_v39 = vld [vmem:[#allocation26_spill] sm:$0xff] }
 0x3c5   :  { %v1725_v49 = vadd.f32 %v7077_v8, %v1724_v46  ;;  %v2886_v2 = vpop.xlane.xlu1 %2885  ;;  %3513 = vmax.xlane.f32.xlu1 %v3512_v50  ;;  %v3663_v46 = vmul.f32 %v12890_v63, %v12889_v30  ;;  %vm807_vm6 = vweird.f32 %v9800_v60 }
 0x3c6   :  { %v2902_v9 = vmax.f32 %v2886_v2, %v9463_v37 }
 0x3c7   :  { %v1729_v32 = vsel %vm1728_vm2, %v7077_v8, %v1725_v49  ;;  %v3666_v10 = vpack.c.bf16 %v3663_v46, %v3663_v46  ;;  %v3660_v49 = vmul.f32 %v12890_v63, %v12828_v41  ;;  %v12902_v46 = vld [vmem:[#allocation17_spill] sm:$0xff] }
 0x3c8   :  { %v1734_v35 = vsel %vm1731_vm3, %v1733_v19, %v1729_v32  ;;  %v2906_v42 = vsub.f32 %v12886_v26, %v2902_v9  ;;  %v2918_v18 = vsub.f32 %v12887_v47, %v2902_v9  ;;  %v9812_v3 = vpop.f32.mrf.mxu2  ;;  %v9833_v13 = vpop.f32.mrf.mxu1  ;;  %v12897_v32 = vld [vmem:[#allocation27_spill] sm:$0xff] }
 0x3c9   :  { %v1864_v37 = vmul.f32 %v1856_v52, %v1734_v35  ;;  %v9805_v56 = vpop.eup %7078  ;;  %v3659_v52 = vmul.f32 %v12890_v63, %v12830_v21  ;;  %v9831_v19 = vpop.f32.mrf.mxu0  ;;  %12896 = vst [vmem:[#allocation77_spill] sm:$0xff] %v9833_v13  ;;  %v12899_v35 = vpack.c.bf16 %v12897_v32, %v12898_v39 }
 0x3ca   :  { %v2913_v8 = vmul.f32 1.442695, %v2906_v42  ;;  %v2925_v14 = vmul.f32 1.442695, %v2918_v18  ;;  %12891 = vst [vmem:[#allocation59_spill] sm:$0xff] %v9805_v56  ;;  %v9807_v1 = vpop.eup %7080 }
 0x3cb   :  { %v1868_v20 = vadd.f32 %v1864_v37, %v1557_v33  ;;  %12892 = vst [vmem:[#allocation94_spill] sm:$0xff] %v9807_v1  ;;  %v3664_v9 = vpack.c.bf16 %v3660_v49, %v3659_v52 }
 0x3cc   :  { %7082 = vpow2.f32 %v2913_v8  ;;  %v9814_v58 = vpop.xlane.xlu0 %1078  ;;  %12895 = vst [vmem:[#allocation90_spill] sm:$0xff] %v9831_v19  ;;  %v3662_v8 = vmul.f32 %v12890_v63, %v12820_v45 }
 0x3cd   :  { %7084 = vpow2.f32 %v2925_v14  ;;  %v3207_v34 = vpop.xlane.xlu1 %3206  ;;  %3525 = vmax.xlane.f32.xlu1 %v3524_v62  ;;  %v5601_v24 = vpack.c.bf16 %v1868_v20, %v1867_v53  ;;  %v3661_v62 = vmul.f32 %v12890_v63, %v12823_v4 }
 0x3ce   :  { %7086 = vrcp.f32 %v9800_v60 }
 0x3cf   :  { %6782 = vmatmul.msk.bf16.vlgmr.msra.gmra.mxu2 %vm362_vm5, %v5601_v24 }
 0x3d0   :  { %v9842_v26 = vpop.f32.mrf.mxu2 }
 0x3d1   :  { %12900 = vst [vmem:[#allocation81_spill] sm:$0xff] %v9842_v26 }
 0x3d2   :  { %v9810_v31 = vpop.eup %7082 }
 0x3d3   :  { %12893 = vst [vmem:[#allocation104_spill] sm:$0xff] %v9810_v31  ;;  %v9816_v22 = vpop.eup %7084  ;;  %3674 = vrot.lane.b32.xlu0 %v3666_v10, %s7389_s11  ;;  %v3016_v55 = vpack.c.bf16 %v9810_v31, %v9805_v56  ;;  %v12903_v10 = vld [vmem:[#allocation19_spill] sm:$0xff] }
 0x3d4   :  { %12894 = vst [vmem:[#allocation101_spill] sm:$0xff] %v9816_v22  ;;  %v3024_v50 = vpack.c.bf16 %v9816_v22, %v9807_v1  ;;  %v9827_v2 = vpop.eup %7086  ;;  %v9844_v42 = vpop.xlane.xlu0 %1377 }
 0x3d5   :  { %v1375_v54 = vpop.xlane.xlu1 %1374  ;;  %6709 = vmatmul.msk.bf16.gmra.mxu1 %vm362_vm5, %v3016_v55  ;;  %v3210_v5 = vpop.xlane.xlu2 %3209  ;;  %v803_v59 = vmul.f32 %v9827_v2, %v9800_v60  ;;  %v3665_v55 = vpack.c.bf16 %v3662_v8, %v3661_v62  ;;  %vm808_vm4 = vweird.f32 %v9827_v2  ;;  %v12913_v62 = vld [vmem:[#allocation98_spill] sm:$0xff] }
 0x3d6   :  { %6707 = vmatmul.msk.bf16.gmra.mxu0 %vm703_vm13, %v3024_v50  ;;  %v811_v50 = vand.u32 2147483647, %v9800_v60  ;;  %v3230_v39 = vmax.f32 %v3210_v5, %v9624_v48  ;;  %vm9875_vm7 = vmor %vm807_vm6, %vm808_vm4 }
 0x3d7   :  { %v804_v27 = vsub.f32 1.0, %v803_v59  ;;  %v3229_v59 = vmax.f32 %v3207_v34, %v9504_v40 }
 0x3d8   :  { %v9867_v32 = vpop.f32.mrf.mxu2  ;;  %vm9879_vm8 = vcmp.eq.f32.partialorder %v811_v50, 8.507059e+37 }
 0x3d9   :  { %v805_v20 = vmul.f32 %v9827_v2, %v804_v27  ;;  %12905 = vst [vmem:[#allocation26_spill] sm:$0xff] %v9867_v32 }
 0x3db   :  { %3670 = vrot.lane.b32.xlu0 %v3664_v9, %s7389_s11  ;;  %3710 = vrot.lane.b32.xlu2 %v12899_v35, %s7388_s29  ;;  %v806_v9 = vadd.f32 %v9827_v2, %v805_v20 }
 0x3dd   :  { %v1387_v47 = vpop.xlane.xlu1 %1386  ;;  %v1076_v18 = vpop.xlane.xlu2 %1075 }
 0x3de   :  { %v1393_v33 = vadd.f32 %v1387_v47, %v1375_v54  ;;  %v9846_v37 = vadd.f32 %v1076_v18, %v1064_v12  ;;  %v12904_v12 = vpack.c.bf16 %v12902_v46, %v12903_v10  ;;  %v813_v54 = vand.u32 2147483648, %v9800_v60  ;;  %v9871_v47 = vpop.xlane.xlu0 %1389 }
 0x3df   :  { %v810_v60 = vsel %vm9875_vm7, %v9827_v2, %v806_v9  ;;  %v3246_v46 = vsub.f32 %v12913_v62, %v3230_v39  ;;  %v12914_v9 = vld [vmem:[#allocation95_spill] sm:$0xff]  ;;  %v12917_v62 = vld [vmem:[#allocation49_spill] sm:$0xff] }
 0x3e0   :  { %7088 = vrcp.f32 %v1393_v33  ;;  %v814_v34 = vor.u32 1.1754944e-38, %v813_v54  ;;  %v1125_v50 = vand.u32 2147483648, %v9846_v37  ;;  %v1434_v54 = vand.u32 2147483647, %v1393_v33 }
 0x3e1   :  { %7090 = vrcp.f32 %v9846_v37  ;;  %v2188_v53 = vpop.f32.mrf.mxu1  ;;  %vm1430_vm11 = vweird.f32 %v1393_v33  ;;  %v3234_v8 = vsub.f32 %v12914_v9, %v3230_v39  ;;  %vm1119_vm15 = vweird.f32 %v9846_v37  ;;  %v12919_v9 = vld [vmem:[#allocation93_spill] sm:$0xff] }
 0x3e2   :  { %v2155_v14 = vpop.f32.mrf.mxu0  ;;  %v815_v2 = vsel %vm9879_vm8, %v814_v34, %v810_v60  ;;  %v9907_v60 = vpop.f32.mrf.mxu2  ;;  %vm1435_vm1 = vcmp.eq.f32.partialorder %v1434_v54, 8.507059e+37 }
 0x3e3   :  { %v9854_v24 = vadd.f32 %v2188_v53, %v2155_v14  ;;  %3708 = vrot.lane.b32.xlu0 %v12904_v12, %s7388_s29  ;;  %v12912_v53 = vld [vmem:[#allocation96_spill] sm:$0xff] }
 0x3e4   :  { %v3245_v20 = vsub.f32 %v12912_v53, %v3229_v59  ;;  %12918 = vst [vmem:[#allocation96_spill] sm:$0xff] %v9907_v60  ;;  %v12958_v60 = vld [vmem:[#allocation68_spill] sm:$0xff] }
 0x3e5   :  { %12901 = vst [vmem:[#allocation27_spill] sm:$0xff] %v9854_v24  ;;  %v9862_v49 = vpop.xlane.xlu2 %1685 }
 0x3e6   :  { %v7089_v52 = vpop.eup %7088  ;;  %3672 = vrot.lane.b32.xlu1 %v3665_v55, %s7389_s11  ;;  %v1436_v55 = vand.u32 2147483648, %v1393_v33  ;;  %v3249_v34 = vmul.f32 1.442695, %v3245_v20 }
 0x3e7   :  { %v7091_v35 = vpop.eup %7090  ;;  %v1426_v18 = vmul.f32 %v7089_v52, %v1393_v33  ;;  %vm1431_vm9 = vweird.f32 %v7089_v52  ;;  %v1126_v33 = vor.u32 1.1754944e-38, %v1125_v50 }
 0x3e8   :  { %v1115_v27 = vmul.f32 %v7091_v35, %v9846_v37  ;;  %vm1120_vm10 = vweird.f32 %v7091_v35  ;;  %vm9899_vm14 = vmor %vm1430_vm11, %vm1431_vm9  ;;  %v1437_v13 = vor.u32 1.1754944e-38, %v1436_v55  ;;  %v3239_v55 = vmul.f32 1.442695, %v3234_v8 }
 0x3e9   :  { %v1427_v48 = vsub.f32 1.0, %v1426_v18  ;;  %v9885_v14 = vpop.f32.mrf.mxu1  ;;  %vm1121_vm0 = vmor %vm1119_vm15, %vm1120_vm10 }
 0x3ea   :  { %v9883_v5 = vpop.f32.mrf.mxu0  ;;  %12911 = vst [vmem:[#allocation19_spill] sm:$0xff] %v9885_v14  ;;  %v1116_v10 = vsub.f32 1.0, %v1115_v27  ;;  %v3251_v27 = vmul.f32 1.442695, %v3246_v46 }
 0x3eb   :  { %12910 = vst [vmem:[#allocation17_spill] sm:$0xff] %v9883_v5  ;;  %v1428_v12 = vmul.f32 %v7089_v52, %v1427_v48  ;;  %v1123_v5 = vand.u32 2147483647, %v9846_v37  ;;  %v932_v37 = vmul.f32 %v12919_v9, %v815_v2 }
 0x3ec   :  { %v1117_v18 = vmul.f32 %v7091_v35, %v1116_v10  ;;  %v3233_v10 = vsub.f32 %v12917_v62, %v3229_v59  ;;  %7092 = vpow2.f32 %v3251_v27 }
 0x3ed   :  { %v1429_v14 = vadd.f32 %v7089_v52, %v1428_v12  ;;  %v9894_v24 = vpop.xlane.xlu2 %1700  ;;  %vm1124_vm2 = vcmp.eq.f32.partialorder %v1123_v5, 8.507059e+37  ;;  %7094 = vpow2.f32 %v3249_v34  ;;  %v3795_v34 = vpop.f32.mrf.mxu3 }
 0x3ee   :  { %v1118_v53 = vadd.f32 %v7091_v35, %v1117_v18  ;;  %7096 = vpow2.f32 %v3239_v55  ;;  %v3805_v9 = vmul.f32 0.35355338, %v3795_v34 }
 0x3ef   :  { %v3407_v12 = vpop.permute.xlu0 %3406  ;;  %v1433_v40 = vsel %vm9899_vm14, %v7089_v52, %v1429_v14  ;;  %v3237_v52 = vmul.f32 1.442695, %v3233_v10 }
 0x3f0   :  { %v1122_v39 = vsel %vm1121_vm0, %v7091_v35, %v1118_v53  ;;  %3422 = vmatpush.bf16.msrb.mxu1 %v3407_v12  ;;  %v1438_v59 = vsel %vm1435_vm1, %v1437_v13, %v1433_v40 }
 0x3f1   :  { %v2487_v18 = vpop.f32.mrf.mxu1  ;;  %v1127_v19 = vsel %vm1124_vm2, %v1126_v33, %v1122_v39  ;;  %v1554_v20 = vmul.f32 %v9497_v28, %v1438_v59  ;;  %7098 = vpow2.f32 %v3237_v52  ;;  %v12930_v59 = vld [vmem:[#allocation33_spill] sm:$0xff]  ;;  %v9948_v52 = vadd.f32 %v3805_v9, %v12869_v43 }
 0x3f2   :  { %v2454_v46 = vpop.f32.mrf.mxu0  ;;  %v1243_v48 = vmul.f32 %v9386_v44, %v1127_v19  ;;  %v9916_v2 = vpop.eup %7092  ;;  %v12926_v19 = vld [vmem:[#allocation107_spill] sm:$0xff]  ;;  %v3477_v55 = vmul.f32 0.35355338, %v12930_v59  ;;  %v12939_v59 = vld [vmem:[#allocation76_spill] sm:$0xff] }
 0x3f3   :  { %v9910_v50 = vadd.f32 %v2487_v18, %v2454_v46  ;;  %12921 = vst [vmem:[#allocation95_spill] sm:$0xff] %v9916_v2  ;;  %v9922_v27 = vpop.eup %7094  ;;  %v9924_v44 = vpop.f32.mrf.mxu2  ;;  %v3503_v28 = vmul.f32 0.35355338, %v12926_v19 }
 0x3f4   :  { %v1247_v14 = vadd.f32 %v1243_v48, %v932_v37  ;;  %12924 = vst [vmem:[#allocation115_spill] sm:$0xff] %v9922_v27  ;;  %v3353_v53 = vpack.c.bf16 %v9916_v2, %v9922_v27  ;;  %v9929_v62 = vpop.eup %7096 }
 0x3f5   :  { %12920 = vst [vmem:[#allocation98_spill] sm:$0xff] %v9910_v50  ;;  %v3369_v35 = vpop.permute.xlu1 %3368  ;;  %v3367_v5 = vpop.permute.xlu2 %3366  ;;  %v9935_v12 = vadd.f32 %v3503_v28, %v12861_v23 }
 0x3f6   :  { %3389 = vmatpush.bf16.msra.mxu0 %v3369_v35  ;;  %v9914_v54 = vadd.f32 %v1554_v20, %v1247_v14  ;;  %12925 = vst [vmem:[#allocation116_spill] sm:$0xff] %v9924_v44  ;;  %v12932_v14 = vld [vmem:[#allocation97_spill] sm:$0xff]  ;;  %v9952_v35 = vadd.f32 %v3477_v55, %v8459_v17  ;;  %v3504_v55 = vmul.f32 0.35355338, %v12939_v59  ;;  %v12959_v44 = vld [vmem:[#allocation34_spill] sm:$0xff] }
 0x3f7   :  { %12927 = vst [vmem:[#allocation107_spill] sm:$0xff] %v9929_v62  ;;  %v9932_v33 = vpop.eup %7098  ;;  %v3527_v37 = vsel %vm703_vm13, %v9935_v12, -inf  ;;  %v3476_v20 = vmul.f32 0.35355338, %v12932_v14  ;;  %v1239_v63 = vadd.f32 %v12959_v44, %v12958_v60 }
 0x3f8   :  { %12928 = vst [vmem:[#allocation117_spill] sm:$0xff] %v9932_v33  ;;  %v3345_v40 = vpack.c.bf16 %v9929_v62, %v9932_v33  ;;  %v12943_v62 = vld [vmem:[#allocation102_spill] sm:$0xff] }
 0x3f9   :  { %v9920_v8 = vpop.f32.mrf.mxu1 }
 0x3fa   :  { %v9918_v13 = vpop.f32.mrf.mxu0  ;;  %12923 = vst [vmem:[#allocation93_spill] sm:$0xff] %v9920_v8  ;;  %3390 = vmatpush.bf16.msra.mxu0 %v3367_v5  ;;  %v9956_v5 = vadd.f32 %v9814_v58, %v9746_v7  ;;  %v9974_v7 = vadd.f32 %v9871_v47, %v9844_v42  ;;  %v3518_v58 = vsel %vm362_vm5, %v9952_v35, -inf }
 0x3fb   :  { %12922 = vst [vmem:[#allocation49_spill] sm:$0xff] %v9918_v13  ;;  %v9945_v48 = vpop.f32.mrf.mxu2 }
 0x3fc   :  { %12931 = vst [vmem:[#allocation33_spill] sm:$0xff] %v9945_v48  ;;  %7100 = vrcp.f32 %v9956_v5  ;;  %vm1134_vm6 = vweird.f32 %v9956_v5  ;;  %vm1445_vm11 = vweird.f32 %v9974_v7 }
 0x3fd   :  { %6714 = vmatmul.msk.bf16.vlgmr.msra.gmra.mxu0 %vm703_vm13, %v3353_v53  ;;  %v3405_v10 = vpop.permute.xlu2 %3404  ;;  %v9963_v53 = vadd.f32 %v3476_v20, %v8420_v16  ;;  %v3797_v20 = vpop.f32.mrf.mxu3 }
 0x3fe   :  { %3423 = vmatpush.bf16.msrb.mxu1 %v3405_v10  ;;  %v12935_v10 = vld [vmem:[#allocation83_spill] sm:$0xff]  ;;  %v3806_v27 = vmul.f32 0.35355338, %v3797_v20 }
 0x3ff   :  { %v3515_v14 = vsel %vm362_vm5, %v9963_v53, -inf }
 0x401   :  { %v2492_v46 = vpop.f32.mrf.mxu1  ;;  %6716 = vmatmul.msk.bf16.vlgmr.msrb.gmra.mxu1 %vm362_vm5, %v3345_v40  ;;  %v12936_v40 = vld [vmem:[#allocation16_spill] sm:$0xff] }
 0x402   :  { %v2459_v39 = vpop.f32.mrf.mxu0  ;;  %v9967_v34 = vadd.f32 %v12936_v40, %v12935_v10  ;;  %v12940_v10 = vld [vmem:[#allocation75_spill] sm:$0xff] }
 0x403   :  { %v9940_v18 = vadd.f32 %v2492_v46, %v2459_v39  ;;  %v3825_v39 = vsel %vm703_vm13, %v9948_v52, -inf  ;;  %v12937_v46 = vld [vmem:[#allocation62_spill] sm:$0xff] }
 0x404   :  { %3528 = vmax.xlane.f32.xlu2 %v3527_v37  ;;  %v3778_v9 = vmul.f32 0.35355338, %v12937_v46  ;;  %v9979_v37 = vpop.f32.mrf.mxu2  ;;  %7102 = vrcp.f32 %v9967_v34  ;;  %v9991_v46 = vpop.eup %7100  ;;  %vm822_vm9 = vweird.f32 %v9967_v34 }
 0x405   :  { %12929 = vst [vmem:[#allocation118_spill] sm:$0xff] %v9940_v18  ;;  %7104 = vrcp.f32 %v9974_v7  ;;  %vm1135_vm3 = vweird.f32 %v9991_v46 }
 0x406   :  { %12938 = vst [vmem:[#allocation83_spill] sm:$0xff] %v9979_v37  ;;  %v9986_v42 = vadd.f32 %v3778_v9, %v12940_v10  ;;  %v828_v37 = vand.u32 2147483648, %v9967_v34  ;;  %vm10060_vm7 = vmor %vm1134_vm6, %vm1135_vm3 }
 0x408   :  { %v3813_v2 = vsel %vm362_vm5, %v9986_v42, -inf }
 0x409   :  { %v9960_v28 = vpop.f32.mrf.mxu1 }
 0x40a   :  { %v9958_v19 = vpop.f32.mrf.mxu0  ;;  %12934 = vst [vmem:[#allocation119_spill] sm:$0xff] %v9960_v28  ;;  %v9998_v33 = vpop.eup %7102 }
 0x40b   :  { %12933 = vst [vmem:[#allocation97_spill] sm:$0xff] %v9958_v19  ;;  %v10000_v9 = vpop.eup %7104  ;;  %v818_v20 = vmul.f32 %v9998_v33, %v9967_v34  ;;  %vm823_vm4 = vweird.f32 %v9998_v33 }
 0x40c   :  { %3826 = vmax.xlane.f32.xlu2 %v3825_v39  ;;  %v10007_v28 = vpop.f32.mrf.mxu2  ;;  %vm1446_vm8 = vweird.f32 %v10000_v9  ;;  %vm10071_vm10 = vmor %vm822_vm9, %vm823_vm4 }
 0x40d   :  { %3519 = vmax.xlane.f32.xlu0 %v3518_v58  ;;  %v12942_v58 = vld [vmem:[#allocation80_spill] sm:$0xff]  ;;  %12944 = vst [vmem:[#allocation62_spill] sm:$0xff] %v10007_v28  ;;  %v819_v28 = vsub.f32 1.0, %v818_v20  ;;  %vm10077_vm15 = vmor %vm1445_vm11, %vm1446_vm8 }
 0x40e   :  { %v9994_v59 = vadd.f32 %v3504_v55, %v12942_v58  ;;  %v10010_v55 = vadd.f32 %v3806_v27, %v12888_v36 }
 0x40f   :  { %v820_v50 = vmul.f32 %v9998_v33, %v819_v28  ;;  %v1140_v28 = vand.u32 2147483648, %v9956_v5 }
 0x410   :  { %3516 = vmax.xlane.f32.xlu1 %v3515_v14  ;;  %v1130_v14 = vmul.f32 %v9991_v46, %v9956_v5  ;;  %v3828_v27 = vsel %vm703_vm13, %v10010_v55, -inf }
 0x411   :  { %v2791_v40 = vpop.f32.mrf.mxu1 }
 0x412   :  { %v2758_v47 = vpop.f32.mrf.mxu0 }
 0x413   :  { %v9989_v39 = vadd.f32 %v2791_v40, %v2758_v47  ;;  %v3779_v47 = vmul.f32 0.35355338, %v12943_v62  ;;  %v3530_v40 = vsel %vm703_vm13, %v9994_v59, -inf  ;;  %v1131_v62 = vsub.f32 1.0, %v1130_v14 }
 0x414   :  { %v10043_v22 = vpop.f32.mrf.mxu2 }
 0x415   :  { %12941 = vst [vmem:[#allocation16_spill] sm:$0xff] %v9989_v39  ;;  %3814 = vmax.xlane.f32.xlu0 %v3813_v2  ;;  %v1441_v2 = vmul.f32 %v10000_v9, %v9974_v7 }
 0x416   :  { %12948 = vst [vmem:[#allocation80_spill] sm:$0xff] %v10043_v22 }
 0x417   :  { %v1442_v39 = vsub.f32 1.0, %v1441_v2 }
 0x418   :  { %3531 = vmax.xlane.f32.xlu1 %v3530_v40  ;;  %v10024_v40 = vadd.f32 %v3779_v47, %v8392_v61 }
 0x419   :  { %v10018_v18 = vpop.f32.mrf.mxu1  ;;  %v1443_v20 = vmul.f32 %v10000_v9, %v1442_v39  ;;  %v12950_v39 = vld [vmem:[#allocation103_spill] sm:$0xff] }
 0x41a   :  { %v10016_v19 = vpop.f32.mrf.mxu0  ;;  %12946 = vst [vmem:[#allocation75_spill] sm:$0xff] %v10018_v18  ;;  %v1698_v8 = vpop.xlane.xlu0 %1697  ;;  %v12947_v18 = vld [vmem:[#allocation10_spill] sm:$0xff] }
 0x41b   :  { %12945 = vst [vmem:[#allocation76_spill] sm:$0xff] %v10016_v19  ;;  %v10021_v13 = vadd.f32 %v1698_v8, %v9862_v49  ;;  %v1132_v19 = vmul.f32 %v9991_v46, %v1131_v62  ;;  %v3965_v14 = vmul.f32 %v12947_v18, %v12823_v4  ;;  %v3966_v49 = vmul.f32 %v12947_v18, %v12820_v45 }
 0x41c   :  { %v3816_v8 = vsel %vm362_vm5, %v10024_v40, -inf  ;;  %v10101_v22 = vpop.f32.mrf.mxu2 }
 0x41d   :  { %7106 = vrcp.f32 %v10021_v13  ;;  %3829 = vmax.xlane.f32.xlu0 %v3828_v27  ;;  %v1133_v51 = vadd.f32 %v9991_v46, %v1132_v19  ;;  %v3969_v1 = vpack.c.bf16 %v3966_v49, %v3965_v14  ;;  %v821_v49 = vadd.f32 %v9998_v33, %v820_v50  ;;  %v12960_v50 = vld [vmem:[#allocation24_spill] sm:$0xff]  ;;  %12964 = vst [vmem:[#allocation10_spill] sm:$0xff] %v10101_v22 }
 0x41e   :  { %vm1741_vm1 = vweird.f32 %v10021_v13 }
 0x420   :  { %3817 = vmax.xlane.f32.xlu1 %v3816_v8  ;;  %v1689_v47 = vpop.xlane.xlu1 %1688 }
 0x421   :  { %v10039_v2 = vadd.f32 %v9894_v24, %v1689_v47  ;;  %v2796_v62 = vpop.f32.mrf.mxu1  ;;  %v1138_v24 = vand.u32 2147483647, %v9956_v5  ;;  %v12951_v47 = vld [vmem:[#allocation106_spill] sm:$0xff]  ;;  %v826_v5 = vand.u32 2147483647, %v9967_v34 }
 0x422   :  { %v2763_v27 = vpop.f32.mrf.mxu0  ;;  %v928_v14 = vadd.f32 %v12951_v47, %v12950_v39  ;;  %v829_v47 = vor.u32 1.1754944e-38, %v828_v37  ;;  %v1449_v34 = vand.u32 2147483647, %v9974_v7  ;;  %v825_v37 = vsel %vm10071_vm10, %v9998_v33, %v821_v49  ;;  %v12961_v33 = vld [vmem:[#allocation63_spill] sm:$0xff] }
 0x423   :  { %v10045_v56 = vadd.f32 %v2796_v62, %v2763_v27  ;;  %v7107_v8 = vpop.eup %7106  ;;  %7108 = vrcp.f32 %v10039_v2  ;;  %v1444_v62 = vadd.f32 %v10000_v9, %v1443_v20  ;;  %v1451_v20 = vand.u32 2147483648, %v9974_v7 }
 0x424   :  { %v1737_v19 = vmul.f32 %v7107_v8, %v10021_v13  ;;  %3976 = vrot.lane.b32.xlu2 %v3969_v1, %s7389_s11  ;;  %v1137_v1 = vsel %vm10060_vm7, %v9991_v46, %v1133_v51  ;;  %vm1139_vm14 = vcmp.eq.f32.partialorder %v1138_v24, 8.507059e+37  ;;  %vm1742_vm0 = vweird.f32 %v7107_v8 }
 0x425   :  { %12949 = vst [vmem:[#allocation102_spill] sm:$0xff] %v10045_v56  ;;  %v1141_v56 = vor.u32 1.1754944e-38, %v1140_v28  ;;  %v1747_v28 = vand.u32 2147483648, %v10021_v13  ;;  %v1448_v24 = vsel %vm10077_vm15, %v10000_v9, %v1444_v62  ;;  %v1745_v7 = vand.u32 2147483647, %v10021_v13  ;;  %vm10097_vm3 = vmor %vm1741_vm1, %vm1742_vm0 }
 0x426   :  { %v1738_v39 = vsub.f32 1.0, %v1737_v19  ;;  %v3216_v19 = vpop.xlane.xlu0 %3215  ;;  %v1550_v49 = vadd.f32 %v12961_v33, %v12960_v50  ;;  %vm827_vm2 = vcmp.eq.f32.partialorder %v826_v5, 8.507059e+37  ;;  %v1452_v32 = vor.u32 1.1754944e-38, %v1451_v20  ;;  %v12965_v50 = vld [vmem:[#allocation114_spill] sm:$0xff]  ;;  %v12966_v33 = vld [vmem:[#allocation71_spill] sm:$0xff] }
 0x427   :  { %v1142_v31 = vsel %vm1139_vm14, %v1141_v56, %v1137_v1  ;;  %vm1450_vm4 = vcmp.eq.f32.partialorder %v1449_v34, 8.507059e+37  ;;  %v830_v13 = vsel %vm827_vm2, %v829_v47, %v825_v37  ;;  %v1748_v1 = vor.u32 1.1754944e-38, %v1747_v28  ;;  %v12968_v28 = vld [vmem:[#allocation28_spill] sm:$0xff] }
 0x428   :  { %v1739_v27 = vmul.f32 %v7107_v8, %v1738_v39  ;;  %v3213_v51 = vpop.xlane.xlu1 %3212  ;;  %v1762_v60 = vand.u32 2147483648, %v10039_v2  ;;  %v1244_v44 = vmul.f32 %v1239_v63, %v1142_v31  ;;  %v1760_v20 = vand.u32 2147483647, %v10039_v2 }
 0x429   :  { %v7109_v46 = vpop.eup %7108  ;;  %vm1746_vm7 = vcmp.eq.f32.partialorder %v1745_v7, 8.507059e+37  ;;  %v1859_v34 = vadd.f32 %v12966_v33, %v12965_v50  ;;  %vm1756_vm8 = vweird.f32 %v10039_v2  ;;  %v933_v37 = vmul.f32 %v928_v14, %v830_v13 }
 0x42a   :  { %v1740_v48 = vadd.f32 %v7107_v8, %v1739_v27  ;;  %v1752_v39 = vmul.f32 %v7109_v46, %v10039_v2  ;;  %v1453_v27 = vsel %vm1450_vm4, %v1452_v32, %v1448_v24  ;;  %vm1757_vm6 = vweird.f32 %v7109_v46  ;;  %v12967_v32 = vld [vmem:[#allocation29_spill] sm:$0xff]  ;;  %v12970_v2 = vld [vmem:[#allocation56_spill] sm:$0xff] }
 0x42b   :  { %vm1758_vm9 = vmor %vm1756_vm8, %vm1757_vm6  ;;  %v1763_v63 = vor.u32 1.1754944e-38, %v1762_v60  ;;  %v12969_v24 = vpack.c.bf16 %v12967_v32, %v12968_v28  ;;  %v1248_v7 = vadd.f32 %v1244_v44, %v933_v37  ;;  %vm1761_vm10 = vcmp.eq.f32.partialorder %v1760_v20, 8.507059e+37  ;;  %v12973_v37 = vld [vmem:[#allocation72_spill] sm:$0xff] }
 0x42c   :  { %v1753_v9 = vsub.f32 1.0, %v1752_v39  ;;  %v1744_v62 = vsel %vm10097_vm3, %v7107_v8, %v1740_v48  ;;  %v1555_v48 = vmul.f32 %v1550_v49, %v1453_v27  ;;  %v1861_v8 = vadd.f32 %v9705_v15, %v9713_v29  ;;  %v12971_v15 = vld [vmem:[#allocation78_spill] sm:$0xff] }
 0x42d   :  { %v1749_v26 = vsel %vm1746_vm7, %v1748_v1, %v1744_v62  ;;  %v3967_v14 = vmul.f32 %v12947_v18, %v12889_v30  ;;  %v10120_v1 = vpop.f32.mrf.mxu2  ;;  %v3964_v28 = vmul.f32 %v12947_v18, %v12828_v41 }
 0x42e   :  { %v1754_v5 = vmul.f32 %v7109_v46, %v1753_v9  ;;  %v1865_v56 = vmul.f32 %v1859_v34, %v1749_v26  ;;  %v3511_v9 = vpop.xlane.xlu0 %3510  ;;  %v1559_v13 = vadd.f32 %v1555_v48, %v1248_v7  ;;  %v6902_v26 = vld [vmem:[%s12390_s5 + $0x48] sm:$0xff] }
 0x42f   :  { %5752 = vmatpush.bf16.msra.mxu3 %v6902_v26  ;;  %v12972_v34 = vld [vmem:[#allocation65_spill] sm:$0xff] }
 0x430   :  { %v1755_v22 = vadd.f32 %v7109_v46, %v1754_v5  ;;  %v3228_v47 = vpop.xlane.xlu1 %3227  ;;  %v1869_v27 = vadd.f32 %v1865_v56, %v9914_v54  ;;  %v3970_v5 = vpack.c.bf16 %v3967_v14, %v3967_v14  ;;  %v12974_v54 = vld [vmem:[#allocation18_spill] sm:$0xff] }
 0x431   :  { %v3232_v31 = vmax.f32 %v3216_v19, %v3228_v47  ;;  %4014 = vrot.lane.b32.xlu0 %v12969_v24, %s7388_s29  ;;  %v10138_v24 = vpop.f32.mrf.mxu3 }
 0x432   :  { %v1759_v39 = vsel %vm1758_vm9, %v7109_v46, %v1755_v22 }
 0x433   :  { %v3236_v62 = vsub.f32 %v12970_v2, %v3232_v31  ;;  %v1764_v49 = vsel %vm1761_vm10, %v1763_v63, %v1759_v39  ;;  %v3248_v29 = vsub.f32 %v12971_v15, %v3232_v31  ;;  %v6901_v39 = vld [vmem:[%s12390_s5 + $0x40] sm:$0xff] }
 0x434   :  { %v1866_v19 = vmul.f32 %v1861_v8, %v1764_v49  ;;  %v12975_v8 = vld [vmem:[#allocation20_spill] sm:$0xff]  ;;  %5753 = vmatpush.bf16.msra.mxu3 %v6901_v39 }
 0x435   :  { %v3243_v46 = vmul.f32 1.442695, %v3236_v62  ;;  %v3255_v20 = vmul.f32 1.442695, %v3248_v29  ;;  %v12976_v63 = vpack.c.bf16 %v12974_v54, %v12975_v8  ;;  %v10143_v62 = vpop.f32.mrf.mxu2 }
 0x436   :  { %v3225_v60 = vpop.xlane.xlu2 %3224  ;;  %v1870_v44 = vadd.f32 %v1866_v19, %v1559_v13  ;;  %v3523_v7 = vpop.xlane.xlu0 %3522  ;;  %12977 = vst [vmem:[#allocation103_spill] sm:$0xff] %v10143_v62 }
 0x437   :  { %v3231_v22 = vmax.f32 %v3213_v51, %v3225_v60  ;;  %v3963_v51 = vmul.f32 %v12947_v18, %v12830_v21  ;;  %7110 = vpow2.f32 %v3243_v46  ;;  %v12982_v60 = vld [vmem:[#allocation60_spill] sm:$0xff] }
 0x438   :  { %v3514_v50 = vpop.xlane.xlu1 %3513  ;;  %v5602_v33 = vpack.c.bf16 %v1870_v44, %v1869_v27  ;;  %7112 = vpow2.f32 %v3255_v20  ;;  %v3780_v27 = vmul.f32 0.35355338, %v12982_v60  ;;  %v3533_v44 = vmax.f32 %v3511_v9, %v3523_v7  ;;  %v10191_v60 = vld [vmem:[%s12391_s6 + $0x2] ss:$0 sm:$0xff] }
 0x439   :  { %v3235_v47 = vsub.f32 %v12972_v34, %v3231_v22  ;;  %v3247_v48 = vsub.f32 %v12973_v37, %v3231_v22  ;;  %3978 = vrot.lane.b32.xlu1 %v3970_v5, %s7389_s11  ;;  %4012 = vrot.lane.b32.xlu0 %v12976_v63, %s7388_s29  ;;  %v3968_v2 = vpack.c.bf16 %v3964_v28, %v3963_v51  ;;  %v10172_v63 = vpop.f32.mrf.mxu0 }
 0x43a   :  { %6783 = vmatmul.msk.bf16.gmra.mxu2 %vm362_vm5, %v5602_v33  ;;  %v10164_v33 = vadd.f32 %v3780_v27, %v8420_v16  ;;  %v3537_v9 = vsub.f32 %v9651_v25, %v3533_v44  ;;  %v3549_v51 = vsub.f32 %v9665_v38, %v3533_v44 }
 0x43b   :  { %v3241_v31 = vmul.f32 1.442695, %v3235_v47  ;;  %v3253_v32 = vmul.f32 1.442695, %v3247_v48 }
 0x43c   :  { %v3541_v48 = vmul.f32 1.442695, %v3537_v9  ;;  %v3553_v39 = vmul.f32 1.442695, %v3549_v51 }
 0x43d   :  { %7114 = vpow2.f32 %v3241_v31  ;;  %v10145_v49 = vpop.eup %7110  ;;  %v10167_v34 = vpop.f32.mrf.mxu2 }
 0x43e   :  { %7116 = vpow2.f32 %v3253_v32  ;;  %v3711_v56 = vpop.permute.xlu2 %3710  ;;  %12978 = vst [vmem:[#allocation106_spill] sm:$0xff] %v10145_v49  ;;  %v10148_v15 = vpop.eup %7112 }
 0x43f   :  { %3726 = vmatpush.bf16.msra.mxu1 %v3711_v56  ;;  %12979 = vst [vmem:[#allocation68_spill] sm:$0xff] %v10148_v15  ;;  %v10175_v31 = vpop.f32.mrf.mxu1 }
 0x440   :  { %v3526_v14 = vpop.xlane.xlu1 %3525  ;;  %12983 = vst [vmem:[#allocation63_spill] sm:$0xff] %v10167_v34 }
 0x441   :  { %3974 = vrot.lane.b32.xlu1 %v3968_v2, %s7389_s11  ;;  %v3534_v29 = vmax.f32 %v3514_v50, %v3526_v14  ;;  %v3802_v50 = vpop.f32.mrf.mxu3 }
 0x442   :  { %v3808_v37 = vmul.f32 0.35355338, %v3802_v50 }
 0x443   :  { %v10150_v13 = vpop.eup %7114  ;;  %v3538_v5 = vsub.f32 %v9729_v11, %v3534_v29  ;;  %v3819_v11 = vsel %vm362_vm5, %v10164_v33, -inf  ;;  %v3550_v54 = vsub.f32 %v9793_v6, %v3534_v29 }
 0x444   :  { %12980 = vst [vmem:[#allocation34_spill] sm:$0xff] %v10150_v13  ;;  %v10152_v19 = vpop.eup %7116  ;;  %v3346_v26 = vpack.c.bf16 %v10145_v49, %v10150_v13  ;;  %v10178_v25 = vadd.f32 %v3808_v37, %v12942_v58 }
 0x445   :  { %12981 = vst [vmem:[#allocation24_spill] sm:$0xff] %v10152_v19  ;;  %v3675_v46 = vpop.permute.xlu0 %3674  ;;  %v3354_v22 = vpack.c.bf16 %v10148_v15, %v10152_v19  ;;  %v3543_v47 = vmul.f32 1.442695, %v3538_v5  ;;  %v3555_v28 = vmul.f32 1.442695, %v3550_v54  ;;  %v12988_v54 = vld [vmem:[#allocation108_spill] sm:$0xff] }
 0x446   :  { %v3685_v20 = vsel %vm874_vm12, %v3675_v46, 0  ;;  %6717 = vmatmul.msk.bf16.gmra.mxu1 %vm362_vm5, %v3346_v26  ;;  %v3834_v2 = vsel %vm703_vm13, %v10178_v25, -inf  ;;  %v10196_v26 = vpop.f32.mrf.mxu0  ;;  %v3807_v46 = vmul.f32 0.35355338, %v10138_v24  ;;  %v3781_v51 = vmul.f32 0.35355338, %v12988_v54 }
 0x447   :  { %6715 = vmatmul.msk.bf16.gmra.mxu0 %vm703_vm13, %v3354_v22  ;;  %7118 = vpow2.f32 %v3543_v47  ;;  %v10200_v22 = vpop.f32.mrf.mxu1 }
 0x448   :  { %3692 = vmatpush.bf16.msrb.mxu0 %v3685_v20  ;;  %7120 = vpow2.f32 %v3541_v48 }
 0x449   :  { %v4099_v32 = vpop.f32.mrf.mxu3  ;;  %7122 = vpow2.f32 %v3555_v28 }
 0x44a   :  { %v4109_v6 = vmul.f32 0.35355338, %v4099_v32  ;;  %7124 = vpow2.f32 %v3553_v39  ;;  %v12989_v32 = vld [vmem:[#allocation64_spill] sm:$0xff] }
 0x44b   :  { %v4083_v28 = vmul.f32 0.35355338, %v12989_v32 }
 0x44c   :  { %v10194_v27 = vadd.f32 %v4109_v6, %v12869_v43  ;;  %v10226_v6 = vadd.f32 %v3781_v51, %v8459_v17 }
 0x44d   :  { %v3671_v8 = vpop.permute.xlu0 %3670  ;;  %3820 = vmax.xlane.f32.xlu2 %v3819_v11  ;;  %v10180_v56 = vpop.eup %7118  ;;  %v10211_v11 = vadd.f32 %v3807_v46, %v12861_v23 }
 0x44e   :  { %12984 = vst [vmem:[#allocation114_spill] sm:$0xff] %v10180_v56  ;;  %v10184_v38 = vpop.eup %7120  ;;  %v4129_v47 = vsel %vm703_vm13, %v10194_v27, -inf }
 0x44f   :  { %12985 = vst [vmem:[#allocation71_spill] sm:$0xff] %v10184_v38  ;;  %v3649_v29 = vpack.c.bf16 %v10180_v56, %v10184_v38  ;;  %v10202_v20 = vpop.eup %7122  ;;  %v10223_v39 = vpop.f32.mrf.mxu1 }
 0x450   :  { %12986 = vst [vmem:[#allocation29_spill] sm:$0xff] %v10202_v20  ;;  %v10208_v37 = vpop.eup %7124 }
 0x451   :  { %12987 = vst [vmem:[#allocation28_spill] sm:$0xff] %v10208_v37  ;;  %v3657_v24 = vpack.c.bf16 %v10202_v20, %v10208_v37 }
 0x452   :  { %v5656_v7 = vpop.f32.mrf.mxu2 }
 0x453   :  { %v5657_v50 = vadd.f32 %v10191_v60, %v5656_v7  ;;  %v3831_v7 = vsel %vm703_vm13, %v10211_v11, -inf }
 0x455   :  { %v3709_v14 = vpop.permute.xlu0 %3708  ;;  %3835 = vmax.xlane.f32.xlu2 %v3834_v2  ;;  %v10229_v2 = vadd.f32 %v4083_v28, %v8392_v61 }
 0x456   :  { %3727 = vmatpush.bf16.msra.mxu1 %v3709_v14  ;;  %v12990_v14 = vld [vmem:[#allocation35_spill] sm:$0xff] }
 0x457   :  { %v4120_v46 = vsel %vm362_vm5, %v10229_v2, -inf }
 0x458   :  { %v3673_v44 = vpop.permute.xlu1 %3672 }
 0x459   :  { %3693 = vmatpush.bf16.msrb.mxu0 %v3673_v44  ;;  %6724 = vmatmul.msk.bf16.vlgmr.msra.gmra.mxu1 %vm362_vm5, %v3649_v29  ;;  %v4082_v29 = vmul.f32 0.35355338, %v12990_v14  ;;  %v3822_v44 = vsel %vm362_vm5, %v10226_v6, -inf }
 0x45a   :  { %v5658_v5 = vpop.f32.mrf.mxu2 }
 0x45b   :  { %v5659_v9 = vadd.f32 %v10191_v60, %v5658_v5 }
 0x45d   :  { %v5700_v48 = vpack.c.bf16 %v5659_v9, %v5657_v50  ;;  %3694 = vmatpush.bf16.msrb.mxu0 %v3671_v8  ;;  %4130 = vmax.xlane.f32.xlu2 %v4129_v47  ;;  %v10221_v8 = vpop.f32.mrf.mxu0  ;;  %v10238_v50 = vpop.f32.mrf.mxu1  ;;  %v10241_v9 = vadd.f32 %v4082_v29, %v12940_v10 }
 0x45e   :  { %v4101_v47 = vpop.f32.mrf.mxu3 }
 0x45f   :  { %6798 = vmatmul.msk.bf16.vlgmr.msra.gmra.mxu3 %vm362_vm5, %v5700_v48  ;;  %v12991_v48 = vld [vmem:[#allocation11_spill] sm:$0xff]  ;;  %v4110_v51 = vmul.f32 0.35355338, %v4101_v47  ;;  %v4117_v32 = vsel %vm362_vm5, %v10241_v9, -inf }
 0x460   :  { %6722 = vmatmul.msk.bf16.vlgmr.msrb.gmra.mxu0 %vm703_vm13, %v3657_v24  ;;  %v4269_v24 = vmul.f32 %v12991_v48, %v12823_v4  ;;  %v4270_v54 = vmul.f32 %v12991_v48, %v12820_v45  ;;  %v4271_v4 = vmul.f32 %v12991_v48, %v12889_v30  ;;  %v4268_v30 = vmul.f32 %v12991_v48, %v12828_v41 }
 0x461   :  { %v10255_v29 = vadd.f32 %v4110_v51, %v12888_v36  ;;  %v4267_v51 = vmul.f32 %v12991_v48, %v12830_v21 }
 0x462   :  { %v4273_v28 = vpack.c.bf16 %v4270_v54, %v4269_v24  ;;  %v4274_v24 = vpack.c.bf16 %v4271_v4, %v4271_v4 }
 0x463   :  { %3832 = vmax.xlane.f32.xlu0 %v3831_v7  ;;  %v4132_v45 = vsel %vm703_vm13, %v10255_v29, -inf  ;;  %v4272_v13 = vpack.c.bf16 %v4268_v30, %v4267_v51 }
 0x465   :  { %v10236_v5 = vpop.f32.mrf.mxu0  ;;  %v10252_v14 = vpop.f32.mrf.mxu1 }
 0x466   :  { %12993 = vst [vmem:[#allocation78_spill] sm:$0xff] %v10252_v14 }
 0x46b   :  { %3823 = vmax.xlane.f32.xlu1 %v3822_v44  ;;  %4121 = vmax.xlane.f32.xlu0 %v4120_v46  ;;  %v12994_v44 = vld [vmem:[#allocation22_spill] sm:$0xff]  ;;  %v12995_v46 = vld [vmem:[#allocation21_spill] sm:$0xff] }
 0x46c   :  { %v12996_v47 = vpack.c.bf16 %v12994_v44, %v12995_v46 }
 0x46d   :  { %v10250_v7 = vpop.f32.mrf.mxu0 }
 0x46e   :  { %12992 = vst [vmem:[#allocation56_spill] sm:$0xff] %v10250_v7 }
 0x473   :  { %4118 = vmax.xlane.f32.xlu1 %v4117_v32 }
 0x475   :  { %4280 = vrot.lane.b32.xlu2 %v4273_v28, %s7389_s11 }
 0x477   :  { %v3529_v49 = vpop.xlane.xlu2 %3528 }
 0x47a   :  { %v3392_v54 = vpop.f32.mrf.mxu0 }
 0x47b   :  { %4133 = vmax.xlane.f32.xlu1 %v4132_v45 }
 0x47d   :  { %4316 = vrot.lane.b32.xlu2 %v12996_v47, %s7388_s29 }
 0x47e   :  { %v3425_v32 = vpop.f32.mrf.mxu1 }
 0x47f   :  { %v10265_v28 = vadd.f32 %v3425_v32, %v3392_v54  ;;  %4282 = vrot.lane.b32.xlu0 %v4274_v24, %s7389_s11 }
 0x480   :  { %v3520_v45 = vpop.xlane.xlu0 %3519 }
 0x481   :  { %12997 = vst [vmem:[#allocation65_spill] sm:$0xff] %v10265_v28 }
 0x483   :  { %v3517_v19 = vpop.xlane.xlu1 %3516 }
 0x484   :  { %v3535_v15 = vmax.f32 %v3517_v19, %v3529_v49  ;;  %v12998_v49 = vld [vmem:[#allocation30_spill] sm:$0xff] }
 0x486   :  { %v3539_v4 = vsub.f32 %v9963_v53, %v3535_v15  ;;  %v3551_v44 = vsub.f32 %v9935_v12, %v3535_v15  ;;  %v12999_v53 = vld [vmem:[#allocation31_spill] sm:$0xff] }
 0x487   :  { %4278 = vrot.lane.b32.xlu0 %v4272_v13, %s7389_s11  ;;  %v13000_v13 = vpack.c.bf16 %v12998_v49, %v12999_v53 }
 0x488   :  { %v3545_v47 = vmul.f32 1.442695, %v3539_v4  ;;  %v3557_v54 = vmul.f32 1.442695, %v3551_v44  ;;  %v3815_v32 = vpop.xlane.xlu0 %3814 }
 0x48a   :  { %7126 = vpow2.f32 %v3545_v47 }
 0x48b   :  { %v3532_v46 = vpop.xlane.xlu1 %3531  ;;  %7128 = vpow2.f32 %v3557_v54 }
 0x48c   :  { %v3536_v24 = vmax.f32 %v3520_v45, %v3532_v46  ;;  %v3827_v45 = vpop.xlane.xlu2 %3826 }
 0x48d   :  { %v3837_v4 = vmax.f32 %v3815_v32, %v3827_v45  ;;  %v4404_v32 = vmul.f32 0.35355338, %v9753_v0 }
 0x48e   :  { %v3540_v21 = vsub.f32 %v9952_v35, %v3536_v24  ;;  %v3552_v41 = vsub.f32 %v9994_v59, %v3536_v24 }
 0x48f   :  { %v3841_v24 = vsub.f32 %v9986_v42, %v3837_v4  ;;  %v13005_v42 = vld [vmem:[#allocation87_spill] sm:$0xff]  ;;  %v10307_v45 = vadd.f32 %v4404_v32, %v8392_v61 }
 0x490   :  { %v3547_v28 = vmul.f32 1.442695, %v3540_v21  ;;  %v3559_v56 = vmul.f32 1.442695, %v3552_v41  ;;  %v10281_v15 = vpop.eup %7126  ;;  %v3830_v51 = vpop.xlane.xlu0 %3829 }
 0x491   :  { %13001 = vst [vmem:[#allocation72_spill] sm:$0xff] %v10281_v15  ;;  %v10283_v19 = vpop.eup %7128  ;;  %v3845_v41 = vmul.f32 1.442695, %v3841_v24 }
 0x492   :  { %7130 = vpow2.f32 %v3547_v28  ;;  %13002 = vst [vmem:[#allocation18_spill] sm:$0xff] %v10283_v19  ;;  %v4104_v28 = vpop.f32.mrf.mxu3 }
 0x493   :  { %7132 = vpow2.f32 %v3559_v56  ;;  %v3818_v12 = vpop.xlane.xlu1 %3817  ;;  %v4111_v47 = vmul.f32 0.35355338, %v4104_v28 }
 0x494   :  { %4318 = vrot.lane.b32.xlu1 %v13000_v13, %s7388_s29  ;;  %v3838_v59 = vmax.f32 %v3818_v12, %v3830_v51  ;;  %v3853_v13 = vsub.f32 %v9948_v52, %v3837_v4  ;;  %v4084_v12 = vmul.f32 0.35355338, %v13005_v42  ;;  %v4450_v4 = vsel %vm362_vm5, %v10307_v45, -inf  ;;  %v13010_v42 = vld [vmem:[#allocation25_spill] sm:$0xff] }
 0x495   :  { %v10298_v21 = vadd.f32 %v4111_v47, %v12861_v23 }
 0x496   :  { %v3842_v46 = vsub.f32 %v10024_v40, %v3838_v59  ;;  %v3854_v53 = vsub.f32 %v10010_v55, %v3838_v59  ;;  %v10314_v59 = vadd.f32 %v4084_v12, %v8420_v16  ;;  %v4085_v12 = vmul.f32 0.35355338, %v13010_v42  ;;  %v13015_v42 = vld [vmem:[#allocation9_spill] sm:$0xff] }
 0x497   :  { %v4135_v40 = vsel %vm703_vm13, %v10298_v21, -inf }
 0x498   :  { %v10285_v35 = vpop.eup %7130  ;;  %v3847_v54 = vmul.f32 1.442695, %v3842_v46  ;;  %v3859_v51 = vmul.f32 1.442695, %v3854_v53 }
 0x499   :  { %13003 = vst [vmem:[#allocation20_spill] sm:$0xff] %v10285_v35  ;;  %v10287_v30 = vpop.eup %7132  ;;  %v3650_v56 = vpack.c.bf16 %v10285_v35, %v10281_v15 }
 0x49a   :  { %13004 = vst [vmem:[#allocation60_spill] sm:$0xff] %v10287_v30  ;;  %v3658_v44 = vpack.c.bf16 %v10287_v30, %v10283_v19  ;;  %7134 = vpow2.f32 %v3847_v54  ;;  %v4106_v28 = vpop.f32.mrf.mxu3  ;;  %v3977_v54 = vpop.permute.xlu2 %3976 }
 0x49b   :  { %6725 = vmatmul.msk.bf16.gmra.mxu1 %vm362_vm5, %v3650_v56  ;;  %7136 = vpow2.f32 %v3845_v41  ;;  %v4112_v24 = vmul.f32 0.35355338, %v4106_v28  ;;  %v4123_v41 = vsel %vm362_vm5, %v10314_v59, -inf }
 0x49c   :  { %6723 = vmatmul.msk.bf16.gmra.mxu0 %vm703_vm13, %v3658_v44  ;;  %v3857_v44 = vmul.f32 1.442695, %v3853_v13  ;;  %7138 = vpow2.f32 %v3859_v51 }
 0x49d   :  { %v10327_v53 = vadd.f32 %v4112_v24, %v12942_v58 }
 0x49e   :  { %7140 = vpow2.f32 %v3857_v44 }
 0x49f   :  { %v4138_v44 = vsel %vm703_vm13, %v10327_v53, -inf }
 0x4a0   :  { %v10309_v56 = vpop.eup %7134 }
 0x4a1   :  { %13006 = vst [vmem:[#allocation108_spill] sm:$0xff] %v10309_v56  ;;  %v10311_v55 = vpop.eup %7136 }
 0x4a2   :  { %13007 = vst [vmem:[#allocation64_spill] sm:$0xff] %v10311_v55  ;;  %v3953_v52 = vpack.c.bf16 %v10309_v56, %v10311_v55  ;;  %v4429_v13 = vpop.f32.mrf.mxu3 }
 0x4a3   :  { %v4015_v49 = vpop.permute.xlu0 %4014  ;;  %v4439_v28 = vmul.f32 0.35355338, %v4429_v13  ;;  %v13014_v13 = vld [vmem:[#allocation110_spill] sm:$0xff] }
 0x4a4   :  { %4030 = vmatpush.bf16.msrb.mxu1 %v4015_v49  ;;  %v10324_v49 = vpop.eup %7138 }
 0x4a5   :  { %13008 = vst [vmem:[#allocation35_spill] sm:$0xff] %v10324_v49 }
 0x4a6   :  { %4136 = vmax.xlane.f32.xlu2 %v4135_v40  ;;  %v10329_v40 = vpop.eup %7140 }
 0x4a7   :  { %13009 = vst [vmem:[#allocation11_spill] sm:$0xff] %v10329_v40  ;;  %v3961_v51 = vpack.c.bf16 %v10324_v49, %v10329_v40 }
 0x4ab   :  { %v3979_v0 = vpop.permute.xlu1 %3978  ;;  %v4013_v46 = vpop.permute.xlu0 %4012 }
 0x4ac   :  { %v3989_v47 = vsel %vm874_vm12, %v3979_v0, 0  ;;  %4031 = vmatpush.bf16.msrb.mxu1 %v4013_v46  ;;  %v10338_v0 = vadd.f32 %v4085_v12, %v8459_v17  ;;  %v10340_v46 = vpop.f32.mrf.mxu1  ;;  %v4601_v12 = vmul.f32 %v13015_v42, %v13014_v13 }
 0x4ad   :  { %3996 = vmatpush.bf16.msra.mxu0 %v3989_v47  ;;  %13011 = vst [vmem:[#allocation22_spill] sm:$0xff] %v10340_v46  ;;  %v10343_v47 = vadd.f32 %v4439_v28, %v12869_v43  ;;  %v4431_v28 = vpop.f32.mrf.mxu3 }
 0x4ae   :  { %4451 = vmax.xlane.f32.xlu2 %v4450_v4  ;;  %v13013_v4 = vld [vmem:[#allocation74_spill] sm:$0xff] }
 0x4af   :  { %6732 = vmatmul.msk.bf16.vlgmr.msrb.gmra.mxu1 %vm362_vm5, %v3953_v52  ;;  %v10345_v52 = vpop.f32.mrf.mxu0  ;;  %v4403_v24 = vmul.f32 0.35355338, %v13013_v4  ;;  %v4440_v4 = vmul.f32 0.35355338, %v4431_v28  ;;  %v13018_v28 = vld [vmem:[#allocation36_spill] sm:$0xff] }
 0x4b0   :  { %13012 = vst [vmem:[#allocation21_spill] sm:$0xff] %v10345_v52  ;;  %v4604_v52 = vpack.c.bf16 %v4601_v12, %v4601_v12  ;;  %v13017_v12 = vld [vmem:[#allocation37_spill] sm:$0xff] }
 0x4b1   :  { %3997 = vmatpush.bf16.msra.mxu0 %v3977_v54  ;;  %4124 = vmax.xlane.f32.xlu0 %v4123_v41  ;;  %v4126_v41 = vsel %vm362_vm5, %v10338_v0, -inf }
 0x4b3   :  { %v3975_v32 = vpop.permute.xlu1 %3974 }
 0x4b5   :  { %3998 = vmatpush.bf16.msra.mxu0 %v3975_v32  ;;  %v4459_v32 = vsel %vm703_vm13, %v10343_v47, -inf }
 0x4b8   :  { %6730 = vmatmul.msk.bf16.vlgmr.msra.gmra.mxu0 %vm703_vm13, %v3961_v51  ;;  %v10355_v51 = vadd.f32 %v4403_v24, %v12940_v10 }
 0x4b9   :  { %4139 = vmax.xlane.f32.xlu0 %v4138_v44 }
 0x4bd   :  { %v5661_v54 = vpop.f32.mrf.mxu2 }
 0x4be   :  { %4127 = vmax.xlane.f32.xlu1 %v4126_v41  ;;  %v4447_v41 = vsel %vm362_vm5, %v10355_v51, -inf  ;;  %v5662_v35 = vadd.f32 %v10191_v60, %v5661_v54  ;;  %v13020_v54 = vld [vmem:[#allocation111_spill] sm:$0xff] }
 0x4c1   :  { %4460 = vmax.xlane.f32.xlu0 %v4459_v32  ;;  %v10365_v32 = vadd.f32 %v4440_v4, %v12888_v36 }
 0x4c3   :  { %v3430_v44 = vpop.f32.mrf.mxu1 }
 0x4c4   :  { %v3397_v46 = vpop.f32.mrf.mxu0 }
 0x4c5   :  { %v10357_v30 = vadd.f32 %v3430_v44, %v3397_v46  ;;  %v5663_v15 = vpop.f32.mrf.mxu2  ;;  %v4462_v46 = vsel %vm703_vm13, %v10365_v32, -inf  ;;  %v13019_v44 = vpack.c.bf16 %v13017_v12, %v13018_v28  ;;  %v13025_v28 = vld [vmem:[#allocation112_spill] sm:$0xff] }
 0x4c6   :  { %v5664_v19 = vadd.f32 %v10191_v60, %v5663_v15  ;;  %4448 = vmax.xlane.f32.xlu1 %v4447_v41  ;;  %4612 = vrot.lane.b32.xlu2 %v4604_v52, %s7389_s11  ;;  %v4600_v60 = vmul.f32 %v13015_v42, %v13020_v54  ;;  %v13021_v15 = vld [vmem:[#allocation15_spill] sm:$0xff]  ;;  %v3821_v52 = vpop.xlane.xlu2 %3820 }
 0x4c7   :  { %13016 = vst [vmem:[#allocation30_spill] sm:$0xff] %v10357_v30  ;;  %v13024_v30 = vld [vmem:[#allocation113_spill] sm:$0xff] }
 0x4c8   :  { %v5701_v24 = vpack.c.bf16 %v5664_v19, %v5662_v35  ;;  %v4599_v19 = vmul.f32 %v13015_v42, %v13021_v15  ;;  %v4598_v12 = vmul.f32 %v13015_v42, %v13024_v30 }
 0x4ca   :  { %6799 = vmatmul.msk.bf16.gmra.mxu3 %vm362_vm5, %v5701_v24  ;;  %v4603_v35 = vpack.c.bf16 %v4600_v60, %v4599_v19 }
 0x4cb   :  { %v10380_v41 = vpop.f32.mrf.mxu1 }
 0x4cc   :  { %v10378_v4 = vpop.f32.mrf.mxu0  ;;  %13023 = vst [vmem:[#allocation87_spill] sm:$0xff] %v10380_v41 }
 0x4cd   :  { %13022 = vst [vmem:[#allocation31_spill] sm:$0xff] %v10378_v4 }
 0x4ce   :  { %4463 = vmax.xlane.f32.xlu1 %v4462_v46  ;;  %4646 = vrot.lane.b32.xlu2 %v13019_v44, %s7388_s29  ;;  %v4597_v44 = vmul.f32 %v13015_v42, %v13025_v28  ;;  %v3836_v41 = vpop.xlane.xlu2 %3835 }
 0x4d0   :  { %v4602_v55 = vpack.c.bf16 %v4598_v12, %v4597_v44  ;;  %v4434_v44 = vpop.f32.mrf.mxu3 }
 0x4d5   :  { %4610 = vrot.lane.b32.xlu0 %v4603_v35, %s7389_s11 }
 0x4d6   :  { %v3833_v24 = vpop.xlane.xlu0 %3832  ;;  %v3729_v19 = vpop.f32.mrf.mxu1 }
 0x4d7   :  { %v3839_v46 = vmax.f32 %v3821_v52, %v3833_v24 }
 0x4d9   :  { %v3843_v49 = vsub.f32 %v10164_v33, %v3839_v46  ;;  %v3855_v60 = vsub.f32 %v10211_v11, %v3839_v46  ;;  %v13028_v46 = vld [vmem:[#allocation44_spill] sm:$0xff] }
 0x4db   :  { %v3849_v52 = vmul.f32 1.442695, %v3843_v49  ;;  %v3861_v37 = vmul.f32 1.442695, %v3855_v60  ;;  %v4131_v49 = vpop.xlane.xlu2 %4130 }
 0x4dd   :  { %v3696_v56 = vpop.f32.mrf.mxu0  ;;  %4608 = vrot.lane.b32.xlu0 %v4602_v55, %s7389_s11  ;;  %7142 = vpow2.f32 %v3849_v52  ;;  %v13027_v55 = vld [vmem:[#allocation46_spill] sm:$0xff] }
 0x4de   :  { %v10390_v4 = vadd.f32 %v3729_v19, %v3696_v56  ;;  %v3824_v35 = vpop.xlane.xlu1 %3823  ;;  %7144 = vpow2.f32 %v3861_v37  ;;  %v13029_v56 = vpack.c.bf16 %v13027_v55, %v13028_v46  ;;  %v4122_v60 = vpop.xlane.xlu0 %4121 }
 0x4df   :  { %v3840_v24 = vmax.f32 %v3824_v35, %v3836_v41  ;;  %v4436_v46 = vpop.f32.mrf.mxu3 }
 0x4e0   :  { %13026 = vst [vmem:[#allocation25_spill] sm:$0xff] %v10390_v4 }
 0x4e1   :  { %v3844_v40 = vsub.f32 %v10226_v6, %v3840_v24  ;;  %v3856_v42 = vsub.f32 %v10178_v25, %v3840_v24  ;;  %v4406_v24 = vmul.f32 0.35355338, %v9812_v3  ;;  %v4442_v3 = vmul.f32 0.35355338, %v4436_v46 }
 0x4e3   :  { %v3851_v33 = vmul.f32 1.442695, %v3844_v40  ;;  %v3863_v12 = vmul.f32 1.442695, %v3856_v42  ;;  %v10398_v41 = vpop.eup %7142  ;;  %v4281_v4 = vpop.permute.xlu2 %4280 }
 0x4e4   :  { %13030 = vst [vmem:[#allocation74_spill] sm:$0xff] %v10398_v41  ;;  %v10400_v19 = vpop.eup %7144 }
 0x4e5   :  { %7146 = vpow2.f32 %v3851_v33  ;;  %13031 = vst [vmem:[#allocation110_spill] sm:$0xff] %v10400_v19 }
 0x4e6   :  { %7148 = vpow2.f32 %v3863_v12  ;;  %v4119_v11 = vpop.xlane.xlu1 %4118 }
 0x4e7   :  { %4648 = vrot.lane.b32.xlu1 %v13029_v56, %s7388_s29  ;;  %v4141_v6 = vmax.f32 %v4119_v11, %v4131_v49 }
 0x4e9   :  { %v4157_v35 = vsub.f32 %v10194_v27, %v4141_v6  ;;  %v10417_v27 = vadd.f32 %v4406_v24, %v8459_v17 }
 0x4eb   :  { %v10402_v25 = vpop.eup %7146  ;;  %v4161_v12 = vmul.f32 1.442695, %v4157_v35 }
 0x4ec   :  { %13032 = vst [vmem:[#allocation9_spill] sm:$0xff] %v10402_v25  ;;  %v10404_v40 = vpop.eup %7148  ;;  %v3954_v37 = vpack.c.bf16 %v10402_v25, %v10398_v41 }
 0x4ed   :  { %13033 = vst [vmem:[#allocation37_spill] sm:$0xff] %v10404_v40  ;;  %v3962_v52 = vpack.c.bf16 %v10404_v40, %v10400_v19  ;;  %7150 = vpow2.f32 %v4161_v12  ;;  %v4145_v12 = vsub.f32 %v10241_v9, %v4141_v6  ;;  %v13036_v9 = vld [vmem:[#allocation81_spill] sm:$0xff] }
 0x4ee   :  { %v4134_v42 = vpop.xlane.xlu1 %4133  ;;  %6733 = vmatmul.msk.bf16.gmra.mxu1 %vm362_vm5, %v3954_v37  ;;  %v4716_v6 = vmul.f32 0.35355338, %v13036_v9 }
 0x4ef   :  { %v4142_v33 = vmax.f32 %v4122_v60, %v4134_v42  ;;  %6731 = vmatmul.msk.bf16.gmra.mxu0 %vm703_vm13, %v3962_v52  ;;  %v4456_v60 = vsel %vm362_vm5, %v10417_v27, -inf  ;;  %v4733_v42 = vpop.f32.mrf.mxu3 }
 0x4f0   :  { %v4743_v46 = vmul.f32 0.35355338, %v4733_v42  ;;  %v10450_v42 = vadd.f32 %v4716_v6, %v12940_v10  ;;  %v10463_v6 = vpop.f32.mrf.mxu1 }
 0x4f1   :  { %v4158_v11 = vsub.f32 %v10255_v29, %v4142_v33  ;;  %v4283_v55 = vpop.permute.xlu0 %4282  ;;  %v10422_v29 = vadd.f32 %v4442_v3, %v12942_v58  ;;  %v4146_v52 = vsub.f32 %v10229_v2, %v4142_v33  ;;  %v4149_v2 = vmul.f32 1.442695, %v4145_v12  ;;  %v4317_v12 = vpop.permute.xlu2 %4316  ;;  %13040 = vst [vmem:[#allocation112_spill] sm:$0xff] %v10463_v6 }
 0x4f2   :  { %v4293_v56 = vsel %vm874_vm12, %v4283_v55, 0  ;;  %v4405_v55 = vmul.f32 0.35355338, %v9787_v57 }
 0x4f3   :  { %v4163_v49 = vmul.f32 1.442695, %v4158_v11  ;;  %4300 = vmatpush.bf16.msrb.mxu0 %v4293_v56  ;;  %v10424_v35 = vpop.eup %7150  ;;  %v4151_v56 = vmul.f32 1.442695, %v4146_v52 }
 0x4f4   :  { %13034 = vst [vmem:[#allocation36_spill] sm:$0xff] %v10424_v35  ;;  %v10437_v33 = vadd.f32 %v4405_v55, %v8420_v16 }
 0x4f5   :  { %7152 = vpow2.f32 %v4163_v49  ;;  %v10440_v49 = vadd.f32 %v4743_v46, %v12869_v43 }
 0x4f6   :  { %7154 = vpow2.f32 %v4151_v56  ;;  %v4453_v3 = vsel %vm362_vm5, %v10437_v33, -inf }
 0x4f7   :  { %4457 = vmax.xlane.f32.xlu2 %v4456_v60  ;;  %4301 = vmatpush.bf16.msrb.mxu0 %v4281_v4  ;;  %v4468_v4 = vsel %vm703_vm13, %v10422_v29, -inf  ;;  %7156 = vpow2.f32 %v4149_v2  ;;  %v4763_v60 = vsel %vm703_vm13, %v10440_v49, -inf  ;;  %v4735_v55 = vpop.f32.mrf.mxu3  ;;  %v13039_v2 = vld [vmem:[#allocation26_spill] sm:$0xff] }
 0x4f8   :  { %v4744_v56 = vmul.f32 0.35355338, %v4735_v55  ;;  %v4717_v9 = vmul.f32 0.35355338, %v13039_v2 }
 0x4f9   :  { %v4279_v37 = vpop.permute.xlu0 %4278 }
 0x4fb   :  { %4302 = vmatpush.bf16.msrb.mxu0 %v4279_v37  ;;  %v10427_v24 = vpop.eup %7152  ;;  %v4441_v37 = vmul.f32 0.35355338, %v4434_v44  ;;  %v4751_v44 = vsel %vm362_vm5, %v10450_v42, -inf }
 0x4fc   :  { %13035 = vst [vmem:[#allocation111_spill] sm:$0xff] %v10427_v24  ;;  %v4265_v11 = vpack.c.bf16 %v10427_v24, %v10424_v35  ;;  %v10447_v52 = vpop.eup %7154  ;;  %v13045_v35 = vld [vmem:[#allocation45_spill] sm:$0xff] }
 0x4fd   :  { %13037 = vst [vmem:[#allocation15_spill] sm:$0xff] %v10447_v52 }
 0x4ff   :  { %6738 = vmatmul.msk.bf16.vlgmr.msrb.gmra.mxu0 %vm703_vm13, %v4265_v11  ;;  %4469 = vmax.xlane.f32.xlu2 %v4468_v4  ;;  %v10452_v11 = vpop.eup %7156  ;;  %v10455_v4 = vadd.f32 %v4441_v37, %v12861_v23  ;;  %v10473_v37 = vadd.f32 %v4717_v9, %v8392_v61 }
 0x500   :  { %13038 = vst [vmem:[#allocation113_spill] sm:$0xff] %v10452_v11  ;;  %v4257_v46 = vpack.c.bf16 %v10447_v52, %v10452_v11 }
 0x506   :  { %v4319_v57 = vpop.permute.xlu1 %4318 }
 0x507   :  { %4334 = vmatpush.bf16.msra.mxu1 %v4319_v57  ;;  %4454 = vmax.xlane.f32.xlu0 %v4453_v3  ;;  %v4465_v57 = vsel %vm703_vm13, %v10455_v4, -inf  ;;  %v10467_v3 = vpop.f32.mrf.mxu0 }
 0x508   :  { %4764 = vmax.xlane.f32.xlu2 %v4763_v60  ;;  %13041 = vst [vmem:[#allocation46_spill] sm:$0xff] %v10467_v3  ;;  %v10470_v60 = vadd.f32 %v4744_v56, %v12888_v36 }
 0x50b   :  { %4335 = vmatpush.bf16.msra.mxu1 %v4317_v12  ;;  %v4766_v12 = vsel %vm703_vm13, %v10470_v60, -inf }
 0x50e   :  { %6740 = vmatmul.msk.bf16.vlgmr.msra.gmra.mxu1 %vm362_vm5, %v4257_v46  ;;  %v4754_v46 = vsel %vm362_vm5, %v10473_v37, -inf }
 0x50f   :  { %4752 = vmax.xlane.f32.xlu0 %v4751_v44 }
 0x511   :  { %4466 = vmax.xlane.f32.xlu1 %v4465_v57  ;;  %v13043_v57 = vld [vmem:[#allocation8_spill] sm:$0xff] }
 0x512   :  { %v4904_v56 = vmul.f32 %v13043_v57, %v13020_v54  ;;  %v4903_v9 = vmul.f32 %v13043_v57, %v13021_v15 }
 0x514   :  { %v4907_v3 = vpack.c.bf16 %v4904_v56, %v4903_v9 }
 0x517   :  { %4767 = vmax.xlane.f32.xlu0 %v4766_v12 }
 0x518   :  { %v3734_v55 = vpop.f32.mrf.mxu1 }
 0x519   :  { %v3701_v44 = vpop.f32.mrf.mxu0  ;;  %4755 = vmax.xlane.f32.xlu1 %v4754_v46  ;;  %v4137_v2 = vpop.xlane.xlu2 %4136  ;;  %v13044_v46 = vld [vmem:[#allocation47_spill] sm:$0xff] }
 0x51a   :  { %v10479_v6 = vadd.f32 %v3734_v55, %v3701_v44  ;;  %v13046_v55 = vpack.c.bf16 %v13044_v46, %v13045_v35  ;;  %v4905_v44 = vmul.f32 %v13043_v57, %v13014_v13 }
 0x51c   :  { %13042 = vst [vmem:[#allocation44_spill] sm:$0xff] %v10479_v6 }
 0x520   :  { %4914 = vrot.lane.b32.xlu2 %v4907_v3, %s7389_s11  ;;  %v10495_v56 = vpop.f32.mrf.mxu1 }
 0x521   :  { %v4452_v19 = vpop.xlane.xlu2 %4451  ;;  %v10493_v6 = vpop.f32.mrf.mxu0  ;;  %13048 = vst [vmem:[#allocation26_spill] sm:$0xff] %v10495_v56 }
 0x522   :  { %13047 = vst [vmem:[#allocation81_spill] sm:$0xff] %v10493_v6 }
 0x524   :  { %v4125_v12 = vpop.xlane.xlu0 %4124 }
 0x525   :  { %v4143_v41 = vmax.f32 %v4125_v12, %v4137_v2  ;;  %v4908_v2 = vpack.c.bf16 %v4905_v44, %v4905_v44 }
 0x527   :  { %v4147_v3 = vsub.f32 %v10314_v59, %v4143_v41  ;;  %v4159_v9 = vsub.f32 %v10298_v21, %v4143_v41 }
 0x529   :  { %v4613_v40 = vpop.permute.xlu2 %4612  ;;  %v4153_v24 = vmul.f32 1.442695, %v4147_v3  ;;  %v4165_v35 = vmul.f32 1.442695, %v4159_v9 }
 0x52a   :  { %v4623_v25 = vsel %vm874_vm12, %v4613_v40, 0 }
 0x52b   :  { %4952 = vrot.lane.b32.xlu0 %v13046_v55, %s7388_s29  ;;  %4630 = vmatpush.bf16.msra.mxu0 %v4623_v25  ;;  %7158 = vpow2.f32 %v4153_v24 }
 0x52c   :  { %v4140_v12 = vpop.xlane.xlu0 %4139  ;;  %v4033_v55 = vpop.f32.mrf.mxu1  ;;  %7160 = vpow2.f32 %v4165_v35 }
 0x531   :  { %v4128_v40 = vpop.xlane.xlu1 %4127  ;;  %v10504_v41 = vpop.eup %7158 }
 0x532   :  { %v4144_v11 = vmax.f32 %v4128_v40, %v4140_v12  ;;  %4916 = vrot.lane.b32.xlu1 %v4908_v2, %s7389_s11  ;;  %13050 = vst [vmem:[#allocation47_spill] sm:$0xff] %v10504_v41  ;;  %v10506_v44 = vpop.eup %7160 }
 0x533   :  { %13051 = vst [vmem:[#allocation45_spill] sm:$0xff] %v10506_v44 }
 0x534   :  { %v4148_v25 = vsub.f32 %v10338_v0, %v4144_v11  ;;  %v4160_v46 = vsub.f32 %v10327_v53, %v4144_v11  ;;  %v4461_v3 = vpop.xlane.xlu0 %4460 }
 0x535   :  { %v4000_v6 = vpop.f32.mrf.mxu0 }
 0x536   :  { %v4155_v56 = vmul.f32 1.442695, %v4148_v25  ;;  %v4167_v52 = vmul.f32 1.442695, %v4160_v46  ;;  %v10502_v59 = vadd.f32 %v4033_v55, %v4000_v6  ;;  %v13054_v25 = vld [vmem:[#allocation32_spill] sm:$0xff] }
 0x537   :  { %v2027_v46 = vsel %vm703_vm13, %v13054_v25, 0.0  ;;  %v13062_v25 = vld [vmem:[#allocation99_spill] sm:$0xff] }
 0x538   :  { %13049 = vst [vmem:[#allocation8_spill] sm:$0xff] %v10502_v59  ;;  %7162 = vpow2.f32 %v4155_v56 }
 0x539   :  { %7164 = vpow2.f32 %v4167_v52  ;;  %v4449_v21 = vpop.xlane.xlu1 %4448 }
 0x53a   :  { %v4471_v0 = vmax.f32 %v4449_v21, %v4461_v3 }
 0x53c   :  { %v4487_v52 = vsub.f32 %v10343_v47, %v4471_v0  ;;  %v4475_v3 = vsub.f32 %v10355_v51, %v4471_v0 }
 0x53e   :  { %v10508_v9 = vpop.eup %7162  ;;  %v4491_v12 = vmul.f32 1.442695, %v4487_v52  ;;  %v4479_v52 = vmul.f32 1.442695, %v4475_v3 }
 0x53f   :  { %13052 = vst [vmem:[#allocation120_spill] sm:$0xff] %v10508_v9  ;;  %v10510_v53 = vpop.eup %7164  ;;  %v4258_v24 = vpack.c.bf16 %v10508_v9, %v10504_v41 }
 0x540   :  { %13053 = vst [vmem:[#allocation121_spill] sm:$0xff] %v10510_v53  ;;  %v4266_v11 = vpack.c.bf16 %v10510_v53, %v10506_v44 }
 0x541   :  { %v4464_v6 = vpop.xlane.xlu1 %4463  ;;  %6741 = vmatmul.msk.bf16.gmra.mxu1 %vm362_vm5, %v4258_v24 }
 0x542   :  { %v4472_v56 = vmax.f32 %v4452_v19, %v4464_v6  ;;  %6739 = vmatmul.msk.bf16.gmra.mxu0 %vm703_vm13, %v4266_v11 }
 0x544   :  { %v4488_v2 = vsub.f32 %v10365_v32, %v4472_v56  ;;  %v4476_v55 = vsub.f32 %v10307_v45, %v4472_v56  ;;  %v13057_v32 = vld [vmem:[#allocation50_spill] sm:$0xff] }
 0x545   :  { %v2322_v24 = vsel %vm362_vm5, %v13057_v32, 0.0  ;;  %v13058_v45 = vld [vmem:[#allocation58_spill] sm:$0xff]  ;;  %v13064_v32 = vld [vmem:[#allocation79_spill] sm:$0xff] }
 0x546   :  { %v4493_v40 = vmul.f32 1.442695, %v4488_v2  ;;  %v4481_v6 = vmul.f32 1.442695, %v4476_v55  ;;  %v2018_v56 = vsel %vm362_vm5, %v13058_v45, 0.0  ;;  %v13059_v2 = vld [vmem:[#allocation52_spill] sm:$0xff]  ;;  %v4647_v55 = vpop.permute.xlu2 %4646  ;;  %v10554_v45 = vpop.f32.mrf.mxu0 }
 0x547   :  { %v4611_v35 = vpop.permute.xlu0 %4610  ;;  %v2623_v51 = vsel %vm362_vm5, %v13059_v2, 0.0 }
 0x548   :  { %4631 = vmatpush.bf16.msra.mxu0 %v4611_v35  ;;  %7166 = vpow2.f32 %v4493_v40 }
 0x549   :  { %2028 = vadd.xlane.f32.xlu2 %v2027_v46  ;;  %7168 = vpow2.f32 %v4491_v12  ;;  %v13060_v12 = vld [vmem:[#allocation91_spill] sm:$0xff]  ;;  %v2319_v46 = vsel %vm362_vm5, %v13062_v25, 0.0 }
 0x54a   :  { %7170 = vpow2.f32 %v4481_v6  ;;  %v2015_v40 = vsel %vm362_vm5, %v13060_v12, 0.0  ;;  %v13066_v6 = vld [vmem:[#allocation82_spill] sm:$0xff]  ;;  %13067 = vst [vmem:[#allocation91_spill] sm:$0xff] %v10554_v45 }
 0x54b   :  { %7172 = vpow2.f32 %v4479_v52  ;;  %v2030_v52 = vsel %vm703_vm13, %v13066_v6, 0.0  ;;  %v13073_v6 = vld [vmem:[#allocation13_spill] sm:$0xff] }
 0x54e   :  { %v10523_v21 = vpop.eup %7166 }
 0x54f   :  { %13055 = vst [vmem:[#allocation32_spill] sm:$0xff] %v10523_v21  ;;  %v4609_v47 = vpop.permute.xlu0 %4608  ;;  %v10525_v19 = vpop.eup %7168 }
 0x550   :  { %13056 = vst [vmem:[#allocation122_spill] sm:$0xff] %v10525_v19  ;;  %4632 = vmatpush.bf16.msra.mxu0 %v4609_v47  ;;  %v4595_v11 = vpack.c.bf16 %v10523_v21, %v10525_v19  ;;  %v10539_v35 = vpop.eup %7170 }
 0x551   :  { %2323 = vadd.xlane.f32.xlu2 %v2322_v24  ;;  %13061 = vst [vmem:[#allocation50_spill] sm:$0xff] %v10539_v35  ;;  %v10543_v47 = vpop.eup %7172  ;;  %v2638_v24 = vsel %vm703_vm13, %v13064_v32, 0.0 }
 0x552   :  { %13063 = vst [vmem:[#allocation58_spill] sm:$0xff] %v10543_v47  ;;  %v4587_v3 = vpack.c.bf16 %v10539_v35, %v10543_v47  ;;  %v13104_v47 = vld [vmem:[#allocation14_spill] sm:$0xff] }
 0x553   :  { %6746 = vmatmul.msk.bf16.vlgmr.msra.gmra.mxu0 %vm703_vm13, %v4595_v11  ;;  %v10550_v11 = vpop.f32.mrf.mxu1 }
 0x554   :  { %13065 = vst [vmem:[#allocation52_spill] sm:$0xff] %v10550_v11 }
 0x555   :  { %2019 = vadd.xlane.f32.xlu0 %v2018_v56  ;;  %v13068_v56 = vld [vmem:[#allocation73_spill] sm:$0xff] }
 0x556   :  { %v2334_v2 = vsel %vm703_vm13, %v13068_v56, 0.0  ;;  %v13074_v56 = vld [vmem:[#allocation70_spill] sm:$0xff] }
 0x559   :  { %v4649_v0 = vpop.permute.xlu1 %4648  ;;  %2624 = vadd.xlane.f32.xlu2 %v2623_v51  ;;  %v13069_v51 = vld [vmem:[#allocation12_spill] sm:$0xff] }
 0x55a   :  { %4664 = vmatpush.bf16.msrb.mxu1 %v4649_v0  ;;  %v2927_v0 = vsel %vm362_vm5, %v13069_v51, 0.0  ;;  %v13075_v51 = vld [vmem:[#allocation116_spill] sm:$0xff] }
 0x55c   :  { %2016 = vadd.xlane.f32.xlu1 %v2015_v40  ;;  %v13070_v40 = vld [vmem:[#allocation109_spill] sm:$0xff] }
 0x55d   :  { %2320 = vadd.xlane.f32.xlu0 %v2319_v46  ;;  %v2331_v25 = vsel %vm703_vm13, %v13070_v40, 0.0  ;;  %v13076_v40 = vld [vmem:[#allocation89_spill] sm:$0xff] }
 0x55e   :  { %4665 = vmatpush.bf16.msrb.mxu1 %v4647_v55  ;;  %v13071_v55 = vld [vmem:[#allocation69_spill] sm:$0xff] }
 0x561   :  { %2639 = vadd.xlane.f32.xlu2 %v2638_v24  ;;  %6748 = vmatmul.msk.bf16.vlgmr.msrb.gmra.mxu1 %vm362_vm5, %v4587_v3  ;;  %v2635_v3 = vsel %vm703_vm13, %v13071_v55, 0.0  ;;  %v4738_v55 = vpop.f32.mrf.mxu3 }
 0x564   :  { %2031 = vadd.xlane.f32.xlu1 %v2030_v52  ;;  %v2930_v52 = vsel %vm362_vm5, %v13073_v6, 0.0 }
 0x565   :  { %2335 = vadd.xlane.f32.xlu0 %v2334_v2  ;;  %v2626_v2 = vsel %vm362_vm5, %v13074_v56, 0.0 }
 0x569   :  { %2928 = vadd.xlane.f32.xlu2 %v2927_v0  ;;  %v4719_v0 = vmul.f32 0.35355338, %v13075_v51  ;;  %v13078_v51 = vld [vmem:[#allocation38_spill] sm:$0xff] }
 0x56a   :  { %v4458_v24 = vpop.xlane.xlu2 %4457 }
 0x56b   :  { %v4038_v12 = vpop.f32.mrf.mxu1 }
 0x56c   :  { %v4005_v46 = vpop.f32.mrf.mxu0  ;;  %2332 = vadd.xlane.f32.xlu1 %v2331_v25  ;;  %v2939_v25 = vsel %vm703_vm13, %v13076_v40, 0.0 }
 0x56d   :  { %v10564_v32 = vadd.f32 %v4038_v12, %v4005_v46  ;;  %2636 = vadd.xlane.f32.xlu0 %v2635_v3  ;;  %v10574_v12 = vadd.f32 %v4719_v0, %v8459_v17  ;;  %v4745_v3 = vmul.f32 0.35355338, %v4738_v55 }
 0x56f   :  { %13072 = vst [vmem:[#allocation99_spill] sm:$0xff] %v10564_v32  ;;  %v4760_v6 = vsel %vm362_vm5, %v10574_v12, -inf }
 0x571   :  { %2931 = vadd.xlane.f32.xlu2 %v2930_v52 }
 0x572   :  { %v4470_v59 = vpop.xlane.xlu2 %4469 }
 0x573   :  { %v4474_v46 = vmax.f32 %v4458_v24, %v4470_v59  ;;  %v4740_v59 = vpop.f32.mrf.mxu3 }
 0x574   :  { %2627 = vadd.xlane.f32.xlu1 %v2626_v2  ;;  %v13077_v2 = vld [vmem:[#allocation40_spill] sm:$0xff]  ;;  %v4746_v21 = vmul.f32 0.35355338, %v4740_v59 }
 0x575   :  { %v4478_v52 = vsub.f32 %v10417_v27, %v4474_v46  ;;  %v13079_v32 = vpack.c.bf16 %v13077_v2, %v13078_v51  ;;  %v4490_v40 = vsub.f32 %v10422_v29, %v4474_v46 }
 0x577   :  { %v4485_v24 = vmul.f32 1.442695, %v4478_v52  ;;  %v4497_v11 = vmul.f32 1.442695, %v4490_v40 }
 0x579   :  { %2940 = vadd.xlane.f32.xlu2 %v2939_v25  ;;  %v10585_v25 = vadd.f32 %v4745_v3, %v12861_v23  ;;  %7174 = vpow2.f32 %v4485_v24  ;;  %v4901_v3 = vmul.f32 %v13043_v57, %v13025_v28 }
 0x57a   :  { %v4455_v56 = vpop.xlane.xlu0 %4454  ;;  %7176 = vpow2.f32 %v4497_v11 }
 0x581   :  { %4761 = vmax.xlane.f32.xlu2 %v4760_v6  ;;  %4950 = vrot.lane.b32.xlu0 %v13079_v32, %s7388_s29  ;;  %v4902_v6 = vmul.f32 %v13043_v57, %v13024_v30  ;;  %v4769_v32 = vsel %vm703_vm13, %v10585_v25, -inf }
 0x582   :  { %v10595_v52 = vpop.xlane.xlu0 %4752 }
 0x584   :  { %v4467_v0 = vpop.xlane.xlu1 %4466 }
 0x585   :  { %v4473_v55 = vmax.f32 %v4455_v56, %v4467_v0  ;;  %v10601_v56 = vpop.eup %7174  ;;  %v13084_v0 = vld [vmem:[#allocation88_spill] sm:$0xff] }
 0x586   :  { %13080 = vst [vmem:[#allocation79_spill] sm:$0xff] %v10601_v56  ;;  %v10603_v2 = vpop.eup %7176  ;;  %v2021_v59 = vsel %vm362_vm5, %v13084_v0, 0.0  ;;  %v13089_v0 = vld [vmem:[#allocation92_spill] sm:$0xff] }
 0x587   :  { %v4477_v45 = vsub.f32 %v10437_v33, %v4473_v55  ;;  %v4489_v27 = vsub.f32 %v10455_v4, %v4473_v55  ;;  %v4906_v33 = vpack.c.bf16 %v4902_v6, %v4901_v3  ;;  %v10598_v4 = vadd.f32 %v4746_v21, %v12942_v58  ;;  %13081 = vst [vmem:[#allocation82_spill] sm:$0xff] %v10603_v2  ;;  %v13085_v6 = vld [vmem:[#allocation57_spill] sm:$0xff] }
 0x589   :  { %v4483_v29 = vmul.f32 1.442695, %v4477_v45  ;;  %v4495_v46 = vmul.f32 1.442695, %v4489_v27  ;;  %4770 = vmax.xlane.f32.xlu2 %v4769_v32  ;;  %v4772_v45 = vsel %vm703_vm13, %v10598_v4, -inf  ;;  %v10623_v27 = vpop.xlane.xlu2 %4764  ;;  %v2024_v32 = vsel %vm362_vm5, %v13085_v6, 0.0 }
 0x58a   :  { %v10616_v40 = vpop.xlane.xlu0 %4767 }
 0x58b   :  { %7178 = vpow2.f32 %v4483_v29  ;;  %v10627_v29 = vpop.f32.mrf.mxu0 }
 0x58c   :  { %7180 = vpow2.f32 %v4495_v46  ;;  %v10621_v24 = vpop.xlane.xlu1 %4755  ;;  %13086 = vst [vmem:[#allocation109_spill] sm:$0xff] %v10627_v29  ;;  %v10629_v46 = vpop.f32.mrf.mxu1  ;;  %v13093_v29 = vld [vmem:[#allocation105_spill] sm:$0xff] }
 0x58d   :  { %4912 = vrot.lane.b32.xlu1 %v4906_v33, %s7389_s11  ;;  %13087 = vst [vmem:[#allocation69_spill] sm:$0xff] %v10629_v46  ;;  %v10722_v20 = vmax.f32 %v10621_v24, %v10616_v40 }
 0x58f   :  { %v4780_v40 = vsub.f32 %v10473_v37, %v10722_v20 }
 0x591   :  { %v10607_v51 = vpop.eup %7178  ;;  %4773 = vmax.xlane.f32.xlu2 %v4772_v45  ;;  %v13088_v45 = vld [vmem:[#allocation51_spill] sm:$0xff] }
 0x592   :  { %13082 = vst [vmem:[#allocation73_spill] sm:$0xff] %v10607_v51  ;;  %v10609_v57 = vpop.eup %7180  ;;  %v4588_v11 = vpack.c.bf16 %v10601_v56, %v10607_v51 }
 0x593   :  { %13083 = vst [vmem:[#allocation12_spill] sm:$0xff] %v10609_v57  ;;  %v4596_v21 = vpack.c.bf16 %v10603_v2, %v10609_v57  ;;  %v10638_v6 = vpop.f32.mrf.mxu0  ;;  %v13100_v2 = vld [vmem:[#allocation33_spill] sm:$0xff] }
 0x594   :  { %6749 = vmatmul.msk.bf16.gmra.mxu1 %vm362_vm5, %v4588_v11  ;;  %v2325_v11 = vsel %vm362_vm5, %v13088_v45, 0.0  ;;  %13091 = vst [vmem:[#allocation70_spill] sm:$0xff] %v10638_v6  ;;  %v13094_v45 = vld [vmem:[#allocation67_spill] sm:$0xff]  ;;  %v5020_v51 = vmul.f32 0.35355338, %v13100_v2 }
 0x595   :  { %6747 = vmatmul.msk.bf16.gmra.mxu0 %vm703_vm13, %v4596_v21  ;;  %v4915_v21 = vpop.permute.xlu2 %4914 }
 0x599   :  { %2022 = vadd.xlane.f32.xlu2 %v2021_v59  ;;  %v2942_v59 = vsel %vm703_vm13, %v13089_v0, 0.0 }
 0x59d   :  { %v4953_v55 = vpop.permute.xlu0 %4952 }
 0x59e   :  { %4968 = vmatpush.bf16.msra.mxu1 %v4953_v55  ;;  %v10636_v55 = vpop.f32.mrf.mxu1 }
 0x59f   :  { %13090 = vst [vmem:[#allocation13_spill] sm:$0xff] %v10636_v55 }
 0x5a1   :  { %2025 = vadd.xlane.f32.xlu2 %v2024_v32  ;;  %v13092_v32 = vld [vmem:[#allocation96_spill] sm:$0xff] }
 0x5a2   :  { %v4718_v46 = vmul.f32 0.35355338, %v13092_v32  ;;  %v13097_v32 = vld [vmem:[#allocation84_spill] sm:$0xff] }
 0x5a3   :  { %v2641_v55 = vsel %vm703_vm13, %v13097_v32, 0.0 }
 0x5a4   :  { %v4917_v3 = vpop.permute.xlu1 %4916 }
 0x5a5   :  { %v4927_v33 = vsel %vm874_vm12, %v4917_v3, 0  ;;  %v2340_v3 = vsel %vm703_vm13, %v13093_v29, 0.0  ;;  %v13098_v29 = vld [vmem:[#allocation61_spill] sm:$0xff] }
 0x5a6   :  { %4934 = vmatpush.bf16.msrb.mxu0 %v4927_v33  ;;  %v10644_v33 = vadd.f32 %v4718_v46, %v8420_v16  ;;  %v2328_v46 = vsel %vm362_vm5, %v13098_v29, 0.0 }
 0x5a8   :  { %v4757_v0 = vsel %vm362_vm5, %v10644_v33, -inf }
 0x5a9   :  { %2326 = vadd.xlane.f32.xlu2 %v2325_v11  ;;  %v2033_v11 = vsel %vm703_vm13, %v13094_v45, 0.0 }
 0x5aa   :  { %4935 = vmatpush.bf16.msrb.mxu0 %v4915_v21  ;;  %v10648_v21 = vpop.f32.mrf.mxu1 }
 0x5ab   :  { %2943 = vadd.xlane.f32.xlu0 %v2942_v59  ;;  %13095 = vst [vmem:[#allocation116_spill] sm:$0xff] %v10648_v21  ;;  %v10652_v59 = vpop.f32.mrf.mxu0 }
 0x5ac   :  { %13096 = vst [vmem:[#allocation89_spill] sm:$0xff] %v10652_v59 }
 0x5b1   :  { %2341 = vadd.xlane.f32.xlu2 %v2340_v3  ;;  %v5037_v3 = vpop.f32.mrf.mxu3 }
 0x5b2   :  { %v5047_v19 = vmul.f32 0.35355338, %v5037_v3 }
 0x5b3   :  { %2034 = vadd.xlane.f32.xlu0 %v2033_v11  ;;  %v13099_v11 = vld [vmem:[#allocation66_spill] sm:$0xff] }
 0x5b4   :  { %v2036_v21 = vsel %vm703_vm13, %v13099_v11, 0.0 }
 0x5b7   :  { %4758 = vmax.xlane.f32.xlu1 %v4757_v0  ;;  %v13102_v0 = vld [vmem:[#allocation104_spill] sm:$0xff] }
 0x5b8   :  { %v2936_v32 = vsel %vm362_vm5, %v13102_v0, 0.0  ;;  %v13105_v0 = vld [vmem:[#allocation85_spill] sm:$0xff] }
 0x5b9   :  { %2642 = vadd.xlane.f32.xlu2 %v2641_v55  ;;  %v13103_v55 = vld [vmem:[#allocation23_spill] sm:$0xff]  ;;  %v5039_v11 = vpop.f32.mrf.mxu3 }
 0x5ba   :  { %v2629_v29 = vsel %vm362_vm5, %v13103_v55, 0.0  ;;  %v5048_v2 = vmul.f32 0.35355338, %v5039_v11 }
 0x5bb   :  { %2329 = vadd.xlane.f32.xlu0 %v2328_v46  ;;  %v10668_v46 = vadd.f32 %v5020_v51, %v12940_v10 }
 0x5bc   :  { %v2029_v6 = vpop.xlane.xlu2 %2028  ;;  %v10681_v51 = vadd.f32 %v5048_v2, %v12888_v36 }
 0x5be   :  { %v4342_v45 = vpop.f32.mrf.mxu1  ;;  %13106 = vst [vmem:[#allocation38_spill] sm:$0xff] %v10681_v51  ;;  %v5070_v35 = vsel %vm703_vm13, %v10681_v51, -inf }
 0x5bf   :  { %v4309_v57 = vpop.f32.mrf.mxu0  ;;  %2037 = vadd.xlane.f32.xlu1 %v2036_v21  ;;  %v2337_v21 = vsel %vm703_vm13, %v13104_v47, 0.0 }
 0x5c0   :  { %v10661_v59 = vadd.f32 %v4342_v45, %v4309_v57  ;;  %v5055_v45 = vsel %vm362_vm5, %v10668_v46, -inf }
 0x5c1   :  { %2937 = vadd.xlane.f32.xlu2 %v2936_v32  ;;  %v2644_v32 = vsel %vm703_vm13, %v13105_v0, 0.0  ;;  %v13109_v0 = vld [vmem:[#allocation94_spill] sm:$0xff] }
 0x5c2   :  { %13101 = vst [vmem:[#allocation40_spill] sm:$0xff] %v10661_v59 }
 0x5c3   :  { %2630 = vadd.xlane.f32.xlu0 %v2629_v29  ;;  %v13107_v29 = vld [vmem:[#allocation86_spill] sm:$0xff] }
 0x5c4   :  { %v10670_v56 = vpop.xlane.xlu2 %2323  ;;  %v2632_v59 = vsel %vm362_vm5, %v13107_v29, 0.0 }
 0x5c7   :  { %2338 = vadd.xlane.f32.xlu1 %v2337_v21  ;;  %v10695_v29 = vpop.f32.mrf.mxu0 }
 0x5c8   :  { %v10674_v57 = vpop.xlane.xlu0 %2019  ;;  %13110 = vst [vmem:[#allocation88_spill] sm:$0xff] %v10695_v29 }
 0x5c9   :  { %5056 = vmax.xlane.f32.xlu2 %v5055_v45  ;;  %v13108_v45 = vld [vmem:[#allocation83_spill] sm:$0xff] }
 0x5ca   :  { %v5021_v9 = vmul.f32 0.35355338, %v13108_v45 }
 0x5cb   :  { %2645 = vadd.xlane.f32.xlu0 %v2644_v32  ;;  %v2945_v32 = vsel %vm703_vm13, %v13109_v0, 0.0 }
 0x5cc   :  { %v2625_v55 = vpop.xlane.xlu2 %2624  ;;  %v10702_v44 = vadd.f32 %v5021_v9, %v8392_v61  ;;  %v10716_v9 = vmax.f32 %v10595_v52, %v10623_v27  ;;  %v10731_v27 = vadd.f32 %v5047_v19, %v12869_v43 }
 0x5ce   :  { %13113 = vst [vmem:[#allocation51_spill] sm:$0xff] %v10702_v44  ;;  %v4779_v52 = vsub.f32 %v10450_v42, %v10716_v9  ;;  %v5209_v42 = vmul.f32 %v12947_v18, %v13014_v13 }
 0x5cf   :  { %v2017_v47 = vpop.xlane.xlu1 %2016  ;;  %2633 = vadd.xlane.f32.xlu1 %v2632_v59  ;;  %v10697_v59 = vpop.f32.mrf.mxu1  ;;  %13116 = vst [vmem:[#allocation96_spill] sm:$0xff] %v10731_v27 }
 0x5d0   :  { %v10685_v11 = vadd.f32 %v2029_v6, %v2017_v47  ;;  %v2321_v21 = vpop.xlane.xlu0 %2320  ;;  %13111 = vst [vmem:[#allocation57_spill] sm:$0xff] %v10697_v59  ;;  %v13112_v6 = vld [vmem:[#allocation59_spill] sm:$0xff]  ;;  %v4783_v24 = vmul.f32 1.442695, %v4779_v52 }
 0x5d1   :  { %5071 = vmax.xlane.f32.xlu2 %v5070_v35  ;;  %v2933_v47 = vsel %vm362_vm5, %v13112_v6, 0.0  ;;  %v4634_v6 = vpop.f32.mrf.mxu0 }
 0x5d2   :  { %7182 = vrcp.f32 %v10685_v11  ;;  %vm2048_vm14 = vweird.f32 %v10685_v11  ;;  %v2054_v52 = vand.u32 2147483648, %v10685_v11 }
 0x5d3   :  { %2946 = vadd.xlane.f32.xlu0 %v2945_v32  ;;  %v5058_v32 = vsel %vm362_vm5, %v10702_v44, -inf }
 0x5d4   :  { %v10693_v2 = vpop.xlane.xlu2 %2639  ;;  %v2055_v7 = vor.u32 1.1754944e-38, %v2054_v52 }
 0x5d7   :  { %v10704_v35 = vpop.xlane.xlu1 %2031  ;;  %2934 = vadd.xlane.f32.xlu1 %v2933_v47  ;;  %v13114_v47 = vld [vmem:[#allocation101_spill] sm:$0xff] }
 0x5d8   :  { %v10706_v45 = vpop.xlane.xlu0 %2335  ;;  %v10708_v0 = vpop.eup %7182  ;;  %v2948_v41 = vsel %vm703_vm13, %v13114_v47, 0.0  ;;  %v13118_v47 = vld [vmem:[#allocation48_spill] sm:$0xff] }
 0x5d9   :  { %v2044_v59 = vmul.f32 %v10708_v0, %v10685_v11  ;;  %vm2049_vm11 = vweird.f32 %v10708_v0 }
 0x5da   :  { %vm10752_vm15 = vmor %vm2048_vm14, %vm2049_vm11 }
 0x5db   :  { %5059 = vmax.xlane.f32.xlu0 %v5058_v32  ;;  %v2045_v62 = vsub.f32 1.0, %v2044_v59 }
 0x5dc   :  { %v2929_v29 = vpop.xlane.xlu2 %2928 }
 0x5de   :  { %v4667_v53 = vpop.f32.mrf.mxu1 }
 0x5df   :  { %v10724_v38 = vadd.f32 %v4667_v53, %v4634_v6  ;;  %v2333_v32 = vpop.xlane.xlu1 %2332  ;;  %2949 = vadd.xlane.f32.xlu1 %v2948_v41  ;;  %v2046_v53 = vmul.f32 %v10708_v0, %v2045_v62  ;;  %v2052_v62 = vand.u32 2147483647, %v10685_v11  ;;  %v13117_v6 = vld [vmem:[#allocation53_spill] sm:$0xff] }
 0x5e0   :  { %v2343_v34 = vadd.f32 %v2333_v32, %v2321_v21  ;;  %v2637_v3 = vpop.xlane.xlu0 %2636  ;;  %v4785_v21 = vmul.f32 1.442695, %v4780_v40  ;;  %v13119_v32 = vpack.c.bf16 %v13117_v6, %v13118_v47  ;;  %v13126_v47 = vld [vmem:[#allocation100_spill] sm:$0xff] }
 0x5e1   :  { %13115 = vst [vmem:[#allocation92_spill] sm:$0xff] %v10724_v38  ;;  %v10726_v51 = vadd.f32 %v2637_v3, %v2625_v55  ;;  %v5067_v55 = vsel %vm703_vm13, %v10731_v27, -inf  ;;  %v2047_v59 = vadd.f32 %v10708_v0, %v2046_v53  ;;  %v5212_v38 = vpack.c.bf16 %v5209_v42, %v5209_v42 }
 0x5e2   :  { %7184 = vrcp.f32 %v2343_v34  ;;  %vm10760_vm0 = vcmp.eq.f32.partialorder %v2052_v62, 8.507059e+37  ;;  %vm2352_vm2 = vweird.f32 %v2343_v34  ;;  %v5206_v62 = vmul.f32 %v12947_v18, %v13024_v30 }
 0x5e3   :  { %7186 = vrcp.f32 %v10726_v51  ;;  %v2051_v6 = vsel %vm10752_vm15, %v10708_v0, %v2047_v59  ;;  %v2662_v42 = vand.u32 2147483648, %v10726_v51  ;;  %v4792_v59 = vsub.f32 %v10470_v60, %v10722_v20 }
 0x5e4   :  { %v10737_v41 = vpop.xlane.xlu2 %2931  ;;  %7188 = vpow2.f32 %v4783_v24  ;;  %v2356_v24 = vand.u32 2147483647, %v2343_v34  ;;  %vm2656_vm7 = vweird.f32 %v10726_v51  ;;  %v5205_v60 = vmul.f32 %v12947_v18, %v13025_v28 }
 0x5e5   :  { %7190 = vpow2.f32 %v4785_v21 }
 0x5e6   :  { %vm2357_vm6 = vcmp.eq.f32.partialorder %v2356_v24, 8.507059e+37  ;;  %v4797_v24 = vmul.f32 1.442695, %v4792_v59 }
 0x5e7   :  { %5068 = vmax.xlane.f32.xlu1 %v5067_v55 }
 0x5e8   :  { %v7185_v19 = vpop.eup %7184 }
 0x5e9   :  { %v2348_v37 = vmul.f32 %v7185_v19, %v2343_v34  ;;  %5256 = vrot.lane.b32.xlu2 %v13119_v32, %s7388_s29  ;;  %v7187_v3 = vpop.eup %7186  ;;  %v2358_v32 = vand.u32 2147483648, %v2343_v34  ;;  %vm2353_vm1 = vweird.f32 %v7185_v19 }
 0x5ea   :  { %v2652_v55 = vmul.f32 %v7187_v3, %v10726_v51  ;;  %vm2657_vm3 = vweird.f32 %v7187_v3  ;;  %v10767_v0 = vpop.eup %7188  ;;  %vm2354_vm4 = vmor %vm2352_vm2, %vm2353_vm1 }
 0x5eb   :  { %v2349_v53 = vsub.f32 1.0, %v2348_v37  ;;  %v2660_v37 = vand.u32 2147483647, %v10726_v51  ;;  %13124 = vst [vmem:[#allocation105_spill] sm:$0xff] %v10767_v0  ;;  %v2359_v34 = vor.u32 1.1754944e-38, %v2358_v32  ;;  %v10776_v52 = vpop.eup %7190  ;;  %vm2658_vm8 = vmor %vm2656_vm7, %vm2657_vm3 }
 0x5ec   :  { %v2941_v11 = vpop.xlane.xlu2 %2940  ;;  %v2653_v27 = vsub.f32 1.0, %v2652_v55  ;;  %13125 = vst [vmem:[#allocation67_spill] sm:$0xff] %v10776_v52 }
 0x5ed   :  { %v2350_v21 = vmul.f32 %v7185_v19, %v2349_v53  ;;  %v2951_v14 = vadd.f32 %v2941_v11, %v2929_v29  ;;  %v2056_v29 = vsel %vm10760_vm0, %v2055_v7, %v2051_v6  ;;  %v2663_v7 = vor.u32 1.1754944e-38, %v2662_v42 }
 0x5ee   :  { %v2654_v40 = vmul.f32 %v7187_v3, %v2653_v27  ;;  %vm2661_vm9 = vcmp.eq.f32.partialorder %v2660_v37, 8.507059e+37  ;;  %v2193_v32 = vmul.f32 %v13126_v47, %v2056_v29 }
 0x5ef   :  { %v2351_v44 = vadd.f32 %v7185_v19, %v2350_v21  ;;  %7192 = vrcp.f32 %v2951_v14  ;;  %5220 = vrot.lane.b32.xlu0 %v5212_v38, %s7389_s11  ;;  %v4791_v38 = vsub.f32 %v10440_v49, %v10716_v9  ;;  %v4891_v9 = vpack.c.bf16 %v10776_v52, %v10767_v0  ;;  %v13151_v52 = vld [vmem:[#allocation76_spill] sm:$0xff] }
 0x5f0   :  { %v2655_v53 = vadd.f32 %v7187_v3, %v2654_v40  ;;  %v5210_v21 = vpack.c.bf16 %v5206_v62, %v5205_v60  ;;  %v13128_v40 = vld [vmem:[#allocation16_spill] sm:$0xff]  ;;  %7194 = vpow2.f32 %v4797_v24  ;;  %v2964_v62 = vand.u32 2147483647, %v2951_v14 }
 0x5f1   :  { %v2355_v27 = vsel %vm2354_vm4, %v7185_v19, %v2351_v44  ;;  %v13127_v44 = vld [vmem:[#allocation98_spill] sm:$0xff]  ;;  %vm2960_vm11 = vweird.f32 %v2951_v14 }
 0x5f2   :  { %v2360_v20 = vsel %vm2357_vm6, %v2359_v34, %v2355_v27  ;;  %v2659_v55 = vsel %vm2658_vm8, %v7187_v3, %v2655_v53  ;;  %v4795_v3 = vmul.f32 1.442695, %v4791_v38  ;;  %v2628_v27 = vpop.xlane.xlu1 %2627  ;;  %v2966_v53 = vand.u32 2147483648, %v2951_v14 }
 0x5f3   :  { %v4951_v6 = vpop.permute.xlu0 %4950  ;;  %v2497_v19 = vmul.f32 %v13127_v44, %v2360_v20  ;;  %v2664_v51 = vsel %vm2661_vm9, %v2663_v7, %v2659_v55  ;;  %v5208_v20 = vmul.f32 %v12947_v18, %v13020_v54  ;;  %v5207_v55 = vmul.f32 %v12947_v18, %v13021_v15 }
 0x5f4   :  { %v10786_v11 = vpop.xlane.xlu2 %4761  ;;  %4969 = vmatpush.bf16.msra.mxu1 %v4951_v6  ;;  %v2801_v34 = vmul.f32 %v13128_v40, %v2664_v51  ;;  %7196 = vpow2.f32 %v4795_v3  ;;  %v2967_v6 = vor.u32 1.1754944e-38, %v2966_v53  ;;  %vm2965_vm15 = vcmp.eq.f32.partialorder %v2964_v62, 8.507059e+37  ;;  %v13130_v51 = vld [vmem:[#allocation41_spill] sm:$0xff] }
 0x5f5   :  { %v7193_v49 = vpop.eup %7192  ;;  %v2501_v42 = vadd.f32 %v2497_v19, %v2193_v32  ;;  %v3096_v32 = vadd.f32 %v10200_v22, %v10196_v26  ;;  %v5211_v44 = vpack.c.bf16 %v5208_v20, %v5207_v55  ;;  %v5042_v26 = vpop.f32.mrf.mxu3  ;;  %v10826_v53 = vadd.f32 %v10706_v45, %v10670_v56 }
 0x5f6   :  { %v2956_v37 = vmul.f32 %v7193_v49, %v2951_v14  ;;  %vm2961_vm10 = vweird.f32 %v7193_v49  ;;  %v10799_v47 = vpop.eup %7194  ;;  %v10828_v20 = vpop.f32.mrf.mxu0 }
 0x5f7   :  { %5216 = vrot.lane.b32.xlu0 %v5210_v21, %s7389_s11  ;;  %6756 = vmatmul.msk.bf16.vlgmr.msra.gmra.mxu1 %vm362_vm5, %v4891_v9  ;;  %v2805_v59 = vadd.f32 %v2801_v34, %v2501_v42  ;;  %vm2962_vm14 = vmor %vm2960_vm11, %vm2961_vm10  ;;  %13129 = vst [vmem:[#allocation84_spill] sm:$0xff] %v10799_v47  ;;  %v13131_v9 = vld [vmem:[#allocation39_spill] sm:$0xff]  ;;  %v13134_v34 = vld [vmem:[#allocation80_spill] sm:$0xff]  ;;  %vm2367_vm6 = vweird.f32 %v10826_v53 }
 0x5f8   :  { %v2957_v29 = vsub.f32 1.0, %v2956_v37  ;;  %v13132_v14 = vpack.c.bf16 %v13130_v51, %v13131_v9  ;;  %v5023_v3 = vmul.f32 0.35355338, %v13134_v34  ;;  %v10820_v37 = vadd.f32 %v10704_v35, %v10674_v57  ;;  %13136 = vst [vmem:[#allocation33_spill] sm:$0xff] %v10828_v20  ;;  %v13138_v34 = vld [vmem:[#allocation62_spill] sm:$0xff] }
 0x5f9   :  { %v5049_v51 = vmul.f32 0.35355338, %v5042_v26  ;;  %v2371_v20 = vand.u32 2147483647, %v10826_v53 }
 0x5fa   :  { %v2958_v7 = vmul.f32 %v7193_v49, %v2957_v29  ;;  %v10807_v42 = vpop.eup %7196  ;;  %v10822_v29 = vpop.f32.mrf.mxu1  ;;  %7198 = vrcp.f32 %v10820_v37  ;;  %vm2063_vm1 = vweird.f32 %v10820_v37 }
 0x5fb   :  { %13133 = vst [vmem:[#allocation61_spill] sm:$0xff] %v10807_v42  ;;  %v4899_v40 = vpack.c.bf16 %v10799_v47, %v10807_v42  ;;  %7200 = vrcp.f32 %v10826_v53  ;;  %vm2372_vm10 = vcmp.eq.f32.partialorder %v2371_v20, 8.507059e+37 }
 0x5fc   :  { %v2959_v60 = vadd.f32 %v7193_v49, %v2958_v7  ;;  %v10795_v38 = vpop.xlane.xlu2 %4770  ;;  %13135 = vst [vmem:[#allocation66_spill] sm:$0xff] %v10822_v29 }
 0x5fd   :  { %v5044_v7 = vpop.f32.mrf.mxu3 }
 0x5fe   :  { %v2963_v19 = vsel %vm2962_vm14, %v7193_v49, %v2959_v60  ;;  %v10837_v60 = vadd.f32 %v5023_v3, %v8459_v17  ;;  %v5050_v57 = vmul.f32 0.35355338, %v5044_v7  ;;  %v5022_v3 = vmul.f32 0.35355338, %v13138_v34 }
 0x5ff   :  { %v4913_v24 = vpop.permute.xlu1 %4912  ;;  %5254 = vrot.lane.b32.xlu0 %v13132_v14, %s7388_s29  ;;  %v2968_v21 = vsel %vm2965_vm15, %v2967_v6, %v2963_v19 }
 0x600   :  { %5218 = vrot.lane.b32.xlu1 %v5211_v44, %s7389_s11  ;;  %4936 = vmatpush.bf16.msrb.mxu0 %v4913_v24  ;;  %v3105_v18 = vmul.f32 %v3096_v32, %v2968_v21  ;;  %v5064_v35 = vsel %vm362_vm5, %v10837_v60, -inf  ;;  %v10854_v44 = vadd.f32 %v5050_v57, %v12942_v58 }
 0x602   :  { %v10812_v22 = vadd.f32 %v3105_v18, %v2805_v59  ;;  %v10831_v59 = vadd.f32 %v10693_v2, %v2628_v27  ;;  %v10843_v2 = vpop.eup %7198  ;;  %v5325_v18 = vmul.f32 0.35355338, %v10120_v1  ;;  %v10878_v1 = vadd.f32 %v5022_v3, %v8420_v16 }
 0x603   :  { %6754 = vmatmul.msk.bf16.vlgmr.msrb.gmra.mxu0 %vm703_vm13, %v4899_v40  ;;  %v10847_v55 = vpop.eup %7200  ;;  %v2059_v9 = vmul.f32 %v10843_v2, %v10820_v37  ;;  %v5076_v40 = vsel %vm703_vm13, %v10854_v44, -inf  ;;  %vm2064_vm0 = vweird.f32 %v10843_v2 }
 0x604   :  { %v10815_v49 = vpop.xlane.xlu2 %4773  ;;  %7202 = vrcp.f32 %v10831_v59  ;;  %v2363_v24 = vmul.f32 %v10847_v55, %v10826_v53  ;;  %v10869_v26 = vadd.f32 %v5325_v18, %v8392_v61  ;;  %v13145_v18 = vld [vmem:[#allocation93_spill] sm:$0xff]  ;;  %vm2368_vm2 = vweird.f32 %v10847_v55  ;;  %vm10916_vm4 = vmor %vm2063_vm1, %vm2064_vm0 }
 0x605   :  { %v5341_v19 = vpop.f32.mrf.mxu3  ;;  %v2060_v57 = vsub.f32 1.0, %v2059_v9  ;;  %v13142_v9 = vld [vmem:[#allocation90_spill] sm:$0xff]  ;;  %vm10925_vm7 = vmor %vm2367_vm6, %vm2368_vm2  ;;  %vm2671_vm8 = vweird.f32 %v10831_v59 }
 0x606   :  { %v5351_v21 = vmul.f32 0.35355338, %v5341_v19  ;;  %v2364_v7 = vsub.f32 1.0, %v2363_v24  ;;  %13139 = vst [vmem:[#allocation23_spill] sm:$0xff] %v10869_v26 }
 0x607   :  { %v2061_v61 = vmul.f32 %v10843_v2, %v2060_v57  ;;  %v5061_v57 = vsel %vm362_vm5, %v10878_v1, -inf }
 0x608   :  { %v10875_v19 = vadd.f32 %v5351_v21, %v12869_v43  ;;  %v5362_v43 = vsel %vm362_vm5, %v10869_v26, -inf  ;;  %v13152_v26 = vld [vmem:[#allocation75_spill] sm:$0xff] }
 0x609   :  { %v2062_v29 = vadd.f32 %v10843_v2, %v2061_v61  ;;  %v2677_v61 = vand.u32 2147483648, %v10831_v59 }
 0x60a   :  { %v10851_v32 = vpop.eup %7202  ;;  %13141 = vst [vmem:[#allocation85_spill] sm:$0xff] %v10875_v19 }
 0x60b   :  { %v2667_v14 = vmul.f32 %v10851_v32, %v10831_v59  ;;  %vm2672_vm3 = vweird.f32 %v10851_v32 }
 0x60c   :  { %v10833_v62 = vpop.xlane.xlu2 %2022  ;;  %vm10941_vm9 = vmor %vm2671_vm8, %vm2672_vm3 }
 0x611   :  { %v4672_v56 = vpop.f32.mrf.mxu1 }
 0x612   :  { %v4639_v45 = vpop.f32.mrf.mxu0  ;;  %5065 = vmax.xlane.f32.xlu2 %v5064_v35 }
 0x613   :  { %v10845_v27 = vadd.f32 %v4672_v56, %v4639_v45  ;;  %v2668_v56 = vsub.f32 1.0, %v2667_v14  ;;  %v10872_v45 = vadd.f32 %v5049_v51, %v12861_v23  ;;  %v13143_v14 = vld [vmem:[#allocation77_spill] sm:$0xff] }
 0x614   :  { %v10849_v6 = vpop.xlane.xlu2 %2025  ;;  %v10886_v34 = vadd.f32 %v13143_v14, %v13142_v9  ;;  %v2373_v14 = vand.u32 2147483648, %v10826_v53  ;;  %v2794_v53 = vadd.f32 %v13152_v26, %v13151_v52 }
 0x615   :  { %13137 = vst [vmem:[#allocation104_spill] sm:$0xff] %v10845_v27  ;;  %v2669_v51 = vmul.f32 %v10851_v32, %v2668_v56  ;;  %v5073_v21 = vsel %vm703_vm13, %v10872_v45, -inf }
 0x616   :  { %13140 = vst [vmem:[#allocation14_spill] sm:$0xff] %v10872_v45 }
 0x61a   :  { %5077 = vmax.xlane.f32.xlu2 %v5076_v40  ;;  %v2365_v40 = vmul.f32 %v10847_v55, %v2364_v7  ;;  %v13146_v7 = vld [vmem:[#allocation10_spill] sm:$0xff] }
 0x61b   :  { %v5324_v9 = vmul.f32 0.35355338, %v13146_v7 }
 0x61c   :  { %v10866_v35 = vpop.xlane.xlu2 %2326  ;;  %v2366_v56 = vadd.f32 %v10847_v55, %v2365_v40  ;;  %v2069_v40 = vand.u32 2147483648, %v10820_v37 }
 0x61d   :  { %v10932_v47 = vadd.f32 %v5324_v9, %v12940_v10  ;;  %v2066_v10 = vsel %vm10916_vm4, %v10843_v2, %v2062_v29  ;;  %v2678_v9 = vor.u32 1.1754944e-38, %v2677_v61  ;;  %v5343_v29 = vpop.f32.mrf.mxu3 }
 0x61e   :  { %v2944_v27 = vpop.xlane.xlu0 %2943  ;;  %v2070_v26 = vor.u32 1.1754944e-38, %v2069_v40 }
 0x61f   :  { %v10882_v24 = vadd.f32 %v2944_v27, %v10737_v41  ;;  %v10897_v41 = vsel %vm703_vm13, %v10875_v19, -inf  ;;  %v13144_v27 = vld [vmem:[#allocation49_spill] sm:$0xff]  ;;  %v2374_v19 = vor.u32 1.1754944e-38, %v2373_v14 }
 0x620   :  { %v2490_v3 = vadd.f32 %v13145_v18, %v13144_v27  ;;  %v2670_v27 = vadd.f32 %v10851_v32, %v2669_v51  ;;  %v2067_v51 = vand.u32 2147483647, %v10820_v37  ;;  %v2370_v37 = vsel %vm10925_vm7, %v10847_v55, %v2366_v56 }
 0x621   :  { %7204 = vrcp.f32 %v10882_v24  ;;  %v2981_v20 = vand.u32 2147483648, %v10882_v24  ;;  %vm2975_vm0 = vweird.f32 %v10882_v24 }
 0x622   :  { %5363 = vmax.xlane.f32.xlu2 %v5362_v43  ;;  %v4778_v43 = vmax.f32 %v10786_v11, %v10815_v49  ;;  %v2675_v11 = vand.u32 2147483647, %v10831_v59  ;;  %v2674_v52 = vsel %vm10941_vm9, %v10851_v32, %v2670_v27  ;;  %vm2068_vm11 = vcmp.eq.f32.partialorder %v2067_v51, 8.507059e+37 }
 0x623   :  { %v2071_v2 = vsel %vm2068_vm11, %v2070_v26, %v2066_v10  ;;  %v5352_v51 = vmul.f32 0.35355338, %v5343_v29 }
 0x624   :  { %v10914_v18 = vpop.xlane.xlu2 %2341  ;;  %v4782_v42 = vsub.f32 %v10574_v12, %v4778_v43  ;;  %vm2676_vm14 = vcmp.eq.f32.partialorder %v2675_v11, 8.507059e+37  ;;  %v4794_v32 = vsub.f32 %v10598_v4, %v4778_v43 }
 0x625   :  { %v2679_v45 = vsel %vm2676_vm14, %v2678_v9, %v2674_v52 }
 0x626   :  { %v2035_v49 = vpop.xlane.xlu0 %2034  ;;  %v4789_v27 = vmul.f32 1.442695, %v4782_v42 }
 0x627   :  { %v7205_v0 = vpop.eup %7204  ;;  %v10946_v59 = vadd.f32 %v2035_v49, %v10833_v62  ;;  %v2375_v62 = vsel %vm2372_vm10, %v2374_v19, %v2370_v37  ;;  %v4801_v49 = vmul.f32 1.442695, %v4794_v32 }
 0x628   :  { %v2971_v55 = vmul.f32 %v7205_v0, %v10882_v24  ;;  %vm2976_vm15 = vweird.f32 %v7205_v0 }
 0x629   :  { %7206 = vrcp.f32 %v10946_v59  ;;  %5074 = vmax.xlane.f32.xlu0 %v5073_v21  ;;  %v2979_v21 = vand.u32 2147483647, %v10882_v24  ;;  %vm10967_vm1 = vmor %vm2975_vm0, %vm2976_vm15  ;;  %vm2078_vm4 = vweird.f32 %v10946_v59 }
 0x62a   :  { %v2972_v56 = vsub.f32 1.0, %v2971_v55  ;;  %v4759_v14 = vpop.xlane.xlu1 %4758  ;;  %5062 = vmax.xlane.f32.xlu1 %v5061_v57  ;;  %v2498_v57 = vmul.f32 %v2490_v3, %v2375_v62  ;;  %7208 = vpow2.f32 %v4789_v27  ;;  %v3098_v55 = vadd.f32 %v10223_v39, %v10221_v8 }
 0x62b   :  { %v4777_v12 = vmax.f32 %v4759_v14, %v10795_v38  ;;  %v2194_v38 = vmul.f32 %v10886_v34, %v2071_v2  ;;  %vm2980_vm2 = vcmp.eq.f32.partialorder %v2979_v21, 8.507059e+37  ;;  %v5359_v34 = vsel %vm362_vm5, %v10932_v47, -inf }
 0x62c   :  { %v2973_v7 = vmul.f32 %v7205_v0, %v2972_v56  ;;  %v2643_v40 = vpop.xlane.xlu2 %2642  ;;  %v2084_v62 = vand.u32 2147483648, %v10946_v59  ;;  %v2082_v14 = vand.u32 2147483647, %v10946_v59  ;;  %v10984_v2 = vadd.f32 %v5352_v51, %v12888_v36 }
 0x62d   :  { %v4781_v19 = vsub.f32 %v10644_v33, %v4777_v12  ;;  %v4793_v61 = vsub.f32 %v10585_v25, %v4777_v12  ;;  %v2802_v33 = vmul.f32 %v2794_v53, %v2679_v45  ;;  %v2982_v25 = vor.u32 1.1754944e-38, %v2981_v20 }
 0x62e   :  { %v2974_v11 = vadd.f32 %v7205_v0, %v2973_v7  ;;  %v10964_v4 = vpop.xlane.xlu0 %2329  ;;  %v2502_v42 = vadd.f32 %v2498_v57, %v2194_v38  ;;  %v5513_v8 = vmul.f32 %v12991_v48, %v13014_v13  ;;  %v2085_v7 = vor.u32 1.1754944e-38, %v2084_v62 }
 0x62f   :  { %v7207_v43 = vpop.eup %7206  ;;  %v4787_v10 = vmul.f32 1.442695, %v4781_v19  ;;  %v4799_v52 = vmul.f32 1.442695, %v4793_v61  ;;  %vm2083_vm7 = vcmp.eq.f32.partialorder %v2082_v14, 8.507059e+37  ;;  %v5374_v57 = vsel %vm703_vm13, %v10984_v2, -inf }
 0x630   :  { %v2074_v3 = vmul.f32 %v7207_v43, %v10946_v59  ;;  %v2978_v24 = vsel %vm10967_vm1, %v7205_v0, %v2974_v11  ;;  %v2806_v0 = vadd.f32 %v2802_v33, %v2502_v42  ;;  %vm2079_vm3 = vweird.f32 %v7207_v43  ;;  %v10988_v39 = vpop.eup %7208 }
 0x631   :  { %7210 = vpow2.f32 %v4787_v10  ;;  %5372 = vmax.xlane.f32.xlu0 %v10897_v41  ;;  %v2983_v9 = vsel %vm2980_vm2, %v2982_v25, %v2978_v24  ;;  %vm2080_vm6 = vmor %vm2078_vm4, %vm2079_vm3  ;;  %v5516_v51 = vpack.c.bf16 %v5513_v8, %v5513_v8  ;;  %v11022_v10 = vadd.f32 %v10914_v18, %v10964_v4  ;;  %v13158_v18 = vld [vmem:[#allocation43_spill] sm:$0xff]  ;;  %v13159_v4 = vld [vmem:[#allocation42_spill] sm:$0xff] }
 0x632   :  { %v2075_v26 = vsub.f32 1.0, %v2074_v3  ;;  %7212 = vpow2.f32 %v4799_v52  ;;  %v2038_v53 = vpop.xlane.xlu1 %2037  ;;  %5360 = vmax.xlane.f32.xlu1 %v5359_v34  ;;  %v3106_v41 = vmul.f32 %v3098_v55, %v2983_v9  ;;  %v5511_v25 = vmul.f32 %v12991_v48, %v13021_v15 }
 0x633   :  { %7214 = vpow2.f32 %v4801_v49  ;;  %v13160_v55 = vpack.c.bf16 %v13158_v18, %v13159_v4  ;;  %v5509_v15 = vmul.f32 %v12991_v48, %v13025_v28  ;;  %v5510_v14 = vmul.f32 %v12991_v48, %v13024_v30 }
 0x634   :  { %v2076_v56 = vmul.f32 %v7207_v43, %v2075_v26  ;;  %v10981_v29 = vpop.xlane.xlu2 %2937  ;;  %v3110_v45 = vadd.f32 %v3106_v41, %v2806_v0 }
 0x636   :  { %v2077_v32 = vadd.f32 %v7207_v43, %v2076_v56  ;;  %v2631_v12 = vpop.xlane.xlu0 %2630  ;;  %v5603_v19 = vpack.c.bf16 %v3110_v45, %v10812_v22  ;;  %v11009_v22 = vadd.f32 %v2038_v53, %v10849_v6 }
 0x637   :  { %v10991_v27 = vpop.eup %7210  ;;  %v10993_v20 = vadd.f32 %v2643_v40, %v2631_v12 }
 0x638   :  { %v10995_v21 = vpop.eup %7212  ;;  %v2081_v36 = vsel %vm2080_vm6, %v7207_v43, %v2077_v32  ;;  %v4892_v13 = vpack.c.bf16 %v10988_v39, %v10991_v27  ;;  %6784 = vmatmul.msk.bf16.gmra.mxu2 %vm362_vm5, %v5603_v19  ;;  %v13157_v43 = vld [vmem:[#allocation27_spill] sm:$0xff]  ;;  %vm2093_vm3 = vweird.f32 %v11009_v22 }
 0x639   :  { %v11000_v61 = vpop.eup %7214  ;;  %v2086_v59 = vsel %vm2083_vm7, %v2085_v7, %v2081_v36  ;;  %7216 = vrcp.f32 %v10993_v20  ;;  %vm2686_vm9 = vweird.f32 %v10993_v20  ;;  %v2690_v41 = vand.u32 2147483647, %v10993_v20 }
 0x63a   :  { %v2339_v40 = vpop.xlane.xlu1 %2338  ;;  %5375 = vmax.xlane.f32.xlu1 %v5374_v57  ;;  %v4900_v11 = vpack.c.bf16 %v11000_v61, %v10995_v21  ;;  %5524 = vrot.lane.b32.xlu2 %v5516_v51, %s7389_s11  ;;  %v11015_v49 = vmul.f32 %v13157_v43, %v2086_v59  ;;  %v2692_v8 = vand.u32 2147483648, %v10993_v20  ;;  %vm2397_vm7 = vweird.f32 %v11022_v10 }
 0x63b   :  { %v2345_v38 = vadd.f32 %v2339_v40, %v10866_v35  ;;  %6757 = vmatmul.msk.bf16.gmra.mxu1 %vm362_vm5, %v4892_v13  ;;  %v5512_v35 = vmul.f32 %v12991_v48, %v13020_v54  ;;  %v5514_v13 = vpack.c.bf16 %v5510_v14, %v5509_v15  ;;  %vm2691_vm0 = vcmp.eq.f32.partialorder %v2690_v41, 8.507059e+37  ;;  %v13165_v14 = vld [vmem:[#allocation55_spill] sm:$0xff]  ;;  %v13166_v41 = vld [vmem:[#allocation54_spill] sm:$0xff] }
 0x63c   :  { %6755 = vmatmul.msk.bf16.gmra.mxu0 %vm703_vm13, %v4900_v11  ;;  %v11018_v37 = vpop.xlane.xlu2 %5056  ;;  %v2693_v51 = vor.u32 1.1754944e-38, %v2692_v8  ;;  %v13167_v8 = vpack.c.bf16 %v13165_v14, %v13166_v41 }
 0x63d   :  { %7218 = vrcp.f32 %v2345_v38  ;;  %v5515_v26 = vpack.c.bf16 %v5512_v35, %v5511_v25  ;;  %v2388_v32 = vand.u32 2147483648, %v2345_v38  ;;  %v2386_v28 = vand.u32 2147483647, %v2345_v38  ;;  %v13163_v25 = vld [vmem:[#allocation118_spill] sm:$0xff] }
 0x63e   :  { %7220 = vrcp.f32 %v11009_v22  ;;  %v2646_v33 = vpop.xlane.xlu0 %2645  ;;  %vm2382_vm14 = vweird.f32 %v2345_v38 }
 0x63f   :  { %v7217_v6 = vpop.eup %7216  ;;  %7222 = vrcp.f32 %v11022_v10  ;;  %v2389_v40 = vor.u32 1.1754944e-38, %v2388_v32  ;;  %vm2387_vm1 = vcmp.eq.f32.partialorder %v2386_v28, 8.507059e+37 }
 0x640   :  { %v2682_v52 = vmul.f32 %v7217_v6, %v10993_v20  ;;  %vm2687_vm8 = vweird.f32 %v7217_v6 }
 0x641   :  { %vm11054_vm11 = vmor %vm2686_vm9, %vm2687_vm8 }
 0x642   :  { %v2683_v3 = vsub.f32 1.0, %v2682_v52  ;;  %v2634_v24 = vpop.xlane.xlu1 %2633  ;;  %5558 = vrot.lane.b32.xlu2 %v13160_v55, %s7388_s29 }
 0x643   :  { %v7219_v34 = vpop.eup %7218  ;;  %v11031_v42 = vadd.f32 %v2646_v33, %v2634_v24 }
 0x644   :  { %v2684_v54 = vmul.f32 %v7217_v6, %v2683_v3  ;;  %v2378_v53 = vmul.f32 %v7219_v34, %v2345_v38  ;;  %v11037_v9 = vpop.xlane.xlu2 %5071  ;;  %v11039_v62 = vpop.eup %7220  ;;  %vm2383_vm10 = vweird.f32 %v7219_v34 }
 0x645   :  { %7224 = vrcp.f32 %v11031_v42  ;;  %5522 = vrot.lane.b32.xlu0 %v5515_v26, %s7389_s11  ;;  %v11050_v12 = vpop.eup %7222  ;;  %v2089_v45 = vmul.f32 %v11039_v62, %v11009_v22  ;;  %vm2384_vm15 = vmor %vm2382_vm14, %vm2383_vm10  ;;  %vm2094_vm2 = vweird.f32 %v11039_v62 }
 0x646   :  { %v2685_v0 = vadd.f32 %v7217_v6, %v2684_v54  ;;  %v2379_v56 = vsub.f32 1.0, %v2378_v53  ;;  %v2947_v19 = vpop.xlane.xlu0 %2946  ;;  %v2393_v57 = vmul.f32 %v11050_v12, %v11022_v10  ;;  %vm2398_vm4 = vweird.f32 %v11050_v12  ;;  %vm11096_vm6 = vmor %vm2093_vm3, %vm2094_vm2 }
 0x647   :  { %v2090_v43 = vsub.f32 1.0, %v2089_v45  ;;  %v2099_v45 = vand.u32 2147483648, %v11009_v22  ;;  %vm11112_vm8 = vmor %vm2397_vm7, %vm2398_vm4 }
 0x648   :  { %v2380_v7 = vmul.f32 %v7219_v34, %v2379_v56  ;;  %v2689_v48 = vsel %vm11054_vm11, %v7217_v6, %v2685_v0  ;;  %v2394_v24 = vsub.f32 1.0, %v2393_v57  ;;  %v2401_v57 = vand.u32 2147483647, %v11022_v10 }
 0x649   :  { %v2694_v38 = vsel %vm2691_vm0, %v2693_v51, %v2689_v48  ;;  %v2091_v18 = vmul.f32 %v11039_v62, %v2090_v43  ;;  %v2403_v51 = vand.u32 2147483648, %v11022_v10  ;;  %v2705_v10 = vand.u32 2147483647, %v11031_v42 }
 0x64a   :  { %v2381_v30 = vadd.f32 %v7219_v34, %v2380_v7  ;;  %v2935_v20 = vpop.xlane.xlu1 %2934  ;;  %v2395_v0 = vmul.f32 %v11050_v12, %v2394_v24  ;;  %v2097_v7 = vand.u32 2147483647, %v11009_v22  ;;  %vm2701_vm11 = vweird.f32 %v11031_v42 }
 0x64b   :  { %v11060_v59 = vpop.eup %7224  ;;  %v11064_v11 = vadd.f32 %v2947_v19, %v2935_v20  ;;  %v13171_v19 = vld [vmem:[#allocation19_spill] sm:$0xff]  ;;  %vm2706_vm2 = vcmp.eq.f32.partialorder %v2705_v10, 8.507059e+37 }
 0x64c   :  { %v2385_v35 = vsel %vm2384_vm15, %v7219_v34, %v2381_v30  ;;  %v5257_v6 = vpop.permute.xlu2 %5256  ;;  %v2697_v33 = vmul.f32 %v11060_v59, %v11031_v42  ;;  %v13164_v34 = vld [vmem:[#allocation102_spill] sm:$0xff]  ;;  %v2396_v36 = vadd.f32 %v11050_v12, %v2395_v0  ;;  %v13170_v30 = vld [vmem:[#allocation17_spill] sm:$0xff]  ;;  %vm2098_vm9 = vcmp.eq.f32.partialorder %v2097_v7, 8.507059e+37 }
 0x64d   :  { %v2390_v52 = vsel %vm2387_vm1, %v2389_v40, %v2385_v35  ;;  %7226 = vrcp.f32 %v11064_v11  ;;  %5272 = vmatpush.bf16.msrb.mxu1 %v5257_v6  ;;  %5520 = vrot.lane.b32.xlu0 %v5514_v13, %s7389_s11  ;;  %v2803_v55 = vmul.f32 %v13164_v34, %v2694_v38  ;;  %v2191_v20 = vadd.f32 %v13171_v19, %v13170_v30  ;;  %v13172_v35 = vld [vmem:[#allocation97_spill] sm:$0xff]  ;;  %v13173_v6 = vld [vmem:[#allocation119_spill] sm:$0xff] }
 0x64e   :  { %v2499_v3 = vmul.f32 %v13163_v25, %v2390_v52  ;;  %v2698_v26 = vsub.f32 1.0, %v2697_v33  ;;  %v2100_v40 = vor.u32 1.1754944e-38, %v2099_v45  ;;  %v5060_v43 = vpop.xlane.xlu0 %5059  ;;  %v2495_v52 = vadd.f32 %v13173_v6, %v13172_v35  ;;  %v13184_v35 = vld [vmem:[#allocation78_spill] sm:$0xff] }
 0x64f   :  { %vm2702_vm10 = vweird.f32 %v11060_v59  ;;  %v2400_v33 = vsel %vm11112_vm8, %v11050_v12, %v2396_v36  ;;  %vm2402_vm15 = vcmp.eq.f32.partialorder %v2401_v57, 8.507059e+37  ;;  %v2404_v12 = vor.u32 1.1754944e-38, %v2403_v51 }
 0x650   :  { %v2503_v4 = vadd.f32 %v2499_v3, %v11015_v49  ;;  %v2092_v49 = vadd.f32 %v11039_v62, %v2091_v18  ;;  %v2707_v3 = vand.u32 2147483648, %v11031_v42  ;;  %vm11129_vm0 = vmor %vm2701_vm11, %vm2702_vm10  ;;  %vm2990_vm1 = vweird.f32 %v11064_v11 }
 0x651   :  { %v2405_v41 = vsel %vm2402_vm15, %v2404_v12, %v2400_v33 }
 0x652   :  { %v2950_v54 = vpop.xlane.xlu1 %2949  ;;  %v11074_v53 = vadd.f32 %v2803_v55, %v2503_v4  ;;  %v2096_v22 = vsel %vm11096_vm6, %v11039_v62, %v2092_v49  ;;  %v2994_v4 = vand.u32 2147483647, %v11064_v11  ;;  %v2799_v55 = vadd.f32 %v10175_v31, %v10172_v63  ;;  %v5346_v49 = vpop.f32.mrf.mxu3 }
 0x653   :  { %v11076_v15 = vpop.eup %7226  ;;  %v11080_v56 = vadd.f32 %v2950_v54, %v10981_v29  ;;  %5560 = vrot.lane.b32.xlu1 %v13167_v8, %s7388_s29  ;;  %v2699_v29 = vmul.f32 %v11060_v59, %v2698_v26  ;;  %v2101_v25 = vsel %vm2098_vm9, %v2100_v40, %v2096_v22  ;;  %v2996_v54 = vand.u32 2147483648, %v11064_v11 }
 0x654   :  { %v2986_v32 = vmul.f32 %v11076_v15, %v11064_v11  ;;  %vm2991_vm14 = vweird.f32 %v11076_v15  ;;  %v2708_v63 = vor.u32 1.1754944e-38, %v2707_v3  ;;  %v2196_v8 = vmul.f32 %v2191_v20, %v2101_v25 }
 0x655   :  { %7228 = vrcp.f32 %v11080_v56  ;;  %v2700_v62 = vadd.f32 %v11060_v59, %v2699_v29  ;;  %vm11142_vm3 = vmor %vm2990_vm1, %vm2991_vm14  ;;  %vm11146_vm4 = vcmp.eq.f32.partialorder %v2994_v4, 8.507059e+37  ;;  %v2997_v45 = vor.u32 1.1754944e-38, %v2996_v54 }
 0x656   :  { %v2987_v28 = vsub.f32 1.0, %v2986_v32  ;;  %v3009_v7 = vand.u32 2147483647, %v11080_v56  ;;  %v3011_v29 = vand.u32 2147483648, %v11080_v56  ;;  %v5353_v20 = vmul.f32 0.35355338, %v5346_v49 }
 0x657   :  { %v2704_v42 = vsel %vm11129_vm0, %v11060_v59, %v2700_v62  ;;  %v5080_v59 = vmax.f32 %v5060_v43, %v11037_v9  ;;  %v3101_v9 = vadd.f32 %v10238_v50, %v10236_v5  ;;  %v2500_v22 = vmul.f32 %v2495_v52, %v2405_v41  ;;  %v13183_v43 = vld [vmem:[#allocation56_spill] sm:$0xff]  ;;  %v13188_v32 = vld [vmem:[#allocation107_spill] sm:$0xff] }
 0x658   :  { %v2988_v13 = vmul.f32 %v11076_v15, %v2987_v28  ;;  %v2709_v36 = vsel %vm2706_vm2, %v2708_v63, %v2704_v42  ;;  %vm3005_vm7 = vweird.f32 %v11080_v56  ;;  %v3012_v6 = vor.u32 1.1754944e-38, %v3011_v29  ;;  %v13185_v52 = vld [vmem:[#allocation96_spill] sm:$0xff] }
 0x659   :  { %v2804_v40 = vmul.f32 %v2799_v55, %v2709_v36  ;;  %v2504_v38 = vadd.f32 %v2500_v22, %v2196_v8  ;;  %vm3010_vm9 = vcmp.eq.f32.partialorder %v3009_v7, 8.507059e+37  ;;  %v11168_v25 = vadd.f32 %v5353_v20, %v12861_v23  ;;  %v11200_v36 = vpop.f32.mrf.mxu1 }
 0x65a   :  { %v5069_v24 = vpop.xlane.xlu1 %5068  ;;  %v2989_v18 = vadd.f32 %v11076_v15, %v2988_v13  ;;  %v13182_v13 = vld [vmem:[#allocation51_spill] sm:$0xff] }
 0x65b   :  { %v7229_v34 = vpop.eup %7228  ;;  %v5079_v14 = vmax.f32 %v11018_v37, %v5069_v24  ;;  %v5084_v57 = vsub.f32 %v13182_v13, %v5080_v59  ;;  %v2808_v24 = vadd.f32 %v2804_v40, %v2504_v38  ;;  %v13193_v38 = vld [vmem:[#allocation95_spill] sm:$0xff] }
 0x65c   :  { %v3001_v0 = vmul.f32 %v7229_v34, %v11080_v56  ;;  %v2993_v37 = vsel %vm11142_vm3, %v11076_v15, %v2989_v18  ;;  %vm3006_vm6 = vweird.f32 %v7229_v34  ;;  %v13186_v18 = vld [vmem:[#allocation38_spill] sm:$0xff]  ;;  %vm5853_vm3 = vcmask 523264  }
 0x65d   :  { %v5083_v30 = vsub.f32 %v10668_v46, %v5079_v14  ;;  %v2998_v15 = vsel %vm11146_vm4, %v2997_v45, %v2993_v37  ;;  %v3103_v46 = vadd.f32 %v13184_v35, %v13183_v43  ;;  %vm3007_vm8 = vmor %vm3005_vm7, %vm3006_vm6  ;;  %v5095_v33 = vsub.f32 %v13185_v52, %v5079_v14  ;;  %v13192_v43 = vld [vmem:[#allocation29_spill] sm:$0xff] }
 0x65e   :  { %v3002_v11 = vsub.f32 1.0, %v3001_v0  ;;  %v3107_v50 = vmul.f32 %v3101_v9, %v2998_v15  ;;  %v5089_v3 = vmul.f32 1.442695, %v5084_v57  ;;  %v5096_v4 = vsub.f32 %v13186_v18, %v5080_v59  ;;  %v13187_v0 = vld [vmem:[#allocation63_spill] sm:$0xff]  ;;  %v13198_v18 = vld [vmem:[#allocation114_spill] sm:$0xff] }
 0x65f   :  { %v5087_v62 = vmul.f32 1.442695, %v5083_v30  ;;  %v5099_v54 = vmul.f32 1.442695, %v5095_v33  ;;  %v5327_v14 = vmul.f32 0.35355338, %v13187_v0  ;;  %v5348_v30 = vpop.f32.mrf.mxu3 }
 0x660   :  { %v3003_v48 = vmul.f32 %v7229_v34, %v3002_v11  ;;  %v3111_v12 = vadd.f32 %v3107_v50, %v11074_v53  ;;  %v5101_v23 = vmul.f32 1.442695, %v5096_v4  ;;  %v3260_v59 = vsel %vm362_vm5, %v13188_v32, 0.0  ;;  %v13189_v11 = vld [vmem:[#allocation103_spill] sm:$0xff] }
 0x661   :  { %v5221_v28 = vpop.permute.xlu0 %5220  ;;  %7230 = vpow2.f32 %v5087_v62  ;;  %v11181_v53 = vadd.f32 %v5327_v14, %v8459_v17  ;;  %v5326_v37 = vmul.f32 0.35355338, %v13189_v11  ;;  %v5354_v9 = vmul.f32 0.35355338, %v5348_v30  ;;  %v13195_v50 = vld [vmem:[#allocation115_spill] sm:$0xff]  ;;  %v13203_v30 = vld [vmem:[#allocation14_spill] sm:$0xff] }
 0x662   :  { %v5231_v19 = vsel %vm874_vm12, %v5221_v28, 0  ;;  %v3004_v51 = vadd.f32 %v7229_v34, %v3003_v48  ;;  %7232 = vpow2.f32 %v5089_v3  ;;  %v11198_v28 = vpop.f32.mrf.mxu0  ;;  %v3576_v35 = vsel %vm703_vm13, %v13192_v43, 0.0  ;;  %v13206_v43 = vld [vmem:[#allocation111_spill] sm:$0xff] }
 0x663   :  { %5238 = vmatpush.bf16.msra.mxu0 %v5231_v19  ;;  %7234 = vpow2.f32 %v5099_v54  ;;  %v5368_v17 = vsel %vm362_vm5, %v11181_v53, -inf  ;;  %v11196_v29 = vadd.f32 %v5326_v37, %v8420_v16  ;;  %v13190_v19 = vld [vmem:[#allocation71_spill] sm:$0xff]  ;;  %v13191_v16 = vld [vmem:[#allocation117_spill] sm:$0xff]  ;;  %v11212_v13 = vadd.f32 %v5354_v9, %v12942_v58 }
 0x664   :  { %v3008_v5 = vsel %vm3007_vm8, %v7229_v34, %v3004_v51  ;;  %v5377_v34 = vsel %vm703_vm13, %v11168_v25, -inf  ;;  %7236 = vpow2.f32 %v5101_v23  ;;  %v3561_v20 = vsel %vm362_vm5, %v13190_v19, 0.0  ;;  %v13200_v23 = vld [vmem:[#allocation34_spill] sm:$0xff] }
 0x665   :  { %v3013_v10 = vsel %vm3010_vm9, %v3012_v6, %v3008_v5  ;;  %v5365_v22 = vsel %vm362_vm5, %v11196_v29, -inf  ;;  %v3257_v15 = vsel %vm362_vm5, %v13191_v16, 0.0  ;;  %v3272_v62 = vsel %vm703_vm13, %v13193_v38, 0.0  ;;  %v13194_v5 = vld [vmem:[#allocation11_spill] sm:$0xff] }
 0x666   :  { %v3108_v56 = vmul.f32 %v3103_v46, %v3013_v10  ;;  %v5380_v46 = vsel %vm703_vm13, %v11212_v13, -inf  ;;  %v3877_v58 = vsel %vm703_vm13, %v13194_v5, 0.0  ;;  %v3269_v52 = vsel %vm703_vm13, %v13195_v50, 0.0  ;;  %v13196_v10 = vld [vmem:[#allocation28_spill] sm:$0xff]  ;;  %v13207_v5 = vld [vmem:[#allocation18_spill] sm:$0xff] }
 0x667   :  { %v11176_v41 = vpop.eup %7230  ;;  %v3573_v3 = vsel %vm703_vm13, %v13196_v10, 0.0  ;;  %v3564_v4 = vsel %vm362_vm5, %v13198_v18, 0.0  ;;  %v3263_v0 = vsel %vm362_vm5, %v13200_v23, 0.0  ;;  %v13209_v18 = vld [vmem:[#allocation24_spill] sm:$0xff]  ;;  %v13211_v23 = vld [vmem:[#allocation9_spill] sm:$0xff] }
 0x668   :  { %v3112_v26 = vadd.f32 %v3108_v56, %v2808_v24  ;;  %v11178_v31 = vpop.eup %7232  ;;  %v13197_v24 = vld [vmem:[#allocation15_spill] sm:$0xff] }
 0x669   :  { %v5217_v55 = vpop.permute.xlu0 %5216  ;;  %v5195_v49 = vpack.c.bf16 %v11178_v31, %v11176_v41  ;;  %v11188_v45 = vpop.eup %7234  ;;  %v4172_v56 = vsel %vm362_vm5, %v13197_v24, 0.0 }
 0x66a   :  { %v5604_v42 = vpack.c.bf16 %v3112_v26, %v3111_v12  ;;  %v11193_v7 = vpop.eup %7236  ;;  %v13199_v26 = vld [vmem:[#allocation108_spill] sm:$0xff] }
 0x66b   :  { %5378 = vmax.xlane.f32.xlu2 %v5377_v34  ;;  %v5203_v48 = vpack.c.bf16 %v11193_v7, %v11188_v45  ;;  %v3868_v54 = vsel %vm362_vm5, %v13199_v26, 0.0 }
 0x66c   :  { %6785 = vmatmul.msk.bf16.gmra.mxu2 %vm362_vm5, %v5604_v42 }
 0x671   :  { %v5255_v63 = vpop.permute.xlu0 %5254 }
 0x672   :  { %v5219_v8 = vpop.permute.xlu1 %5218  ;;  %5273 = vmatpush.bf16.msrb.mxu1 %v5255_v63  ;;  %v13201_v63 = vld [vmem:[#allocation64_spill] sm:$0xff] }
 0x673   :  { %5239 = vmatpush.bf16.msra.mxu0 %v5219_v8  ;;  %3261 = vadd.xlane.f32.xlu2 %v3260_v59  ;;  %v3865_v8 = vsel %vm362_vm5, %v13201_v63, 0.0 }
 0x674   :  { %v4971_v57 = vpop.f32.mrf.mxu1 }
 0x675   :  { %6764 = vmatmul.msk.bf16.vlgmr.msrb.gmra.mxu1 %vm362_vm5, %v5195_v49 }
 0x677   :  { %5240 = vmatpush.bf16.msra.mxu0 %v5217_v55  ;;  %5369 = vmax.xlane.f32.xlu0 %v5368_v17  ;;  %v13202_v17 = vld [vmem:[#allocation113_spill] sm:$0xff] }
 0x67a   :  { %6762 = vmatmul.msk.bf16.vlgmr.msra.gmra.mxu0 %vm703_vm13, %v5203_v48 }
 0x67b   :  { %3562 = vadd.xlane.f32.xlu2 %v3561_v20 }
 0x67d   :  { %5366 = vmax.xlane.f32.xlu1 %v5365_v22  ;;  %v13204_v22 = vld [vmem:[#allocation68_spill] sm:$0xff] }
 0x67e   :  { %v3278_v16 = vsel %vm703_vm13, %v13204_v22, 0.0 }
 0x67f   :  { %3258 = vadd.xlane.f32.xlu0 %v3257_v15  ;;  %v13205_v15 = vld [vmem:[#allocation35_spill] sm:$0xff] }
 0x680   :  { %v4938_v51 = vpop.f32.mrf.mxu0 }
 0x681   :  { %v11214_v40 = vadd.f32 %v4971_v57, %v4938_v51  ;;  %v3880_v57 = vsel %vm703_vm13, %v13205_v15, 0.0  ;;  %v13217_v15 = vld [vmem:[#allocation74_spill] sm:$0xff] }
 0x683   :  { %3577 = vadd.xlane.f32.xlu2 %v3576_v35 }
 0x685   :  { %5381 = vmax.xlane.f32.xlu1 %v5380_v46  ;;  %v5066_v6 = vpop.xlane.xlu2 %5065 }
 0x687   :  { %3273 = vadd.xlane.f32.xlu0 %v3272_v62 }
 0x68b   :  { %3878 = vadd.xlane.f32.xlu2 %v3877_v58  ;;  %v3579_v58 = vsel %vm703_vm13, %v13207_v5, 0.0 }
 0x68d   :  { %3270 = vadd.xlane.f32.xlu1 %v3269_v52  ;;  %v5078_v33 = vpop.xlane.xlu2 %5077  ;;  %v13208_v52 = vld [vmem:[#allocation36_spill] sm:$0xff] }
 0x68e   :  { %v5082_v12 = vmax.f32 %v5066_v6, %v5078_v33  ;;  %v4181_v33 = vsel %vm703_vm13, %v13208_v52, 0.0 }
 0x68f   :  { %3574 = vadd.xlane.f32.xlu0 %v3573_v3 }
 0x690   :  { %v5086_v34 = vsub.f32 %v10837_v60, %v5082_v12  ;;  %v5098_v42 = vsub.f32 %v10854_v44, %v5082_v12  ;;  %v4169_v60 = vsel %vm362_vm5, %v13202_v17, 0.0  ;;  %v11271_v12 = vpop.f32.mrf.mxu1 }
 0x692   :  { %v5093_v59 = vmul.f32 1.442695, %v5086_v34  ;;  %v5105_v48 = vmul.f32 1.442695, %v5098_v42  ;;  %v13210_v34 = vld [vmem:[#allocation85_spill] sm:$0xff] }
 0x693   :  { %4173 = vadd.xlane.f32.xlu2 %v4172_v56 }
 0x694   :  { %7238 = vpow2.f32 %v5093_v59 }
 0x695   :  { %3565 = vadd.xlane.f32.xlu1 %v3564_v4  ;;  %v5364_v55 = vpop.xlane.xlu2 %5363  ;;  %7240 = vpow2.f32 %v5105_v48  ;;  %v3275_v4 = vsel %vm703_vm13, %v13209_v18, 0.0  ;;  %v13215_v48 = vld [vmem:[#allocation47_spill] sm:$0xff] }
 0x697   :  { %3869 = vadd.xlane.f32.xlu0 %v3868_v54  ;;  %v11274_v54 = vpop.f32.mrf.mxu0 }
 0x69a   :  { %v11251_v35 = vpop.eup %7238 }
 0x69b   :  { %3264 = vadd.xlane.f32.xlu2 %v3263_v0  ;;  %v11253_v46 = vpop.eup %7240  ;;  %v3874_v0 = vsel %vm362_vm5, %v13211_v23, 0.0 }
 0x69c   :  { %v5075_v14 = vpop.xlane.xlu0 %5074 }
 0x69d   :  { %v5063_v49 = vpop.xlane.xlu1 %5062  ;;  %3866 = vadd.xlane.f32.xlu1 %v3865_v8  ;;  %v5525_v32 = vpop.permute.xlu2 %5524 }
 0x69e   :  { %v5081_v11 = vmax.f32 %v5063_v49, %v5075_v14  ;;  %v5535_v37 = vsel %vm874_vm12, %v5525_v32, 0  ;;  %v13213_v49 = vld [vmem:[#allocation20_spill] sm:$0xff] }
 0x69f   :  { %5542 = vmatpush.bf16.msrb.mxu0 %v5535_v37  ;;  %4170 = vadd.xlane.f32.xlu0 %v4169_v60  ;;  %v3570_v32 = vsel %vm362_vm5, %v13213_v49, 0.0  ;;  %v13214_v37 = vld [vmem:[#allocation23_spill] sm:$0xff] }
 0x6a0   :  { %v5085_v44 = vsub.f32 %v10878_v1, %v5081_v11  ;;  %v5097_v19 = vsub.f32 %v13203_v30, %v5081_v11  ;;  %v4184_v1 = vsel %vm703_vm13, %v13206_v43, 0.0 }
 0x6a2   :  { %v5091_v20 = vmul.f32 1.442695, %v5085_v44  ;;  %v5103_v9 = vmul.f32 1.442695, %v5097_v19  ;;  %v4175_v44 = vsel %vm362_vm5, %v13215_v48, 0.0  ;;  %v13216_v19 = vld [vmem:[#allocation72_spill] sm:$0xff] }
 0x6a3   :  { %3279 = vadd.xlane.f32.xlu2 %v3278_v16  ;;  %v5107_v48 = vsel %vm362_vm5, %v11176_v41, 0.0 }
 0x6a4   :  { %7242 = vpow2.f32 %v5091_v20  ;;  %v5373_v62 = vpop.xlane.xlu0 %5372  ;;  %v3567_v20 = vsel %vm362_vm5, %v13216_v19, 0.0  ;;  %v13228_v19 = vld [vmem:[#allocation105_spill] sm:$0xff] }
 0x6a5   :  { %7244 = vpow2.f32 %v5103_v9  ;;  %v5361_v51 = vpop.xlane.xlu1 %5360  ;;  %3881 = vadd.xlane.f32.xlu1 %v3880_v57  ;;  %v3871_v57 = vsel %vm362_vm5, %v13217_v15, 0.0  ;;  %v13229_v15 = vld [vmem:[#allocation32_spill] sm:$0xff] }
 0x6a6   :  { %v5383_v24 = vmax.f32 %v5361_v51, %v5373_v62 }
 0x6a7   :  { %4185 = vadd.xlane.f32.xlu0 %v4184_v1 }
 0x6a8   :  { %v5399_v42 = vsub.f32 %v13210_v34, %v5383_v24  ;;  %v5387_v30 = vsub.f32 %v10932_v47, %v5383_v24  ;;  %v13218_v47 = vld [vmem:[#allocation121_spill] sm:$0xff]  ;;  %v5559_v34 = vpop.permute.xlu2 %5558 }
 0x6a9   :  { %v4190_v5 = vsel %vm703_vm13, %v13218_v47, 0.0 }
 0x6aa   :  { %v11255_v6 = vpop.eup %7242  ;;  %v5403_v8 = vmul.f32 1.442695, %v5399_v42  ;;  %v5391_v1 = vmul.f32 1.442695, %v5387_v30 }
 0x6ab   :  { %v11257_v38 = vpop.eup %7244  ;;  %v5196_v50 = vpack.c.bf16 %v11251_v35, %v11255_v6  ;;  %3580 = vadd.xlane.f32.xlu2 %v3579_v58  ;;  %v13219_v58 = vld [vmem:[#allocation60_spill] sm:$0xff] }
 0x6ac   :  { %v5204_v10 = vpack.c.bf16 %v11253_v46, %v11257_v38 }
 0x6ad   :  { %v5376_v3 = vpop.xlane.xlu1 %5375  ;;  %4182 = vadd.xlane.f32.xlu1 %v4181_v33  ;;  %6765 = vmatmul.msk.bf16.gmra.mxu1 %vm362_vm5, %v5196_v50  ;;  %v3582_v50 = vsel %vm703_vm13, %v13219_v58, 0.0 }
 0x6ae   :  { %v5384_v56 = vmax.f32 %v5364_v55, %v5376_v3  ;;  %6763 = vmatmul.msk.bf16.gmra.mxu0 %vm703_vm13, %v5204_v10  ;;  %v13212_v55 = vld [vmem:[#allocation106_spill] sm:$0xff]  ;;  %v11304_v10 = vld [vmem:[%s12391_s6 + $0x2] ss:$0 sm:$0xff] }
 0x6af   :  { %3276 = vadd.xlane.f32.xlu0 %v3275_v4  ;;  %v3266_v63 = vsel %vm362_vm5, %v13212_v55, 0.0  ;;  %v13222_v55 = vld [vmem:[#allocation110_spill] sm:$0xff] }
 0x6b0   :  { %v5400_v26 = vsub.f32 %v10984_v2, %v5384_v56  ;;  %v5388_v17 = vsub.f32 %v13214_v37, %v5384_v56  ;;  %v13220_v56 = vld [vmem:[#allocation37_spill] sm:$0xff]  ;;  %v13226_v37 = vld [vmem:[#allocation50_spill] sm:$0xff] }
 0x6b1   :  { %v3886_v18 = vsel %vm703_vm13, %v13220_v56, 0.0 }
 0x6b2   :  { %v5405_v14 = vmul.f32 1.442695, %v5400_v26  ;;  %v5393_v16 = vmul.f32 1.442695, %v5388_v17  ;;  %v4502_v17 = vsel %vm362_vm5, %v13226_v37, 0.0 }
 0x6b3   :  { %3875 = vadd.xlane.f32.xlu2 %v3874_v0  ;;  %v13221_v0 = vld [vmem:[#allocation122_spill] sm:$0xff] }
 0x6b4   :  { %7246 = vpow2.f32 %v5405_v14  ;;  %v4511_v14 = vsel %vm703_vm13, %v13221_v0, 0.0  ;;  %v11360_v0 = vpop.f32.mrf.mxu3 }
 0x6b5   :  { %3267 = vadd.xlane.f32.xlu1 %v3266_v63  ;;  %7248 = vpow2.f32 %v5403_v8  ;;  %v3883_v63 = vsel %vm703_vm13, %v13222_v55, 0.0  ;;  %v13223_v8 = vld [vmem:[#allocation45_spill] sm:$0xff] }
 0x6b6   :  { %7250 = vpow2.f32 %v5393_v16  ;;  %v4187_v49 = vsel %vm703_vm13, %v13223_v8, 0.0  ;;  %v5122_v16 = vsel %vm703_vm13, %v11193_v7, 0.0  ;;  %v6906_v7 = vld [vmem:[%s12390_s5 + $0x68] sm:$0xff] }
 0x6b7   :  { %v5523_v59 = vpop.permute.xlu0 %5522  ;;  %3571 = vadd.xlane.f32.xlu0 %v3570_v32  ;;  %7252 = vpow2.f32 %v5391_v1  ;;  %v13224_v32 = vld [vmem:[#allocation67_spill] sm:$0xff] }
 0x6b8   :  { %v4976_v2 = vpop.f32.mrf.mxu1  ;;  %5543 = vmatpush.bf16.msrb.mxu0 %v5523_v59  ;;  %v4806_v59 = vsel %vm362_vm5, %v13224_v32, 0.0 }
 0x6b9   :  { %v4943_v11 = vpop.f32.mrf.mxu0 }
 0x6ba   :  { %v11284_v60 = vadd.f32 %v4976_v2, %v4943_v11  ;;  %v11291_v22 = vpop.eup %7246  ;;  %v13225_v2 = vld [vmem:[#allocation120_spill] sm:$0xff] }
 0x6bb   :  { %4176 = vadd.xlane.f32.xlu2 %v4175_v44  ;;  %v5666_v9 = vpop.f32.mrf.mxu2  ;;  %v7249_v43 = vpop.eup %7248  ;;  %v4178_v11 = vsel %vm362_vm5, %v13225_v2, 0.0  ;;  %v13227_v44 = vld [vmem:[#allocation58_spill] sm:$0xff] }
 0x6bc   :  { %v5507_v62 = vpack.c.bf16 %v11291_v22, %v7249_v43  ;;  %v5667_v3 = vadd.f32 %v11304_v10, %v5666_v9  ;;  %v7251_v4 = vpop.eup %7250  ;;  %v4499_v30 = vsel %vm362_vm5, %v13227_v44, 0.0  ;;  %v5423_v47 = vsel %vm703_vm13, %v7249_v43, 0.0  ;;  %v6905_v43 = vld [vmem:[%s12390_s5 + $0x60] sm:$0xff] }
 0x6bd   :  { %3568 = vadd.xlane.f32.xlu1 %v3567_v20  ;;  %v11310_v42 = vpop.eup %7252  ;;  %v4803_v20 = vsel %vm362_vm5, %v13228_v19, 0.0  ;;  %v5414_v55 = vsel %vm362_vm5, %v7251_v4, 0.0 }
 0x6be   :  { %v5499_v23 = vpack.c.bf16 %v7251_v4, %v11310_v42  ;;  %v5411_v44 = vsel %vm362_vm5, %v11310_v42, 0.0  ;;  %v4824_v42 = vsel %vm703_vm13, %v11000_v61, 0.0 }
 0x6bf   :  { %v5521_v51 = vpop.permute.xlu0 %5520  ;;  %3872 = vadd.xlane.f32.xlu0 %v3871_v57  ;;  %v4514_v57 = vsel %vm703_vm13, %v13229_v15, 0.0 }
 0x6c0   :  { %5544 = vmatpush.bf16.msrb.mxu0 %v5521_v51  ;;  %v13230_v51 = vld [vmem:[#allocation84_spill] sm:$0xff] }
 0x6c1   :  { %v4818_v41 = vsel %vm703_vm13, %v13230_v51, 0.0 }
 0x6c3   :  { %6770 = vmatmul.msk.bf16.vlgmr.msrb.gmra.mxu0 %vm703_vm13, %v5507_v62  ;;  %4191 = vadd.xlane.f32.xlu2 %v4190_v5  ;;  %v5668_v52 = vpop.f32.mrf.mxu2  ;;  %v13231_v5 = vld [vmem:[#allocation61_spill] sm:$0xff] }
 0x6c4   :  { %v5669_v24 = vadd.f32 %v11304_v10, %v5668_v52  ;;  %v4815_v58 = vsel %vm703_vm13, %v13231_v5, 0.0  ;;  %5882 = vmatpush.bf16.msra.mxu0 %v6906_v7  ;;  %v13234_v5 = vld [vmem:[#allocation82_spill] sm:$0xff] }
 0x6c5   :  { %v5561_v33 = vpop.permute.xlu1 %5560  ;;  %3583 = vadd.xlane.f32.xlu1 %v3582_v50  ;;  %v5119_v50 = vsel %vm703_vm13, %v11188_v45, 0.0  ;;  %v6904_v45 = vld [vmem:[%s12390_s5 + $0x58] sm:$0xff] }
 0x6c6   :  { %5576 = vmatpush.bf16.msra.mxu1 %v5561_v33  ;;  %v5702_v26 = vpack.c.bf16 %v5669_v24, %v5667_v3 }
 0x6c7   :  { %3887 = vadd.xlane.f32.xlu0 %v3886_v18  ;;  %v13232_v18 = vld [vmem:[#allocation79_spill] sm:$0xff] }
 0x6c8   :  { %6800 = vmatmul.msk.bf16.gmra.mxu3 %vm362_vm5, %v5702_v26  ;;  %5883 = vmatpush.bf16.msra.mxu0 %v6905_v43  ;;  %v4508_v26 = vsel %vm362_vm5, %v13232_v18, 0.0 }
 0x6ca   :  { %5577 = vmatpush.bf16.msra.mxu1 %v5559_v34  ;;  %v5110_v34 = vsel %vm362_vm5, %v11178_v31, 0.0  ;;  %v6903_v31 = vld [vmem:[%s12390_s5 + $0x50] sm:$0xff] }
 0x6cb   :  { %4512 = vadd.xlane.f32.xlu2 %v4511_v14 }
 0x6cc   :  { %5884 = vmatpush.bf16.msra.mxu0 %v6904_v45 }
 0x6cd   :  { %3884 = vadd.xlane.f32.xlu1 %v3883_v63  ;;  %6772 = vmatmul.msk.bf16.vlgmr.msra.gmra.mxu1 %vm362_vm5, %v5499_v23 }
 0x6cf   :  { %4188 = vadd.xlane.f32.xlu0 %v4187_v49 }
 0x6d0   :  { %5885 = vmatpush.bf16.msra.mxu0 %v6903_v31 }
 0x6d3   :  { %4807 = vadd.xlane.f32.xlu2 %v4806_v59 }
 0x6d5   :  { %4179 = vadd.xlane.f32.xlu1 %v4178_v11 }
 0x6d7   :  { %4503 = vadd.xlane.f32.xlu0 %v4502_v17  ;;  %v4809_v17 = vsel %vm362_vm5, %v10991_v27, 0.0 }
 0x6db   :  { %5108 = vadd.xlane.f32.xlu2 %v5107_v48 }
 0x6dd   :  { %4500 = vadd.xlane.f32.xlu1 %v4499_v30 }
 0x6de   :  { %v5379_v9 = vpop.xlane.xlu2 %5378 }
 0x6df   :  { %4804 = vadd.xlane.f32.xlu0 %v4803_v20  ;;  %v5757_v20 = vpop.f32.mrf.mxu3 }
 0x6e3   :  { %5123 = vadd.xlane.f32.xlu2 %v5122_v16 }
 0x6e5   :  { %4515 = vadd.xlane.f32.xlu1 %v4514_v57 }
 0x6e6   :  { %v11339_v1 = vpop.xlane.xlu2 %3261 }
 0x6e7   :  { %4819 = vadd.xlane.f32.xlu0 %v4818_v41  ;;  %v5426_v41 = vsel %vm703_vm13, %v11291_v22, 0.0 }
 0x6ea   :  { %v5370_v62 = vpop.xlane.xlu0 %5369 }
 0x6eb   :  { %5424 = vadd.xlane.f32.xlu2 %v5423_v47 }
 0x6ed   :  { %4816 = vadd.xlane.f32.xlu1 %v4815_v58  ;;  %v4520_v58 = vsel %vm703_vm13, %v13234_v5, 0.0  ;;  %v5116_v5 = vsel %vm362_vm5, %v11251_v35, 0.0 }
 0x6ee   :  { %v3563_v52 = vpop.xlane.xlu2 %3562 }
 0x6ef   :  { %5120 = vadd.xlane.f32.xlu0 %v5119_v50  ;;  %v5671_v3 = vpop.f32.mrf.mxu2 }
 0x6f0   :  { %v5367_v33 = vpop.xlane.xlu1 %5366 }
 0x6f1   :  { %v5385_v24 = vmax.f32 %v5367_v33, %v5379_v9 }
 0x6f2   :  { %v3259_v56 = vpop.xlane.xlu0 %3258 }
 0x6f3   :  { %4509 = vadd.xlane.f32.xlu2 %v4508_v26  ;;  %v5389_v23 = vsub.f32 %v11196_v29, %v5385_v24  ;;  %v5401_v14 = vsub.f32 %v11168_v25, %v5385_v24  ;;  %v5672_v29 = vadd.f32 %v11304_v10, %v5671_v3  ;;  %v5125_v26 = vsel %vm703_vm13, %v11257_v38, 0.0 }
 0x6f5   :  { %5111 = vadd.xlane.f32.xlu1 %v5110_v34  ;;  %v5395_v49 = vmul.f32 1.442695, %v5389_v23  ;;  %v5407_v2 = vmul.f32 1.442695, %v5401_v14  ;;  %v13235_v23 = vld [vmem:[#allocation12_spill] sm:$0xff] }
 0x6f6   :  { %v3578_v63 = vpop.xlane.xlu2 %3577  ;;  %v4517_v14 = vsel %vm703_vm13, %v13235_v23, 0.0 }
 0x6f7   :  { %5415 = vadd.xlane.f32.xlu0 %v5414_v55  ;;  %v5673_v32 = vpop.f32.mrf.mxu2  ;;  %7254 = vpow2.f32 %v5395_v49 }
 0x6f8   :  { %v5382_v8 = vpop.xlane.xlu1 %5381  ;;  %v5674_v11 = vadd.f32 %v11304_v10, %v5673_v32  ;;  %7256 = vpow2.f32 %v5407_v2  ;;  %v13233_v10 = vld [vmem:[#allocation73_spill] sm:$0xff] }
 0x6f9   :  { %v5386_v59 = vmax.f32 %v5370_v62, %v5382_v8 }
 0x6fa   :  { %v3274_v37 = vpop.xlane.xlu0 %3273  ;;  %v5703_v48 = vpack.c.bf16 %v5674_v11, %v5672_v29 }
 0x6fb   :  { %v5390_v25 = vsub.f32 %v11181_v53, %v5386_v59  ;;  %v5402_v4 = vsub.f32 %v11212_v13, %v5386_v59  ;;  %4810 = vadd.xlane.f32.xlu2 %v4809_v17  ;;  %v4505_v53 = vsel %vm362_vm5, %v13233_v10, 0.0  ;;  %v11412_v18 = vadd.f32 %v3274_v37, %v11339_v1 }
 0x6fc   :  { %6801 = vmatmul.msk.bf16.gmra.mxu3 %vm362_vm5, %v5703_v48  ;;  %v4821_v1 = vsel %vm703_vm13, %v10995_v21, 0.0  ;;  %v5113_v21 = vsel %vm362_vm5, %v11255_v6, 0.0 }
 0x6fd   :  { %v5397_v30 = vmul.f32 1.442695, %v5390_v25  ;;  %v5409_v19 = vmul.f32 1.442695, %v5402_v4  ;;  %5412 = vadd.xlane.f32.xlu1 %v5411_v44  ;;  %v11378_v15 = vpop.eup %7254  ;;  %vm3305_vm6 = vweird.f32 %v11412_v18 }
 0x6fe   :  { %v3879_v13 = vpop.xlane.xlu2 %3878  ;;  %v11382_v57 = vpop.eup %7256 }
 0x6ff   :  { %7258 = vpow2.f32 %v5397_v30  ;;  %4506 = vadd.xlane.f32.xlu0 %v4505_v53 }
 0x700   :  { %7260 = vpow2.f32 %v5409_v19  ;;  %v3271_v27 = vpop.xlane.xlu1 %3270 }
 0x701   :  { %v3281_v9 = vadd.f32 %v3271_v27, %v3259_v56  ;;  %v11409_v56 = vld [vmem:[%s12391_s6 + $0x3] ss:$0 sm:$0xff] }
 0x702   :  { %v3575_v16 = vpop.xlane.xlu0 %3574  ;;  %v5758_v55 = vadd.f32 %v11409_v56, %v5757_v20  ;;  %v5756_v59 = vadd.f32 %v11409_v56, %v11360_v0 }
 0x703   :  { %7262 = vrcp.f32 %v3281_v9  ;;  %v11384_v51 = vadd.f32 %v3575_v16, %v3563_v52  ;;  %4825 = vadd.xlane.f32.xlu2 %v4824_v42  ;;  %v11398_v52 = vpop.f32.mrf.mxu3  ;;  %v3294_v31 = vand.u32 2147483647, %v3281_v9  ;;  %v3296_v38 = vand.u32 2147483648, %v3281_v9 }
 0x704   :  { %vm3290_vm10 = vweird.f32 %v3281_v9  ;;  %v5796_v48 = vmax.f32 %v5758_v55, 0.0  ;;  %v13240_v55 = vld [vmem:[#allocation21_spill] sm:$0xff] }
 0x705   :  { %v7259_v62 = vpop.eup %7258  ;;  %5427 = vadd.xlane.f32.xlu1 %v5426_v41  ;;  %7264 = vrcp.f32 %v11384_v51  ;;  %v3600_v2 = vand.u32 2147483648, %v11384_v51  ;;  %v3598_v25 = vand.u32 2147483647, %v11384_v51  ;;  %vm3295_vm15 = vcmp.eq.f32.partialorder %v3294_v31, 8.507059e+37  ;;  %v13243_v31 = vld [vmem:[#allocation112_spill] sm:$0xff] }
 0x706   :  { %v11388_v47 = vpop.eup %7260  ;;  %v11393_v7 = vpop.xlane.xlu2 %4173  ;;  %v5500_v50 = vpack.c.bf16 %v7259_v62, %v11378_v15  ;;  %v3297_v30 = vor.u32 1.1754944e-38, %v3296_v38  ;;  %vm3594_vm0 = vweird.f32 %v11384_v51  ;;  %v5420_v53 = vsel %vm362_vm5, %v7259_v62, 0.0 }
 0x707   :  { %4521 = vadd.xlane.f32.xlu0 %v4520_v58  ;;  %v5508_v61 = vpack.c.bf16 %v11388_v47, %v11382_v57  ;;  %v3601_v27 = vor.u32 1.1754944e-38, %v3600_v2  ;;  %vm3599_vm2 = vcmp.eq.f32.partialorder %v3598_v25, 8.507059e+37  ;;  %v13245_v2 = vld [vmem:[#allocation52_spill] sm:$0xff]  ;;  %v3311_v25 = vand.u32 2147483648, %v11412_v18 }
 0x708   :  { %v3566_v22 = vpop.xlane.xlu1 %3565  ;;  %6773 = vmatmul.msk.bf16.gmra.mxu1 %vm362_vm5, %v5500_v50  ;;  %v13238_v50 = vld [vmem:[#allocation65_spill] sm:$0xff] }
 0x709   :  { %v7263_v33 = vpop.eup %7262  ;;  %v11400_v43 = vadd.f32 %v3578_v63, %v3566_v22  ;;  %6771 = vmatmul.msk.bf16.gmra.mxu0 %vm703_vm13, %v5508_v61  ;;  %v5761_v61 = vadd.f32 %v11409_v56, %v11398_v52 }
 0x70a   :  { %v3286_v3 = vmul.f32 %v7263_v33, %v3281_v9  ;;  %v11404_v24 = vpop.xlane.xlu0 %3869  ;;  %vm3291_vm12 = vweird.f32 %v7263_v33  ;;  %v4812_v9 = vsel %vm362_vm5, %v10988_v39, 0.0 }
 0x70b   :  { %v7265_v34 = vpop.eup %7264  ;;  %7266 = vrcp.f32 %v11400_v43  ;;  %5126 = vadd.xlane.f32.xlu2 %v5125_v26  ;;  %vm11429_vm11 = vmor %vm3290_vm10, %vm3291_vm12  ;;  %v5762_v44 = vpop.f32.mrf.mxu3  ;;  %vm3609_vm10 = vweird.f32 %v11400_v43 }
 0x70c   :  { %v3287_v45 = vsub.f32 1.0, %v3286_v3  ;;  %v3590_v63 = vmul.f32 %v7265_v34, %v11384_v51  ;;  %7268 = vrcp.f32 %v11412_v18  ;;  %vm3595_vm14 = vweird.f32 %v7265_v34 }
 0x70d   :  { %4518 = vadd.xlane.f32.xlu1 %v4517_v14  ;;  %vm3596_vm1 = vmor %vm3594_vm0, %vm3595_vm14  ;;  %v5763_v42 = vadd.f32 %v11409_v56, %v5762_v44 }
 0x70e   :  { %v3288_v8 = vmul.f32 %v7263_v33, %v3287_v45  ;;  %v3591_v49 = vsub.f32 1.0, %v3590_v63  ;;  %v11424_v32 = vpop.xlane.xlu2 %3264  ;;  %v13241_v63 = vld [vmem:[#allocation22_spill] sm:$0xff] }
 0x70f   :  { %4822 = vadd.xlane.f32.xlu0 %v4821_v1  ;;  %v5798_v23 = vmax.f32 %v5763_v42, 0.0  ;;  %v11471_v1 = vadd.f32 %v13241_v63, %v13240_v55  ;;  %v5432_v63 = vsel %vm703_vm13, %v11388_v47, 0.0 }
 0x710   :  { %v3289_v29 = vadd.f32 %v7263_v33, %v3288_v8  ;;  %v3867_v11 = vpop.xlane.xlu1 %3866  ;;  %v3592_v37 = vmul.f32 %v7265_v34, %v3591_v49  ;;  %v13242_v8 = vld [vmem:[#allocation46_spill] sm:$0xff] }
 0x711   :  { %v11434_v4 = vadd.f32 %v3879_v13, %v3867_v11  ;;  %v11436_v17 = vpop.eup %7266  ;;  %v5795_v13 = vmax.f32 %v5756_v59, 0.0  ;;  %v11475_v38 = vadd.f32 %v13243_v31, %v13242_v8 }
 0x712   :  { %v3293_v0 = vsel %vm11429_vm11, %v7263_v33, %v3289_v29  ;;  %v11440_v19 = vpop.xlane.xlu0 %4170  ;;  %v3593_v10 = vadd.f32 %v7265_v34, %v3592_v37  ;;  %v11448_v16 = vpop.eup %7268  ;;  %v3605_v51 = vmul.f32 %v11436_v17, %v11400_v43  ;;  %v13239_v33 = vld [vmem:[#allocation25_spill] sm:$0xff]  ;;  %v13244_v29 = vld [vmem:[#allocation91_spill] sm:$0xff]  ;;  %vm3610_vm8 = vweird.f32 %v11436_v17 }
 0x713   :  { %7270 = vrcp.f32 %v11434_v4  ;;  %v3298_v20 = vsel %vm3295_vm15, %v3297_v30, %v3293_v0  ;;  %5421 = vadd.xlane.f32.xlu2 %v5420_v53  ;;  %v5819_v58 = vpack.c.bf16 %v5796_v48, %v5795_v13  ;;  %v3301_v26 = vmul.f32 %v11448_v16, %v11412_v18  ;;  %vm11537_vm14 = vmor %vm3609_vm10, %vm3610_vm8 }
 0x714   :  { %v3597_v41 = vsel %vm3596_vm1, %v7265_v34, %v3593_v10  ;;  %v3435_v22 = vmul.f32 %v13238_v50, %v3298_v20  ;;  %v3606_v14 = vsub.f32 1.0, %v3605_v51  ;;  %v11480_v11 = vadd.f32 %v13245_v2, %v13244_v29 }
 0x715   :  { %4813 = vadd.xlane.f32.xlu1 %v4812_v9  ;;  %v3602_v62 = vsel %vm3599_vm2, %v3601_v27, %v3597_v41  ;;  %v3302_v37 = vsub.f32 1.0, %v3301_v26  ;;  %v5417_v10 = vsel %vm362_vm5, %v11378_v15, 0.0  ;;  %v5128_v53 = vsel %vm703_vm13, %v11253_v46, 0.0 }
 0x716   :  { %v11457_v39 = vpop.xlane.xlu2 %3279  ;;  %v3739_v3 = vmul.f32 %v13239_v33, %v3602_v62  ;;  %v3607_v30 = vmul.f32 %v11436_v17, %v3606_v14  ;;  %v3904_v6 = vand.u32 2147483648, %v11434_v4  ;;  %v3902_v20 = vand.u32 2147483647, %v11434_v4 }
 0x717   :  { %5117 = vadd.xlane.f32.xlu0 %v5116_v5  ;;  %v11505_v15 = vsel %vm703_vm13, %v11382_v57, 0.0  ;;  %v3303_v46 = vmul.f32 %v11448_v16, %v3302_v37  ;;  %v11508_v9 = vor.u32 1.1754944e-38, %v3311_v25  ;;  %vm3898_vm7 = vweird.f32 %v11434_v4 }
 0x718   :  { %v3882_v34 = vpop.xlane.xlu1 %3881  ;;  %v11467_v52 = vadd.f32 %v3739_v3, %v3435_v22  ;;  %v3608_v62 = vadd.f32 %v11436_v17, %v3607_v30  ;;  %v3615_v5 = vand.u32 2147483648, %v11400_v43  ;;  %vm3306_vm12 = vweird.f32 %v11448_v16 }
 0x719   :  { %v7271_v45 = vpop.eup %7270  ;;  %v11464_v35 = vadd.f32 %v3882_v34, %v11404_v24  ;;  %6822 = vmatmul.msk.bf16.vlgmr.msra.gmra.mxu0 %vm5853_vm3, %v5819_v58  ;;  %v5797_v24 = vmax.f32 %v5761_v61, 0.0  ;;  %v3905_v61 = vor.u32 1.1754944e-38, %v3904_v6  ;;  %v3613_v33 = vand.u32 2147483647, %v11400_v43  ;;  %vm11559_vm0 = vmor %vm3305_vm6, %vm3306_vm12 }
 0x71a   :  { %v3894_v49 = vmul.f32 %v7271_v45, %v11434_v4  ;;  %v4186_v59 = vpop.xlane.xlu0 %4185  ;;  %vm3899_vm4 = vweird.f32 %v7271_v45  ;;  %vm3903_vm11 = vcmp.eq.f32.partialorder %v3902_v20, 8.507059e+37  ;;  %v3612_v43 = vsel %vm11537_vm14, %v11436_v17, %v3608_v62 }
 0x71b   :  { %7272 = vrcp.f32 %v11464_v35  ;;  %v11487_v44 = vadd.f32 %v4186_v59, %v11393_v7  ;;  %v11489_v0 = vpack.c.bf16 %v5798_v23, %v5797_v24  ;;  %v3309_v7 = vand.u32 2147483647, %v11412_v18  ;;  %vm11517_vm9 = vmor %vm3898_vm7, %vm3899_vm4  ;;  %v13252_v59 = vld [vmem:[#allocation8_spill] sm:$0xff] }
 0x71c   :  { %v3895_v48 = vsub.f32 1.0, %v3894_v49  ;;  %v3616_v14 = vor.u32 1.1754944e-38, %v3615_v5  ;;  %vm3614_vm1 = vcmp.eq.f32.partialorder %v3613_v33, 8.507059e+37  ;;  %v3917_v31 = vand.u32 2147483647, %v11464_v35  ;;  %v13257_v33 = vld [vmem:[#allocation89_spill] sm:$0xff] }
 0x71d   :  { %5114 = vadd.xlane.f32.xlu1 %v5113_v21  ;;  %7274 = vrcp.f32 %v11487_v44  ;;  %vm3913_vm13 = vweird.f32 %v11464_v35  ;;  %vm3310_vm6 = vcmp.eq.f32.partialorder %v3309_v7, 8.507059e+37  ;;  %vm4217_vm8 = vweird.f32 %v11487_v44 }
 0x71e   :  { %v3896_v13 = vmul.f32 %v7271_v45, %v3895_v48  ;;  %v11501_v27 = vpop.xlane.xlu2 %3580  ;;  %v3617_v24 = vsel %vm3614_vm1, %v3616_v14, %v3612_v43  ;;  %vm3918_vm7 = vcmp.eq.f32.partialorder %v3917_v31, 8.507059e+37  ;;  %v13260_v43 = vld [vmem:[#allocation13_spill] sm:$0xff] }
 0x71f   :  { %5418 = vadd.xlane.f32.xlu0 %v5417_v10  ;;  %v4223_v10 = vand.u32 2147483648, %v11487_v44  ;;  %v3740_v7 = vmul.f32 %v11475_v38, %v3617_v24 }
 0x720   :  { %v3897_v42 = vadd.f32 %v7271_v45, %v3896_v13  ;;  %v4183_v41 = vpop.xlane.xlu1 %4182 }
 0x721   :  { %v11511_v51 = vpop.eup %7272  ;;  %v11522_v58 = vadd.f32 %v4183_v41, %v11440_v19  ;;  %v3304_v19 = vadd.f32 %v11448_v16, %v3303_v46  ;;  %v4224_v62 = vor.u32 1.1754944e-38, %v4223_v10 }
 0x722   :  { %v3901_v4 = vsel %vm11517_vm9, %v7271_v45, %v3897_v42  ;;  %v3909_v50 = vmul.f32 %v11511_v51, %v11464_v35  ;;  %v3277_v22 = vpop.xlane.xlu0 %3276  ;;  %vm3914_vm15 = vweird.f32 %v11511_v51 }
 0x723   :  { %7276 = vrcp.f32 %v11522_v58  ;;  %v11532_v3 = vpop.eup %7274  ;;  %v11542_v45 = vadd.f32 %v3277_v22, %v11424_v32  ;;  %v3906_v23 = vsel %vm3903_vm11, %v3905_v61, %v3901_v4  ;;  %v3919_v32 = vand.u32 2147483648, %v11464_v35  ;;  %vm11574_vm2 = vmor %vm3913_vm13, %vm3914_vm15 }
 0x724   :  { %v3910_v34 = vsub.f32 1.0, %v3909_v50  ;;  %v4213_v55 = vmul.f32 %v11532_v3, %v11487_v44  ;;  %v4043_v29 = vmul.f32 %v13252_v59, %v3906_v23  ;;  %v3308_v2 = vsel %vm11559_vm0, %v11448_v16, %v3304_v19  ;;  %v13258_v19 = vld [vmem:[#allocation116_spill] sm:$0xff]  ;;  %v13259_v23 = vld [vmem:[#allocation70_spill] sm:$0xff] }
 0x725   :  { %5129 = vadd.xlane.f32.xlu1 %v5128_v53  ;;  %7278 = vrcp.f32 %v11542_v45  ;;  %v3920_v13 = vor.u32 1.1754944e-38, %v3919_v32  ;;  %vm4218_vm4 = vweird.f32 %v11532_v3  ;;  %v4206_v18 = vand.u32 2147483647, %v11522_v58 }
 0x726   :  { %v3911_v8 = vmul.f32 %v11511_v51, %v3910_v34  ;;  %v4214_v47 = vsub.f32 1.0, %v4213_v55  ;;  %v11564_v49 = vpop.xlane.xlu2 %3875  ;;  %v4047_v16 = vadd.f32 %v4043_v29, %v11467_v52  ;;  %v3313_v52 = vsel %vm3310_vm6, %v11508_v9, %v3308_v2  ;;  %vm11599_vm9 = vmor %vm4217_vm8, %vm4218_vm4 }
 0x727   :  { %5433 = vadd.xlane.f32.xlu0 %v5432_v63  ;;  %v4208_v9 = vand.u32 2147483648, %v11522_v58  ;;  %v3436_v61 = vmul.f32 %v11471_v1, %v3313_v52  ;;  %vm4202_vm11 = vweird.f32 %v11522_v58  ;;  %v4340_v26 = vadd.f32 %v13258_v19, %v13257_v33 }
 0x728   :  { %v3912_v21 = vadd.f32 %v11511_v51, %v3911_v8  ;;  %v3268_v37 = vpop.xlane.xlu1 %3267  ;;  %v4215_v30 = vmul.f32 %v11532_v3, %v4214_v47  ;;  %v4338_v14 = vadd.f32 %v13260_v43, %v13259_v23  ;;  %vm4207_vm15 = vcmp.eq.f32.partialorder %v4206_v18, 8.507059e+37  ;;  %v13290_v23 = vld [vmem:[#allocation57_spill] sm:$0xff] }
 0x729   :  { %v7277_v25 = vpop.eup %7276  ;;  %v11581_v53 = vadd.f32 %v11457_v39, %v3268_v37  ;;  %6823 = vmatmul.msk.bf16.gmra.mxu0 %vm5853_vm3, %v11489_v0  ;;  %v4221_v0 = vand.u32 2147483647, %v11487_v44  ;;  %v3744_v34 = vadd.f32 %v3740_v7, %v3436_v61  ;;  %v4209_v55 = vor.u32 1.1754944e-38, %v4208_v9 }
 0x72a   :  { %v3916_v35 = vsel %vm11574_vm2, %v11511_v51, %v3912_v21  ;;  %v4198_v6 = vmul.f32 %v7277_v25, %v11522_v58  ;;  %v3572_v20 = vpop.xlane.xlu0 %3571  ;;  %v4216_v39 = vadd.f32 %v11532_v3, %v4215_v30  ;;  %vm4203_vm12 = vweird.f32 %v7277_v25 }
 0x72b   :  { %v11595_v46 = vpop.eup %7278  ;;  %v3921_v41 = vsel %vm3918_vm7, %v3920_v13, %v3916_v35  ;;  %7280 = vrcp.f32 %v11581_v53  ;;  %vm4222_vm10 = vcmp.eq.f32.partialorder %v4221_v0, 8.507059e+37  ;;  %vm4204_vm14 = vmor %vm4202_vm11, %vm4203_vm12  ;;  %v3324_v13 = vand.u32 2147483647, %v11542_v45 }
 0x72c   :  { %v4199_v42 = vsub.f32 1.0, %v4198_v6  ;;  %v4220_v44 = vsel %vm11599_vm9, %v11532_v3, %v4216_v39  ;;  %v3316_v57 = vmul.f32 %v11595_v46, %v11542_v45  ;;  %vm3321_vm0 = vweird.f32 %v11595_v46 }
 0x72d   :  { %5430 = vadd.xlane.f32.xlu1 %v11505_v15  ;;  %v4044_v15 = vmul.f32 %v11480_v11, %v3921_v41  ;;  %v4225_v22 = vsel %vm4222_vm10, %v4224_v62, %v4220_v44  ;;  %vm3320_vm1 = vweird.f32 %v11542_v45  ;;  %vm3325_vm4 = vcmp.eq.f32.partialorder %v3324_v13, 8.507059e+37 }
 0x72e   :  { %v4200_v5 = vmul.f32 %v7277_v25, %v4199_v42  ;;  %v11613_v4 = vpop.xlane.xlu2 %4176  ;;  %v3317_v8 = vsub.f32 1.0, %v3316_v57  ;;  %v4348_v32 = vmul.f32 %v4340_v26, %v4225_v22  ;;  %vm11642_vm13 = vmor %vm3320_vm1, %vm3321_vm0  ;;  %vm3335_vm12 = vweird.f32 %v11581_v53 }
 0x72f   :  { %v4048_v58 = vadd.f32 %v4044_v15, %v3744_v34  ;;  %v3339_v33 = vand.u32 2147483647, %v11581_v53 }
 0x730   :  { %v4201_v50 = vadd.f32 %v7277_v25, %v4200_v5  ;;  %v3569_v38 = vpop.xlane.xlu1 %3568 }
 0x731   :  { %v3587_v3 = vadd.f32 %v11501_v27, %v3569_v38  ;;  %v11623_v11 = vpop.eup %7280  ;;  %v3318_v27 = vmul.f32 %v11595_v46, %v3317_v8  ;;  %v4352_v2 = vadd.f32 %v4348_v32, %v4048_v58  ;;  %v13267_v32 = vld [vmem:[#allocation31_spill] sm:$0xff]  ;;  %vm3340_vm11 = vcmp.eq.f32.partialorder %v3339_v33, 8.507059e+37 }
 0x732   :  { %v3873_v1 = vpop.xlane.xlu0 %3872  ;;  %v4205_v63 = vsel %vm4204_vm14, %v7277_v25, %v4201_v50  ;;  %v3331_v47 = vmul.f32 %v11623_v11, %v11581_v53  ;;  %vm3336_vm7 = vweird.f32 %v11623_v11 }
 0x733   :  { %7282 = vrcp.f32 %v3587_v3  ;;  %v4210_v17 = vsel %vm4207_vm15, %v4209_v55, %v4205_v63  ;;  %v3319_v35 = vadd.f32 %v11595_v46, %v3318_v27  ;;  %v3628_v39 = vand.u32 2147483647, %v3587_v3  ;;  %vm11673_vm10 = vmor %vm3335_vm12, %vm3336_vm7  ;;  %v13270_v27 = vld [vmem:[#allocation26_spill] sm:$0xff] }
 0x734   :  { %v4347_v31 = vmul.f32 %v4338_v14, %v4210_v17  ;;  %v3332_v48 = vsub.f32 1.0, %v3331_v47  ;;  %v3630_v0 = vand.u32 2147483648, %v3587_v3  ;;  %vm3624_vm6 = vweird.f32 %v3587_v3  ;;  %v13266_v14 = vld [vmem:[#allocation30_spill] sm:$0xff]  ;;  %v13268_v17 = vld [vmem:[#allocation87_spill] sm:$0xff]  ;;  %v13269_v47 = vld [vmem:[#allocation81_spill] sm:$0xff] }
 0x735   :  { %v3323_v51 = vsel %vm11642_vm13, %v11595_v46, %v3319_v35  ;;  %vm3629_vm9 = vcmp.eq.f32.partialorder %v3628_v39, 8.507059e+37 }
 0x736   :  { %v11628_v59 = vpop.xlane.xlu2 %4191  ;;  %v4351_v29 = vadd.f32 %v4347_v31, %v4047_v16  ;;  %v3326_v16 = vand.u32 2147483648, %v11542_v45  ;;  %v3333_v42 = vmul.f32 %v11623_v11, %v3332_v48  ;;  %v3341_v45 = vand.u32 2147483648, %v11581_v53  ;;  %v13272_v48 = vld [vmem:[#allocation69_spill] sm:$0xff] }
 0x737   :  { %v3631_v9 = vor.u32 1.1754944e-38, %v3630_v0  ;;  %v11690_v31 = vadd.f32 %v13268_v17, %v13267_v32 }
 0x738   :  { %v3584_v24 = vpop.xlane.xlu1 %3583  ;;  %v5605_v25 = vpack.c.bf16 %v4352_v2, %v4351_v29  ;;  %v3334_v46 = vadd.f32 %v11623_v11, %v3333_v42  ;;  %v11694_v29 = vadd.f32 %v13270_v27, %v13269_v47  ;;  %v11696_v2 = vpop.f32.mrf.mxu0 }
 0x739   :  { %v7283_v21 = vpop.eup %7282  ;;  %v11630_v37 = vadd.f32 %v3584_v24, %v3572_v20 }
 0x73a   :  { %v3620_v30 = vmul.f32 %v7283_v21, %v3587_v3  ;;  %v3888_v10 = vpop.xlane.xlu0 %3887  ;;  %6786 = vmatmul.msk.bf16.gmra.mxu2 %vm362_vm5, %v5605_v25  ;;  %vm3625_vm2 = vweird.f32 %v7283_v21  ;;  %v13263_v3 = vld [vmem:[#allocation44_spill] sm:$0xff]  ;;  %v3338_v53 = vsel %vm11673_vm10, %v11623_v11, %v3334_v46  ;;  %v13271_v25 = vld [vmem:[#allocation109_spill] sm:$0xff] }
 0x73b   :  { %7284 = vrcp.f32 %v11630_v37  ;;  %v11639_v20 = vadd.f32 %v3888_v10, %v11564_v49  ;;  %v3327_v49 = vor.u32 1.1754944e-38, %v3326_v16  ;;  %vm3626_vm8 = vmor %vm3624_vm6, %vm3625_vm2  ;;  %v3643_v63 = vand.u32 2147483647, %v11630_v37  ;;  %v11705_v10 = vpop.f32.mrf.mxu1 }
 0x73c   :  { %v3621_v6 = vsub.f32 1.0, %v3620_v30  ;;  %v3645_v11 = vand.u32 2147483648, %v11630_v37  ;;  %v11703_v30 = vadd.f32 %v13272_v48, %v13271_v25  ;;  %vm3639_vm14 = vweird.f32 %v11630_v37 }
 0x73d   :  { %7286 = vrcp.f32 %v11639_v20  ;;  %v3328_v57 = vsel %vm3325_vm4, %v3327_v49, %v3323_v51  ;;  %v3947_v13 = vand.u32 2147483647, %v11639_v20  ;;  %v3949_v39 = vand.u32 2147483648, %v11639_v20 }
 0x73e   :  { %v3622_v41 = vmul.f32 %v7283_v21, %v3621_v6  ;;  %v11652_v18 = vpop.xlane.xlu2 %4512  ;;  %v3437_v55 = vmul.f32 %v13266_v14, %v3328_v57  ;;  %vm11724_vm0 = vcmp.eq.f32.partialorder %v3643_v63, 8.507059e+37  ;;  %v3646_v49 = vor.u32 1.1754944e-38, %v3645_v11 }
 0x73f   :  { %vm3943_vm1 = vweird.f32 %v11639_v20  ;;  %vm11733_vm2 = vcmp.eq.f32.partialorder %v3947_v13, 8.507059e+37 }
 0x740   :  { %v3623_v62 = vadd.f32 %v7283_v21, %v3622_v41  ;;  %v3885_v7 = vpop.xlane.xlu1 %3884 }
 0x741   :  { %v11654_v5 = vpop.eup %7284  ;;  %v11657_v44 = vadd.f32 %v3885_v7, %v3873_v1  ;;  %v3342_v1 = vor.u32 1.1754944e-38, %v3341_v45 }
 0x742   :  { %v3627_v61 = vsel %vm3626_vm8, %v7283_v21, %v3623_v62  ;;  %v3635_v15 = vmul.f32 %v11654_v5, %v11630_v37  ;;  %v4189_v50 = vpop.xlane.xlu0 %4188  ;;  %vm3640_vm15 = vweird.f32 %v11654_v5 }
 0x743   :  { %v3632_v38 = vsel %vm3629_vm9, %v3631_v9, %v3627_v61  ;;  %7288 = vrcp.f32 %v11657_v44  ;;  %v11664_v22 = vpop.eup %7286  ;;  %v11668_v26 = vadd.f32 %v4189_v50, %v11613_v4  ;;  %v11707_v35 = vsel %vm3340_vm11, %v3342_v1, %v3338_v53  ;;  %vm11740_vm4 = vmor %vm3639_vm14, %vm3640_vm15  ;;  %v11766_v1 = vpop.f32.mrf.mxu1 }
 0x744   :  { %v3636_v19 = vsub.f32 1.0, %v3635_v15  ;;  %v3741_v34 = vmul.f32 %v13263_v3, %v3632_v38  ;;  %v3939_v43 = vmul.f32 %v11664_v22, %v11639_v20  ;;  %v3932_v62 = vand.u32 2147483647, %v11657_v44 }
 0x745   :  { %7290 = vrcp.f32 %v11668_v26  ;;  %v3934_v7 = vand.u32 2147483648, %v11657_v44  ;;  %vm3944_vm13 = vweird.f32 %v11664_v22  ;;  %v3950_v50 = vor.u32 1.1754944e-38, %v3949_v39  ;;  %v13287_v39 = vld [vmem:[#allocation99_spill] sm:$0xff] }
 0x746   :  { %v3637_v4 = vmul.f32 %v11654_v5, %v3636_v19  ;;  %v3940_v8 = vsub.f32 1.0, %v3939_v43  ;;  %v11686_v58 = vadd.f32 %v3741_v34, %v3437_v55  ;;  %v11718_v52 = vpop.xlane.xlu2 %4807  ;;  %v4236_v3 = vand.u32 2147483647, %v11668_v26  ;;  %v11752_v34 = vpop.f32.mrf.mxu0  ;;  %vm11756_vm7 = vmor %vm3943_vm1, %vm3944_vm13 }
 0x747   :  { %v4238_v37 = vand.u32 2147483648, %v11668_v26  ;;  %vm3928_vm8 = vweird.f32 %v11657_v44  ;;  %vm11762_vm9 = vcmp.eq.f32.partialorder %v3932_v62, 8.507059e+37  ;;  %vm4232_vm10 = vweird.f32 %v11668_v26 }
 0x748   :  { %v4180_v24 = vpop.xlane.xlu1 %4179  ;;  %v3941_v6 = vmul.f32 %v11664_v22, %v3940_v8  ;;  %v3638_v41 = vadd.f32 %v11654_v5, %v3637_v4  ;;  %vm11785_vm14 = vcmp.eq.f32.partialorder %v4236_v3, 8.507059e+37 }
 0x749   :  { %v11699_v21 = vpop.eup %7288  ;;  %v11711_v16 = vadd.f32 %v11628_v59, %v4180_v24 }
 0x74a   :  { %v3924_v0 = vmul.f32 %v11699_v21, %v11657_v44  ;;  %v11720_v42 = vpop.xlane.xlu0 %4503  ;;  %v3942_v15 = vadd.f32 %v11664_v22, %v3941_v6  ;;  %vm3929_vm6 = vweird.f32 %v11699_v21  ;;  %v3642_v33 = vsel %vm11740_vm4, %v11654_v5, %v3638_v41 }
 0x74b   :  { %7292 = vrcp.f32 %v11711_v16  ;;  %v7291_v51 = vpop.eup %7290  ;;  %v5765_v46 = vpop.f32.mrf.mxu3  ;;  %v3935_v5 = vor.u32 1.1754944e-38, %v3934_v7  ;;  %vm11768_vm12 = vmor %vm3928_vm8, %vm3929_vm6  ;;  %v3647_v44 = vsel %vm11724_vm0, %v3646_v49, %v3642_v33  ;;  %v4253_v11 = vand.u32 2147483648, %v11711_v16 }
 0x74c   :  { %v3925_v45 = vsub.f32 1.0, %v3924_v0  ;;  %v4228_v57 = vmul.f32 %v7291_v51, %v11668_v26  ;;  %vm4233_vm11 = vweird.f32 %v7291_v51  ;;  %v3946_v8 = vsel %vm11756_vm7, %v11664_v22, %v3942_v15 }
 0x74d   :  { %vm4234_vm15 = vmor %vm4232_vm10, %vm4233_vm11  ;;  %v5766_v25 = vadd.f32 %v11409_v56, %v5765_v46  ;;  %v3742_v13 = vmul.f32 %v11694_v29, %v3647_v44  ;;  %v3951_v6 = vsel %vm11733_vm2, %v3950_v50, %v3946_v8  ;;  %v4251_v62 = vand.u32 2147483647, %v11711_v16 }
 0x74e   :  { %v3926_v38 = vmul.f32 %v11699_v21, %v3925_v45  ;;  %v4229_v19 = vsub.f32 1.0, %v4228_v57  ;;  %v5109_v22 = vpop.xlane.xlu2 %5108  ;;  %v3438_v7 = vmul.f32 %v11690_v31, %v11707_v35  ;;  %v13288_v57 = vld [vmem:[#allocation40_spill] sm:$0xff]  ;;  %vm4247_vm1 = vweird.f32 %v11711_v16 }
 0x74f   :  { %v4046_v50 = vmul.f32 %v11703_v30, %v3951_v6  ;;  %v4254_v31 = vor.u32 1.1754944e-38, %v4253_v11  ;;  %vm4252_vm2 = vcmp.eq.f32.partialorder %v4251_v62, 8.507059e+37 }
 0x750   :  { %v3927_v43 = vadd.f32 %v11699_v21, %v3926_v38  ;;  %v4501_v55 = vpop.xlane.xlu1 %4500  ;;  %v4230_v20 = vmul.f32 %v7291_v51, %v4229_v19  ;;  %v11810_v19 = vpop.f32.mrf.mxu0 }
 0x751   :  { %v7293_v53 = vpop.eup %7292  ;;  %v11774_v63 = vadd.f32 %v11652_v18, %v4501_v55  ;;  %v4239_v18 = vor.u32 1.1754944e-38, %v4238_v37  ;;  %v13289_v37 = vld [vmem:[#allocation88_spill] sm:$0xff] }
 0x752   :  { %v3931_v32 = vsel %vm11768_vm12, %v11699_v21, %v3927_v43  ;;  %v4243_v17 = vmul.f32 %v7293_v53, %v11711_v16  ;;  %v4805_v47 = vpop.xlane.xlu0 %4804  ;;  %v4231_v27 = vadd.f32 %v7291_v51, %v4230_v20  ;;  %vm4248_vm0 = vweird.f32 %v7293_v53  ;;  %v11814_v16 = vpop.f32.mrf.mxu1 }
 0x753   :  { %7294 = vrcp.f32 %v11774_v63  ;;  %v3936_v21 = vsel %vm11762_vm9, %v3935_v5, %v3931_v32  ;;  %v5767_v48 = vpop.f32.mrf.mxu3  ;;  %vm4249_vm13 = vmor %vm4247_vm1, %vm4248_vm0  ;;  %v4345_v43 = vadd.f32 %v13290_v23, %v13289_v37  ;;  %vm4532_vm6 = vweird.f32 %v11774_v63 }
 0x754   :  { %v4244_v24 = vsub.f32 1.0, %v4243_v17  ;;  %v4045_v0 = vmul.f32 %v13287_v39, %v3936_v21  ;;  %v4235_v41 = vsel %vm4234_vm15, %v7291_v51, %v4231_v27  ;;  %v5768_v49 = vadd.f32 %v11409_v56, %v5767_v48 }
 0x755   :  { %v4240_v45 = vsel %vm11785_vm14, %v4239_v18, %v4235_v41  ;;  %v5799_v51 = vmax.f32 %v5766_v25, 0.0  ;;  %v3746_v56 = vadd.f32 %v3742_v13, %v3438_v7  ;;  %v4538_v41 = vand.u32 2147483648, %v11774_v63 }
 0x756   :  { %v4245_v59 = vmul.f32 %v7293_v53, %v4244_v24  ;;  %v4049_v29 = vadd.f32 %v4045_v0, %v11686_v58  ;;  %v4349_v9 = vmul.f32 %v13288_v57, %v4240_v45  ;;  %v5800_v61 = vmax.f32 %v5768_v49, 0.0  ;;  %v5124_v20 = vpop.xlane.xlu2 %5123 }
 0x757   :  { %v4050_v55 = vadd.f32 %v4046_v50, %v3746_v56  ;;  %v4536_v45 = vand.u32 2147483647, %v11774_v63  ;;  %v4539_v56 = vor.u32 1.1754944e-38, %v4538_v41  ;;  %v11897_v41 = vadd.f32 %v11814_v16, %v11810_v19 }
 0x758   :  { %v4246_v46 = vadd.f32 %v7293_v53, %v4245_v59  ;;  %v4516_v15 = vpop.xlane.xlu1 %4515  ;;  %v4353_v38 = vadd.f32 %v4349_v9, %v4049_v29  ;;  %v5821_v35 = vpack.c.bf16 %v5800_v61, %v5799_v51  ;;  %v11826_v26 = vpop.f32.mrf.mxu0 }
 0x759   :  { %v11808_v33 = vpop.eup %7294  ;;  %v11820_v5 = vadd.f32 %v4516_v15, %v11720_v42  ;;  %vm4537_vm9 = vcmp.eq.f32.partialorder %v4536_v45, 8.507059e+37 }
 0x75a   :  { %v4820_v58 = vpop.xlane.xlu0 %4819  ;;  %v4250_v3 = vsel %vm4249_vm13, %v7293_v53, %v4246_v46  ;;  %6824 = vmatmul.msk.bf16.gmra.mxu0 %vm5853_vm3, %v5821_v35  ;;  %v4528_v30 = vmul.f32 %v11808_v33, %v11774_v63  ;;  %v11828_v11 = vpop.f32.mrf.mxu1  ;;  %vm4533_vm4 = vweird.f32 %v11808_v33 }
 0x75b   :  { %v4255_v14 = vsel %vm4252_vm2, %v4254_v31, %v4250_v3  ;;  %v11823_v53 = vadd.f32 %v4820_v58, %v11718_v52  ;;  %7296 = vrcp.f32 %v11820_v5  ;;  %vm11851_vm7 = vmor %vm4532_vm6, %vm4533_vm4  ;;  %vm4547_vm15 = vweird.f32 %v11820_v5 }
 0x75c   :  { %v4350_v4 = vmul.f32 %v4345_v43, %v4255_v14  ;;  %v4529_v32 = vsub.f32 1.0, %v4528_v30  ;;  %v4551_v45 = vand.u32 2147483647, %v11820_v5 }
 0x75d   :  { %vm4851_vm13 = vweird.f32 %v11823_v53 }
 0x75e   :  { %v4354_v44 = vadd.f32 %v4350_v4, %v4050_v55  ;;  %v4530_v42 = vmul.f32 %v11808_v33, %v4529_v32  ;;  %v5425_v25 = vpop.xlane.xlu2 %5424  ;;  %vm4552_vm2 = vcmp.eq.f32.partialorder %v4551_v45, 8.507059e+37 }
 0x760   :  { %v4817_v8 = vpop.xlane.xlu1 %4816  ;;  %v5606_v27 = vpack.c.bf16 %v4354_v44, %v4353_v38  ;;  %v4531_v48 = vadd.f32 %v11808_v33, %v4530_v42  ;;  %v11849_v59 = vpop.f32.mrf.mxu0 }
 0x761   :  { %v4827_v17 = vadd.f32 %v4817_v8, %v4805_v47  ;;  %v11835_v24 = vpop.eup %7296 }
 0x762   :  { %v5121_v18 = vpop.xlane.xlu0 %5120  ;;  %6787 = vmatmul.msk.bf16.gmra.mxu2 %vm362_vm5, %v5606_v27  ;;  %v4543_v39 = vmul.f32 %v11835_v24, %v11820_v5  ;;  %v11856_v7 = vpop.f32.mrf.mxu1  ;;  %v4535_v29 = vsel %vm11851_vm7, %v11808_v33, %v4531_v48  ;;  %vm4548_vm14 = vweird.f32 %v11835_v24 }
 0x763   :  { %7298 = vrcp.f32 %v4827_v17  ;;  %v11833_v52 = vadd.f32 %v5121_v18, %v5109_v22  ;;  %v4842_v9 = vand.u32 2147483648, %v4827_v17  ;;  %v4840_v61 = vand.u32 2147483647, %v4827_v17  ;;  %vm11905_vm0 = vmor %vm4547_vm15, %vm4548_vm14 }
 0x764   :  { %7300 = vrcp.f32 %v11823_v53  ;;  %v4544_v46 = vsub.f32 1.0, %v4543_v39  ;;  %vm4836_vm12 = vweird.f32 %v4827_v17  ;;  %v4540_v31 = vsel %vm4537_vm9, %v4539_v56, %v4535_v29 }
 0x765   :  { %7302 = vrcp.f32 %v11833_v52  ;;  %v4843_v33 = vor.u32 1.1754944e-38, %v4842_v9  ;;  %vm4841_vm11 = vcmp.eq.f32.partialorder %v4840_v61, 8.507059e+37  ;;  %v11889_v39 = vadd.f32 %v11271_v12, %v11274_v54 }
 0x766   :  { %v4545_v3 = vmul.f32 %v11835_v24, %v4544_v46  ;;  %v4510_v43 = vpop.xlane.xlu2 %4509  ;;  %v4855_v46 = vand.u32 2147483647, %v11823_v53  ;;  %v5146_v61 = vand.u32 2147483648, %v11833_v52 }
 0x768   :  { %v5112_v21 = vpop.xlane.xlu1 %5111  ;;  %v5546_v4 = vpop.f32.mrf.mxu0  ;;  %v4546_v18 = vadd.f32 %v11835_v24, %v4545_v3  ;;  %vm4856_vm7 = vcmp.eq.f32.partialorder %v4855_v46, 8.507059e+37 }
 0x769   :  { %v7299_v47 = vpop.eup %7298  ;;  %v11840_v13 = vadd.f32 %v5124_v20, %v5112_v21  ;;  %v13293_v20 = vld [vmem:[#allocation92_spill] sm:$0xff]  ;;  %v13294_v21 = vld [vmem:[#allocation33_spill] sm:$0xff] }
 0x76a   :  { %v11842_v6 = vpop.eup %7300  ;;  %v4832_v22 = vmul.f32 %v7299_v47, %v4827_v17  ;;  %v5416_v0 = vpop.xlane.xlu0 %5415  ;;  %vm4837_vm8 = vweird.f32 %v7299_v47  ;;  %v4677_v44 = vmul.f32 %v13293_v20, %v4540_v31  ;;  %v4553_v17 = vand.u32 2147483648, %v11820_v5 }
 0x76b   :  { %7304 = vrcp.f32 %v11840_v13  ;;  %v4847_v57 = vmul.f32 %v11842_v6, %v11823_v53  ;;  %v11863_v15 = vpop.eup %7302  ;;  %vm4838_vm10 = vmor %vm4836_vm12, %vm4837_vm8  ;;  %v5579_v32 = vpop.f32.mrf.mxu1  ;;  %vm4852_vm1 = vweird.f32 %v11842_v6  ;;  %v4550_v19 = vsel %vm11905_vm0, %v11835_v24, %v4546_v18 }
 0x76c   :  { %v4833_v62 = vsub.f32 1.0, %v4832_v22  ;;  %v5136_v23 = vmul.f32 %v11863_v15, %v11833_v52  ;;  %v11899_v49 = vadd.f32 %v5579_v32, %v5546_v4  ;;  %v4554_v16 = vor.u32 1.1754944e-38, %v4553_v17  ;;  %vm11924_vm4 = vmor %vm4851_vm13, %vm4852_vm1 }
 0x76d   :  { %v4848_v35 = vsub.f32 1.0, %v4847_v57  ;;  %v5144_v24 = vand.u32 2147483647, %v11833_v52  ;;  %vm5141_vm6 = vweird.f32 %v11863_v15  ;;  %vm5140_vm8 = vweird.f32 %v11833_v52 }
 0x76e   :  { %v4834_v51 = vmul.f32 %v7299_v47, %v4833_v62  ;;  %v5137_v42 = vsub.f32 1.0, %v5136_v23  ;;  %v4811_v56 = vpop.xlane.xlu2 %4810  ;;  %v5147_v4 = vor.u32 1.1754944e-38, %v5146_v61 }
 0x76f   :  { %v4849_v27 = vmul.f32 %v11842_v6, %v4848_v35  ;;  %v5159_v35 = vand.u32 2147483647, %v11840_v13  ;;  %vm11942_vm12 = vcmp.eq.f32.partialorder %v5144_v24, 8.507059e+37 }
 0x770   :  { %v4835_v63 = vadd.f32 %v7299_v47, %v4834_v51  ;;  %v5413_v50 = vpop.xlane.xlu1 %5412  ;;  %v5138_v5 = vmul.f32 %v11863_v15, %v5137_v42 }
 0x771   :  { %v11865_v38 = vpop.eup %7304  ;;  %v11867_v58 = vadd.f32 %v5425_v25, %v5413_v50  ;;  %v4850_v54 = vadd.f32 %v11842_v6, %v4849_v27  ;;  %v4555_v50 = vsel %vm4552_vm2, %v4554_v16, %v4550_v19  ;;  %vm11957_vm14 = vcmp.eq.f32.partialorder %v5159_v35, 8.507059e+37 }
 0x772   :  { %v4839_v37 = vsel %vm4838_vm10, %v7299_v47, %v4835_v63  ;;  %v11872_v14 = vpop.xlane.xlu0 %4506  ;;  %v5151_v55 = vmul.f32 %v11865_v38, %v11840_v13  ;;  %v13295_v47 = vld [vmem:[#allocation66_spill] sm:$0xff]  ;;  %v5139_v3 = vadd.f32 %v11863_v15, %v5138_v5  ;;  %vm5156_vm9 = vweird.f32 %v11865_v38  ;;  %vm11952_vm10 = vmor %vm5140_vm8, %vm5141_vm6 }
 0x773   :  { %v4844_v30 = vsel %vm4841_vm11, %v4843_v33, %v4839_v37  ;;  %7306 = vrcp.f32 %v11867_v58  ;;  %v4670_v48 = vadd.f32 %v13295_v47, %v13294_v21  ;;  %v5548_v33 = vpop.f32.mrf.mxu0  ;;  %v5161_v37 = vand.u32 2147483648, %v11840_v13  ;;  %v5581_v45 = vpop.f32.mrf.mxu1 }
 0x774   :  { %v4981_v8 = vmul.f32 %v11214_v40, %v4844_v30  ;;  %v11893_v40 = vadd.f32 %v11766_v1, %v11752_v34  ;;  %v5152_v22 = vsub.f32 1.0, %v5151_v55  ;;  %v4857_v34 = vand.u32 2147483648, %v11823_v53 }
 0x775   :  { %v4854_v53 = vsel %vm11924_vm4, %v11842_v6, %v4850_v54  ;;  %vm5155_vm11 = vweird.f32 %v11840_v13  ;;  %v4678_v18 = vmul.f32 %v4670_v48, %v4555_v50  ;;  %v5143_v42 = vsel %vm11952_vm10, %v11863_v15, %v5139_v3 }
 0x776   :  { %v11883_v25 = vadd.f32 %v4981_v8, %v4677_v44  ;;  %v5153_v51 = vmul.f32 %v11865_v38, %v5152_v22  ;;  %v4858_v31 = vor.u32 1.1754944e-38, %v4857_v34  ;;  %vm11969_vm15 = vmor %vm5155_vm11, %vm5156_vm9  ;;  %v5162_v13 = vor.u32 1.1754944e-38, %v5161_v37  ;;  %v6907_v34 = vld [vmem:[%s12390_s5 + $0x70] sm:$0xff]  ;;  %v4826_v16 = vpop.xlane.xlu2 %4825 }
 0x777   :  { %v5448_v15 = vand.u32 2147483647, %v11867_v58  ;;  %vm5444_vm1 = vweird.f32 %v11867_v58  ;;  %v5582_v46 = vadd.f32 %v5581_v45, %v5548_v33 }
 0x778   :  { %v5428_v62 = vpop.xlane.xlu1 %5427  ;;  %v5154_v30 = vadd.f32 %v11865_v38, %v5153_v51  ;;  %v4859_v6 = vsel %vm4856_vm7, %v4858_v31, %v4854_v53 }
 0x779   :  { %v11903_v29 = vpop.eup %7306  ;;  %v11912_v1 = vadd.f32 %v5428_v62, %v5416_v0  ;;  %v4982_v48 = vmul.f32 %v11889_v39, %v4859_v6  ;;  %v5148_v39 = vsel %vm11942_vm12, %v5147_v4, %v5143_v42  ;;  %v12011_v0 = vld [vmem:[%s12391_s6 + $0x3] ss:$0 sm:$0xff]  ;;  %vm12016_vm4 = vcmp.eq.f32.partialorder %v5448_v15, 8.507059e+37 }
 0x77a   :  { %v5440_v57 = vmul.f32 %v11903_v29, %v11867_v58  ;;  %v4522_v9 = vpop.xlane.xlu0 %4521  ;;  %vm5445_vm0 = vweird.f32 %v11903_v29  ;;  %v5285_v6 = vmul.f32 %v11893_v40, %v5148_v39 }
 0x77b   :  { %7308 = vrcp.f32 %v11912_v1  ;;  %v11937_v23 = vadd.f32 %v4522_v9, %v4510_v43  ;;  %v6908_v43 = vld [vmem:[%s12390_s5 + $0x78] sm:$0xff]  ;;  %v5465_v19 = vand.u32 2147483648, %v11912_v1  ;;  %vm12003_vm2 = vmor %vm5444_vm1, %vm5445_vm0  ;;  %v5463_v51 = vand.u32 2147483647, %v11912_v1 }
 0x77c   :  { %v5441_v63 = vsub.f32 1.0, %v5440_v57  ;;  %5997 = vmatpush.bf16.msrb.mxu1 %v6908_v43  ;;  %v4986_v61 = vadd.f32 %v4982_v48, %v4678_v18  ;;  %vm5459_vm6 = vweird.f32 %v11912_v1 }
 0x77d   :  { %7310 = vrcp.f32 %v11937_v23  ;;  %v5466_v55 = vor.u32 1.1754944e-38, %v5465_v19  ;;  %vm5464_vm8 = vcmp.eq.f32.partialorder %v5463_v51, 8.507059e+37 }
 0x77e   :  { %v5442_v20 = vmul.f32 %v11903_v29, %v5441_v63 }
 0x77f   :  { %v5770_v17 = vpop.f32.mrf.mxu3 }
 0x780   :  { %v4519_v44 = vpop.xlane.xlu1 %4518  ;;  %v5443_v62 = vadd.f32 %v11903_v29, %v5442_v20  ;;  %5998 = vmatpush.bf16.msrb.mxu1 %v6907_v34  ;;  %v5771_v24 = vadd.f32 %v12011_v0, %v5770_v17  ;;  %v5127_v34 = vpop.xlane.xlu2 %5126 }
 0x781   :  { %v11950_v8 = vpop.eup %7308  ;;  %v11962_v27 = vadd.f32 %v4519_v44, %v11872_v14  ;;  %v5158_v14 = vsel %vm11969_vm15, %v11865_v38, %v5154_v30  ;;  %v5450_v38 = vand.u32 2147483648, %v11867_v58 }
 0x782   :  { %v5455_v47 = vmul.f32 %v11950_v8, %v11912_v1  ;;  %v4823_v22 = vpop.xlane.xlu0 %4822  ;;  %vm5460_vm13 = vweird.f32 %v11950_v8  ;;  %v5163_v9 = vsel %vm11957_vm14, %v5162_v13, %v5158_v14  ;;  %v5447_v31 = vsel %vm12003_vm2, %v11903_v29, %v5443_v62 }
 0x783   :  { %7312 = vrcp.f32 %v11962_v27  ;;  %v11984_v54 = vadd.f32 %v4823_v22, %v4811_v56  ;;  %v12014_v56 = vpop.eup %7310  ;;  %v5451_v33 = vor.u32 1.1754944e-38, %v5450_v38  ;;  %vm12027_vm7 = vmor %vm5459_vm6, %vm5460_vm13  ;;  %v5286_v1 = vmul.f32 %v11897_v41, %v5163_v9 }
 0x784   :  { %v5456_v12 = vsub.f32 1.0, %v5455_v47  ;;  %v4573_v43 = vmul.f32 %v12014_v56, %v11937_v23  ;;  %v5801_v52 = vmax.f32 %v5771_v24, 0.0  ;;  %v4568_v42 = vand.u32 2147483648, %v11962_v27 }
 0x785   :  { %7314 = vrcp.f32 %v11984_v54  ;;  %v5452_v40 = vsel %vm12016_vm4, %v5451_v33, %v5447_v31  ;;  %v5290_v13 = vadd.f32 %v5286_v1, %v4986_v61  ;;  %vm4562_vm12 = vweird.f32 %v11962_v27 }
 0x786   :  { %v5457_v5 = vmul.f32 %v11950_v8, %v5456_v12  ;;  %v11997_v57 = vpop.f32.mrf.mxu0  ;;  %v5589_v15 = vmul.f32 %v11899_v49, %v5452_v40  ;;  %v4566_v48 = vand.u32 2147483647, %v11962_v27  ;;  %v4574_v12 = vsub.f32 1.0, %v4573_v43 }
 0x787   :  { %v5772_v37 = vpop.f32.mrf.mxu3  ;;  %v4870_v19 = vand.u32 2147483647, %v11984_v54  ;;  %vm4866_vm15 = vweird.f32 %v11984_v54  ;;  %vm4578_vm13 = vweird.f32 %v12014_v56  ;;  %vm4577_vm2 = vweird.f32 %v11937_v23 }
 0x788   :  { %v5458_v50 = vadd.f32 %v11950_v8, %v5457_v5  ;;  %v4814_v53 = vpop.xlane.xlu1 %4813  ;;  %v5773_v29 = vadd.f32 %v12011_v0, %v5772_v37  ;;  %vm4567_vm14 = vcmp.eq.f32.partialorder %v4566_v48, 8.507059e+37  ;;  %v13314_v37 = vld [vmem:[#allocation104_spill] sm:$0xff]  ;;  %vm4579_vm4 = vmor %vm4577_vm2, %vm4578_vm13 }
 0x789   :  { %v7313_v35 = vpop.eup %7312  ;;  %v12031_v30 = vadd.f32 %v4826_v16, %v4814_v53  ;;  %v4575_v53 = vmul.f32 %v12014_v56, %v4574_v12  ;;  %vm4871_vm1 = vcmp.eq.f32.partialorder %v4870_v19, 8.507059e+37  ;;  %v12118_v19 = vpop.f32.mrf.mxu1 }
 0x78a   :  { %v4558_v4 = vmul.f32 %v7313_v35, %v11962_v27  ;;  %v12037_v20 = vpop.xlane.xlu0 %5117  ;;  %v5462_v44 = vsel %vm12027_vm7, %v11950_v8, %v5458_v50  ;;  %v5802_v17 = vmax.f32 %v5773_v29, 0.0  ;;  %v5289_v8 = vadd.f32 %v5285_v6, %v11883_v25 }
 0x78b   :  { %v7315_v41 = vpop.eup %7314  ;;  %7316 = vrcp.f32 %v12031_v30  ;;  %v5467_v18 = vsel %vm5464_vm8, %v5466_v55, %v5462_v44  ;;  %vm4563_vm9 = vweird.f32 %v7313_v35  ;;  %v4872_v25 = vand.u32 2147483648, %v11984_v54  ;;  %v12078_v44 = vld [vmem:[%s12391_s6 + $0x4] ss:$0 sm:$0xff] }
 0x78c   :  { %v4559_v32 = vsub.f32 1.0, %v4558_v4  ;;  %v4862_v21 = vmul.f32 %v7315_v41, %v11984_v54  ;;  %v5822_v22 = vpack.c.bf16 %v5802_v17, %v5801_v52  ;;  %v5590_v62 = vmul.f32 %v5582_v46, %v5467_v18  ;;  %vm4564_vm10 = vmor %vm4562_vm12, %vm4563_vm9  ;;  %v5422_v17 = vpop.xlane.xlu2 %5421 }
 0x78d   :  { %vm4867_vm11 = vweird.f32 %v7315_v41  ;;  %v4569_v46 = vor.u32 1.1754944e-38, %v4568_v42  ;;  %v5593_v58 = vadd.f32 %v5589_v15, %v5289_v8  ;;  %v4873_v63 = vor.u32 1.1754944e-38, %v4872_v25 }
 0x78e   :  { %v4560_v47 = vmul.f32 %v7313_v35, %v4559_v32  ;;  %v12050_v14 = vpop.f32.mrf.mxu0  ;;  %v4863_v45 = vsub.f32 1.0, %v4862_v21  ;;  %6825 = vmatmul.msk.bf16.gmra.mxu0 %vm5853_vm3, %v5822_v22  ;;  %v5594_v5 = vadd.f32 %v5590_v62, %v5290_v13  ;;  %vm4868_vm0 = vmor %vm4866_vm15, %vm4867_vm11  ;;  %v4576_v4 = vadd.f32 %v12014_v56, %v4575_v53 }
 0x78f   :  { %v4581_v32 = vand.u32 2147483647, %v11937_v23  ;;  %v12103_v22 = vadd.f32 %v11705_v10, %v11696_v2  ;;  %v4885_v48 = vand.u32 2147483647, %v12031_v30  ;;  %v12114_v2 = vadd.f32 %v11828_v11, %v11826_v26 }
 0x790   :  { %v4561_v38 = vadd.f32 %v7313_v35, %v4560_v47  ;;  %v5115_v39 = vpop.xlane.xlu1 %5114  ;;  %v4864_v16 = vmul.f32 %v7315_v41, %v4863_v45  ;;  %v5607_v50 = vpack.c.bf16 %v5594_v5, %v5593_v58  ;;  %v4580_v18 = vsel %vm4579_vm4, %v12014_v56, %v4576_v4 }
 0x791   :  { %v12059_v49 = vadd.f32 %v5127_v34, %v5115_v39  ;;  %v12061_v27 = vpop.eup %7316  ;;  %vm4582_vm6 = vcmp.eq.f32.partialorder %v4581_v32, 8.507059e+37  ;;  %v4887_v45 = vand.u32 2147483648, %v12031_v30  ;;  %v5283_v10 = vadd.f32 %v11856_v7, %v11849_v59  ;;  %v5586_v32 = vpop.f32.mrf.mxu1 }
 0x792   :  { %v4565_v9 = vsel %vm4564_vm10, %v7313_v35, %v4561_v38  ;;  %v5419_v51 = vpop.xlane.xlu0 %5418  ;;  %v4865_v24 = vadd.f32 %v7315_v41, %v4864_v16  ;;  %v4877_v35 = vmul.f32 %v12061_v27, %v12031_v30  ;;  %6788 = vmatmul.msk.bf16.gmra.mxu2 %vm362_vm5, %v5607_v50  ;;  %vm4882_vm7 = vweird.f32 %v12061_v27 }
 0x793   :  { %7318 = vrcp.f32 %v12059_v49  ;;  %v4570_v61 = vsel %vm4567_vm14, %v4569_v46, %v4565_v9  ;;  %vm4881_vm8 = vweird.f32 %v12031_v30  ;;  %v5174_v16 = vand.u32 2147483647, %v12059_v49 }
 0x794   :  { %v4869_v31 = vsel %vm4868_vm0, %v7315_v41, %v4865_v24  ;;  %v4679_v6 = vmul.f32 %v13314_v37, %v4570_v61  ;;  %v4878_v29 = vsub.f32 1.0, %v4877_v35  ;;  %vm12129_vm9 = vmor %vm4881_vm8, %vm4882_vm7  ;;  %vm12133_vm12 = vcmp.eq.f32.partialorder %v4885_v48, 8.507059e+37 }
 0x795   :  { %v4874_v33 = vsel %vm4871_vm1, %v4873_v63, %v4869_v31  ;;  %v4888_v59 = vor.u32 1.1754944e-38, %v4887_v45  ;;  %vm5170_vm14 = vweird.f32 %v12059_v49  ;;  %vm12148_vm15 = vcmp.eq.f32.partialorder %v5174_v16, 8.507059e+37 }
 0x796   :  { %v5887_v3 = vpop.f32.mrf.mxu0  ;;  %v4983_v54 = vmul.f32 %v11284_v60, %v4874_v33  ;;  %v4583_v60 = vand.u32 2147483648, %v11937_v23  ;;  %v4879_v42 = vmul.f32 %v12061_v27, %v4878_v29  ;;  %v4675_v23 = vadd.f32 %v11200_v36, %v11198_v28 }
 0x797   :  { %v5888_v21 = vadd.f32 %v12078_v44, %v5887_v3  ;;  %v5176_v53 = vand.u32 2147483648, %v12059_v49  ;;  %v5587_v48 = vadd.f32 %v5586_v32, %v12050_v14 }
 0x798   :  { %v5130_v1 = vpop.xlane.xlu1 %5129  ;;  %v12083_v52 = vadd.f32 %v4983_v54, %v4679_v6  ;;  %v4584_v8 = vor.u32 1.1754944e-38, %v4583_v60  ;;  %v4880_v34 = vadd.f32 %v12061_v27, %v4879_v42 }
 0x799   :  { %v12072_v55 = vpop.eup %7318  ;;  %v12081_v43 = vadd.f32 %v5130_v1, %v12037_v20  ;;  %v5927_v38 = vmax.f32 %v5888_v21, 0.0  ;;  %v5177_v60 = vor.u32 1.1754944e-38, %v5176_v53 }
 0x79a   :  { %v5166_v40 = vmul.f32 %v12072_v55, %v12059_v49  ;;  %v5434_v41 = vpop.xlane.xlu0 %5433  ;;  %v4585_v56 = vsel %vm4582_vm6, %v4584_v8, %v4580_v18  ;;  %v4884_v46 = vsel %vm12129_vm9, %v12061_v27, %v4880_v34  ;;  %vm5171_vm10 = vweird.f32 %v12072_v55 }
 0x79b   :  { %7320 = vrcp.f32 %v12081_v43  ;;  %v12093_v20 = vadd.f32 %v5434_v41, %v5422_v17  ;;  %v4680_v30 = vmul.f32 %v4675_v23, %v4585_v56  ;;  %v5191_v58 = vand.u32 2147483648, %v12081_v43  ;;  %vm12153_vm0 = vmor %vm5170_vm14, %vm5171_vm10 }
 0x79c   :  { %v5167_v13 = vsub.f32 1.0, %v5166_v40  ;;  %v5189_v63 = vand.u32 2147483647, %v12081_v43  ;;  %vm5185_vm1 = vweird.f32 %v12081_v43  ;;  %v4889_v54 = vsel %vm12133_vm12, %v4888_v59, %v4884_v46 }
 0x79d   :  { %7322 = vrcp.f32 %v12093_v20  ;;  %v5493_v3 = vand.u32 2147483647, %v12093_v20  ;;  %v5495_v37 = vand.u32 2147483648, %v12093_v20  ;;  %v5192_v1 = vor.u32 1.1754944e-38, %v5191_v58 }
 0x79e   :  { %v5889_v47 = vpop.f32.mrf.mxu0  ;;  %v5168_v25 = vmul.f32 %v12072_v55, %v5167_v13  ;;  %vm5190_vm4 = vcmp.eq.f32.partialorder %v5189_v63, 8.507059e+37  ;;  %vm5489_vm6 = vweird.f32 %v12093_v20  ;;  %v4984_v21 = vmul.f32 %v12103_v22, %v4889_v54 }
 0x79f   :  { %v5890_v15 = vadd.f32 %v12078_v44, %v5889_v47  ;;  %vm5494_vm8 = vcmp.eq.f32.partialorder %v5493_v3, 8.507059e+37  ;;  %v5496_v18 = vor.u32 1.1754944e-38, %v5495_v37  ;;  %vm6398_vm14 = vcmask 785408  }
 0x7a0   :  { %v5431_v62 = vpop.xlane.xlu1 %5430  ;;  %v5169_v24 = vadd.f32 %v12072_v55, %v5168_v25 }
 0x7a1   :  { %v7321_v12 = vpop.eup %7320  ;;  %v5928_v28 = vmax.f32 %v5890_v15, 0.0  ;;  %v12110_v36 = vadd.f32 %v5431_v62, %v5419_v51 }
 0x7a2   :  { %v5181_v39 = vmul.f32 %v7321_v12, %v12081_v43  ;;  %vm5186_vm11 = vweird.f32 %v7321_v12  ;;  %v5173_v49 = vsel %vm12153_vm0, %v12072_v55, %v5169_v24 }
 0x7a3   :  { %v12124_v5 = vpack.c.bf16 %v5928_v28, %v5927_v38  ;;  %7324 = vrcp.f32 %v12110_v36  ;;  %v7323_v9 = vpop.eup %7322  ;;  %vm5187_vm13 = vmor %vm5185_vm1, %vm5186_vm11  ;;  %v5480_v55 = vand.u32 2147483648, %v12110_v36  ;;  %v5178_v13 = vsel %vm12148_vm15, %v5177_v60, %v5173_v49 }
 0x7a4   :  { %v5182_v7 = vsub.f32 1.0, %v5181_v39  ;;  %v5485_v51 = vmul.f32 %v7323_v9, %v12093_v20  ;;  %vm5490_vm2 = vweird.f32 %v7323_v9  ;;  %v5478_v23 = vand.u32 2147483647, %v12110_v36 }
 0x7a5   :  { %6838 = vmatmul.msk.bf16.vlgmr.msrb.gmra.mxu1 %vm362_vm5, %v12124_v5  ;;  %vm12167_vm7 = vmor %vm5489_vm6, %vm5490_vm2  ;;  %vm5474_vm12 = vweird.f32 %v12110_v36  ;;  %v5287_v34 = vmul.f32 %v12114_v2, %v5178_v13  ;;  %v5585_v38 = vadd.f32 %v12118_v19, %v11997_v57  ;;  %v5481_v28 = vor.u32 1.1754944e-38, %v5480_v55 }
 0x7a6   :  { %v5183_v61 = vmul.f32 %v7321_v12, %v5182_v7  ;;  %v5892_v50 = vpop.f32.mrf.mxu0  ;;  %v5486_v31 = vsub.f32 1.0, %v5485_v51  ;;  %vm5479_vm11 = vcmp.eq.f32.partialorder %v5478_v23, 8.507059e+37 }
 0x7a7   :  { %v5893_v8 = vadd.f32 %v12078_v44, %v5892_v50  ;;  %v5291_v11 = vadd.f32 %v5287_v34, %v12083_v52 }
 0x7a8   :  { %v5184_v33 = vadd.f32 %v7321_v12, %v5183_v61  ;;  %v5487_v4 = vmul.f32 %v7323_v9, %v5486_v31 }
 0x7a9   :  { %v7325_v6 = vpop.eup %7324  ;;  %v5929_v25 = vmax.f32 %v5893_v8, 0.0 }
 0x7aa   :  { %v5188_v29 = vsel %vm5187_vm13, %v7321_v12, %v5184_v33  ;;  %v5470_v43 = vmul.f32 %v7325_v6, %v12110_v36  ;;  %v5488_v40 = vadd.f32 %v7323_v9, %v5487_v4  ;;  %vm5475_vm9 = vweird.f32 %v7325_v6 }
 0x7ab   :  { %v5193_v41 = vsel %vm5190_vm4, %v5192_v1, %v5188_v29  ;;  %v4988_v12 = vadd.f32 %v4984_v21, %v4680_v30  ;;  %vm5476_vm10 = vmor %vm5474_vm12, %vm5475_vm9  ;;  %v7329_v30 = vld [vmem:[%s12391_s6 + $0x2] ss:$0 sm:$0xff] }
 0x7ac   :  { %v5471_v42 = vsub.f32 1.0, %v5470_v43  ;;  %v5492_v20 = vsel %vm12167_vm7, %v7323_v9, %v5488_v40  ;;  %v5288_v56 = vmul.f32 %v5283_v10, %v5193_v41 }
 0x7ad   :  { %v5497_v45 = vsel %vm5494_vm8, %v5496_v18, %v5492_v20 }
 0x7ae   :  { %v5472_v47 = vmul.f32 %v7325_v6, %v5471_v42  ;;  %v5894_v15 = vpop.f32.mrf.mxu0  ;;  %v5292_v10 = vadd.f32 %v5288_v56, %v4988_v12  ;;  %v5592_v14 = vmul.f32 %v5587_v48, %v5497_v45 }
 0x7af   :  { %v5895_v22 = vadd.f32 %v12078_v44, %v5894_v15 }
 0x7b0   :  { %v5473_v62 = vadd.f32 %v7325_v6, %v5472_v47  ;;  %v5596_v59 = vadd.f32 %v5592_v14, %v5292_v10 }
 0x7b1   :  { %v5930_v39 = vmax.f32 %v5895_v22, 0.0 }
 0x7b2   :  { %v5477_v16 = vsel %vm5476_vm10, %v7325_v6, %v5473_v62 }
 0x7b3   :  { %v12185_v9 = vpack.c.bf16 %v5930_v39, %v5929_v25  ;;  %v5482_v26 = vsel %vm5479_vm11, %v5481_v28, %v5477_v16 }
 0x7b4   :  { %v5591_v36 = vmul.f32 %v5585_v38, %v5482_v26 }
 0x7b5   :  { %6839 = vmatmul.msk.bf16.gmra.mxu1 %vm362_vm5, %v12185_v9 }
 0x7b6   :  { %v5595_v2 = vadd.f32 %v5591_v36, %v5291_v11 }
 0x7b8   :  { %v5608_v57 = vpack.c.bf16 %v5596_v59, %v5595_v2 }
 0x7ba   :  { %6789 = vmatmul.msk.bf16.gmra.mxu2 %vm362_vm5, %v5608_v57 }
 0x7bd   :  { %v5676_v19 = vpop.f32.mrf.mxu2 }
 0x7be   :  { %v5677_v46 = vadd.f32 %v7329_v30, %v5676_v19 }
 0x7c5   :  { %v5678_v7 = vpop.f32.mrf.mxu2 }
 0x7c6   :  { %v5679_v58 = vadd.f32 %v7329_v30, %v5678_v7 }
 0x7c8   :  { %v5704_v51 = vpack.c.bf16 %v5679_v58, %v5677_v46 }
 0x7ca   :  { %6802 = vmatmul.msk.bf16.gmra.mxu3 %vm362_vm5, %v5704_v51 }
 0x7d7   :  { %v5897_v52 = vpop.f32.mrf.mxu0 }
 0x7d8   :  { %v5898_v24 = vadd.f32 %v12078_v44, %v5897_v52 }
 0x7da   :  { %v5931_v50 = vmax.f32 %v5898_v24, 0.0 }
 0x7df   :  { %v5899_v61 = vpop.f32.mrf.mxu0 }
 0x7e0   :  { %v5900_v63 = vadd.f32 %v12078_v44, %v5899_v61 }
 0x7e2   :  { %v5932_v27 = vmax.f32 %v5900_v63, 0.0 }
 0x7e4   :  { %v12197_v53 = vpack.c.bf16 %v5932_v27, %v5931_v50 }
 0x7e5   :  { %v5681_v31 = vpop.f32.mrf.mxu2 }
 0x7e6   :  { %6840 = vmatmul.msk.bf16.gmra.mxu1 %vm362_vm5, %v12197_v53  ;;  %v5682_v33 = vadd.f32 %v7329_v30, %v5681_v31 }
 0x7ed   :  { %v5683_v35 = vpop.f32.mrf.mxu2 }
 0x7ee   :  { %v5684_v3 = vadd.f32 %v7329_v30, %v5683_v35 }
 0x7f0   :  { %v5705_v37 = vpack.c.bf16 %v5684_v3, %v5682_v33 }
 0x7f2   :  { %6803 = vmatmul.msk.bf16.gmra.mxu3 %vm362_vm5, %v5705_v37 }
 0x80b   :  { %v5902_v6 = vpop.f32.mrf.mxu0 }
 0x80c   :  { %v5903_v54 = vadd.f32 %v12078_v44, %v5902_v6 }
 0x80e   :  { %v5933_v49 = vmax.f32 %v5903_v54, 0.0 }
 0x813   :  { %v5904_v1 = vpop.f32.mrf.mxu0 }
 0x814   :  { %v5905_v4 = vadd.f32 %v12078_v44, %v5904_v1 }
 0x815   :  { %v5686_v43 = vpop.f32.mrf.mxu2 }
 0x816   :  { %v5934_v29 = vmax.f32 %v5905_v4, 0.0  ;;  %v5687_v41 = vadd.f32 %v7329_v30, %v5686_v43 }
 0x818   :  { %v12204_v60 = vpack.c.bf16 %v5934_v29, %v5933_v49 }
 0x81a   :  { %6841 = vmatmul.msk.bf16.gmra.mxu1 %vm362_vm5, %v12204_v60 }
 0x81d   :  { %v5688_v40 = vpop.f32.mrf.mxu2 }
 0x81e   :  { %v5689_v32 = vadd.f32 %v7329_v30, %v5688_v40 }
 0x820   :  { %v5706_v18 = vpack.c.bf16 %v5689_v32, %v5687_v41 }
 0x822   :  { %v6000_v17 = vpop.f32.mrf.mxu1  ;;  %6804 = vmatmul.msk.bf16.gmra.mxu3 %vm362_vm5, %v5706_v18 }
 0x823   :  { %v6040_v42 = vpack.c.bf16 %v6000_v17, %v6000_v17 }
 0x825   :  { %v6061_v8 = vunpack.c.l.b16 %v6040_v42 }
 0x82a   :  { %v6002_v21 = vpop.f32.mrf.mxu1 }
 0x82b   :  { %v6041_v55 = vpack.c.bf16 %v6002_v21, %v6002_v21 }
 0x82d   :  { %v6062_v13 = vunpack.c.l.b16 %v6041_v55 }
 0x82f   :  { %v6065_v20 = vpack.c.b16 %v6062_v13, %v6061_v8 }
 0x831   :  { %6067 = vrot.lane.b32.xlu1 %v6065_v20, %s7389_s11 }
 0x832   :  { %v6005_v47 = vpop.f32.mrf.mxu1 }
 0x833   :  { %v6042_v23 = vpack.c.bf16 %v6005_v47, %v6005_v47 }
 0x835   :  { %v6063_v48 = vunpack.c.l.b16 %v6042_v23 }
 0x83a   :  { %v6007_v15 = vpop.f32.mrf.mxu1 }
 0x83b   :  { %v6043_v56 = vpack.c.bf16 %v6007_v15, %v6007_v15 }
 0x83d   :  { %v6064_v22 = vunpack.c.l.b16 %v6043_v56  ;;  %v5691_v45 = vpop.f32.mrf.mxu2 }
 0x83e   :  { %v5692_v34 = vadd.f32 %v7329_v30, %v5691_v45 }
 0x83f   :  { %v6066_v62 = vpack.c.b16 %v6064_v22, %v6063_v48 }
 0x841   :  { %6069 = vrot.lane.b32.xlu2 %v6066_v62, %s7389_s11 }
 0x845   :  { %v5693_v12 = vpop.f32.mrf.mxu2 }
 0x846   :  { %v5694_v38 = vadd.f32 %v7329_v30, %v5693_v12 }
 0x848   :  { %v5707_v28 = vpack.c.bf16 %v5694_v38, %v5692_v34 }
 0x84a   :  { %6805 = vmatmul.msk.bf16.gmra.mxu3 %vm362_vm5, %v5707_v28 }
 0x84d   :  { %v5775_v25 = vpop.f32.mrf.mxu3 }
 0x84e   :  { %v5776_v39 = vadd.f32 %v12011_v0, %v5775_v25 }
 0x850   :  { %v5803_v14 = vmax.f32 %v5776_v39, 0.0 }
 0x855   :  { %v5777_v10 = vpop.f32.mrf.mxu3 }
 0x856   :  { %v5778_v16 = vadd.f32 %v12011_v0, %v5777_v10 }
 0x858   :  { %v5804_v26 = vmax.f32 %v5778_v16, 0.0 }
 0x85a   :  { %v5823_v11 = vpack.c.bf16 %v5804_v26, %v5803_v14 }
 0x85c   :  { %6826 = vmatmul.msk.bf16.gmra.mxu0 %vm5853_vm3, %v5823_v11 }
 0x863   :  { %v6010_v36 = vpop.f32.mrf.mxu1 }
 0x864   :  { %v6044_v2 = vpack.c.bf16 %v6010_v36, %v6010_v36 }
 0x866   :  { %v6145_v19 = vunpack.c.l.b16 %v6044_v2 }
 0x86b   :  { %v6012_v59 = vpop.f32.mrf.mxu1 }
 0x86c   :  { %v6045_v57 = vpack.c.bf16 %v6012_v59, %v6012_v59 }
 0x86e   :  { %v6146_v7 = vunpack.c.l.b16 %v6045_v57 }
 0x870   :  { %v12215_v30 = vpack.c.b16 %v6146_v7, %v6145_v19  ;;  %v12254_v7 = vld [vmem:[%s12387_s2 + $0x18] sm:$0xff] }
 0x872   :  { %6151 = vrot.lane.b32.xlu2 %v12215_v30, %s7389_s11 }
 0x875   :  { %v5780_v46 = vpop.f32.mrf.mxu3 }
 0x876   :  { %v5781_v58 = vadd.f32 %v12011_v0, %v5780_v46 }
 0x878   :  { %v5805_v24 = vmax.f32 %v5781_v58, 0.0  ;;  %v12261_v58 = vld [vmem:[%s12387_s2 + $0x10] sm:$0xff] }
 0x87d   :  { %v5782_v51 = vpop.f32.mrf.mxu3 }
 0x87e   :  { %v5783_v52 = vadd.f32 %v12011_v0, %v5782_v51 }
 0x880   :  { %v5806_v61 = vmax.f32 %v5783_v52, 0.0  ;;  %v12268_v52 = vld [vmem:[%s12387_s2 + $0x8] sm:$0xff] }
 0x882   :  { %v5824_v63 = vpack.c.bf16 %v5806_v61, %v5805_v24 }
 0x884   :  { %6827 = vmatmul.msk.bf16.gmra.mxu0 %vm5853_vm3, %v5824_v63  ;;  %v12275_v63 = vld [vmem:[%s12387_s2] sm:$0xff] }
 0x897   :  { %v6015_v50 = vpop.f32.mrf.mxu1 }
 0x898   :  { %v6046_v35 = vpack.c.bf16 %v6015_v50, %v6015_v50 }
 0x89a   :  { %v6147_v6 = vunpack.c.l.b16 %v6046_v35 }
 0x89b   :  { %v6070_v27 = vpop.permute.xlu2 %6069 }
 0x89c   :  { %v6081_v31 = vsel %vm362_vm5, %v6070_v27, 0 }
 0x89d   :  { %6089 = vmatpush.bf16.xpose.msrb.mxu2 %v6081_v31  ;;  %v12283_v31 = vld [vmem:[%s12389_s4] sm:$0xf] }
 0x89f   :  { %v6017_v33 = vpop.f32.mrf.mxu1 }
 0x8a0   :  { %v6047_v3 = vpack.c.bf16 %v6017_v33, %v6017_v33 }
 0x8a2   :  { %v6148_v54 = vunpack.c.l.b16 %v6047_v3 }
 0x8a3   :  { %v6068_v37 = vpop.permute.xlu1 %6067 }
 0x8a4   :  { %v6078_v1 = vsel %vm362_vm5, %v6068_v37, 0  ;;  %v12224_v4 = vpack.c.b16 %v6148_v54, %v6147_v6 }
 0x8a5   :  { %6090 = vmatpush.bf16.xpose.msrb.mxu2 %v6078_v1  ;;  %v5785_v49 = vpop.f32.mrf.mxu3 }
 0x8a6   :  { %6153 = vrot.lane.b32.xlu0 %v12224_v4, %s7389_s11  ;;  %v5786_v29 = vadd.f32 %v12011_v0, %v5785_v49 }
 0x8a8   :  { %v5807_v41 = vmax.f32 %v5786_v29, 0.0 }
 0x8ac   :  { %6846 = vmatmul.msk.bf16.vlgmr.msrb.gmra.mxu2 %vm362_vm5, %v6065_v20 }
 0x8ad   :  { %v5787_v43 = vpop.f32.mrf.mxu3 }
 0x8ae   :  { %v5788_v40 = vadd.f32 %v12011_v0, %v5787_v43 }
 0x8b0   :  { %v5808_v32 = vmax.f32 %v5788_v40, 0.0 }
 0x8b2   :  { %v5825_v17 = vpack.c.bf16 %v5808_v32, %v5807_v41 }
 0x8b4   :  { %6828 = vmatmul.msk.bf16.gmra.mxu0 %vm5853_vm3, %v5825_v17 }
 0x8bc   :  { %6847 = vmatmul.msk.bf16.gmra.mxu2 %vm362_vm5, %v6066_v62 }
 0x8cc   :  { %v6152_v33 = vpop.permute.xlu2 %6151 }
 0x8cd   :  { %v5790_v18 = vpop.f32.mrf.mxu3  ;;  %v6162_v3 = vsel %vm362_vm5, %v6152_v33, 0 }
 0x8ce   :  { %v5791_v42 = vadd.f32 %v12011_v0, %v5790_v18 }
 0x8d0   :  { %v5809_v8 = vmax.f32 %v5791_v42, 0.0 }
 0x8d5   :  { %v5792_v21 = vpop.f32.mrf.mxu3 }
 0x8d6   :  { %v5793_v55 = vadd.f32 %v12011_v0, %v5792_v21 }
 0x8d8   :  { %v5810_v13 = vmax.f32 %v5793_v55, 0.0 }
 0x8d9   :  { %v5907_v47 = vpop.f32.mrf.mxu0 }
 0x8da   :  { %v5826_v20 = vpack.c.bf16 %v5810_v13, %v5809_v8  ;;  %v5908_v23 = vadd.f32 %v12078_v44, %v5907_v47 }
 0x8dc   :  { %6829 = vmatmul.msk.bf16.gmra.mxu0 %vm5853_vm3, %v5826_v20  ;;  %v5935_v48 = vmax.f32 %v5908_v23, 0.0 }
 0x8e1   :  { %v5909_v15 = vpop.f32.mrf.mxu0 }
 0x8e2   :  { %v5910_v56 = vadd.f32 %v12078_v44, %v5909_v15 }
 0x8e4   :  { %v5936_v22 = vmax.f32 %v5910_v56, 0.0 }
 0x8e6   :  { %v12238_v45 = vpack.c.bf16 %v5936_v22, %v5935_v48 }
 0x8e8   :  { %6842 = vmatmul.msk.bf16.gmra.mxu1 %vm362_vm5, %v12238_v45 }
 0x901   :  { %v5912_v62 = vpop.f32.mrf.mxu0 }
 0x902   :  { %v5913_v0 = vadd.f32 %v12078_v44, %v5912_v62 }
 0x904   :  { %v5937_v38 = vmax.f32 %v5913_v0, 0.0 }
 0x909   :  { %v5914_v12 = vpop.f32.mrf.mxu0 }
 0x90a   :  { %v5915_v34 = vadd.f32 %v12078_v44, %v5914_v12 }
 0x90c   :  { %v5938_v28 = vmax.f32 %v5915_v34, 0.0 }
 0x90e   :  { %v12244_v25 = vpack.c.bf16 %v5938_v28, %v5937_v38 }
 0x910   :  { %6843 = vmatmul.msk.bf16.gmra.mxu1 %vm362_vm5, %v12244_v25 }
 0x918   :  { %v6154_v61 = vpop.permute.xlu0 %6153 }
 0x919   :  { %v6165_v27 = vsel %vm362_vm5, %v6154_v61, 0 }
 0x92f   :  { %v6092_v39 = vpop.f32.mrf.mxu2 }
 0x930   :  { %v6102_v50 = vmul.f32 %v12275_v63, %v6092_v39 }
 0x931   :  { %v5917_v10 = vpop.f32.mrf.mxu0 }
 0x932   :  { %v5918_v14 = vadd.f32 %v12078_v44, %v5917_v10 }
 0x934   :  { %v5939_v2 = vmax.f32 %v5918_v14, 0.0 }
 0x937   :  { %v6094_v16 = vpop.f32.mrf.mxu2 }
 0x938   :  { %v6103_v24 = vmul.f32 %v12268_v52, %v6094_v16 }
 0x939   :  { %v5919_v26 = vpop.f32.mrf.mxu0 }
 0x93a   :  { %v5920_v11 = vadd.f32 %v12078_v44, %v5919_v26 }
 0x93c   :  { %v5940_v59 = vmax.f32 %v5920_v11, 0.0 }
 0x93e   :  { %v5953_v57 = vpack.c.bf16 %v5940_v59, %v5939_v2 }
 0x93f   :  { %v6097_v36 = vpop.f32.mrf.mxu2 }
 0x940   :  { %6844 = vmatmul.msk.bf16.gmra.mxu1 %vm362_vm5, %v5953_v57  ;;  %v6104_v51 = vmul.f32 %v12261_v58, %v6097_v36 }
 0x947   :  { %v6099_v19 = vpop.f32.mrf.mxu2 }
 0x948   :  { %v6105_v46 = vmul.f32 %v12254_v7, %v6099_v19 }
 0x94a   :  { %6848 = vmatpush.xpose.msk.msrb.mxu3 %vm362_vm5, %v6105_v46 }
 0x94e   :  { %6849 = vmatpush.xpose.msk.msrb.mxu3 %vm362_vm5, %v6104_v51 }
 0x952   :  { %6850 = vmatpush.xpose.msk.msrb.mxu3 %vm362_vm5, %v6103_v24 }
 0x956   :  { %6851 = vmatpush.xpose.msk.msrb.mxu3 %vm362_vm5, %v6102_v50 }
 0x959   :  { %v5922_v35 = vpop.f32.mrf.mxu0  ;;  %6852 = vmatmul.msk.f32.vlgmr.msrb.gmra.mxu3 %vm362_vm5, %v12283_v31 }
 0x95a   :  { %6173 = vmatpush.bf16.xpose.msra.mxu3 %v6165_v27  ;;  %v5923_v37 = vadd.f32 %v12078_v44, %v5922_v35 }
 0x95c   :  { %v5941_v1 = vmax.f32 %v5923_v37, 0.0 }
 0x961   :  { %v5924_v6 = vpop.f32.mrf.mxu0 }
 0x962   :  { %6174 = vmatpush.bf16.xpose.msra.mxu3 %v6162_v3  ;;  %v5925_v54 = vadd.f32 %v12078_v44, %v5924_v6 }
 0x964   :  { %v5942_v49 = vmax.f32 %v5925_v54, 0.0 }
 0x965   :  { %v6020_v43 = vpop.f32.mrf.mxu1 }
 0x966   :  { %v5954_v29 = vpack.c.bf16 %v5942_v49, %v5941_v1  ;;  %v6048_v40 = vpack.c.bf16 %v6020_v43, %v6020_v43 }
 0x968   :  { %6845 = vmatmul.msk.bf16.gmra.mxu1 %vm362_vm5, %v5954_v29  ;;  %v6226_v17 = vunpack.c.l.b16 %v6048_v40 }
 0x969   :  { %6853 = vmatmul.msk.bf16.vlgmr.msra.gmra.mxu3 %vm362_vm5, %v12215_v30 }
 0x96d   :  { %v6022_v41 = vpop.f32.mrf.mxu1 }
 0x96e   :  { %v6049_v32 = vpack.c.bf16 %v6022_v41, %v6022_v41 }
 0x970   :  { %v6227_v18 = vunpack.c.l.b16 %v6049_v32 }
 0x972   :  { %v12293_v42 = vpack.c.b16 %v6227_v18, %v6226_v17 }
 0x979   :  { %6854 = vmatmul.msk.bf16.gmra.mxu3 %vm362_vm5, %v12224_v4 }
 0x98d   :  { %v6025_v44 = vpop.f32.mrf.mxu1 }
 0x98e   :  { %v6050_v21 = vpack.c.bf16 %v6025_v44, %v6025_v44 }
 0x990   :  { %v6228_v13 = vunpack.c.l.b16 %v6050_v21 }
 0x995   :  { %v6027_v55 = vpop.f32.mrf.mxu1 }
 0x996   :  { %v6051_v8 = vpack.c.bf16 %v6027_v55, %v6027_v55 }
 0x998   :  { %v6229_v20 = vunpack.c.l.b16 %v6051_v8 }
 0x99a   :  { %v12297_v47 = vpack.c.b16 %v6229_v20, %v6228_v13 }
 0x99c   :  { %6234 = vrot.lane.b32.xlu1 %v12297_v47, %s7389_s11 }
 0x9a4   :  { %6426 = vrot.lane.b32.xlu1 %v5954_v29, %s7389_s11 }
 0x9ac   :  { %6420 = vrot.lane.b32.xlu1 %v12238_v45, %s7389_s11 }
 0x9b4   :  { %6414 = vrot.lane.b32.xlu1 %v12185_v9, %s7389_s11 }
 0x9bd   :  { %v6030_v30 = vpop.f32.mrf.mxu1 }
 0x9be   :  { %v6052_v4 = vpack.c.bf16 %v6030_v30, %v6030_v30 }
 0x9c0   :  { %v6307_v56 = vunpack.c.l.b16 %v6052_v4 }
 0x9c5   :  { %v6032_v23 = vpop.f32.mrf.mxu1 }
 0x9c6   :  { %v6053_v15 = vpack.c.bf16 %v6032_v23, %v6032_v23 }
 0x9c8   :  { %v6308_v48 = vunpack.c.l.b16 %v6053_v15 }
 0x9ca   :  { %v6311_v22 = vpack.c.b16 %v6308_v48, %v6307_v56 }
 0x9cc   :  { %6313 = vrot.lane.b32.xlu2 %v6311_v22, %s7389_s11 }
 0x9d4   :  { %6424 = vrot.lane.b32.xlu2 %v5953_v57, %s7389_s11 }
 0x9dc   :  { %v12308_v62 = vpop.f32.mrf.mxu3  ;;  %6418 = vrot.lane.b32.xlu2 %v12204_v60, %s7389_s11 }
 0x9e4   :  { %6412 = vrot.lane.b32.xlu2 %v12124_v5, %s7389_s11 }
 0x9e5   :  { %v6035_v45 = vpop.f32.mrf.mxu1 }
 0x9e6   :  { %v6054_v0 = vpack.c.bf16 %v6035_v45, %v6035_v45 }
 0x9e8   :  { %v6309_v38 = vunpack.c.l.b16 %v6054_v0 }
 0x9ec   :  { %v6176_v9 = vpop.f32.mrf.mxu3 }
 0x9ed   :  { %v6037_v12 = vpop.f32.mrf.mxu1  ;;  %v6186_v11 = vmul.f32 %v12275_v63, %v6176_v9 }
 0x9ee   :  { %v6055_v34 = vpack.c.bf16 %v6037_v12, %v6037_v12 }
 0x9f0   :  { %v6310_v28 = vunpack.c.l.b16 %v6055_v34 }
 0x9f2   :  { %v6312_v10 = vpack.c.b16 %v6310_v28, %v6309_v38 }
 0x9f4   :  { %v6178_v39 = vpop.f32.mrf.mxu3  ;;  %6315 = vrot.lane.b32.xlu0 %v6312_v10, %s7389_s11 }
 0x9f5   :  { %v6187_v26 = vmul.f32 %v12268_v52, %v6178_v39 }
 0x9fc   :  { %v6181_v16 = vpop.f32.mrf.mxu3  ;;  %6232 = vrot.lane.b32.xlu0 %v12293_v42, %s7389_s11 }
 0x9fd   :  { %v6188_v5 = vmul.f32 %v12261_v58, %v6181_v16 }
 0xa04   :  { %v6183_v14 = vpop.f32.mrf.mxu3  ;;  %6422 = vrot.lane.b32.xlu0 %v12244_v25, %s7389_s11 }
 0xa05   :  { %v6189_v60 = vmul.f32 %v12254_v7, %v6183_v14 }
 0xa07   :  { %6855 = vmatpush.xpose.msk.msrb.mxu0 %vm362_vm5, %v6189_v60 }
 0xa0b   :  { %6856 = vmatpush.xpose.msk.msrb.mxu0 %vm362_vm5, %v6188_v5 }
 0xa0c   :  { %6416 = vrot.lane.b32.xlu0 %v12197_v53, %s7389_s11 }
 0xa0e   :  { %v6235_v36 = vpop.permute.xlu1 %6234 }
 0xa0f   :  { %6857 = vmatpush.xpose.msk.msrb.mxu0 %vm362_vm5, %v6187_v26  ;;  %v6246_v2 = vsel %vm362_vm5, %v6235_v36, 0 }
 0xa10   :  { %6254 = vmatpush.bf16.xpose.msra.mxu1 %v6246_v2 }
 0xa13   :  { %6858 = vmatpush.xpose.msk.msrb.mxu0 %vm362_vm5, %v6186_v11 }
 0xa16   :  { %6859 = vmatmul.msk.f32.vlgmr.msrb.gmra.mxu0 %vm362_vm5, %v12283_v31  ;;  %v6427_v25 = vpop.permute.xlu1 %6426 }
 0xa17   :  { %v6453_v59 = vsel %vm362_vm5, %v6427_v25, 0 }
 0xa18   :  { %6455 = vmatpush.bf16.xpose.msrb.mxu3 %v6453_v59 }
 0xa1e   :  { %v6421_v33 = vpop.permute.xlu1 %6420 }
 0xa1f   :  { %v6444_v3 = vsel %vm362_vm5, %v6421_v33, 0 }
 0xa26   :  { %v6314_v57 = vpop.permute.xlu2 %6313  ;;  %v6415_v29 = vpop.permute.xlu1 %6414 }
 0xa27   :  { %v6324_v61 = vsel %vm362_vm5, %v6314_v57, 0  ;;  %v6435_v43 = vsel %vm362_vm5, %v6415_v29, 0 }
 0xa2e   :  { %v6425_v19 = vpop.permute.xlu2 %6424 }
 0xa2f   :  { %v6450_v46 = vsel %vm362_vm5, %v6425_v19, 0 }
 0xa30   :  { %6456 = vmatpush.bf16.xpose.msrb.mxu3 %v6450_v46 }
 0xa36   :  { %v6419_v37 = vpop.permute.xlu2 %6418 }
 0xa37   :  { %v6441_v6 = vsel %vm362_vm5, %v6419_v37, 0 }
 0xa3e   :  { %v6413_v40 = vpop.permute.xlu2 %6412 }
 0xa3f   :  { %v6432_v41 = vsel %vm362_vm5, %v6413_v40, 0 }
 0xa66   :  { %v6316_v53 = vpop.permute.xlu0 %6315 }
 0xa67   :  { %v6327_v51 = vsel %vm362_vm5, %v6316_v53, 0 }
 0xa68   :  { %6335 = vmatpush.bf16.xpose.msra.mxu0 %v6327_v51 }
 0xa6e   :  { %v6233_v24 = vpop.permute.xlu0 %6232 }
 0xa6f   :  { %v6243_v50 = vsel %vm362_vm5, %v6233_v24, 0 }
 0xa70   :  { %6255 = vmatpush.bf16.xpose.msra.mxu1 %v6243_v50  ;;  %6336 = vmatpush.bf16.xpose.msra.mxu0 %v6324_v61 }
 0xa76   :  { %v6423_v27 = vpop.permute.xlu0 %6422 }
 0xa77   :  { %v6447_v35 = vsel %vm362_vm5, %v6423_v27, 0  ;;  %6860 = vmatmul.msk.bf16.vlgmr.msra.gmra.mxu1 %vm362_vm5, %v12293_v42  ;;  %6867 = vmatmul.msk.bf16.vlgmr.msra.gmra.mxu0 %vm362_vm5, %v6311_v22 }
 0xa78   :  { %6457 = vmatpush.bf16.xpose.msrb.mxu3 %v6447_v35 }
 0xa7e   :  { %v6417_v54 = vpop.permute.xlu0 %6416 }
 0xa7f   :  { %v6438_v1 = vsel %vm362_vm5, %v6417_v54, 0 }
 0xa80   :  { %6458 = vmatpush.bf16.xpose.msrb.mxu3 %v6444_v3 }
 0xa87   :  { %6861 = vmatmul.msk.bf16.gmra.mxu1 %vm362_vm5, %v12297_v47  ;;  %6868 = vmatmul.msk.bf16.gmra.mxu0 %vm362_vm5, %v6312_v10 }
 0xa88   :  { %6459 = vmatpush.bf16.xpose.msrb.mxu3 %v6441_v6 }
 0xa90   :  { %6460 = vmatpush.bf16.xpose.msrb.mxu3 %v6438_v1 }
 0xa93   :  { %v6219_v49 = vpop.f32.mrf.mxu0 }
 0xa94   :  { %6385 = vrot.lane.b32.xlu0 %v6219_v49, %s7387_s28  ;;  %s7390_s28 = smov [#allocation4]  }
 0xa95   :  { %s6486_s27 = sshll.u32 %s7390_s28, 4  ;;  %s6487_s27 = int_to_ptr.vmem [resolvable:$true] %s6486_s27 }
 0xa98   :  { %6461 = vmatpush.bf16.xpose.msrb.mxu3 %v6435_v43 }
 0xaa0   :  { %6462 = vmatpush.bf16.xpose.msrb.mxu3 %v6432_v41 }
 0xaf4   :  { %v6257_v32 = vpop.f32.mrf.mxu1  ;;  %v6338_v17 = vpop.f32.mrf.mxu0 }
 0xaf5   :  { %v6348_v15 = vmul.f32 %v12275_v63, %v6338_v17 }
 0xafc   :  { %v6259_v18 = vpop.f32.mrf.mxu1  ;;  %v6340_v42 = vpop.f32.mrf.mxu0 }
 0xafd   :  { %v6268_v4 = vmul.f32 %v12268_v52, %v6259_v18  ;;  %v6349_v23 = vmul.f32 %v12268_v52, %v6340_v42 }
 0xb04   :  { %v6262_v44 = vpop.f32.mrf.mxu1  ;;  %v6343_v21 = vpop.f32.mrf.mxu0 }
 0xb05   :  { %v6269_v47 = vmul.f32 %v12261_v58, %v6262_v44  ;;  %v6350_v30 = vmul.f32 %v12261_v58, %v6343_v21  ;;  %v6402_v58 = vld [vmem:[%s12391_s6 + $0x5] sm:$0x1]  ;;  %s7391_s6 = smov [#allocation2]  }
 0xb06   :  { %v6403_v52 = vpack.c.bf16 %v6402_v58, %v6402_v58  ;;  %v6386_v45 = vpop.permute.xlu0 %6385 }
 0xb07   :  { %v6396_v0 = vsel %vm362_vm5, %v12308_v62, %v6386_v45 }
 0xb08   :  { %6874 = vmatmul.msk.bf16.vlgmr.msrb.gmra.mxu3 %vm362_vm5, %v6403_v52 }
 0xb0c   :  { %v6264_v55 = vpop.f32.mrf.mxu1  ;;  %v6345_v8 = vpop.f32.mrf.mxu0 }
 0xb0d   :  { %v6270_v13 = vmul.f32 %v12254_v7, %v6264_v55  ;;  %v6351_v20 = vmul.f32 %v12254_v7, %v6345_v8  ;;  %v6267_v7 = vmul.f32 %v12275_v63, %v6257_v32 }
 0xb0f   :  { %6862 = vmatpush.xpose.msk.msrb.mxu1 %vm362_vm5, %v6270_v13  ;;  %6869 = vmatpush.xpose.msk.msra.mxu2 %vm362_vm5, %v6351_v20 }
 0xb13   :  { %6863 = vmatpush.xpose.msk.msrb.mxu1 %vm362_vm5, %v6269_v47  ;;  %6870 = vmatpush.xpose.msk.msra.mxu2 %vm362_vm5, %v6350_v30 }
 0xb17   :  { %6864 = vmatpush.xpose.msk.msrb.mxu1 %vm362_vm5, %v6268_v4  ;;  %6871 = vmatpush.xpose.msk.msra.mxu2 %vm362_vm5, %v6349_v23 }
 0xb1b   :  { %6865 = vmatpush.xpose.msk.msrb.mxu1 %vm362_vm5, %v6267_v7  ;;  %6872 = vmatpush.xpose.msk.msra.mxu2 %vm362_vm5, %v6348_v15 }
 0xb1e   :  { %6866 = vmatmul.msk.f32.vlgmr.msrb.gmra.mxu1 %vm362_vm5, %v12283_v31  ;;  %6873 = vmatmul.msk.f32.vlgmr.msra.gmra.mxu2 %vm362_vm5, %v12283_v31 }
 0xb8b   :  { %v6464_v48 = vpop.f32.mrf.mxu3 }
 0xb8c   :  { %v6468_v22 = vmul.f32 0.088388346, %v6464_v48 }
 0xb8e   :  { %6469 = vst [vmem:[#allocation4] sm:$0x1] %v6468_v22 }
 0xb8f   :  { %6491 = dma.vmem_to_hbm [thread:$0]  %s6487_s27, 16, %s6489_s1, [#allocation5]  }
 0xb93   :  { %v6466_v31 = vpop.f32.mrf.mxu3 }
 0xb9b   :  { %v6300_v56 = vpop.f32.mrf.mxu1 }
 0xb9c   :  { %6389 = vrot.lane.b32.xlu1 %v6300_v56, %s7388_s29  ;;  %s6475_s29 = sshll.u32 %s7391_s6, 4  ;;  %s6476_s29 = int_to_ptr.vmem [resolvable:$true] %s6475_s29 }
 0xba1   :  { %v6381_v63 = vpop.f32.mrf.mxu2 }
 0xba2   :  { %6393 = vrot.lane.b32.xlu2 %v6381_v63, %s7389_s11 }
 0xbfc   :  { %v6394_v9 = vpop.permute.xlu2 %6393 }
 0xc0e   :  { %v6390_v12 = vpop.permute.xlu1 %6389 }
 0xc0f   :  { %v6397_v34 = vsel %vm5853_vm3, %v6396_v0, %v6390_v12 }
 0xc10   :  { %v6399_v38 = vsel %vm6398_vm14, %v6397_v34, %v6394_v9 }
 0xc11   :  { %v6400_v28 = vmul.f32 0.088388346, %v6399_v38 }
 0xc13   :  { %6401 = vst [vmem:[#allocation2] sm:$0xf] %v6400_v28 }
 0xc14   :  { %6480 = dma.vmem_to_hbm [thread:$0]  %s6476_s29, 64, %s6478_s12, [#allocation3]  }
 0xc15   :  { %7382 = dma.done.wait [#allocation3], 64  }
 0xc16   :  { %7383 = vsyncadd [#allocation3], 4294967232 }
 0xc17   :  { %7384 = dma.done.wait [#allocation5], 16  }
 0xc18   :  { %7385 = vsyncadd [#allocation5], 4294967280 }
 0xc19   :  { %6500 = vsyncpa [#allocation3], 1 }
 0xc1a   :  { %6501 = vsyncpa [#allocation5], 1 }

</bundles_post_ra>
